<compile_context>
chip_gen: v7x
topology: tpu7x:2x2x1
jax: 0.10.0
libtpu: 0.0.40
codegen_flags: <defaults>
</compile_context>

<pallas_src>
import functools

import jax
import jax.numpy as jnp
from jax.experimental import pallas as pl
from jax.experimental.pallas import tpu as pltpu


# ----------------------------------------------------------------------------
# Fused kernel: 4 stacked LSTM layers + BatchNorm1d(eval) + Linear head.
# ----------------------------------------------------------------------------
def _fused_kernel(gx0_ref, w_hh_ref, w_ih_ref, b_ref,
                  gamma_ref, beta_ref, mean_ref, var_ref,
                  fc_w_ref, fc_b_ref,
                  out_ref,
                  hseq_sc, gates_sc,
                  *, T, B, H, L):
    f32, bf16 = jnp.float32, jnp.bfloat16

    h_last = None
    for l in range(L):                               # static unroll over layers
        w_hh_l = w_hh_ref[l]                         # (H, 4H) bf16, load once
        gsrc = gx0_ref if l == 0 else gates_sc       # precomputed input gates
        last_layer = (l == L - 1)

        c = jnp.zeros((B, H), f32)
        h_bf = jnp.zeros((B, H), bf16)               # h_{t-1} in MXU dtype
        h = None
        for t in range(T):                           # static unroll over time
            gx_t = gsrc[pl.ds(t * B, B), :]          # (B, 4H) f32
            if t == 0:
                g = gx_t                             # h0 == 0: skip matmul
            else:
                # Per-step critical path: recurrent matmul + gate math only.
                g = gx_t + jnp.dot(h_bf, w_hh_l, preferred_element_type=f32)
            # PyTorch gate order: i, f, g, o
            i_g = jax.nn.sigmoid(g[:, 0 * H:1 * H])
            f_g = jax.nn.sigmoid(g[:, 1 * H:2 * H])
            g_g = jnp.tanh(g[:, 2 * H:3 * H])
            o_g = jax.nn.sigmoid(g[:, 3 * H:4 * H])
            c = f_g * c + i_g * g_g
            h = o_g * jnp.tanh(c)                    # f32 state
            h_bf = h.astype(bf16)                    # single cast, shared
            if not last_layer:
                hseq_sc[pl.ds(t * B, B), :] = h_bf   # feed next layer (VMEM)

        if last_layer:
            h_last = h                               # only t == T-1 is consumed
        else:
            # Hoisted input projection for layer l+1 over all T steps at once:
            # (T*B, H) bf16 x (H, 4H) bf16 -> (T*B, 4H) f32, bias folded in.
            gx = jnp.dot(hseq_sc[...], w_ih_ref[l], preferred_element_type=f32)
            gates_sc[...] = gx + b_ref[l]            # b_ref[l]: (1, 4H)

    # BatchNorm1d (eval, running stats) in fused scale/shift form + Linear head.
    scale = gamma_ref[...] * jax.lax.rsqrt(var_ref[...] + 1e-5)        # (1, H)
    shift = beta_ref[...] - mean_ref[...] * scale                      # (1, H)
    xn = h_last * scale + shift                                        # (B, H)
    out_ref[...] = (jnp.dot(xn, fc_w_ref[...], preferred_element_type=f32)
                    + fc_b_ref[...])


# ----------------------------------------------------------------------------
# Wrapper: hoist the layer-0 input projection, then one fused pallas_call.
# ----------------------------------------------------------------------------
def stock_lstm_forward(x_bti, params):
    """x_bti: (B, T, I) like PyTorch nn.LSTM(batch_first=True)."""
    B, T, _ = x_bti.shape
    L, H, _ = params["w_hh_all"].shape
    O = params["fc_w_t"].shape[1]

    # Layer-0 input projection for ALL timesteps in one matmul, laid out
    # time-major and flattened to (T*B, 4H) (lane-dense last dim = 4H).
    gx0 = jnp.einsum("bti,ig->tbg", x_bti, params["w_ih0_t"]) + params["b0"]
    gx0 = gx0.reshape(T * B, 4 * H)

    kernel = functools.partial(_fused_kernel, T=T, B=B, H=H, L=L)
    vmem = pl.BlockSpec(memory_space=pltpu.MemorySpace.VMEM)

    return pl.pallas_call(
        kernel,
        out_shape=jax.ShapeDtypeStruct((B, O), jnp.float32),
        in_specs=[vmem] * 10,
        out_specs=vmem,
        scratch_shapes=[
            pltpu.VMEM((T * B, H), jnp.bfloat16),      # inter-layer h sequence
            pltpu.VMEM((T * B, 4 * H), jnp.float32),   # hoisted next-layer gates
        ],
    )(gx0,
      params["w_hh_all"], params["w_ih_rest"], params["b_rest"],
      params["bn_gamma"], params["bn_beta"], params["bn_mean"], params["bn_var"],
      params["fc_w_t"], params["fc_b"])


# ----------------------------------------------------------------------------
# Parameter construction (PyTorch-style init; weights pre-transposed/stacked).
# ----------------------------------------------------------------------------
def init_params(key, input_size, hidden_size, num_layers, output_size):
    H, L = hidden_size, num_layers
    bound = 1.0 / float(H) ** 0.5

    w_ih0_t = None
    b0 = None
    w_hh_list, w_ih_rest_list, b_rest_list = [], [], []
    for l in range(L):
        in_dim = input_size if l == 0 else H
        key, k1, k2, k3, k4 = jax.random.split(key, 5)
        w_ih = jax.random.uniform(k1, (4 * H, in_dim), jnp.float32, -bound, bound)
        w_hh = jax.random.uniform(k2, (4 * H, H), jnp.float32, -bound, bound)
        b_ih = jax.random.uniform(k3, (4 * H,), jnp.float32, -bound, bound)
        b_hh = jax.random.uniform(k4, (4 * H,), jnp.float32, -bound, bound)
        b = (b_ih + b_hh).reshape(1, 4 * H)            # merged bias
        w_hh_list.append(jnp.transpose(w_hh))          # (H, 4H)
        if l == 0:
            w_ih0_t = jnp.transpose(w_ih)              # (I, 4H)
            b0 = b                                     # (1, 4H)
        else:
            w_ih_rest_list.append(jnp.transpose(w_ih))  # (H, 4H)
            b_rest_list.append(b)                       # (1, 4H)

    key, kf1, kf2 = jax.random.split(key, 3)
    fc_w = jax.random.uniform(kf1, (output_size, H), jnp.float32, -bound, bound)
    fc_b = jax.random.uniform(kf2, (output_size,), jnp.float32, -bound, bound)

    return dict(
        w_ih0_t=w_ih0_t,                                            # (I, 4H) f32
        b0=b0,                                                      # (1, 4H) f32
        # bf16 weights for the MXU (f32 accumulation inside the kernel).
        w_hh_all=jnp.stack(w_hh_list).astype(jnp.bfloat16),         # (L, H, 4H)
        w_ih_rest=jnp.stack(w_ih_rest_list).astype(jnp.bfloat16),   # (L-1, H, 4H)
        b_rest=jnp.stack(b_rest_list),                              # (L-1, 1, 4H)
        bn_gamma=jnp.ones((1, H), jnp.float32),
        bn_beta=jnp.zeros((1, H), jnp.float32),
        bn_mean=jnp.zeros((1, H), jnp.float32),                     # running_mean
        bn_var=jnp.ones((1, H), jnp.float32),                       # running_var
        fc_w_t=jnp.transpose(fc_w),                                 # (H, O)
        fc_b=fc_b.reshape(1, output_size),                          # (1, O)
    )


if __name__ == "__main__":
    B, T = 8, 8
    INPUT_SIZE, HIDDEN_SIZE, NUM_LAYERS, OUTPUT_SIZE = 3, 128, 4, 3

    key = jax.random.PRNGKey(0)
    key, xk = jax.random.split(key)
    x = jax.random.normal(xk, (B, T, INPUT_SIZE), jnp.float32)

    params = init_params(key, INPUT_SIZE, HIDDEN_SIZE, NUM_LAYERS, OUTPUT_SIZE)

    out = jax.jit(stock_lstm_forward)(x, params)
    out = jax.block_until_ready(out)
    assert out.shape == (B, OUTPUT_SIZE), out.shape
    assert bool(jnp.all(jnp.isfinite(out)))
    print("KERNEL_OK")
</pallas_src>

<mosaic_0001>
module attributes {stable_mosaic.version = 11 : i64} {
  func.func @_fused_kernel(%arg0: memref<64x512xf32, #tpu.memory_space<vmem>>, %arg1: memref<4x128x512xbf16, #tpu.memory_space<vmem>>, %arg2: memref<3x128x512xbf16, #tpu.memory_space<vmem>>, %arg3: memref<3x1x512xf32, #tpu.memory_space<vmem>>, %arg4: memref<1x128xf32, #tpu.memory_space<vmem>>, %arg5: memref<1x128xf32, #tpu.memory_space<vmem>>, %arg6: memref<1x128xf32, #tpu.memory_space<vmem>>, %arg7: memref<1x128xf32, #tpu.memory_space<vmem>>, %arg8: memref<128x3xf32, #tpu.memory_space<vmem>>, %arg9: memref<1x3xf32, #tpu.memory_space<vmem>>, %arg10: memref<8x3xf32, #tpu.memory_space<vmem>>, %arg11: memref<64x128xbf16, #tpu.memory_space<vmem>>, %arg12: memref<64x512xf32, #tpu.memory_space<vmem>>) attributes {dimension_semantics = [], scalar_prefetch = 0 : i64, scratch_operands = 2 : i64, tpu.core_type = #tpu.core_type<tc>} {
    %c0 = arith.constant 0 : index
    %c0_0 = arith.constant 0 : index
    %c0_1 = arith.constant 0 : index
    %0 = vector.load %arg1[%c0, %c0_0, %c0_1] : memref<4x128x512xbf16, #tpu.memory_space<vmem>>, vector<1x128x512xbf16>
    %1 = vector.shape_cast %0 : vector<1x128x512xbf16> to vector<128x512xbf16>
    %cst = arith.constant 0.000000e+00 : f32
    %2 = vector.broadcast %cst : f32 to vector<8x128xf32>
    %c0_2 = arith.constant 0 : index
    %c0_3 = arith.constant 0 : index
    %3 = vector.load %arg0[%c0_2, %c0_3] : memref<64x512xf32, #tpu.memory_space<vmem>>, vector<8x512xf32>
    %4 = vector.extract_strided_slice %3 {offsets = [0, 0], sizes = [8, 128], strides = [1, 1]} : vector<8x512xf32> to vector<8x128xf32>
    %5 = arith.negf %4 : vector<8x128xf32>
    %6 = math.exp %5 : vector<8x128xf32>
    %cst_4 = arith.constant 1.000000e+00 : f32
    %7 = vector.broadcast %cst_4 : f32 to vector<8x128xf32>
    %8 = arith.addf %7, %6 : vector<8x128xf32>
    %9 = arith.divf %7, %8 : vector<8x128xf32>
    %10 = vector.extract_strided_slice %3 {offsets = [0, 128], sizes = [8, 128], strides = [1, 1]} : vector<8x512xf32> to vector<8x128xf32>
    %11 = arith.negf %10 : vector<8x128xf32>
    %12 = math.exp %11 : vector<8x128xf32>
    %cst_5 = arith.constant 1.000000e+00 : f32
    %13 = vector.broadcast %cst_5 : f32 to vector<8x128xf32>
    %14 = arith.addf %13, %12 : vector<8x128xf32>
    %15 = arith.divf %13, %14 : vector<8x128xf32>
    %16 = vector.extract_strided_slice %3 {offsets = [0, 256], sizes = [8, 128], strides = [1, 1]} : vector<8x512xf32> to vector<8x128xf32>
    %17 = math.tanh %16 : vector<8x128xf32>
    %18 = vector.extract_strided_slice %3 {offsets = [0, 384], sizes = [8, 128], strides = [1, 1]} : vector<8x512xf32> to vector<8x128xf32>
    %19 = arith.negf %18 : vector<8x128xf32>
    %20 = math.exp %19 : vector<8x128xf32>
    %cst_6 = arith.constant 1.000000e+00 : f32
    %21 = vector.broadcast %cst_6 : f32 to vector<8x128xf32>
    %22 = arith.addf %21, %20 : vector<8x128xf32>
    %23 = arith.divf %21, %22 : vector<8x128xf32>
    %24 = arith.mulf %15, %2 : vector<8x128xf32>
    %25 = arith.mulf %9, %17 : vector<8x128xf32>
    %26 = arith.addf %24, %25 : vector<8x128xf32>
    %27 = math.tanh %26 : vector<8x128xf32>
    %28 = arith.mulf %23, %27 : vector<8x128xf32>
    %29 = arith.truncf %28 : vector<8x128xf32> to vector<8x128xbf16>
    %c0_7 = arith.constant 0 : index
    %c0_8 = arith.constant 0 : index
    %30 = vector.load %arg11[%c0_7, %c0_8] : memref<64x128xbf16, #tpu.memory_space<vmem>>, vector<8x128xbf16>
    tpu.vector_store %arg11[%c0_7, %c0_8], %29 {strides = array<i32>} : memref<64x128xbf16, #tpu.memory_space<vmem>>, vector<8x128xbf16>,
    %c8 = arith.constant 8 : index
    %c0_9 = arith.constant 0 : index
    %31 = vector.load %arg0[%c8, %c0_9] : memref<64x512xf32, #tpu.memory_space<vmem>>, vector<8x512xf32>
    %cst_10 = arith.constant dense<0.000000e+00> : vector<8x512xf32>
    %32 = tpu.matmul %29, %1, %cst_10 {dimension_numbers = #tpu.dot_dimension_numbers<[1], [0], [0], [1], [0, 0, 1, 1], [], []>} : vector<8x128xbf16>, vector<128x512xbf16>, vector<8x512xf32> -> vector<8x512xf32>
    %33 = arith.addf %31, %32 : vector<8x512xf32>
    %34 = vector.extract_strided_slice %33 {offsets = [0, 0], sizes = [8, 128], strides = [1, 1]} : vector<8x512xf32> to vector<8x128xf32>
    %35 = arith.negf %34 : vector<8x128xf32>
    %36 = math.exp %35 : vector<8x128xf32>
    %cst_11 = arith.constant 1.000000e+00 : f32
    %37 = vector.broadcast %cst_11 : f32 to vector<8x128xf32>
    %38 = arith.addf %37, %36 : vector<8x128xf32>
    %39 = arith.divf %37, %38 : vector<8x128xf32>
    %40 = vector.extract_strided_slice %33 {offsets = [0, 128], sizes = [8, 128], strides = [1, 1]} : vector<8x512xf32> to vector<8x128xf32>
    %41 = arith.negf %40 : vector<8x128xf32>
    %42 = math.exp %41 : vector<8x128xf32>
    %cst_12 = arith.constant 1.000000e+00 : f32
    %43 = vector.broadcast %cst_12 : f32 to vector<8x128xf32>
    %44 = arith.addf %43, %42 : vector<8x128xf32>
    %45 = arith.divf %43, %44 : vector<8x128xf32>
    %46 = vector.extract_strided_slice %33 {offsets = [0, 256], sizes = [8, 128], strides = [1, 1]} : vector<8x512xf32> to vector<8x128xf32>
    %47 = math.tanh %46 : vector<8x128xf32>
    %48 = vector.extract_strided_slice %33 {offsets = [0, 384], sizes = [8, 128], strides = [1, 1]} : vector<8x512xf32> to vector<8x128xf32>
    %49 = arith.negf %48 : vector<8x128xf32>
    %50 = math.exp %49 : vector<8x128xf32>
    %cst_13 = arith.constant 1.000000e+00 : f32
    %51 = vector.broadcast %cst_13 : f32 to vector<8x128xf32>
    %52 = arith.addf %51, %50 : vector<8x128xf32>
    %53 = arith.divf %51, %52 : vector<8x128xf32>
    %54 = arith.mulf %45, %26 : vector<8x128xf32>
    %55 = arith.mulf %39, %47 : vector<8x128xf32>
    %56 = arith.addf %54, %55 : vector<8x128xf32>
    %57 = math.tanh %56 : vector<8x128xf32>
    %58 = arith.mulf %53, %57 : vector<8x128xf32>
    %59 = arith.truncf %58 : vector<8x128xf32> to vector<8x128xbf16>
    %c8_14 = arith.constant 8 : index
    %c0_15 = arith.constant 0 : index
    %60 = vector.load %arg11[%c8_14, %c0_15] : memref<64x128xbf16, #tpu.memory_space<vmem>>, vector<8x128xbf16>
    tpu.vector_store %arg11[%c8_14, %c0_15], %59 {strides = array<i32>} : memref<64x128xbf16, #tpu.memory_space<vmem>>, vector<8x128xbf16>,
    %c16 = arith.constant 16 : index
    %c0_16 = arith.constant 0 : index
    %61 = vector.load %arg0[%c16, %c0_16] : memref<64x512xf32, #tpu.memory_space<vmem>>, vector<8x512xf32>
    %cst_17 = arith.constant dense<0.000000e+00> : vector<8x512xf32>
    %62 = tpu.matmul %59, %1, %cst_17 {dimension_numbers = #tpu.dot_dimension_numbers<[1], [0], [0], [1], [0, 0, 1, 1], [], []>} : vector<8x128xbf16>, vector<128x512xbf16>, vector<8x512xf32> -> vector<8x512xf32>
    %63 = arith.addf %61, %62 : vector<8x512xf32>
    %64 = vector.extract_strided_slice %63 {offsets = [0, 0], sizes = [8, 128], strides = [1, 1]} : vector<8x512xf32> to vector<8x128xf32>
    %65 = arith.negf %64 : vector<8x128xf32>
    %66 = math.exp %65 : vector<8x128xf32>
    %cst_18 = arith.constant 1.000000e+00 : f32
    %67 = vector.broadcast %cst_18 : f32 to vector<8x128xf32>
    %68 = arith.addf %67, %66 : vector<8x128xf32>
    %69 = arith.divf %67, %68 : vector<8x128xf32>
    %70 = vector.extract_strided_slice %63 {offsets = [0, 128], sizes = [8, 128], strides = [1, 1]} : vector<8x512xf32> to vector<8x128xf32>
    %71 = arith.negf %70 : vector<8x128xf32>
    %72 = math.exp %71 : vector<8x128xf32>
    %cst_19 = arith.constant 1.000000e+00 : f32
    %73 = vector.broadcast %cst_19 : f32 to vector<8x128xf32>
    %74 = arith.addf %73, %72 : vector<8x128xf32>
    %75 = arith.divf %73, %74 : vector<8x128xf32>
    %76 = vector.extract_strided_slice %63 {offsets = [0, 256], sizes = [8, 128], strides = [1, 1]} : vector<8x512xf32> to vector<8x128xf32>
    %77 = math.tanh %76 : vector<8x128xf32>
    %78 = vector.extract_strided_slice %63 {offsets = [0, 384], sizes = [8, 128], strides = [1, 1]} : vector<8x512xf32> to vector<8x128xf32>
    %79 = arith.negf %78 : vector<8x128xf32>
    %80 = math.exp %79 : vector<8x128xf32>
    %cst_20 = arith.constant 1.000000e+00 : f32
    %81 = vector.broadcast %cst_20 : f32 to vector<8x128xf32>
    %82 = arith.addf %81, %80 : vector<8x128xf32>
    %83 = arith.divf %81, %82 : vector<8x128xf32>
    %84 = arith.mulf %75, %56 : vector<8x128xf32>
    %85 = arith.mulf %69, %77 : vector<8x128xf32>
    %86 = arith.addf %84, %85 : vector<8x128xf32>
    %87 = math.tanh %86 : vector<8x128xf32>
    %88 = arith.mulf %83, %87 : vector<8x128xf32>
    %89 = arith.truncf %88 : vector<8x128xf32> to vector<8x128xbf16>
    %c16_21 = arith.constant 16 : index
    %c0_22 = arith.constant 0 : index
    %90 = vector.load %arg11[%c16_21, %c0_22] : memref<64x128xbf16, #tpu.memory_space<vmem>>, vector<8x128xbf16>
    tpu.vector_store %arg11[%c16_21, %c0_22], %89 {strides = array<i32>} : memref<64x128xbf16, #tpu.memory_space<vmem>>, vector<8x128xbf16>,
    %c24 = arith.constant 24 : index
    %c0_23 = arith.constant 0 : index
    %91 = vector.load %arg0[%c24, %c0_23] : memref<64x512xf32, #tpu.memory_space<vmem>>, vector<8x512xf32>
    %cst_24 = arith.constant dense<0.000000e+00> : vector<8x512xf32>
    %92 = tpu.matmul %89, %1, %cst_24 {dimension_numbers = #tpu.dot_dimension_numbers<[1], [0], [0], [1], [0, 0, 1, 1], [], []>} : vector<8x128xbf16>, vector<128x512xbf16>, vector<8x512xf32> -> vector<8x512xf32>
    %93 = arith.addf %91, %92 : vector<8x512xf32>
    %94 = vector.extract_strided_slice %93 {offsets = [0, 0], sizes = [8, 128], strides = [1, 1]} : vector<8x512xf32> to vector<8x128xf32>
    %95 = arith.negf %94 : vector<8x128xf32>
    %96 = math.exp %95 : vector<8x128xf32>
    %cst_25 = arith.constant 1.000000e+00 : f32
    %97 = vector.broadcast %cst_25 : f32 to vector<8x128xf32>
    %98 = arith.addf %97, %96 : vector<8x128xf32>
    %99 = arith.divf %97, %98 : vector<8x128xf32>
    %100 = vector.extract_strided_slice %93 {offsets = [0, 128], sizes = [8, 128], strides = [1, 1]} : vector<8x512xf32> to vector<8x128xf32>
    %101 = arith.negf %100 : vector<8x128xf32>
    %102 = math.exp %101 : vector<8x128xf32>
    %cst_26 = arith.constant 1.000000e+00 : f32
    %103 = vector.broadcast %cst_26 : f32 to vector<8x128xf32>
    %104 = arith.addf %103, %102 : vector<8x128xf32>
    %105 = arith.divf %103, %104 : vector<8x128xf32>
    %106 = vector.extract_strided_slice %93 {offsets = [0, 256], sizes = [8, 128], strides = [1, 1]} : vector<8x512xf32> to vector<8x128xf32>
    %107 = math.tanh %106 : vector<8x128xf32>
    %108 = vector.extract_strided_slice %93 {offsets = [0, 384], sizes = [8, 128], strides = [1, 1]} : vector<8x512xf32> to vector<8x128xf32>
    %109 = arith.negf %108 : vector<8x128xf32>
    %110 = math.exp %109 : vector<8x128xf32>
    %cst_27 = arith.constant 1.000000e+00 : f32
    %111 = vector.broadcast %cst_27 : f32 to vector<8x128xf32>
    %112 = arith.addf %111, %110 : vector<8x128xf32>
    %113 = arith.divf %111, %112 : vector<8x128xf32>
    %114 = arith.mulf %105, %86 : vector<8x128xf32>
    %115 = arith.mulf %99, %107 : vector<8x128xf32>
    %116 = arith.addf %114, %115 : vector<8x128xf32>
    %117 = math.tanh %116 : vector<8x128xf32>
    %118 = arith.mulf %113, %117 : vector<8x128xf32>
    %119 = arith.truncf %118 : vector<8x128xf32> to vector<8x128xbf16>
    %c24_28 = arith.constant 24 : index
    %c0_29 = arith.constant 0 : index
    %120 = vector.load %arg11[%c24_28, %c0_29] : memref<64x128xbf16, #tpu.memory_space<vmem>>, vector<8x128xbf16>
    tpu.vector_store %arg11[%c24_28, %c0_29], %119 {strides = array<i32>} : memref<64x128xbf16, #tpu.memory_space<vmem>>, vector<8x128xbf16>,
    %c32 = arith.constant 32 : index
    %c0_30 = arith.constant 0 : index
    %121 = vector.load %arg0[%c32, %c0_30] : memref<64x512xf32, #tpu.memory_space<vmem>>, vector<8x512xf32>
    %cst_31 = arith.constant dense<0.000000e+00> : vector<8x512xf32>
    %122 = tpu.matmul %119, %1, %cst_31 {dimension_numbers = #tpu.dot_dimension_numbers<[1], [0], [0], [1], [0, 0, 1, 1], [], []>} : vector<8x128xbf16>, vector<128x512xbf16>, vector<8x512xf32> -> vector<8x512xf32>
    %123 = arith.addf %121, %122 : vector<8x512xf32>
    %124 = vector.extract_strided_slice %123 {offsets = [0, 0], sizes = [8, 128], strides = [1, 1]} : vector<8x512xf32> to vector<8x128xf32>
    %125 = arith.negf %124 : vector<8x128xf32>
    %126 = math.exp %125 : vector<8x128xf32>
    %cst_32 = arith.constant 1.000000e+00 : f32
    %127 = vector.broadcast %cst_32 : f32 to vector<8x128xf32>
    %128 = arith.addf %127, %126 : vector<8x128xf32>
    %129 = arith.divf %127, %128 : vector<8x128xf32>
    %130 = vector.extract_strided_slice %123 {offsets = [0, 128], sizes = [8, 128], strides = [1, 1]} : vector<8x512xf32> to vector<8x128xf32>
    %131 = arith.negf %130 : vector<8x128xf32>
    %132 = math.exp %131 : vector<8x128xf32>
    %cst_33 = arith.constant 1.000000e+00 : f32
    %133 = vector.broadcast %cst_33 : f32 to vector<8x128xf32>
    %134 = arith.addf %133, %132 : vector<8x128xf32>
    %135 = arith.divf %133, %134 : vector<8x128xf32>
    %136 = vector.extract_strided_slice %123 {offsets = [0, 256], sizes = [8, 128], strides = [1, 1]} : vector<8x512xf32> to vector<8x128xf32>
    %137 = math.tanh %136 : vector<8x128xf32>
    %138 = vector.extract_strided_slice %123 {offsets = [0, 384], sizes = [8, 128], strides = [1, 1]} : vector<8x512xf32> to vector<8x128xf32>
    %139 = arith.negf %138 : vector<8x128xf32>
    %140 = math.exp %139 : vector<8x128xf32>
    %cst_34 = arith.constant 1.000000e+00 : f32
    %141 = vector.broadcast %cst_34 : f32 to vector<8x128xf32>
    %142 = arith.addf %141, %140 : vector<8x128xf32>
    %143 = arith.divf %141, %142 : vector<8x128xf32>
    %144 = arith.mulf %135, %116 : vector<8x128xf32>
    %145 = arith.mulf %129, %137 : vector<8x128xf32>
    %146 = arith.addf %144, %145 : vector<8x128xf32>
    %147 = math.tanh %146 : vector<8x128xf32>
    %148 = arith.mulf %143, %147 : vector<8x128xf32>
    %149 = arith.truncf %148 : vector<8x128xf32> to vector<8x128xbf16>
    %c32_35 = arith.constant 32 : index
    %c0_36 = arith.constant 0 : index
    %150 = vector.load %arg11[%c32_35, %c0_36] : memref<64x128xbf16, #tpu.memory_space<vmem>>, vector<8x128xbf16>
    tpu.vector_store %arg11[%c32_35, %c0_36], %149 {strides = array<i32>} : memref<64x128xbf16, #tpu.memory_space<vmem>>, vector<8x128xbf16>,
    %c40 = arith.constant 40 : index
    %c0_37 = arith.constant 0 : index
    %151 = vector.load %arg0[%c40, %c0_37] : memref<64x512xf32, #tpu.memory_space<vmem>>, vector<8x512xf32>
    %cst_38 = arith.constant dense<0.000000e+00> : vector<8x512xf32>
    %152 = tpu.matmul %149, %1, %cst_38 {dimension_numbers = #tpu.dot_dimension_numbers<[1], [0], [0], [1], [0, 0, 1, 1], [], []>} : vector<8x128xbf16>, vector<128x512xbf16>, vector<8x512xf32> -> vector<8x512xf32>
    %153 = arith.addf %151, %152 : vector<8x512xf32>
    %154 = vector.extract_strided_slice %153 {offsets = [0, 0], sizes = [8, 128], strides = [1, 1]} : vector<8x512xf32> to vector<8x128xf32>
    %155 = arith.negf %154 : vector<8x128xf32>
    %156 = math.exp %155 : vector<8x128xf32>
    %cst_39 = arith.constant 1.000000e+00 : f32
    %157 = vector.broadcast %cst_39 : f32 to vector<8x128xf32>
    %158 = arith.addf %157, %156 : vector<8x128xf32>
    %159 = arith.divf %157, %158 : vector<8x128xf32>
    %160 = vector.extract_strided_slice %153 {offsets = [0, 128], sizes = [8, 128], strides = [1, 1]} : vector<8x512xf32> to vector<8x128xf32>
    %161 = arith.negf %160 : vector<8x128xf32>
    %162 = math.exp %161 : vector<8x128xf32>
    %cst_40 = arith.constant 1.000000e+00 : f32
    %163 = vector.broadcast %cst_40 : f32 to vector<8x128xf32>
    %164 = arith.addf %163, %162 : vector<8x128xf32>
    %165 = arith.divf %163, %164 : vector<8x128xf32>
    %166 = vector.extract_strided_slice %153 {offsets = [0, 256], sizes = [8, 128], strides = [1, 1]} : vector<8x512xf32> to vector<8x128xf32>
    %167 = math.tanh %166 : vector<8x128xf32>
    %168 = vector.extract_strided_slice %153 {offsets = [0, 384], sizes = [8, 128], strides = [1, 1]} : vector<8x512xf32> to vector<8x128xf32>
    %169 = arith.negf %168 : vector<8x128xf32>
    %170 = math.exp %169 : vector<8x128xf32>
    %cst_41 = arith.constant 1.000000e+00 : f32
    %171 = vector.broadcast %cst_41 : f32 to vector<8x128xf32>
    %172 = arith.addf %171, %170 : vector<8x128xf32>
    %173 = arith.divf %171, %172 : vector<8x128xf32>
    %174 = arith.mulf %165, %146 : vector<8x128xf32>
    %175 = arith.mulf %159, %167 : vector<8x128xf32>
    %176 = arith.addf %174, %175 : vector<8x128xf32>
    %177 = math.tanh %176 : vector<8x128xf32>
    %178 = arith.mulf %173, %177 : vector<8x128xf32>
    %179 = arith.truncf %178 : vector<8x128xf32> to vector<8x128xbf16>
    %c40_42 = arith.constant 40 : index
    %c0_43 = arith.constant 0 : index
    %180 = vector.load %arg11[%c40_42, %c0_43] : memref<64x128xbf16, #tpu.memory_space<vmem>>, vector<8x128xbf16>
    tpu.vector_store %arg11[%c40_42, %c0_43], %179 {strides = array<i32>} : memref<64x128xbf16, #tpu.memory_space<vmem>>, vector<8x128xbf16>,
    %c48 = arith.constant 48 : index
    %c0_44 = arith.constant 0 : index
    %181 = vector.load %arg0[%c48, %c0_44] : memref<64x512xf32, #tpu.memory_space<vmem>>, vector<8x512xf32>
    %cst_45 = arith.constant dense<0.000000e+00> : vector<8x512xf32>
    %182 = tpu.matmul %179, %1, %cst_45 {dimension_numbers = #tpu.dot_dimension_numbers<[1], [0], [0], [1], [0, 0, 1, 1], [], []>} : vector<8x128xbf16>, vector<128x512xbf16>, vector<8x512xf32> -> vector<8x512xf32>
    %183 = arith.addf %181, %182 : vector<8x512xf32>
    %184 = vector.extract_strided_slice %183 {offsets = [0, 0], sizes = [8, 128], strides = [1, 1]} : vector<8x512xf32> to vector<8x128xf32>
    %185 = arith.negf %184 : vector<8x128xf32>
    %186 = math.exp %185 : vector<8x128xf32>
    %cst_46 = arith.constant 1.000000e+00 : f32
    %187 = vector.broadcast %cst_46 : f32 to vector<8x128xf32>
    %188 = arith.addf %187, %186 : vector<8x128xf32>
    %189 = arith.divf %187, %188 : vector<8x128xf32>
    %190 = vector.extract_strided_slice %183 {offsets = [0, 128], sizes = [8, 128], strides = [1, 1]} : vector<8x512xf32> to vector<8x128xf32>
    %191 = arith.negf %190 : vector<8x128xf32>
    %192 = math.exp %191 : vector<8x128xf32>
    %cst_47 = arith.constant 1.000000e+00 : f32
    %193 = vector.broadcast %cst_47 : f32 to vector<8x128xf32>
    %194 = arith.addf %193, %192 : vector<8x128xf32>
    %195 = arith.divf %193, %194 : vector<8x128xf32>
    %196 = vector.extract_strided_slice %183 {offsets = [0, 256], sizes = [8, 128], strides = [1, 1]} : vector<8x512xf32> to vector<8x128xf32>
    %197 = math.tanh %196 : vector<8x128xf32>
    %198 = vector.extract_strided_slice %183 {offsets = [0, 384], sizes = [8, 128], strides = [1, 1]} : vector<8x512xf32> to vector<8x128xf32>
    %199 = arith.negf %198 : vector<8x128xf32>
    %200 = math.exp %199 : vector<8x128xf32>
    %cst_48 = arith.constant 1.000000e+00 : f32
    %201 = vector.broadcast %cst_48 : f32 to vector<8x128xf32>
    %202 = arith.addf %201, %200 : vector<8x128xf32>
    %203 = arith.divf %201, %202 : vector<8x128xf32>
    %204 = arith.mulf %195, %176 : vector<8x128xf32>
    %205 = arith.mulf %189, %197 : vector<8x128xf32>
    %206 = arith.addf %204, %205 : vector<8x128xf32>
    %207 = math.tanh %206 : vector<8x128xf32>
    %208 = arith.mulf %203, %207 : vector<8x128xf32>
    %209 = arith.truncf %208 : vector<8x128xf32> to vector<8x128xbf16>
    %c48_49 = arith.constant 48 : index
    %c0_50 = arith.constant 0 : index
    %210 = vector.load %arg11[%c48_49, %c0_50] : memref<64x128xbf16, #tpu.memory_space<vmem>>, vector<8x128xbf16>
    tpu.vector_store %arg11[%c48_49, %c0_50], %209 {strides = array<i32>} : memref<64x128xbf16, #tpu.memory_space<vmem>>, vector<8x128xbf16>,
    %c56 = arith.constant 56 : index
    %c0_51 = arith.constant 0 : index
    %211 = vector.load %arg0[%c56, %c0_51] : memref<64x512xf32, #tpu.memory_space<vmem>>, vector<8x512xf32>
    %cst_52 = arith.constant dense<0.000000e+00> : vector<8x512xf32>
    %212 = tpu.matmul %209, %1, %cst_52 {dimension_numbers = #tpu.dot_dimension_numbers<[1], [0], [0], [1], [0, 0, 1, 1], [], []>} : vector<8x128xbf16>, vector<128x512xbf16>, vector<8x512xf32> -> vector<8x512xf32>
    %213 = arith.addf %211, %212 : vector<8x512xf32>
    %214 = vector.extract_strided_slice %213 {offsets = [0, 0], sizes = [8, 128], strides = [1, 1]} : vector<8x512xf32> to vector<8x128xf32>
    %215 = arith.negf %214 : vector<8x128xf32>
    %216 = math.exp %215 : vector<8x128xf32>
    %cst_53 = arith.constant 1.000000e+00 : f32
    %217 = vector.broadcast %cst_53 : f32 to vector<8x128xf32>
    %218 = arith.addf %217, %216 : vector<8x128xf32>
    %219 = arith.divf %217, %218 : vector<8x128xf32>
    %220 = vector.extract_strided_slice %213 {offsets = [0, 128], sizes = [8, 128], strides = [1, 1]} : vector<8x512xf32> to vector<8x128xf32>
    %221 = arith.negf %220 : vector<8x128xf32>
    %222 = math.exp %221 : vector<8x128xf32>
    %cst_54 = arith.constant 1.000000e+00 : f32
    %223 = vector.broadcast %cst_54 : f32 to vector<8x128xf32>
    %224 = arith.addf %223, %222 : vector<8x128xf32>
    %225 = arith.divf %223, %224 : vector<8x128xf32>
    %226 = vector.extract_strided_slice %213 {offsets = [0, 256], sizes = [8, 128], strides = [1, 1]} : vector<8x512xf32> to vector<8x128xf32>
    %227 = math.tanh %226 : vector<8x128xf32>
    %228 = vector.extract_strided_slice %213 {offsets = [0, 384], sizes = [8, 128], strides = [1, 1]} : vector<8x512xf32> to vector<8x128xf32>
    %229 = arith.negf %228 : vector<8x128xf32>
    %230 = math.exp %229 : vector<8x128xf32>
    %cst_55 = arith.constant 1.000000e+00 : f32
    %231 = vector.broadcast %cst_55 : f32 to vector<8x128xf32>
    %232 = arith.addf %231, %230 : vector<8x128xf32>
    %233 = arith.divf %231, %232 : vector<8x128xf32>
    %234 = arith.mulf %225, %206 : vector<8x128xf32>
    %235 = arith.mulf %219, %227 : vector<8x128xf32>
    %236 = arith.addf %234, %235 : vector<8x128xf32>
    %237 = math.tanh %236 : vector<8x128xf32>
    %238 = arith.mulf %233, %237 : vector<8x128xf32>
    %239 = arith.truncf %238 : vector<8x128xf32> to vector<8x128xbf16>
    %c56_56 = arith.constant 56 : index
    %c0_57 = arith.constant 0 : index
    %240 = vector.load %arg11[%c56_56, %c0_57] : memref<64x128xbf16, #tpu.memory_space<vmem>>, vector<8x128xbf16>
    tpu.vector_store %arg11[%c56_56, %c0_57], %239 {strides = array<i32>} : memref<64x128xbf16, #tpu.memory_space<vmem>>, vector<8x128xbf16>,
    %c0_58 = arith.constant 0 : index
    %c0_59 = arith.constant 0 : index
    %241 = vector.load %arg11[%c0_58, %c0_59] : memref<64x128xbf16, #tpu.memory_space<vmem>>, vector<64x128xbf16>
    %c0_60 = arith.constant 0 : index
    %c0_61 = arith.constant 0 : index
    %c0_62 = arith.constant 0 : index
    %242 = vector.load %arg2[%c0_60, %c0_61, %c0_62] : memref<3x128x512xbf16, #tpu.memory_space<vmem>>, vector<1x128x512xbf16>
    %243 = vector.shape_cast %242 : vector<1x128x512xbf16> to vector<128x512xbf16>
    %cst_63 = arith.constant dense<0.000000e+00> : vector<64x512xf32>
    %244 = tpu.matmul %241, %243, %cst_63 {dimension_numbers = #tpu.dot_dimension_numbers<[1], [0], [0], [1], [0, 0, 1, 1], [], []>} : vector<64x128xbf16>, vector<128x512xbf16>, vector<64x512xf32> -> vector<64x512xf32>
    %c0_64 = arith.constant 0 : index
    %c0_65 = arith.constant 0 : index
    %c0_66 = arith.constant 0 : index
    %245 = vector.load %arg3[%c0_64, %c0_65, %c0_66] : memref<3x1x512xf32, #tpu.memory_space<vmem>>, vector<1x1x512xf32>
    %246 = vector.shape_cast %245 : vector<1x1x512xf32> to vector<1x512xf32>
    %247 = vector.broadcast %246 : vector<1x512xf32> to vector<64x512xf32>
    %248 = arith.addf %244, %247 : vector<64x512xf32>
    %c0_67 = arith.constant 0 : index
    %c0_68 = arith.constant 0 : index
    %249 = vector.load %arg12[%c0_67, %c0_68] : memref<64x512xf32, #tpu.memory_space<vmem>>, vector<64x512xf32>
    tpu.vector_store %arg12[%c0_67, %c0_68], %248 {strides = array<i32>} : memref<64x512xf32, #tpu.memory_space<vmem>>, vector<64x512xf32>,
    %c1 = arith.constant 1 : index
    %c0_69 = arith.constant 0 : index
    %c0_70 = arith.constant 0 : index
    %250 = vector.load %arg1[%c1, %c0_69, %c0_70] : memref<4x128x512xbf16, #tpu.memory_space<vmem>>, vector<1x128x512xbf16>
    %251 = vector.shape_cast %250 : vector<1x128x512xbf16> to vector<128x512xbf16>
    %cst_71 = arith.constant 0.000000e+00 : f32
    %252 = vector.broadcast %cst_71 : f32 to vector<8x128xf32>
    %c0_72 = arith.constant 0 : index
    %c0_73 = arith.constant 0 : index
    %253 = vector.load %arg12[%c0_72, %c0_73] : memref<64x512xf32, #tpu.memory_space<vmem>>, vector<8x512xf32>
    %254 = vector.extract_strided_slice %253 {offsets = [0, 0], sizes = [8, 128], strides = [1, 1]} : vector<8x512xf32> to vector<8x128xf32>
    %255 = arith.negf %254 : vector<8x128xf32>
    %256 = math.exp %255 : vector<8x128xf32>
    %cst_74 = arith.constant 1.000000e+00 : f32
    %257 = vector.broadcast %cst_74 : f32 to vector<8x128xf32>
    %258 = arith.addf %257, %256 : vector<8x128xf32>
    %259 = arith.divf %257, %258 : vector<8x128xf32>
    %260 = vector.extract_strided_slice %253 {offsets = [0, 128], sizes = [8, 128], strides = [1, 1]} : vector<8x512xf32> to vector<8x128xf32>
    %261 = arith.negf %260 : vector<8x128xf32>
    %262 = math.exp %261 : vector<8x128xf32>
    %cst_75 = arith.constant 1.000000e+00 : f32
    %263 = vector.broadcast %cst_75 : f32 to vector<8x128xf32>
    %264 = arith.addf %263, %262 : vector<8x128xf32>
    %265 = arith.divf %263, %264 : vector<8x128xf32>
    %266 = vector.extract_strided_slice %253 {offsets = [0, 256], sizes = [8, 128], strides = [1, 1]} : vector<8x512xf32> to vector<8x128xf32>
    %267 = math.tanh %266 : vector<8x128xf32>
    %268 = vector.extract_strided_slice %253 {offsets = [0, 384], sizes = [8, 128], strides = [1, 1]} : vector<8x512xf32> to vector<8x128xf32>
    %269 = arith.negf %268 : vector<8x128xf32>
    %270 = math.exp %269 : vector<8x128xf32>
    %cst_76 = arith.constant 1.000000e+00 : f32
    %271 = vector.broadcast %cst_76 : f32 to vector<8x128xf32>
    %272 = arith.addf %271, %270 : vector<8x128xf32>
    %273 = arith.divf %271, %272 : vector<8x128xf32>
    %274 = arith.mulf %265, %252 : vector<8x128xf32>
    %275 = arith.mulf %259, %267 : vector<8x128xf32>
    %276 = arith.addf %274, %275 : vector<8x128xf32>
    %277 = math.tanh %276 : vector<8x128xf32>
    %278 = arith.mulf %273, %277 : vector<8x128xf32>
    %279 = arith.truncf %278 : vector<8x128xf32> to vector<8x128xbf16>
    %c0_77 = arith.constant 0 : index
    %c0_78 = arith.constant 0 : index
    %280 = vector.load %arg11[%c0_77, %c0_78] : memref<64x128xbf16, #tpu.memory_space<vmem>>, vector<8x128xbf16>
    tpu.vector_store %arg11[%c0_77, %c0_78], %279 {strides = array<i32>} : memref<64x128xbf16, #tpu.memory_space<vmem>>, vector<8x128xbf16>,
    %c8_79 = arith.constant 8 : index
    %c0_80 = arith.constant 0 : index
    %281 = vector.load %arg12[%c8_79, %c0_80] : memref<64x512xf32, #tpu.memory_space<vmem>>, vector<8x512xf32>
    %cst_81 = arith.constant dense<0.000000e+00> : vector<8x512xf32>
    %282 = tpu.matmul %279, %251, %cst_81 {dimension_numbers = #tpu.dot_dimension_numbers<[1], [0], [0], [1], [0, 0, 1, 1], [], []>} : vector<8x128xbf16>, vector<128x512xbf16>, vector<8x512xf32> -> vector<8x512xf32>
    %283 = arith.addf %281, %282 : vector<8x512xf32>
    %284 = vector.extract_strided_slice %283 {offsets = [0, 0], sizes = [8, 128], strides = [1, 1]} : vector<8x512xf32> to vector<8x128xf32>
    %285 = arith.negf %284 : vector<8x128xf32>
    %286 = math.exp %285 : vector<8x128xf32>
    %cst_82 = arith.constant 1.000000e+00 : f32
    %287 = vector.broadcast %cst_82 : f32 to vector<8x128xf32>
    %288 = arith.addf %287, %286 : vector<8x128xf32>
    %289 = arith.divf %287, %288 : vector<8x128xf32>
    %290 = vector.extract_strided_slice %283 {offsets = [0, 128], sizes = [8, 128], strides = [1, 1]} : vector<8x512xf32> to vector<8x128xf32>
    %291 = arith.negf %290 : vector<8x128xf32>
    %292 = math.exp %291 : vector<8x128xf32>
    %cst_83 = arith.constant 1.000000e+00 : f32
    %293 = vector.broadcast %cst_83 : f32 to vector<8x128xf32>
    %294 = arith.addf %293, %292 : vector<8x128xf32>
    %295 = arith.divf %293, %294 : vector<8x128xf32>
    %296 = vector.extract_strided_slice %283 {offsets = [0, 256], sizes = [8, 128], strides = [1, 1]} : vector<8x512xf32> to vector<8x128xf32>
    %297 = math.tanh %296 : vector<8x128xf32>
    %298 = vector.extract_strided_slice %283 {offsets = [0, 384], sizes = [8, 128], strides = [1, 1]} : vector<8x512xf32> to vector<8x128xf32>
    %299 = arith.negf %298 : vector<8x128xf32>
    %300 = math.exp %299 : vector<8x128xf32>
    %cst_84 = arith.constant 1.000000e+00 : f32
    %301 = vector.broadcast %cst_84 : f32 to vector<8x128xf32>
    %302 = arith.addf %301, %300 : vector<8x128xf32>
    %303 = arith.divf %301, %302 : vector<8x128xf32>
    %304 = arith.mulf %295, %276 : vector<8x128xf32>
    %305 = arith.mulf %289, %297 : vector<8x128xf32>
    %306 = arith.addf %304, %305 : vector<8x128xf32>
    %307 = math.tanh %306 : vector<8x128xf32>
    %308 = arith.mulf %303, %307 : vector<8x128xf32>
    %309 = arith.truncf %308 : vector<8x128xf32> to vector<8x128xbf16>
    %c8_85 = arith.constant 8 : index
    %c0_86 = arith.constant 0 : index
    %310 = vector.load %arg11[%c8_85, %c0_86] : memref<64x128xbf16, #tpu.memory_space<vmem>>, vector<8x128xbf16>
    tpu.vector_store %arg11[%c8_85, %c0_86], %309 {strides = array<i32>} : memref<64x128xbf16, #tpu.memory_space<vmem>>, vector<8x128xbf16>,
    %c16_87 = arith.constant 16 : index
    %c0_88 = arith.constant 0 : index
    %311 = vector.load %arg12[%c16_87, %c0_88] : memref<64x512xf32, #tpu.memory_space<vmem>>, vector<8x512xf32>
    %cst_89 = arith.constant dense<0.000000e+00> : vector<8x512xf32>
    %312 = tpu.matmul %309, %251, %cst_89 {dimension_numbers = #tpu.dot_dimension_numbers<[1], [0], [0], [1], [0, 0, 1, 1], [], []>} : vector<8x128xbf16>, vector<128x512xbf16>, vector<8x512xf32> -> vector<8x512xf32>
    %313 = arith.addf %311, %312 : vector<8x512xf32>
    %314 = vector.extract_strided_slice %313 {offsets = [0, 0], sizes = [8, 128], strides = [1, 1]} : vector<8x512xf32> to vector<8x128xf32>
    %315 = arith.negf %314 : vector<8x128xf32>
    %316 = math.exp %315 : vector<8x128xf32>
    %cst_90 = arith.constant 1.000000e+00 : f32
    %317 = vector.broadcast %cst_90 : f32 to vector<8x128xf32>
    %318 = arith.addf %317, %316 : vector<8x128xf32>
    %319 = arith.divf %317, %318 : vector<8x128xf32>
    %320 = vector.extract_strided_slice %313 {offsets = [0, 128], sizes = [8, 128], strides = [1, 1]} : vector<8x512xf32> to vector<8x128xf32>
    %321 = arith.negf %320 : vector<8x128xf32>
    %322 = math.exp %321 : vector<8x128xf32>
    %cst_91 = arith.constant 1.000000e+00 : f32
    %323 = vector.broadcast %cst_91 : f32 to vector<8x128xf32>
    %324 = arith.addf %323, %322 : vector<8x128xf32>
    %325 = arith.divf %323, %324 : vector<8x128xf32>
    %326 = vector.extract_strided_slice %313 {offsets = [0, 256], sizes = [8, 128], strides = [1, 1]} : vector<8x512xf32> to vector<8x128xf32>
    %327 = math.tanh %326 : vector<8x128xf32>
    %328 = vector.extract_strided_slice %313 {offsets = [0, 384], sizes = [8, 128], strides = [1, 1]} : vector<8x512xf32> to vector<8x128xf32>
    %329 = arith.negf %328 : vector<8x128xf32>
    %330 = math.exp %329 : vector<8x128xf32>
    %cst_92 = arith.constant 1.000000e+00 : f32
    %331 = vector.broadcast %cst_92 : f32 to vector<8x128xf32>
    %332 = arith.addf %331, %330 : vector<8x128xf32>
    %333 = arith.divf %331, %332 : vector<8x128xf32>
    %334 = arith.mulf %325, %306 : vector<8x128xf32>
    %335 = arith.mulf %319, %327 : vector<8x128xf32>
    %336 = arith.addf %334, %335 : vector<8x128xf32>
    %337 = math.tanh %336 : vector<8x128xf32>
    %338 = arith.mulf %333, %337 : vector<8x128xf32>
    %339 = arith.truncf %338 : vector<8x128xf32> to vector<8x128xbf16>
    %c16_93 = arith.constant 16 : index
    %c0_94 = arith.constant 0 : index
    %340 = vector.load %arg11[%c16_93, %c0_94] : memref<64x128xbf16, #tpu.memory_space<vmem>>, vector<8x128xbf16>
    tpu.vector_store %arg11[%c16_93, %c0_94], %339 {strides = array<i32>} : memref<64x128xbf16, #tpu.memory_space<vmem>>, vector<8x128xbf16>,
    %c24_95 = arith.constant 24 : index
    %c0_96 = arith.constant 0 : index
    %341 = vector.load %arg12[%c24_95, %c0_96] : memref<64x512xf32, #tpu.memory_space<vmem>>, vector<8x512xf32>
    %cst_97 = arith.constant dense<0.000000e+00> : vector<8x512xf32>
    %342 = tpu.matmul %339, %251, %cst_97 {dimension_numbers = #tpu.dot_dimension_numbers<[1], [0], [0], [1], [0, 0, 1, 1], [], []>} : vector<8x128xbf16>, vector<128x512xbf16>, vector<8x512xf32> -> vector<8x512xf32>
    %343 = arith.addf %341, %342 : vector<8x512xf32>
    %344 = vector.extract_strided_slice %343 {offsets = [0, 0], sizes = [8, 128], strides = [1, 1]} : vector<8x512xf32> to vector<8x128xf32>
    %345 = arith.negf %344 : vector<8x128xf32>
    %346 = math.exp %345 : vector<8x128xf32>
    %cst_98 = arith.constant 1.000000e+00 : f32
    %347 = vector.broadcast %cst_98 : f32 to vector<8x128xf32>
    %348 = arith.addf %347, %346 : vector<8x128xf32>
    %349 = arith.divf %347, %348 : vector<8x128xf32>
    %350 = vector.extract_strided_slice %343 {offsets = [0, 128], sizes = [8, 128], strides = [1, 1]} : vector<8x512xf32> to vector<8x128xf32>
    %351 = arith.negf %350 : vector<8x128xf32>
    %352 = math.exp %351 : vector<8x128xf32>
    %cst_99 = arith.constant 1.000000e+00 : f32
    %353 = vector.broadcast %cst_99 : f32 to vector<8x128xf32>
    %354 = arith.addf %353, %352 : vector<8x128xf32>
    %355 = arith.divf %353, %354 : vector<8x128xf32>
    %356 = vector.extract_strided_slice %343 {offsets = [0, 256], sizes = [8, 128], strides = [1, 1]} : vector<8x512xf32> to vector<8x128xf32>
    %357 = math.tanh %356 : vector<8x128xf32>
    %358 = vector.extract_strided_slice %343 {offsets = [0, 384], sizes = [8, 128], strides = [1, 1]} : vector<8x512xf32> to vector<8x128xf32>
    %359 = arith.negf %358 : vector<8x128xf32>
    %360 = math.exp %359 : vector<8x128xf32>
    %cst_100 = arith.constant 1.000000e+00 : f32
    %361 = vector.broadcast %cst_100 : f32 to vector<8x128xf32>
    %362 = arith.addf %361, %360 : vector<8x128xf32>
    %363 = arith.divf %361, %362 : vector<8x128xf32>
    %364 = arith.mulf %355, %336 : vector<8x128xf32>
    %365 = arith.mulf %349, %357 : vector<8x128xf32>
    %366 = arith.addf %364, %365 : vector<8x128xf32>
    %367 = math.tanh %366 : vector<8x128xf32>
    %368 = arith.mulf %363, %367 : vector<8x128xf32>
    %369 = arith.truncf %368 : vector<8x128xf32> to vector<8x128xbf16>
    %c24_101 = arith.constant 24 : index
    %c0_102 = arith.constant 0 : index
    %370 = vector.load %arg11[%c24_101, %c0_102] : memref<64x128xbf16, #tpu.memory_space<vmem>>, vector<8x128xbf16>
    tpu.vector_store %arg11[%c24_101, %c0_102], %369 {strides = array<i32>} : memref<64x128xbf16, #tpu.memory_space<vmem>>, vector<8x128xbf16>,
    %c32_103 = arith.constant 32 : index
    %c0_104 = arith.constant 0 : index
    %371 = vector.load %arg12[%c32_103, %c0_104] : memref<64x512xf32, #tpu.memory_space<vmem>>, vector<8x512xf32>
    %cst_105 = arith.constant dense<0.000000e+00> : vector<8x512xf32>
    %372 = tpu.matmul %369, %251, %cst_105 {dimension_numbers = #tpu.dot_dimension_numbers<[1], [0], [0], [1], [0, 0, 1, 1], [], []>} : vector<8x128xbf16>, vector<128x512xbf16>, vector<8x512xf32> -> vector<8x512xf32>
    %373 = arith.addf %371, %372 : vector<8x512xf32>
    %374 = vector.extract_strided_slice %373 {offsets = [0, 0], sizes = [8, 128], strides = [1, 1]} : vector<8x512xf32> to vector<8x128xf32>
    %375 = arith.negf %374 : vector<8x128xf32>
    %376 = math.exp %375 : vector<8x128xf32>
    %cst_106 = arith.constant 1.000000e+00 : f32
    %377 = vector.broadcast %cst_106 : f32 to vector<8x128xf32>
    %378 = arith.addf %377, %376 : vector<8x128xf32>
    %379 = arith.divf %377, %378 : vector<8x128xf32>
    %380 = vector.extract_strided_slice %373 {offsets = [0, 128], sizes = [8, 128], strides = [1, 1]} : vector<8x512xf32> to vector<8x128xf32>
    %381 = arith.negf %380 : vector<8x128xf32>
    %382 = math.exp %381 : vector<8x128xf32>
    %cst_107 = arith.constant 1.000000e+00 : f32
    %383 = vector.broadcast %cst_107 : f32 to vector<8x128xf32>
    %384 = arith.addf %383, %382 : vector<8x128xf32>
    %385 = arith.divf %383, %384 : vector<8x128xf32>
    %386 = vector.extract_strided_slice %373 {offsets = [0, 256], sizes = [8, 128], strides = [1, 1]} : vector<8x512xf32> to vector<8x128xf32>
    %387 = math.tanh %386 : vector<8x128xf32>
    %388 = vector.extract_strided_slice %373 {offsets = [0, 384], sizes = [8, 128], strides = [1, 1]} : vector<8x512xf32> to vector<8x128xf32>
    %389 = arith.negf %388 : vector<8x128xf32>
    %390 = math.exp %389 : vector<8x128xf32>
    %cst_108 = arith.constant 1.000000e+00 : f32
    %391 = vector.broadcast %cst_108 : f32 to vector<8x128xf32>
    %392 = arith.addf %391, %390 : vector<8x128xf32>
    %393 = arith.divf %391, %392 : vector<8x128xf32>
    %394 = arith.mulf %385, %366 : vector<8x128xf32>
    %395 = arith.mulf %379, %387 : vector<8x128xf32>
    %396 = arith.addf %394, %395 : vector<8x128xf32>
    %397 = math.tanh %396 : vector<8x128xf32>
    %398 = arith.mulf %393, %397 : vector<8x128xf32>
    %399 = arith.truncf %398 : vector<8x128xf32> to vector<8x128xbf16>
    %c32_109 = arith.constant 32 : index
    %c0_110 = arith.constant 0 : index
    %400 = vector.load %arg11[%c32_109, %c0_110] : memref<64x128xbf16, #tpu.memory_space<vmem>>, vector<8x128xbf16>
    tpu.vector_store %arg11[%c32_109, %c0_110], %399 {strides = array<i32>} : memref<64x128xbf16, #tpu.memory_space<vmem>>, vector<8x128xbf16>,
    %c40_111 = arith.constant 40 : index
    %c0_112 = arith.constant 0 : index
    %401 = vector.load %arg12[%c40_111, %c0_112] : memref<64x512xf32, #tpu.memory_space<vmem>>, vector<8x512xf32>
    %cst_113 = arith.constant dense<0.000000e+00> : vector<8x512xf32>
    %402 = tpu.matmul %399, %251, %cst_113 {dimension_numbers = #tpu.dot_dimension_numbers<[1], [0], [0], [1], [0, 0, 1, 1], [], []>} : vector<8x128xbf16>, vector<128x512xbf16>, vector<8x512xf32> -> vector<8x512xf32>
    %403 = arith.addf %401, %402 : vector<8x512xf32>
    %404 = vector.extract_strided_slice %403 {offsets = [0, 0], sizes = [8, 128], strides = [1, 1]} : vector<8x512xf32> to vector<8x128xf32>
    %405 = arith.negf %404 : vector<8x128xf32>
    %406 = math.exp %405 : vector<8x128xf32>
    %cst_114 = arith.constant 1.000000e+00 : f32
    %407 = vector.broadcast %cst_114 : f32 to vector<8x128xf32>
    %408 = arith.addf %407, %406 : vector<8x128xf32>
    %409 = arith.divf %407, %408 : vector<8x128xf32>
    %410 = vector.extract_strided_slice %403 {offsets = [0, 128], sizes = [8, 128], strides = [1, 1]} : vector<8x512xf32> to vector<8x128xf32>
    %411 = arith.negf %410 : vector<8x128xf32>
    %412 = math.exp %411 : vector<8x128xf32>
    %cst_115 = arith.constant 1.000000e+00 : f32
    %413 = vector.broadcast %cst_115 : f32 to vector<8x128xf32>
    %414 = arith.addf %413, %412 : vector<8x128xf32>
    %415 = arith.divf %413, %414 : vector<8x128xf32>
    %416 = vector.extract_strided_slice %403 {offsets = [0, 256], sizes = [8, 128], strides = [1, 1]} : vector<8x512xf32> to vector<8x128xf32>
    %417 = math.tanh %416 : vector<8x128xf32>
    %418 = vector.extract_strided_slice %403 {offsets = [0, 384], sizes = [8, 128], strides = [1, 1]} : vector<8x512xf32> to vector<8x128xf32>
    %419 = arith.negf %418 : vector<8x128xf32>
    %420 = math.exp %419 : vector<8x128xf32>
    %cst_116 = arith.constant 1.000000e+00 : f32
    %421 = vector.broadcast %cst_116 : f32 to vector<8x128xf32>
    %422 = arith.addf %421, %420 : vector<8x128xf32>
    %423 = arith.divf %421, %422 : vector<8x128xf32>
    %424 = arith.mulf %415, %396 : vector<8x128xf32>
    %425 = arith.mulf %409, %417 : vector<8x128xf32>
    %426 = arith.addf %424, %425 : vector<8x128xf32>
    %427 = math.tanh %426 : vector<8x128xf32>
    %428 = arith.mulf %423, %427 : vector<8x128xf32>
    %429 = arith.truncf %428 : vector<8x128xf32> to vector<8x128xbf16>
    %c40_117 = arith.constant 40 : index
    %c0_118 = arith.constant 0 : index
    %430 = vector.load %arg11[%c40_117, %c0_118] : memref<64x128xbf16, #tpu.memory_space<vmem>>, vector<8x128xbf16>
    tpu.vector_store %arg11[%c40_117, %c0_118], %429 {strides = array<i32>} : memref<64x128xbf16, #tpu.memory_space<vmem>>, vector<8x128xbf16>,
    %c48_119 = arith.constant 48 : index
    %c0_120 = arith.constant 0 : index
    %431 = vector.load %arg12[%c48_119, %c0_120] : memref<64x512xf32, #tpu.memory_space<vmem>>, vector<8x512xf32>
    %cst_121 = arith.constant dense<0.000000e+00> : vector<8x512xf32>
    %432 = tpu.matmul %429, %251, %cst_121 {dimension_numbers = #tpu.dot_dimension_numbers<[1], [0], [0], [1], [0, 0, 1, 1], [], []>} : vector<8x128xbf16>, vector<128x512xbf16>, vector<8x512xf32> -> vector<8x512xf32>
    %433 = arith.addf %431, %432 : vector<8x512xf32>
    %434 = vector.extract_strided_slice %433 {offsets = [0, 0], sizes = [8, 128], strides = [1, 1]} : vector<8x512xf32> to vector<8x128xf32>
    %435 = arith.negf %434 : vector<8x128xf32>
    %436 = math.exp %435 : vector<8x128xf32>
    %cst_122 = arith.constant 1.000000e+00 : f32
    %437 = vector.broadcast %cst_122 : f32 to vector<8x128xf32>
    %438 = arith.addf %437, %436 : vector<8x128xf32>
    %439 = arith.divf %437, %438 : vector<8x128xf32>
    %440 = vector.extract_strided_slice %433 {offsets = [0, 128], sizes = [8, 128], strides = [1, 1]} : vector<8x512xf32> to vector<8x128xf32>
    %441 = arith.negf %440 : vector<8x128xf32>
    %442 = math.exp %441 : vector<8x128xf32>
    %cst_123 = arith.constant 1.000000e+00 : f32
    %443 = vector.broadcast %cst_123 : f32 to vector<8x128xf32>
    %444 = arith.addf %443, %442 : vector<8x128xf32>
    %445 = arith.divf %443, %444 : vector<8x128xf32>
    %446 = vector.extract_strided_slice %433 {offsets = [0, 256], sizes = [8, 128], strides = [1, 1]} : vector<8x512xf32> to vector<8x128xf32>
    %447 = math.tanh %446 : vector<8x128xf32>
    %448 = vector.extract_strided_slice %433 {offsets = [0, 384], sizes = [8, 128], strides = [1, 1]} : vector<8x512xf32> to vector<8x128xf32>
    %449 = arith.negf %448 : vector<8x128xf32>
    %450 = math.exp %449 : vector<8x128xf32>
    %cst_124 = arith.constant 1.000000e+00 : f32
    %451 = vector.broadcast %cst_124 : f32 to vector<8x128xf32>
    %452 = arith.addf %451, %450 : vector<8x128xf32>
    %453 = arith.divf %451, %452 : vector<8x128xf32>
    %454 = arith.mulf %445, %426 : vector<8x128xf32>
    %455 = arith.mulf %439, %447 : vector<8x128xf32>
    %456 = arith.addf %454, %455 : vector<8x128xf32>
    %457 = math.tanh %456 : vector<8x128xf32>
    %458 = arith.mulf %453, %457 : vector<8x128xf32>
    %459 = arith.truncf %458 : vector<8x128xf32> to vector<8x128xbf16>
    %c48_125 = arith.constant 48 : index
    %c0_126 = arith.constant 0 : index
    %460 = vector.load %arg11[%c48_125, %c0_126] : memref<64x128xbf16, #tpu.memory_space<vmem>>, vector<8x128xbf16>
    tpu.vector_store %arg11[%c48_125, %c0_126], %459 {strides = array<i32>} : memref<64x128xbf16, #tpu.memory_space<vmem>>, vector<8x128xbf16>,
    %c56_127 = arith.constant 56 : index
    %c0_128 = arith.constant 0 : index
    %461 = vector.load %arg12[%c56_127, %c0_128] : memref<64x512xf32, #tpu.memory_space<vmem>>, vector<8x512xf32>
    %cst_129 = arith.constant dense<0.000000e+00> : vector<8x512xf32>
    %462 = tpu.matmul %459, %251, %cst_129 {dimension_numbers = #tpu.dot_dimension_numbers<[1], [0], [0], [1], [0, 0, 1, 1], [], []>} : vector<8x128xbf16>, vector<128x512xbf16>, vector<8x512xf32> -> vector<8x512xf32>
    %463 = arith.addf %461, %462 : vector<8x512xf32>
    %464 = vector.extract_strided_slice %463 {offsets = [0, 0], sizes = [8, 128], strides = [1, 1]} : vector<8x512xf32> to vector<8x128xf32>
    %465 = arith.negf %464 : vector<8x128xf32>
    %466 = math.exp %465 : vector<8x128xf32>
    %cst_130 = arith.constant 1.000000e+00 : f32
    %467 = vector.broadcast %cst_130 : f32 to vector<8x128xf32>
    %468 = arith.addf %467, %466 : vector<8x128xf32>
    %469 = arith.divf %467, %468 : vector<8x128xf32>
    %470 = vector.extract_strided_slice %463 {offsets = [0, 128], sizes = [8, 128], strides = [1, 1]} : vector<8x512xf32> to vector<8x128xf32>
    %471 = arith.negf %470 : vector<8x128xf32>
    %472 = math.exp %471 : vector<8x128xf32>
    %cst_131 = arith.constant 1.000000e+00 : f32
    %473 = vector.broadcast %cst_131 : f32 to vector<8x128xf32>
    %474 = arith.addf %473, %472 : vector<8x128xf32>
    %475 = arith.divf %473, %474 : vector<8x128xf32>
    %476 = vector.extract_strided_slice %463 {offsets = [0, 256], sizes = [8, 128], strides = [1, 1]} : vector<8x512xf32> to vector<8x128xf32>
    %477 = math.tanh %476 : vector<8x128xf32>
    %478 = vector.extract_strided_slice %463 {offsets = [0, 384], sizes = [8, 128], strides = [1, 1]} : vector<8x512xf32> to vector<8x128xf32>
    %479 = arith.negf %478 : vector<8x128xf32>
    %480 = math.exp %479 : vector<8x128xf32>
    %cst_132 = arith.constant 1.000000e+00 : f32
    %481 = vector.broadcast %cst_132 : f32 to vector<8x128xf32>
    %482 = arith.addf %481, %480 : vector<8x128xf32>
    %483 = arith.divf %481, %482 : vector<8x128xf32>
    %484 = arith.mulf %475, %456 : vector<8x128xf32>
    %485 = arith.mulf %469, %477 : vector<8x128xf32>
    %486 = arith.addf %484, %485 : vector<8x128xf32>
    %487 = math.tanh %486 : vector<8x128xf32>
    %488 = arith.mulf %483, %487 : vector<8x128xf32>
    %489 = arith.truncf %488 : vector<8x128xf32> to vector<8x128xbf16>
    %c56_133 = arith.constant 56 : index
    %c0_134 = arith.constant 0 : index
    %490 = vector.load %arg11[%c56_133, %c0_134] : memref<64x128xbf16, #tpu.memory_space<vmem>>, vector<8x128xbf16>
    tpu.vector_store %arg11[%c56_133, %c0_134], %489 {strides = array<i32>} : memref<64x128xbf16, #tpu.memory_space<vmem>>, vector<8x128xbf16>,
    %c0_135 = arith.constant 0 : index
    %c0_136 = arith.constant 0 : index
    %491 = vector.load %arg11[%c0_135, %c0_136] : memref<64x128xbf16, #tpu.memory_space<vmem>>, vector<64x128xbf16>
    %c1_137 = arith.constant 1 : index
    %c0_138 = arith.constant 0 : index
    %c0_139 = arith.constant 0 : index
    %492 = vector.load %arg2[%c1_137, %c0_138, %c0_139] : memref<3x128x512xbf16, #tpu.memory_space<vmem>>, vector<1x128x512xbf16>
    %493 = vector.shape_cast %492 : vector<1x128x512xbf16> to vector<128x512xbf16>
    %cst_140 = arith.constant dense<0.000000e+00> : vector<64x512xf32>
    %494 = tpu.matmul %491, %493, %cst_140 {dimension_numbers = #tpu.dot_dimension_numbers<[1], [0], [0], [1], [0, 0, 1, 1], [], []>} : vector<64x128xbf16>, vector<128x512xbf16>, vector<64x512xf32> -> vector<64x512xf32>
    %c1_141 = arith.constant 1 : index
    %c0_142 = arith.constant 0 : index
    %c0_143 = arith.constant 0 : index
    %495 = vector.load %arg3[%c1_141, %c0_142, %c0_143] : memref<3x1x512xf32, #tpu.memory_space<vmem>>, vector<1x1x512xf32>
    %496 = vector.shape_cast %495 : vector<1x1x512xf32> to vector<1x512xf32>
    %497 = vector.broadcast %496 : vector<1x512xf32> to vector<64x512xf32>
    %498 = arith.addf %494, %497 : vector<64x512xf32>
    %c0_144 = arith.constant 0 : index
    %c0_145 = arith.constant 0 : index
    %499 = vector.load %arg12[%c0_144, %c0_145] : memref<64x512xf32, #tpu.memory_space<vmem>>, vector<64x512xf32>
    tpu.vector_store %arg12[%c0_144, %c0_145], %498 {strides = array<i32>} : memref<64x512xf32, #tpu.memory_space<vmem>>, vector<64x512xf32>,
    %c2 = arith.constant 2 : index
    %c0_146 = arith.constant 0 : index
    %c0_147 = arith.constant 0 : index
    %500 = vector.load %arg1[%c2, %c0_146, %c0_147] : memref<4x128x512xbf16, #tpu.memory_space<vmem>>, vector<1x128x512xbf16>
    %501 = vector.shape_cast %500 : vector<1x128x512xbf16> to vector<128x512xbf16>
    %cst_148 = arith.constant 0.000000e+00 : f32
    %502 = vector.broadcast %cst_148 : f32 to vector<8x128xf32>
    %c0_149 = arith.constant 0 : index
    %c0_150 = arith.constant 0 : index
    %503 = vector.load %arg12[%c0_149, %c0_150] : memref<64x512xf32, #tpu.memory_space<vmem>>, vector<8x512xf32>
    %504 = vector.extract_strided_slice %503 {offsets = [0, 0], sizes = [8, 128], strides = [1, 1]} : vector<8x512xf32> to vector<8x128xf32>
    %505 = arith.negf %504 : vector<8x128xf32>
    %506 = math.exp %505 : vector<8x128xf32>
    %cst_151 = arith.constant 1.000000e+00 : f32
    %507 = vector.broadcast %cst_151 : f32 to vector<8x128xf32>
    %508 = arith.addf %507, %506 : vector<8x128xf32>
    %509 = arith.divf %507, %508 : vector<8x128xf32>
    %510 = vector.extract_strided_slice %503 {offsets = [0, 128], sizes = [8, 128], strides = [1, 1]} : vector<8x512xf32> to vector<8x128xf32>
    %511 = arith.negf %510 : vector<8x128xf32>
    %512 = math.exp %511 : vector<8x128xf32>
    %cst_152 = arith.constant 1.000000e+00 : f32
    %513 = vector.broadcast %cst_152 : f32 to vector<8x128xf32>
    %514 = arith.addf %513, %512 : vector<8x128xf32>
    %515 = arith.divf %513, %514 : vector<8x128xf32>
    %516 = vector.extract_strided_slice %503 {offsets = [0, 256], sizes = [8, 128], strides = [1, 1]} : vector<8x512xf32> to vector<8x128xf32>
    %517 = math.tanh %516 : vector<8x128xf32>
    %518 = vector.extract_strided_slice %503 {offsets = [0, 384], sizes = [8, 128], strides = [1, 1]} : vector<8x512xf32> to vector<8x128xf32>
    %519 = arith.negf %518 : vector<8x128xf32>
    %520 = math.exp %519 : vector<8x128xf32>
    %cst_153 = arith.constant 1.000000e+00 : f32
    %521 = vector.broadcast %cst_153 : f32 to vector<8x128xf32>
    %522 = arith.addf %521, %520 : vector<8x128xf32>
    %523 = arith.divf %521, %522 : vector<8x128xf32>
    %524 = arith.mulf %515, %502 : vector<8x128xf32>
    %525 = arith.mulf %509, %517 : vector<8x128xf32>
    %526 = arith.addf %524, %525 : vector<8x128xf32>
    %527 = math.tanh %526 : vector<8x128xf32>
    %528 = arith.mulf %523, %527 : vector<8x128xf32>
    %529 = arith.truncf %528 : vector<8x128xf32> to vector<8x128xbf16>
    %c0_154 = arith.constant 0 : index
    %c0_155 = arith.constant 0 : index
    %530 = vector.load %arg11[%c0_154, %c0_155] : memref<64x128xbf16, #tpu.memory_space<vmem>>, vector<8x128xbf16>
    tpu.vector_store %arg11[%c0_154, %c0_155], %529 {strides = array<i32>} : memref<64x128xbf16, #tpu.memory_space<vmem>>, vector<8x128xbf16>,
    %c8_156 = arith.constant 8 : index
    %c0_157 = arith.constant 0 : index
    %531 = vector.load %arg12[%c8_156, %c0_157] : memref<64x512xf32, #tpu.memory_space<vmem>>, vector<8x512xf32>
    %cst_158 = arith.constant dense<0.000000e+00> : vector<8x512xf32>
    %532 = tpu.matmul %529, %501, %cst_158 {dimension_numbers = #tpu.dot_dimension_numbers<[1], [0], [0], [1], [0, 0, 1, 1], [], []>} : vector<8x128xbf16>, vector<128x512xbf16>, vector<8x512xf32> -> vector<8x512xf32>
    %533 = arith.addf %531, %532 : vector<8x512xf32>
    %534 = vector.extract_strided_slice %533 {offsets = [0, 0], sizes = [8, 128], strides = [1, 1]} : vector<8x512xf32> to vector<8x128xf32>
    %535 = arith.negf %534 : vector<8x128xf32>
    %536 = math.exp %535 : vector<8x128xf32>
    %cst_159 = arith.constant 1.000000e+00 : f32
    %537 = vector.broadcast %cst_159 : f32 to vector<8x128xf32>
    %538 = arith.addf %537, %536 : vector<8x128xf32>
    %539 = arith.divf %537, %538 : vector<8x128xf32>
    %540 = vector.extract_strided_slice %533 {offsets = [0, 128], sizes = [8, 128], strides = [1, 1]} : vector<8x512xf32> to vector<8x128xf32>
    %541 = arith.negf %540 : vector<8x128xf32>
    %542 = math.exp %541 : vector<8x128xf32>
    %cst_160 = arith.constant 1.000000e+00 : f32
    %543 = vector.broadcast %cst_160 : f32 to vector<8x128xf32>
    %544 = arith.addf %543, %542 : vector<8x128xf32>
    %545 = arith.divf %543, %544 : vector<8x128xf32>
    %546 = vector.extract_strided_slice %533 {offsets = [0, 256], sizes = [8, 128], strides = [1, 1]} : vector<8x512xf32> to vector<8x128xf32>
    %547 = math.tanh %546 : vector<8x128xf32>
    %548 = vector.extract_strided_slice %533 {offsets = [0, 384], sizes = [8, 128], strides = [1, 1]} : vector<8x512xf32> to vector<8x128xf32>
    %549 = arith.negf %548 : vector<8x128xf32>
    %550 = math.exp %549 : vector<8x128xf32>
    %cst_161 = arith.constant 1.000000e+00 : f32
    %551 = vector.broadcast %cst_161 : f32 to vector<8x128xf32>
    %552 = arith.addf %551, %550 : vector<8x128xf32>
    %553 = arith.divf %551, %552 : vector<8x128xf32>
    %554 = arith.mulf %545, %526 : vector<8x128xf32>
    %555 = arith.mulf %539, %547 : vector<8x128xf32>
    %556 = arith.addf %554, %555 : vector<8x128xf32>
    %557 = math.tanh %556 : vector<8x128xf32>
    %558 = arith.mulf %553, %557 : vector<8x128xf32>
    %559 = arith.truncf %558 : vector<8x128xf32> to vector<8x128xbf16>
    %c8_162 = arith.constant 8 : index
    %c0_163 = arith.constant 0 : index
    %560 = vector.load %arg11[%c8_162, %c0_163] : memref<64x128xbf16, #tpu.memory_space<vmem>>, vector<8x128xbf16>
    tpu.vector_store %arg11[%c8_162, %c0_163], %559 {strides = array<i32>} : memref<64x128xbf16, #tpu.memory_space<vmem>>, vector<8x128xbf16>,
    %c16_164 = arith.constant 16 : index
    %c0_165 = arith.constant 0 : index
    %561 = vector.load %arg12[%c16_164, %c0_165] : memref<64x512xf32, #tpu.memory_space<vmem>>, vector<8x512xf32>
    %cst_166 = arith.constant dense<0.000000e+00> : vector<8x512xf32>
    %562 = tpu.matmul %559, %501, %cst_166 {dimension_numbers = #tpu.dot_dimension_numbers<[1], [0], [0], [1], [0, 0, 1, 1], [], []>} : vector<8x128xbf16>, vector<128x512xbf16>, vector<8x512xf32> -> vector<8x512xf32>
    %563 = arith.addf %561, %562 : vector<8x512xf32>
    %564 = vector.extract_strided_slice %563 {offsets = [0, 0], sizes = [8, 128], strides = [1, 1]} : vector<8x512xf32> to vector<8x128xf32>
    %565 = arith.negf %564 : vector<8x128xf32>
    %566 = math.exp %565 : vector<8x128xf32>
    %cst_167 = arith.constant 1.000000e+00 : f32
    %567 = vector.broadcast %cst_167 : f32 to vector<8x128xf32>
    %568 = arith.addf %567, %566 : vector<8x128xf32>
    %569 = arith.divf %567, %568 : vector<8x128xf32>
    %570 = vector.extract_strided_slice %563 {offsets = [0, 128], sizes = [8, 128], strides = [1, 1]} : vector<8x512xf32> to vector<8x128xf32>
    %571 = arith.negf %570 : vector<8x128xf32>
    %572 = math.exp %571 : vector<8x128xf32>
    %cst_168 = arith.constant 1.000000e+00 : f32
    %573 = vector.broadcast %cst_168 : f32 to vector<8x128xf32>
    %574 = arith.addf %573, %572 : vector<8x128xf32>
    %575 = arith.divf %573, %574 : vector<8x128xf32>
    %576 = vector.extract_strided_slice %563 {offsets = [0, 256], sizes = [8, 128], strides = [1, 1]} : vector<8x512xf32> to vector<8x128xf32>
    %577 = math.tanh %576 : vector<8x128xf32>
    %578 = vector.extract_strided_slice %563 {offsets = [0, 384], sizes = [8, 128], strides = [1, 1]} : vector<8x512xf32> to vector<8x128xf32>
    %579 = arith.negf %578 : vector<8x128xf32>
    %580 = math.exp %579 : vector<8x128xf32>
    %cst_169 = arith.constant 1.000000e+00 : f32
    %581 = vector.broadcast %cst_169 : f32 to vector<8x128xf32>
    %582 = arith.addf %581, %580 : vector<8x128xf32>
    %583 = arith.divf %581, %582 : vector<8x128xf32>
    %584 = arith.mulf %575, %556 : vector<8x128xf32>
    %585 = arith.mulf %569, %577 : vector<8x128xf32>
    %586 = arith.addf %584, %585 : vector<8x128xf32>
    %587 = math.tanh %586 : vector<8x128xf32>
    %588 = arith.mulf %583, %587 : vector<8x128xf32>
    %589 = arith.truncf %588 : vector<8x128xf32> to vector<8x128xbf16>
    %c16_170 = arith.constant 16 : index
    %c0_171 = arith.constant 0 : index
    %590 = vector.load %arg11[%c16_170, %c0_171] : memref<64x128xbf16, #tpu.memory_space<vmem>>, vector<8x128xbf16>
    tpu.vector_store %arg11[%c16_170, %c0_171], %589 {strides = array<i32>} : memref<64x128xbf16, #tpu.memory_space<vmem>>, vector<8x128xbf16>,
    %c24_172 = arith.constant 24 : index
    %c0_173 = arith.constant 0 : index
    %591 = vector.load %arg12[%c24_172, %c0_173] : memref<64x512xf32, #tpu.memory_space<vmem>>, vector<8x512xf32>
    %cst_174 = arith.constant dense<0.000000e+00> : vector<8x512xf32>
    %592 = tpu.matmul %589, %501, %cst_174 {dimension_numbers = #tpu.dot_dimension_numbers<[1], [0], [0], [1], [0, 0, 1, 1], [], []>} : vector<8x128xbf16>, vector<128x512xbf16>, vector<8x512xf32> -> vector<8x512xf32>
    %593 = arith.addf %591, %592 : vector<8x512xf32>
    %594 = vector.extract_strided_slice %593 {offsets = [0, 0], sizes = [8, 128], strides = [1, 1]} : vector<8x512xf32> to vector<8x128xf32>
    %595 = arith.negf %594 : vector<8x128xf32>
    %596 = math.exp %595 : vector<8x128xf32>
    %cst_175 = arith.constant 1.000000e+00 : f32
    %597 = vector.broadcast %cst_175 : f32 to vector<8x128xf32>
    %598 = arith.addf %597, %596 : vector<8x128xf32>
    %599 = arith.divf %597, %598 : vector<8x128xf32>
    %600 = vector.extract_strided_slice %593 {offsets = [0, 128], sizes = [8, 128], strides = [1, 1]} : vector<8x512xf32> to vector<8x128xf32>
    %601 = arith.negf %600 : vector<8x128xf32>
    %602 = math.exp %601 : vector<8x128xf32>
    %cst_176 = arith.constant 1.000000e+00 : f32
    %603 = vector.broadcast %cst_176 : f32 to vector<8x128xf32>
    %604 = arith.addf %603, %602 : vector<8x128xf32>
    %605 = arith.divf %603, %604 : vector<8x128xf32>
    %606 = vector.extract_strided_slice %593 {offsets = [0, 256], sizes = [8, 128], strides = [1, 1]} : vector<8x512xf32> to vector<8x128xf32>
    %607 = math.tanh %606 : vector<8x128xf32>
    %608 = vector.extract_strided_slice %593 {offsets = [0, 384], sizes = [8, 128], strides = [1, 1]} : vector<8x512xf32> to vector<8x128xf32>
    %609 = arith.negf %608 : vector<8x128xf32>
    %610 = math.exp %609 : vector<8x128xf32>
    %cst_177 = arith.constant 1.000000e+00 : f32
    %611 = vector.broadcast %cst_177 : f32 to vector<8x128xf32>
    %612 = arith.addf %611, %610 : vector<8x128xf32>
    %613 = arith.divf %611, %612 : vector<8x128xf32>
    %614 = arith.mulf %605, %586 : vector<8x128xf32>
    %615 = arith.mulf %599, %607 : vector<8x128xf32>
    %616 = arith.addf %614, %615 : vector<8x128xf32>
    %617 = math.tanh %616 : vector<8x128xf32>
    %618 = arith.mulf %613, %617 : vector<8x128xf32>
    %619 = arith.truncf %618 : vector<8x128xf32> to vector<8x128xbf16>
    %c24_178 = arith.constant 24 : index
    %c0_179 = arith.constant 0 : index
    %620 = vector.load %arg11[%c24_178, %c0_179] : memref<64x128xbf16, #tpu.memory_space<vmem>>, vector<8x128xbf16>
    tpu.vector_store %arg11[%c24_178, %c0_179], %619 {strides = array<i32>} : memref<64x128xbf16, #tpu.memory_space<vmem>>, vector<8x128xbf16>,
    %c32_180 = arith.constant 32 : index
    %c0_181 = arith.constant 0 : index
    %621 = vector.load %arg12[%c32_180, %c0_181] : memref<64x512xf32, #tpu.memory_space<vmem>>, vector<8x512xf32>
    %cst_182 = arith.constant dense<0.000000e+00> : vector<8x512xf32>
    %622 = tpu.matmul %619, %501, %cst_182 {dimension_numbers = #tpu.dot_dimension_numbers<[1], [0], [0], [1], [0, 0, 1, 1], [], []>} : vector<8x128xbf16>, vector<128x512xbf16>, vector<8x512xf32> -> vector<8x512xf32>
    %623 = arith.addf %621, %622 : vector<8x512xf32>
    %624 = vector.extract_strided_slice %623 {offsets = [0, 0], sizes = [8, 128], strides = [1, 1]} : vector<8x512xf32> to vector<8x128xf32>
    %625 = arith.negf %624 : vector<8x128xf32>
    %626 = math.exp %625 : vector<8x128xf32>
    %cst_183 = arith.constant 1.000000e+00 : f32
    %627 = vector.broadcast %cst_183 : f32 to vector<8x128xf32>
    %628 = arith.addf %627, %626 : vector<8x128xf32>
    %629 = arith.divf %627, %628 : vector<8x128xf32>
    %630 = vector.extract_strided_slice %623 {offsets = [0, 128], sizes = [8, 128], strides = [1, 1]} : vector<8x512xf32> to vector<8x128xf32>
    %631 = arith.negf %630 : vector<8x128xf32>
    %632 = math.exp %631 : vector<8x128xf32>
    %cst_184 = arith.constant 1.000000e+00 : f32
    %633 = vector.broadcast %cst_184 : f32 to vector<8x128xf32>
    %634 = arith.addf %633, %632 : vector<8x128xf32>
    %635 = arith.divf %633, %634 : vector<8x128xf32>
    %636 = vector.extract_strided_slice %623 {offsets = [0, 256], sizes = [8, 128], strides = [1, 1]} : vector<8x512xf32> to vector<8x128xf32>
    %637 = math.tanh %636 : vector<8x128xf32>
    %638 = vector.extract_strided_slice %623 {offsets = [0, 384], sizes = [8, 128], strides = [1, 1]} : vector<8x512xf32> to vector<8x128xf32>
    %639 = arith.negf %638 : vector<8x128xf32>
    %640 = math.exp %639 : vector<8x128xf32>
    %cst_185 = arith.constant 1.000000e+00 : f32
    %641 = vector.broadcast %cst_185 : f32 to vector<8x128xf32>
    %642 = arith.addf %641, %640 : vector<8x128xf32>
    %643 = arith.divf %641, %642 : vector<8x128xf32>
    %644 = arith.mulf %635, %616 : vector<8x128xf32>
    %645 = arith.mulf %629, %637 : vector<8x128xf32>
    %646 = arith.addf %644, %645 : vector<8x128xf32>
    %647 = math.tanh %646 : vector<8x128xf32>
    %648 = arith.mulf %643, %647 : vector<8x128xf32>
    %649 = arith.truncf %648 : vector<8x128xf32> to vector<8x128xbf16>
    %c32_186 = arith.constant 32 : index
    %c0_187 = arith.constant 0 : index
    %650 = vector.load %arg11[%c32_186, %c0_187] : memref<64x128xbf16, #tpu.memory_space<vmem>>, vector<8x128xbf16>
    tpu.vector_store %arg11[%c32_186, %c0_187], %649 {strides = array<i32>} : memref<64x128xbf16, #tpu.memory_space<vmem>>, vector<8x128xbf16>,
    %c40_188 = arith.constant 40 : index
    %c0_189 = arith.constant 0 : index
    %651 = vector.load %arg12[%c40_188, %c0_189] : memref<64x512xf32, #tpu.memory_space<vmem>>, vector<8x512xf32>
    %cst_190 = arith.constant dense<0.000000e+00> : vector<8x512xf32>
    %652 = tpu.matmul %649, %501, %cst_190 {dimension_numbers = #tpu.dot_dimension_numbers<[1], [0], [0], [1], [0, 0, 1, 1], [], []>} : vector<8x128xbf16>, vector<128x512xbf16>, vector<8x512xf32> -> vector<8x512xf32>
    %653 = arith.addf %651, %652 : vector<8x512xf32>
    %654 = vector.extract_strided_slice %653 {offsets = [0, 0], sizes = [8, 128], strides = [1, 1]} : vector<8x512xf32> to vector<8x128xf32>
    %655 = arith.negf %654 : vector<8x128xf32>
    %656 = math.exp %655 : vector<8x128xf32>
    %cst_191 = arith.constant 1.000000e+00 : f32
    %657 = vector.broadcast %cst_191 : f32 to vector<8x128xf32>
    %658 = arith.addf %657, %656 : vector<8x128xf32>
    %659 = arith.divf %657, %658 : vector<8x128xf32>
    %660 = vector.extract_strided_slice %653 {offsets = [0, 128], sizes = [8, 128], strides = [1, 1]} : vector<8x512xf32> to vector<8x128xf32>
    %661 = arith.negf %660 : vector<8x128xf32>
    %662 = math.exp %661 : vector<8x128xf32>
    %cst_192 = arith.constant 1.000000e+00 : f32
    %663 = vector.broadcast %cst_192 : f32 to vector<8x128xf32>
    %664 = arith.addf %663, %662 : vector<8x128xf32>
    %665 = arith.divf %663, %664 : vector<8x128xf32>
    %666 = vector.extract_strided_slice %653 {offsets = [0, 256], sizes = [8, 128], strides = [1, 1]} : vector<8x512xf32> to vector<8x128xf32>
    %667 = math.tanh %666 : vector<8x128xf32>
    %668 = vector.extract_strided_slice %653 {offsets = [0, 384], sizes = [8, 128], strides = [1, 1]} : vector<8x512xf32> to vector<8x128xf32>
    %669 = arith.negf %668 : vector<8x128xf32>
    %670 = math.exp %669 : vector<8x128xf32>
    %cst_193 = arith.constant 1.000000e+00 : f32
    %671 = vector.broadcast %cst_193 : f32 to vector<8x128xf32>
    %672 = arith.addf %671, %670 : vector<8x128xf32>
    %673 = arith.divf %671, %672 : vector<8x128xf32>
    %674 = arith.mulf %665, %646 : vector<8x128xf32>
    %675 = arith.mulf %659, %667 : vector<8x128xf32>
    %676 = arith.addf %674, %675 : vector<8x128xf32>
    %677 = math.tanh %676 : vector<8x128xf32>
    %678 = arith.mulf %673, %677 : vector<8x128xf32>
    %679 = arith.truncf %678 : vector<8x128xf32> to vector<8x128xbf16>
    %c40_194 = arith.constant 40 : index
    %c0_195 = arith.constant 0 : index
    %680 = vector.load %arg11[%c40_194, %c0_195] : memref<64x128xbf16, #tpu.memory_space<vmem>>, vector<8x128xbf16>
    tpu.vector_store %arg11[%c40_194, %c0_195], %679 {strides = array<i32>} : memref<64x128xbf16, #tpu.memory_space<vmem>>, vector<8x128xbf16>,
    %c48_196 = arith.constant 48 : index
    %c0_197 = arith.constant 0 : index
    %681 = vector.load %arg12[%c48_196, %c0_197] : memref<64x512xf32, #tpu.memory_space<vmem>>, vector<8x512xf32>
    %cst_198 = arith.constant dense<0.000000e+00> : vector<8x512xf32>
    %682 = tpu.matmul %679, %501, %cst_198 {dimension_numbers = #tpu.dot_dimension_numbers<[1], [0], [0], [1], [0, 0, 1, 1], [], []>} : vector<8x128xbf16>, vector<128x512xbf16>, vector<8x512xf32> -> vector<8x512xf32>
    %683 = arith.addf %681, %682 : vector<8x512xf32>
    %684 = vector.extract_strided_slice %683 {offsets = [0, 0], sizes = [8, 128], strides = [1, 1]} : vector<8x512xf32> to vector<8x128xf32>
    %685 = arith.negf %684 : vector<8x128xf32>
    %686 = math.exp %685 : vector<8x128xf32>
    %cst_199 = arith.constant 1.000000e+00 : f32
    %687 = vector.broadcast %cst_199 : f32 to vector<8x128xf32>
    %688 = arith.addf %687, %686 : vector<8x128xf32>
    %689 = arith.divf %687, %688 : vector<8x128xf32>
    %690 = vector.extract_strided_slice %683 {offsets = [0, 128], sizes = [8, 128], strides = [1, 1]} : vector<8x512xf32> to vector<8x128xf32>
    %691 = arith.negf %690 : vector<8x128xf32>
    %692 = math.exp %691 : vector<8x128xf32>
    %cst_200 = arith.constant 1.000000e+00 : f32
    %693 = vector.broadcast %cst_200 : f32 to vector<8x128xf32>
    %694 = arith.addf %693, %692 : vector<8x128xf32>
    %695 = arith.divf %693, %694 : vector<8x128xf32>
    %696 = vector.extract_strided_slice %683 {offsets = [0, 256], sizes = [8, 128], strides = [1, 1]} : vector<8x512xf32> to vector<8x128xf32>
    %697 = math.tanh %696 : vector<8x128xf32>
    %698 = vector.extract_strided_slice %683 {offsets = [0, 384], sizes = [8, 128], strides = [1, 1]} : vector<8x512xf32> to vector<8x128xf32>
    %699 = arith.negf %698 : vector<8x128xf32>
    %700 = math.exp %699 : vector<8x128xf32>
    %cst_201 = arith.constant 1.000000e+00 : f32
    %701 = vector.broadcast %cst_201 : f32 to vector<8x128xf32>
    %702 = arith.addf %701, %700 : vector<8x128xf32>
    %703 = arith.divf %701, %702 : vector<8x128xf32>
    %704 = arith.mulf %695, %676 : vector<8x128xf32>
    %705 = arith.mulf %689, %697 : vector<8x128xf32>
    %706 = arith.addf %704, %705 : vector<8x128xf32>
    %707 = math.tanh %706 : vector<8x128xf32>
    %708 = arith.mulf %703, %707 : vector<8x128xf32>
    %709 = arith.truncf %708 : vector<8x128xf32> to vector<8x128xbf16>
    %c48_202 = arith.constant 48 : index
    %c0_203 = arith.constant 0 : index
    %710 = vector.load %arg11[%c48_202, %c0_203] : memref<64x128xbf16, #tpu.memory_space<vmem>>, vector<8x128xbf16>
    tpu.vector_store %arg11[%c48_202, %c0_203], %709 {strides = array<i32>} : memref<64x128xbf16, #tpu.memory_space<vmem>>, vector<8x128xbf16>,
    %c56_204 = arith.constant 56 : index
    %c0_205 = arith.constant 0 : index
    %711 = vector.load %arg12[%c56_204, %c0_205] : memref<64x512xf32, #tpu.memory_space<vmem>>, vector<8x512xf32>
    %cst_206 = arith.constant dense<0.000000e+00> : vector<8x512xf32>
    %712 = tpu.matmul %709, %501, %cst_206 {dimension_numbers = #tpu.dot_dimension_numbers<[1], [0], [0], [1], [0, 0, 1, 1], [], []>} : vector<8x128xbf16>, vector<128x512xbf16>, vector<8x512xf32> -> vector<8x512xf32>
    %713 = arith.addf %711, %712 : vector<8x512xf32>
    %714 = vector.extract_strided_slice %713 {offsets = [0, 0], sizes = [8, 128], strides = [1, 1]} : vector<8x512xf32> to vector<8x128xf32>
    %715 = arith.negf %714 : vector<8x128xf32>
    %716 = math.exp %715 : vector<8x128xf32>
    %cst_207 = arith.constant 1.000000e+00 : f32
    %717 = vector.broadcast %cst_207 : f32 to vector<8x128xf32>
    %718 = arith.addf %717, %716 : vector<8x128xf32>
    %719 = arith.divf %717, %718 : vector<8x128xf32>
    %720 = vector.extract_strided_slice %713 {offsets = [0, 128], sizes = [8, 128], strides = [1, 1]} : vector<8x512xf32> to vector<8x128xf32>
    %721 = arith.negf %720 : vector<8x128xf32>
    %722 = math.exp %721 : vector<8x128xf32>
    %cst_208 = arith.constant 1.000000e+00 : f32
    %723 = vector.broadcast %cst_208 : f32 to vector<8x128xf32>
    %724 = arith.addf %723, %722 : vector<8x128xf32>
    %725 = arith.divf %723, %724 : vector<8x128xf32>
    %726 = vector.extract_strided_slice %713 {offsets = [0, 256], sizes = [8, 128], strides = [1, 1]} : vector<8x512xf32> to vector<8x128xf32>
    %727 = math.tanh %726 : vector<8x128xf32>
    %728 = vector.extract_strided_slice %713 {offsets = [0, 384], sizes = [8, 128], strides = [1, 1]} : vector<8x512xf32> to vector<8x128xf32>
    %729 = arith.negf %728 : vector<8x128xf32>
    %730 = math.exp %729 : vector<8x128xf32>
    %cst_209 = arith.constant 1.000000e+00 : f32
    %731 = vector.broadcast %cst_209 : f32 to vector<8x128xf32>
    %732 = arith.addf %731, %730 : vector<8x128xf32>
    %733 = arith.divf %731, %732 : vector<8x128xf32>
    %734 = arith.mulf %725, %706 : vector<8x128xf32>
    %735 = arith.mulf %719, %727 : vector<8x128xf32>
    %736 = arith.addf %734, %735 : vector<8x128xf32>
    %737 = math.tanh %736 : vector<8x128xf32>
    %738 = arith.mulf %733, %737 : vector<8x128xf32>
    %739 = arith.truncf %738 : vector<8x128xf32> to vector<8x128xbf16>
    %c56_210 = arith.constant 56 : index
    %c0_211 = arith.constant 0 : index
    %740 = vector.load %arg11[%c56_210, %c0_211] : memref<64x128xbf16, #tpu.memory_space<vmem>>, vector<8x128xbf16>
    tpu.vector_store %arg11[%c56_210, %c0_211], %739 {strides = array<i32>} : memref<64x128xbf16, #tpu.memory_space<vmem>>, vector<8x128xbf16>,
    %c0_212 = arith.constant 0 : index
    %c0_213 = arith.constant 0 : index
    %741 = vector.load %arg11[%c0_212, %c0_213] : memref<64x128xbf16, #tpu.memory_space<vmem>>, vector<64x128xbf16>
    %c2_214 = arith.constant 2 : index
    %c0_215 = arith.constant 0 : index
    %c0_216 = arith.constant 0 : index
    %742 = vector.load %arg2[%c2_214, %c0_215, %c0_216] : memref<3x128x512xbf16, #tpu.memory_space<vmem>>, vector<1x128x512xbf16>
    %743 = vector.shape_cast %742 : vector<1x128x512xbf16> to vector<128x512xbf16>
    %cst_217 = arith.constant dense<0.000000e+00> : vector<64x512xf32>
    %744 = tpu.matmul %741, %743, %cst_217 {dimension_numbers = #tpu.dot_dimension_numbers<[1], [0], [0], [1], [0, 0, 1, 1], [], []>} : vector<64x128xbf16>, vector<128x512xbf16>, vector<64x512xf32> -> vector<64x512xf32>
    %c2_218 = arith.constant 2 : index
    %c0_219 = arith.constant 0 : index
    %c0_220 = arith.constant 0 : index
    %745 = vector.load %arg3[%c2_218, %c0_219, %c0_220] : memref<3x1x512xf32, #tpu.memory_space<vmem>>, vector<1x1x512xf32>
    %746 = vector.shape_cast %745 : vector<1x1x512xf32> to vector<1x512xf32>
    %747 = vector.broadcast %746 : vector<1x512xf32> to vector<64x512xf32>
    %748 = arith.addf %744, %747 : vector<64x512xf32>
    %c0_221 = arith.constant 0 : index
    %c0_222 = arith.constant 0 : index
    %749 = vector.load %arg12[%c0_221, %c0_222] : memref<64x512xf32, #tpu.memory_space<vmem>>, vector<64x512xf32>
    tpu.vector_store %arg12[%c0_221, %c0_222], %748 {strides = array<i32>} : memref<64x512xf32, #tpu.memory_space<vmem>>, vector<64x512xf32>,
    %c3 = arith.constant 3 : index
    %c0_223 = arith.constant 0 : index
    %c0_224 = arith.constant 0 : index
    %750 = vector.load %arg1[%c3, %c0_223, %c0_224] : memref<4x128x512xbf16, #tpu.memory_space<vmem>>, vector<1x128x512xbf16>
    %751 = vector.shape_cast %750 : vector<1x128x512xbf16> to vector<128x512xbf16>
    %cst_225 = arith.constant 0.000000e+00 : f32
    %752 = vector.broadcast %cst_225 : f32 to vector<8x128xf32>
    %c0_226 = arith.constant 0 : index
    %c0_227 = arith.constant 0 : index
    %753 = vector.load %arg12[%c0_226, %c0_227] : memref<64x512xf32, #tpu.memory_space<vmem>>, vector<8x512xf32>
    %754 = vector.extract_strided_slice %753 {offsets = [0, 0], sizes = [8, 128], strides = [1, 1]} : vector<8x512xf32> to vector<8x128xf32>
    %755 = arith.negf %754 : vector<8x128xf32>
    %756 = math.exp %755 : vector<8x128xf32>
    %cst_228 = arith.constant 1.000000e+00 : f32
    %757 = vector.broadcast %cst_228 : f32 to vector<8x128xf32>
    %758 = arith.addf %757, %756 : vector<8x128xf32>
    %759 = arith.divf %757, %758 : vector<8x128xf32>
    %760 = vector.extract_strided_slice %753 {offsets = [0, 128], sizes = [8, 128], strides = [1, 1]} : vector<8x512xf32> to vector<8x128xf32>
    %761 = arith.negf %760 : vector<8x128xf32>
    %762 = math.exp %761 : vector<8x128xf32>
    %cst_229 = arith.constant 1.000000e+00 : f32
    %763 = vector.broadcast %cst_229 : f32 to vector<8x128xf32>
    %764 = arith.addf %763, %762 : vector<8x128xf32>
    %765 = arith.divf %763, %764 : vector<8x128xf32>
    %766 = vector.extract_strided_slice %753 {offsets = [0, 256], sizes = [8, 128], strides = [1, 1]} : vector<8x512xf32> to vector<8x128xf32>
    %767 = math.tanh %766 : vector<8x128xf32>
    %768 = vector.extract_strided_slice %753 {offsets = [0, 384], sizes = [8, 128], strides = [1, 1]} : vector<8x512xf32> to vector<8x128xf32>
    %769 = arith.negf %768 : vector<8x128xf32>
    %770 = math.exp %769 : vector<8x128xf32>
    %cst_230 = arith.constant 1.000000e+00 : f32
    %771 = vector.broadcast %cst_230 : f32 to vector<8x128xf32>
    %772 = arith.addf %771, %770 : vector<8x128xf32>
    %773 = arith.divf %771, %772 : vector<8x128xf32>
    %774 = arith.mulf %765, %752 : vector<8x128xf32>
    %775 = arith.mulf %759, %767 : vector<8x128xf32>
    %776 = arith.addf %774, %775 : vector<8x128xf32>
    %777 = math.tanh %776 : vector<8x128xf32>
    %778 = arith.mulf %773, %777 : vector<8x128xf32>
    %779 = arith.truncf %778 : vector<8x128xf32> to vector<8x128xbf16>
    %c8_231 = arith.constant 8 : index
    %c0_232 = arith.constant 0 : index
    %780 = vector.load %arg12[%c8_231, %c0_232] : memref<64x512xf32, #tpu.memory_space<vmem>>, vector<8x512xf32>
    %cst_233 = arith.constant dense<0.000000e+00> : vector<8x512xf32>
    %781 = tpu.matmul %779, %751, %cst_233 {dimension_numbers = #tpu.dot_dimension_numbers<[1], [0], [0], [1], [0, 0, 1, 1], [], []>} : vector<8x128xbf16>, vector<128x512xbf16>, vector<8x512xf32> -> vector<8x512xf32>
    %782 = arith.addf %780, %781 : vector<8x512xf32>
    %783 = vector.extract_strided_slice %782 {offsets = [0, 0], sizes = [8, 128], strides = [1, 1]} : vector<8x512xf32> to vector<8x128xf32>
    %784 = arith.negf %783 : vector<8x128xf32>
    %785 = math.exp %784 : vector<8x128xf32>
    %cst_234 = arith.constant 1.000000e+00 : f32
    %786 = vector.broadcast %cst_234 : f32 to vector<8x128xf32>
    %787 = arith.addf %786, %785 : vector<8x128xf32>
    %788 = arith.divf %786, %787 : vector<8x128xf32>
    %789 = vector.extract_strided_slice %782 {offsets = [0, 128], sizes = [8, 128], strides = [1, 1]} : vector<8x512xf32> to vector<8x128xf32>
    %790 = arith.negf %789 : vector<8x128xf32>
    %791 = math.exp %790 : vector<8x128xf32>
    %cst_235 = arith.constant 1.000000e+00 : f32
    %792 = vector.broadcast %cst_235 : f32 to vector<8x128xf32>
    %793 = arith.addf %792, %791 : vector<8x128xf32>
    %794 = arith.divf %792, %793 : vector<8x128xf32>
    %795 = vector.extract_strided_slice %782 {offsets = [0, 256], sizes = [8, 128], strides = [1, 1]} : vector<8x512xf32> to vector<8x128xf32>
    %796 = math.tanh %795 : vector<8x128xf32>
    %797 = vector.extract_strided_slice %782 {offsets = [0, 384], sizes = [8, 128], strides = [1, 1]} : vector<8x512xf32> to vector<8x128xf32>
    %798 = arith.negf %797 : vector<8x128xf32>
    %799 = math.exp %798 : vector<8x128xf32>
    %cst_236 = arith.constant 1.000000e+00 : f32
    %800 = vector.broadcast %cst_236 : f32 to vector<8x128xf32>
    %801 = arith.addf %800, %799 : vector<8x128xf32>
    %802 = arith.divf %800, %801 : vector<8x128xf32>
    %803 = arith.mulf %794, %776 : vector<8x128xf32>
    %804 = arith.mulf %788, %796 : vector<8x128xf32>
    %805 = arith.addf %803, %804 : vector<8x128xf32>
    %806 = math.tanh %805 : vector<8x128xf32>
    %807 = arith.mulf %802, %806 : vector<8x128xf32>
    %808 = arith.truncf %807 : vector<8x128xf32> to vector<8x128xbf16>
    %c16_237 = arith.constant 16 : index
    %c0_238 = arith.constant 0 : index
    %809 = vector.load %arg12[%c16_237, %c0_238] : memref<64x512xf32, #tpu.memory_space<vmem>>, vector<8x512xf32>
    %cst_239 = arith.constant dense<0.000000e+00> : vector<8x512xf32>
    %810 = tpu.matmul %808, %751, %cst_239 {dimension_numbers = #tpu.dot_dimension_numbers<[1], [0], [0], [1], [0, 0, 1, 1], [], []>} : vector<8x128xbf16>, vector<128x512xbf16>, vector<8x512xf32> -> vector<8x512xf32>
    %811 = arith.addf %809, %810 : vector<8x512xf32>
    %812 = vector.extract_strided_slice %811 {offsets = [0, 0], sizes = [8, 128], strides = [1, 1]} : vector<8x512xf32> to vector<8x128xf32>
    %813 = arith.negf %812 : vector<8x128xf32>
    %814 = math.exp %813 : vector<8x128xf32>
    %cst_240 = arith.constant 1.000000e+00 : f32
    %815 = vector.broadcast %cst_240 : f32 to vector<8x128xf32>
    %816 = arith.addf %815, %814 : vector<8x128xf32>
    %817 = arith.divf %815, %816 : vector<8x128xf32>
    %818 = vector.extract_strided_slice %811 {offsets = [0, 128], sizes = [8, 128], strides = [1, 1]} : vector<8x512xf32> to vector<8x128xf32>
    %819 = arith.negf %818 : vector<8x128xf32>
    %820 = math.exp %819 : vector<8x128xf32>
    %cst_241 = arith.constant 1.000000e+00 : f32
    %821 = vector.broadcast %cst_241 : f32 to vector<8x128xf32>
    %822 = arith.addf %821, %820 : vector<8x128xf32>
    %823 = arith.divf %821, %822 : vector<8x128xf32>
    %824 = vector.extract_strided_slice %811 {offsets = [0, 256], sizes = [8, 128], strides = [1, 1]} : vector<8x512xf32> to vector<8x128xf32>
    %825 = math.tanh %824 : vector<8x128xf32>
    %826 = vector.extract_strided_slice %811 {offsets = [0, 384], sizes = [8, 128], strides = [1, 1]} : vector<8x512xf32> to vector<8x128xf32>
    %827 = arith.negf %826 : vector<8x128xf32>
    %828 = math.exp %827 : vector<8x128xf32>
    %cst_242 = arith.constant 1.000000e+00 : f32
    %829 = vector.broadcast %cst_242 : f32 to vector<8x128xf32>
    %830 = arith.addf %829, %828 : vector<8x128xf32>
    %831 = arith.divf %829, %830 : vector<8x128xf32>
    %832 = arith.mulf %823, %805 : vector<8x128xf32>
    %833 = arith.mulf %817, %825 : vector<8x128xf32>
    %834 = arith.addf %832, %833 : vector<8x128xf32>
    %835 = math.tanh %834 : vector<8x128xf32>
    %836 = arith.mulf %831, %835 : vector<8x128xf32>
    %837 = arith.truncf %836 : vector<8x128xf32> to vector<8x128xbf16>
    %c24_243 = arith.constant 24 : index
    %c0_244 = arith.constant 0 : index
    %838 = vector.load %arg12[%c24_243, %c0_244] : memref<64x512xf32, #tpu.memory_space<vmem>>, vector<8x512xf32>
    %cst_245 = arith.constant dense<0.000000e+00> : vector<8x512xf32>
    %839 = tpu.matmul %837, %751, %cst_245 {dimension_numbers = #tpu.dot_dimension_numbers<[1], [0], [0], [1], [0, 0, 1, 1], [], []>} : vector<8x128xbf16>, vector<128x512xbf16>, vector<8x512xf32> -> vector<8x512xf32>
    %840 = arith.addf %838, %839 : vector<8x512xf32>
    %841 = vector.extract_strided_slice %840 {offsets = [0, 0], sizes = [8, 128], strides = [1, 1]} : vector<8x512xf32> to vector<8x128xf32>
    %842 = arith.negf %841 : vector<8x128xf32>
    %843 = math.exp %842 : vector<8x128xf32>
    %cst_246 = arith.constant 1.000000e+00 : f32
    %844 = vector.broadcast %cst_246 : f32 to vector<8x128xf32>
    %845 = arith.addf %844, %843 : vector<8x128xf32>
    %846 = arith.divf %844, %845 : vector<8x128xf32>
    %847 = vector.extract_strided_slice %840 {offsets = [0, 128], sizes = [8, 128], strides = [1, 1]} : vector<8x512xf32> to vector<8x128xf32>
    %848 = arith.negf %847 : vector<8x128xf32>
    %849 = math.exp %848 : vector<8x128xf32>
    %cst_247 = arith.constant 1.000000e+00 : f32
    %850 = vector.broadcast %cst_247 : f32 to vector<8x128xf32>
    %851 = arith.addf %850, %849 : vector<8x128xf32>
    %852 = arith.divf %850, %851 : vector<8x128xf32>
    %853 = vector.extract_strided_slice %840 {offsets = [0, 256], sizes = [8, 128], strides = [1, 1]} : vector<8x512xf32> to vector<8x128xf32>
    %854 = math.tanh %853 : vector<8x128xf32>
    %855 = vector.extract_strided_slice %840 {offsets = [0, 384], sizes = [8, 128], strides = [1, 1]} : vector<8x512xf32> to vector<8x128xf32>
    %856 = arith.negf %855 : vector<8x128xf32>
    %857 = math.exp %856 : vector<8x128xf32>
    %cst_248 = arith.constant 1.000000e+00 : f32
    %858 = vector.broadcast %cst_248 : f32 to vector<8x128xf32>
    %859 = arith.addf %858, %857 : vector<8x128xf32>
    %860 = arith.divf %858, %859 : vector<8x128xf32>
    %861 = arith.mulf %852, %834 : vector<8x128xf32>
    %862 = arith.mulf %846, %854 : vector<8x128xf32>
    %863 = arith.addf %861, %862 : vector<8x128xf32>
    %864 = math.tanh %863 : vector<8x128xf32>
    %865 = arith.mulf %860, %864 : vector<8x128xf32>
    %866 = arith.truncf %865 : vector<8x128xf32> to vector<8x128xbf16>
    %c32_249 = arith.constant 32 : index
    %c0_250 = arith.constant 0 : index
    %867 = vector.load %arg12[%c32_249, %c0_250] : memref<64x512xf32, #tpu.memory_space<vmem>>, vector<8x512xf32>
    %cst_251 = arith.constant dense<0.000000e+00> : vector<8x512xf32>
    %868 = tpu.matmul %866, %751, %cst_251 {dimension_numbers = #tpu.dot_dimension_numbers<[1], [0], [0], [1], [0, 0, 1, 1], [], []>} : vector<8x128xbf16>, vector<128x512xbf16>, vector<8x512xf32> -> vector<8x512xf32>
    %869 = arith.addf %867, %868 : vector<8x512xf32>
    %870 = vector.extract_strided_slice %869 {offsets = [0, 0], sizes = [8, 128], strides = [1, 1]} : vector<8x512xf32> to vector<8x128xf32>
    %871 = arith.negf %870 : vector<8x128xf32>
    %872 = math.exp %871 : vector<8x128xf32>
    %cst_252 = arith.constant 1.000000e+00 : f32
    %873 = vector.broadcast %cst_252 : f32 to vector<8x128xf32>
    %874 = arith.addf %873, %872 : vector<8x128xf32>
    %875 = arith.divf %873, %874 : vector<8x128xf32>
    %876 = vector.extract_strided_slice %869 {offsets = [0, 128], sizes = [8, 128], strides = [1, 1]} : vector<8x512xf32> to vector<8x128xf32>
    %877 = arith.negf %876 : vector<8x128xf32>
    %878 = math.exp %877 : vector<8x128xf32>
    %cst_253 = arith.constant 1.000000e+00 : f32
    %879 = vector.broadcast %cst_253 : f32 to vector<8x128xf32>
    %880 = arith.addf %879, %878 : vector<8x128xf32>
    %881 = arith.divf %879, %880 : vector<8x128xf32>
    %882 = vector.extract_strided_slice %869 {offsets = [0, 256], sizes = [8, 128], strides = [1, 1]} : vector<8x512xf32> to vector<8x128xf32>
    %883 = math.tanh %882 : vector<8x128xf32>
    %884 = vector.extract_strided_slice %869 {offsets = [0, 384], sizes = [8, 128], strides = [1, 1]} : vector<8x512xf32> to vector<8x128xf32>
    %885 = arith.negf %884 : vector<8x128xf32>
    %886 = math.exp %885 : vector<8x128xf32>
    %cst_254 = arith.constant 1.000000e+00 : f32
    %887 = vector.broadcast %cst_254 : f32 to vector<8x128xf32>
    %888 = arith.addf %887, %886 : vector<8x128xf32>
    %889 = arith.divf %887, %888 : vector<8x128xf32>
    %890 = arith.mulf %881, %863 : vector<8x128xf32>
    %891 = arith.mulf %875, %883 : vector<8x128xf32>
    %892 = arith.addf %890, %891 : vector<8x128xf32>
    %893 = math.tanh %892 : vector<8x128xf32>
    %894 = arith.mulf %889, %893 : vector<8x128xf32>
    %895 = arith.truncf %894 : vector<8x128xf32> to vector<8x128xbf16>
    %c40_255 = arith.constant 40 : index
    %c0_256 = arith.constant 0 : index
    %896 = vector.load %arg12[%c40_255, %c0_256] : memref<64x512xf32, #tpu.memory_space<vmem>>, vector<8x512xf32>
    %cst_257 = arith.constant dense<0.000000e+00> : vector<8x512xf32>
    %897 = tpu.matmul %895, %751, %cst_257 {dimension_numbers = #tpu.dot_dimension_numbers<[1], [0], [0], [1], [0, 0, 1, 1], [], []>} : vector<8x128xbf16>, vector<128x512xbf16>, vector<8x512xf32> -> vector<8x512xf32>
    %898 = arith.addf %896, %897 : vector<8x512xf32>
    %899 = vector.extract_strided_slice %898 {offsets = [0, 0], sizes = [8, 128], strides = [1, 1]} : vector<8x512xf32> to vector<8x128xf32>
    %900 = arith.negf %899 : vector<8x128xf32>
    %901 = math.exp %900 : vector<8x128xf32>
    %cst_258 = arith.constant 1.000000e+00 : f32
    %902 = vector.broadcast %cst_258 : f32 to vector<8x128xf32>
    %903 = arith.addf %902, %901 : vector<8x128xf32>
    %904 = arith.divf %902, %903 : vector<8x128xf32>
    %905 = vector.extract_strided_slice %898 {offsets = [0, 128], sizes = [8, 128], strides = [1, 1]} : vector<8x512xf32> to vector<8x128xf32>
    %906 = arith.negf %905 : vector<8x128xf32>
    %907 = math.exp %906 : vector<8x128xf32>
    %cst_259 = arith.constant 1.000000e+00 : f32
    %908 = vector.broadcast %cst_259 : f32 to vector<8x128xf32>
    %909 = arith.addf %908, %907 : vector<8x128xf32>
    %910 = arith.divf %908, %909 : vector<8x128xf32>
    %911 = vector.extract_strided_slice %898 {offsets = [0, 256], sizes = [8, 128], strides = [1, 1]} : vector<8x512xf32> to vector<8x128xf32>
    %912 = math.tanh %911 : vector<8x128xf32>
    %913 = vector.extract_strided_slice %898 {offsets = [0, 384], sizes = [8, 128], strides = [1, 1]} : vector<8x512xf32> to vector<8x128xf32>
    %914 = arith.negf %913 : vector<8x128xf32>
    %915 = math.exp %914 : vector<8x128xf32>
    %cst_260 = arith.constant 1.000000e+00 : f32
    %916 = vector.broadcast %cst_260 : f32 to vector<8x128xf32>
    %917 = arith.addf %916, %915 : vector<8x128xf32>
    %918 = arith.divf %916, %917 : vector<8x128xf32>
    %919 = arith.mulf %910, %892 : vector<8x128xf32>
    %920 = arith.mulf %904, %912 : vector<8x128xf32>
    %921 = arith.addf %919, %920 : vector<8x128xf32>
    %922 = math.tanh %921 : vector<8x128xf32>
    %923 = arith.mulf %918, %922 : vector<8x128xf32>
    %924 = arith.truncf %923 : vector<8x128xf32> to vector<8x128xbf16>
    %c48_261 = arith.constant 48 : index
    %c0_262 = arith.constant 0 : index
    %925 = vector.load %arg12[%c48_261, %c0_262] : memref<64x512xf32, #tpu.memory_space<vmem>>, vector<8x512xf32>
    %cst_263 = arith.constant dense<0.000000e+00> : vector<8x512xf32>
    %926 = tpu.matmul %924, %751, %cst_263 {dimension_numbers = #tpu.dot_dimension_numbers<[1], [0], [0], [1], [0, 0, 1, 1], [], []>} : vector<8x128xbf16>, vector<128x512xbf16>, vector<8x512xf32> -> vector<8x512xf32>
    %927 = arith.addf %925, %926 : vector<8x512xf32>
    %928 = vector.extract_strided_slice %927 {offsets = [0, 0], sizes = [8, 128], strides = [1, 1]} : vector<8x512xf32> to vector<8x128xf32>
    %929 = arith.negf %928 : vector<8x128xf32>
    %930 = math.exp %929 : vector<8x128xf32>
    %cst_264 = arith.constant 1.000000e+00 : f32
    %931 = vector.broadcast %cst_264 : f32 to vector<8x128xf32>
    %932 = arith.addf %931, %930 : vector<8x128xf32>
    %933 = arith.divf %931, %932 : vector<8x128xf32>
    %934 = vector.extract_strided_slice %927 {offsets = [0, 128], sizes = [8, 128], strides = [1, 1]} : vector<8x512xf32> to vector<8x128xf32>
    %935 = arith.negf %934 : vector<8x128xf32>
    %936 = math.exp %935 : vector<8x128xf32>
    %cst_265 = arith.constant 1.000000e+00 : f32
    %937 = vector.broadcast %cst_265 : f32 to vector<8x128xf32>
    %938 = arith.addf %937, %936 : vector<8x128xf32>
    %939 = arith.divf %937, %938 : vector<8x128xf32>
    %940 = vector.extract_strided_slice %927 {offsets = [0, 256], sizes = [8, 128], strides = [1, 1]} : vector<8x512xf32> to vector<8x128xf32>
    %941 = math.tanh %940 : vector<8x128xf32>
    %942 = vector.extract_strided_slice %927 {offsets = [0, 384], sizes = [8, 128], strides = [1, 1]} : vector<8x512xf32> to vector<8x128xf32>
    %943 = arith.negf %942 : vector<8x128xf32>
    %944 = math.exp %943 : vector<8x128xf32>
    %cst_266 = arith.constant 1.000000e+00 : f32
    %945 = vector.broadcast %cst_266 : f32 to vector<8x128xf32>
    %946 = arith.addf %945, %944 : vector<8x128xf32>
    %947 = arith.divf %945, %946 : vector<8x128xf32>
    %948 = arith.mulf %939, %921 : vector<8x128xf32>
    %949 = arith.mulf %933, %941 : vector<8x128xf32>
    %950 = arith.addf %948, %949 : vector<8x128xf32>
    %951 = math.tanh %950 : vector<8x128xf32>
    %952 = arith.mulf %947, %951 : vector<8x128xf32>
    %953 = arith.truncf %952 : vector<8x128xf32> to vector<8x128xbf16>
    %c56_267 = arith.constant 56 : index
    %c0_268 = arith.constant 0 : index
    %954 = vector.load %arg12[%c56_267, %c0_268] : memref<64x512xf32, #tpu.memory_space<vmem>>, vector<8x512xf32>
    %cst_269 = arith.constant dense<0.000000e+00> : vector<8x512xf32>
    %955 = tpu.matmul %953, %751, %cst_269 {dimension_numbers = #tpu.dot_dimension_numbers<[1], [0], [0], [1], [0, 0, 1, 1], [], []>} : vector<8x128xbf16>, vector<128x512xbf16>, vector<8x512xf32> -> vector<8x512xf32>
    %956 = arith.addf %954, %955 : vector<8x512xf32>
    %957 = vector.extract_strided_slice %956 {offsets = [0, 0], sizes = [8, 128], strides = [1, 1]} : vector<8x512xf32> to vector<8x128xf32>
    %958 = arith.negf %957 : vector<8x128xf32>
    %959 = math.exp %958 : vector<8x128xf32>
    %cst_270 = arith.constant 1.000000e+00 : f32
    %960 = vector.broadcast %cst_270 : f32 to vector<8x128xf32>
    %961 = arith.addf %960, %959 : vector<8x128xf32>
    %962 = arith.divf %960, %961 : vector<8x128xf32>
    %963 = vector.extract_strided_slice %956 {offsets = [0, 128], sizes = [8, 128], strides = [1, 1]} : vector<8x512xf32> to vector<8x128xf32>
    %964 = arith.negf %963 : vector<8x128xf32>
    %965 = math.exp %964 : vector<8x128xf32>
    %cst_271 = arith.constant 1.000000e+00 : f32
    %966 = vector.broadcast %cst_271 : f32 to vector<8x128xf32>
    %967 = arith.addf %966, %965 : vector<8x128xf32>
    %968 = arith.divf %966, %967 : vector<8x128xf32>
    %969 = vector.extract_strided_slice %956 {offsets = [0, 256], sizes = [8, 128], strides = [1, 1]} : vector<8x512xf32> to vector<8x128xf32>
    %970 = math.tanh %969 : vector<8x128xf32>
    %971 = vector.extract_strided_slice %956 {offsets = [0, 384], sizes = [8, 128], strides = [1, 1]} : vector<8x512xf32> to vector<8x128xf32>
    %972 = arith.negf %971 : vector<8x128xf32>
    %973 = math.exp %972 : vector<8x128xf32>
    %cst_272 = arith.constant 1.000000e+00 : f32
    %974 = vector.broadcast %cst_272 : f32 to vector<8x128xf32>
    %975 = arith.addf %974, %973 : vector<8x128xf32>
    %976 = arith.divf %974, %975 : vector<8x128xf32>
    %977 = arith.mulf %968, %950 : vector<8x128xf32>
    %978 = arith.mulf %962, %970 : vector<8x128xf32>
    %979 = arith.addf %977, %978 : vector<8x128xf32>
    %980 = math.tanh %979 : vector<8x128xf32>
    %981 = arith.mulf %976, %980 : vector<8x128xf32>
    %c0_273 = arith.constant 0 : index
    %c0_274 = arith.constant 0 : index
    %982 = vector.load %arg4[%c0_273, %c0_274] : memref<1x128xf32, #tpu.memory_space<vmem>>, vector<1x128xf32>
    %c0_275 = arith.constant 0 : index
    %c0_276 = arith.constant 0 : index
    %983 = vector.load %arg7[%c0_275, %c0_276] : memref<1x128xf32, #tpu.memory_space<vmem>>, vector<1x128xf32>
    %cst_277 = arith.constant 9.99999974E-6 : f32
    %984 = vector.broadcast %cst_277 : f32 to vector<1x128xf32>
    %985 = arith.addf %983, %984 : vector<1x128xf32>
    %986 = math.rsqrt %985 : vector<1x128xf32>
    %987 = arith.mulf %982, %986 : vector<1x128xf32>
    %c0_278 = arith.constant 0 : index
    %c0_279 = arith.constant 0 : index
    %988 = vector.load %arg5[%c0_278, %c0_279] : memref<1x128xf32, #tpu.memory_space<vmem>>, vector<1x128xf32>
    %c0_280 = arith.constant 0 : index
    %c0_281 = arith.constant 0 : index
    %989 = vector.load %arg6[%c0_280, %c0_281] : memref<1x128xf32, #tpu.memory_space<vmem>>, vector<1x128xf32>
    %990 = arith.mulf %989, %987 : vector<1x128xf32>
    %991 = arith.subf %988, %990 : vector<1x128xf32>
    %992 = vector.broadcast %987 : vector<1x128xf32> to vector<8x128xf32>
    %993 = arith.mulf %981, %992 : vector<8x128xf32>
    %994 = vector.broadcast %991 : vector<1x128xf32> to vector<8x128xf32>
    %995 = arith.addf %993, %994 : vector<8x128xf32>
    %c0_282 = arith.constant 0 : index
    %c0_283 = arith.constant 0 : index
    %996 = vector.load %arg8[%c0_282, %c0_283] : memref<128x3xf32, #tpu.memory_space<vmem>>, vector<128x3xf32>
    %cst_284 = arith.constant dense<0.000000e+00> : vector<8x3xf32>
    %997 = tpu.matmul %995, %996, %cst_284 {dimension_numbers = #tpu.dot_dimension_numbers<[1], [0], [0], [1], [0, 0, 1, 1], [], []>} : vector<8x128xf32>, vector<128x3xf32>, vector<8x3xf32> -> vector<8x3xf32>
    %c0_285 = arith.constant 0 : index
    %c0_286 = arith.constant 0 : index
    %998 = vector.load %arg9[%c0_285, %c0_286] : memref<1x3xf32, #tpu.memory_space<vmem>>, vector<1x3xf32>
    %999 = vector.broadcast %998 : vector<1x3xf32> to vector<8x3xf32>
    %1000 = arith.addf %997, %999 : vector<8x3xf32>
    %c0_287 = arith.constant 0 : index
    %c0_288 = arith.constant 0 : index
    %1001 = vector.load %arg10[%c0_287, %c0_288] : memref<8x3xf32, #tpu.memory_space<vmem>>, vector<8x3xf32>
    tpu.vector_store %arg10[%c0_287, %c0_288], %1000 {strides = array<i32>} : memref<8x3xf32, #tpu.memory_space<vmem>>, vector<8x3xf32>,
    return
  }
}

</mosaic_0001>

<bundles_post_ra>
// kernel: stock_lstm_forward.1
= control target key start
LH: loop header
LB: loop body
LE: loop exit
PB: predicated region body
PF: predicated region fallthrough
CT: control target
= control target key end

     0   :  { %15 = vsyncpa [#allocation5], 0  ;;  %s7003_s13 = smov [#allocation4]   ;;  %s9248_s0 = inlined_call_operand.vmem [shape: f32[64,512], index: 0, kind: input, shape index: {}]   ;;  %s9249_s1 = inlined_call_operand.hbm [shape: bf16[4,128,512], index: 1, kind: input, shape index: {}]   ;;  %s9250_s2 = inlined_call_operand.vmem [shape: bf16[3,128,512], index: 2, kind: input, shape index: {}]   ;;  %s9251_s3 = inlined_call_operand.vmem [shape: f32[3,1,512], index: 3, kind: input, shape index: {}]   ;;  %s9252_s4 = inlined_call_operand.vmem [shape: f32[1,128], index: 4, kind: input, shape index: {}]   ;;  %s9253_s5 = inlined_call_operand.vmem [shape: f32[1,128], index: 5, kind: input, shape index: {}]   ;;  %s9254_s6 = inlined_call_operand.vmem [shape: f32[1,128], index: 6, kind: input, shape index: {}]   ;;  %s9255_s7 = inlined_call_operand.vmem [shape: f32[1,128], index: 7, kind: input, shape index: {}]   ;;  %s9256_s8 = inlined_call_operand.vmem [shape: f32[128,3], index: 8, kind: input, shape index: {}]   ;;  %s9257_s9 = inlined_call_operand.vmem [shape: f32[1,3], index: 9, kind: input, shape index: {}]   ;;  %s9258_s10 = inlined_call_operand.vmem [shape: f32[8,3], index: 10, kind: output, shape index: {}]  }
   0x1   :  { %s23_s14 = sshll.u32 %s7003_s13, 4  ;;  %s6979_s17 = scalar_lea.hbm %s9249_s1, 16384  ;;  %s24_s14 = int_to_ptr.vmem [resolvable:$true] %s23_s14 }
   0x2   :  { %p6980_p0 = scmp.ne.s32.totalorder %s9249_s1, %s6979_s17  ;;  %p6983_p1 = scmp.lt.u32.totalorder %s6979_s17, %s9249_s1 }
   0x4   :  { %p6985_p2 = pnand %p6983_p1, %p6980_p0 }
   0x6   :  { %6988 = shalt.err (!%p6985_p2)
}
   0x7   :  { %s6989_s22 = scalar_lea.vmem %s24_s14, 16384  ;;  %p6994_p4 = scmp.lt.s32.totalorder %s24_s14, %s24_s14 }
   0x8   :  { %p6990_p3 = scmp.ne.s32.totalorder %s24_s14, %s6989_s22  ;;  %p6995_p5 = scmp.lt.s32.totalorder %s6989_s22, %s6989_s22 }
   0xa   :  { %p6996_p6 = por %p6995_p5, %p6994_p4 }
   0xc   :  { %p6997_p7 = pnand %p6996_p6, %p6990_p3 }
   0xe   :  { %7000 = shalt.err (!%p6997_p7)
}
   0xf   :  { %s7004_s23 = smov 256   ;;  %s7005_s24 = smov 16  }
  0x10   :  { %29 = dma.hbm_to_vmem [thread:$0]  %s9249_s1, 16384, %s24_s14, [#allocation5], %s7004_s23, %s7004_s23, %s7005_s24  }
  0x11   :  { %7001 = dma.done.wait [#allocation5], 16384  }
  0x12   :  { %7002 = vsyncadd [#allocation5], 4294950912  ;;  %v9259_v0 = vmov 0   ;;  %v7079_v1 = vld [vmem:[#allocation4 + $0x4] ss:$16 sps:$4 sm:$0xff]   ;;  %v83_v22 = vld [vmem:[%s9248_s0 + $0x8] sm:$0xff] }
  0x13   :  { %308 = vmatprep.mubr.bf16.mxu0 %v9259_v0  ;;  %349 = vmatprep.mubr.bf16.mxu1 %v9259_v0  ;;  %v7081_v2 = vld [vmem:[#allocation4] ss:$16 sps:$4 sm:$0xff]   ;;  %v7084_v3 = vld [vmem:[#allocation4 + $0x24] ss:$16 sps:$4 sm:$0xff]   ;;  %v7092_v6 = vld [vmem:[#allocation4 + $0xc] ss:$16 sps:$4 sm:$0xff]  }
  0x14   :  { %276 = vmatprep.subr.bf16.mxu0 %v7079_v1  ;;  %v7087_v4 = vld [vmem:[#allocation4 + $0x20] ss:$16 sps:$4 sm:$0xff]   ;;  %v7090_v5 = vld [vmem:[#allocation4 + $0x44] ss:$16 sps:$4 sm:$0xff]   ;;  %v7094_v7 = vld [vmem:[#allocation4 + $0x8] ss:$16 sps:$4 sm:$0xff]   ;;  %317 = vmatprep.subr.bf16.mxu1 %v7092_v6 }
  0x15   :  { %277 = vmatpush1.bf16.msra.mxu0 %v7081_v2  ;;  %v7097_v8 = vld [vmem:[#allocation4 + $0x40] ss:$16 sps:$4 sm:$0xff]   ;;  %v7101_v9 = vld [vmem:[#allocation4 + $0x64] ss:$16 sps:$4 sm:$0xff]   ;;  %318 = vmatpush1.bf16.msra.mxu1 %v7094_v7  ;;  %v7104_v10 = vld [vmem:[#allocation4 + $0x2c] ss:$16 sps:$4 sm:$0xff]  }
  0x16   :  { %278 = vmatprep.subr.bf16.mxu0 %v7084_v3  ;;  %v7106_v11 = vld [vmem:[#allocation4 + $0x28] ss:$16 sps:$4 sm:$0xff]   ;;  %319 = vmatprep.subr.bf16.mxu1 %v7104_v10  ;;  %v7110_v12 = vld [vmem:[#allocation4 + $0x60] ss:$16 sps:$4 sm:$0xff]   ;;  %v7112_v13 = vld [vmem:[#allocation4 + $0x84] ss:$16 sps:$4 sm:$0xff]  }
  0x17   :  { %v7114_v14 = vld [vmem:[#allocation4 + $0x4c] ss:$16 sps:$4 sm:$0xff]   ;;  %v7118_v15 = vld [vmem:[#allocation4 + $0x48] ss:$16 sps:$4 sm:$0xff]   ;;  %v7124_v17 = vld [vmem:[#allocation4 + $0x80] ss:$16 sps:$4 sm:$0xff]  }
  0x18   :  { %v7121_v16 = vld [vmem:[#allocation4 + $0x6c] ss:$16 sps:$4 sm:$0xff]   ;;  %v7127_v18 = vld [vmem:[#allocation4 + $0xa4] ss:$16 sps:$4 sm:$0xff]   ;;  %v7130_v19 = vld [vmem:[#allocation4 + $0x68] ss:$16 sps:$4 sm:$0xff]  }
  0x19   :  { %279 = vmatpush1.bf16.msra.mxu0 %v7087_v4  ;;  %320 = vmatpush1.bf16.msra.mxu1 %v7106_v11  ;;  %v7133_v20 = vld [vmem:[#allocation4 + $0x8c] ss:$16 sps:$4 sm:$0xff]   ;;  %v82_v21 = vld [vmem:[%s9248_s0] sm:$0xff]  ;;  %v5532_v25 = vmul.f32 -1.442695, %v83_v22  ;;  %v84_v35 = vld [vmem:[%s9248_s0 + $0x10] sm:$0xff] }
  0x1a   :  { %280 = vmatprep.subr.bf16.mxu0 %v7090_v5  ;;  %321 = vmatprep.subr.bf16.mxu1 %v7114_v14  ;;  %v7141_v23 = vld [vmem:[#allocation4 + $0xa0] ss:$16 sps:$4 sm:$0xff]   ;;  %v5531_v24 = vmul.f32 -1.442695, %v82_v21  ;;  %v7144_v26 = vld [vmem:[#allocation4 + $0xc4] ss:$16 sps:$4 sm:$0xff]  }
  0x1b   :  { %v7148_v27 = vld [vmem:[#allocation4 + $0x88] ss:$16 sps:$4 sm:$0xff]   ;;  %v7150_v28 = vld [vmem:[#allocation4 + $0xc0] ss:$16 sps:$4 sm:$0xff]   ;;  %v7153_v29 = vld [vmem:[#allocation4 + $0xac] ss:$16 sps:$4 sm:$0xff]  }
  0x1c   :  { %6337 = vpow2.f32 %v5531_v24  ;;  %v7155_v30 = vld [vmem:[#allocation4 + $0xe4] ss:$16 sps:$4 sm:$0xff]   ;;  %v85_v31 = vld [vmem:[%s9248_s0 + $0x18] sm:$0xff]  ;;  %v7167_v34 = vld [vmem:[#allocation4 + $0xe0] ss:$16 sps:$4 sm:$0xff]   ;;  %vm7008_vm0 = vmmov 0  }
  0x1d   :  { %281 = vmatpush1.bf16.msra.mxu0 %v7097_v8  ;;  %322 = vmatpush1.bf16.msra.mxu1 %v7118_v15  ;;  %6339 = vpow2.f32 %v5532_v25  ;;  %v7160_v32 = vld [vmem:[#allocation4 + $0xa8] ss:$16 sps:$4 sm:$0xff]   ;;  %v7163_v33 = vld [vmem:[#allocation4 + $0xcc] ss:$16 sps:$4 sm:$0xff]   ;;  %v5533_v36 = vmul.f32 -1.442695, %v85_v31 }
  0x1e   :  { %282 = vmatprep.subr.bf16.mxu0 %v7101_v9  ;;  %323 = vmatprep.subr.bf16.mxu1 %v7121_v16  ;;  %v7173_v37 = vld [vmem:[#allocation4 + $0xc8] ss:$16 sps:$4 sm:$0xff]   ;;  %v7176_v38 = vld [vmem:[#allocation4 + $0xec] ss:$16 sps:$4 sm:$0xff]   ;;  %v112_v56 = vld [vmem:[%s9248_s0 + $0x20] sm:$0xff]  ;;  %vm5524_vm1 = vcmask 23552  }
  0x1f   :  { %6341 = vpow2.f32 %v5533_v36  ;;  %v7181_v40 = vld [vmem:[#allocation4 + $0xe8] ss:$16 sps:$4 sm:$0xff]  }
  0x20   :  { %6343 = vtanh.f32 %v84_v35  ;;  %v113_v57 = vld [vmem:[%s9248_s0 + $0x28] sm:$0xff]  ;;  %v115_v36 = vld [vmem:[%s9248_s0 + $0x38] sm:$0xff] }
  0x21   :  { %283 = vmatpush1.bf16.msra.mxu0 %v7110_v12  ;;  %324 = vmatpush1.bf16.msra.mxu1 %v7130_v19 }
  0x22   :  { %284 = vmatprep.subr.bf16.mxu0 %v7112_v13  ;;  %325 = vmatprep.subr.bf16.mxu1 %v7133_v20 }
  0x25   :  { %285 = vmatpush1.bf16.msra.mxu0 %v7124_v17  ;;  %326 = vmatpush1.bf16.msra.mxu1 %v7148_v27 }
  0x26   :  { %286 = vmatprep.subr.bf16.mxu0 %v7127_v18  ;;  %327 = vmatprep.subr.bf16.mxu1 %v7153_v29  ;;  %v6338_v39 = vpop.eup %6337 }
  0x27   :  { %v6340_v41 = vpop.eup %6339  ;;  %v89_v42 = vadd.f32 1.0, %v6338_v39 }
  0x28   :  { %v95_v43 = vadd.f32 1.0, %v6340_v41  ;;  %v114_v41 = vld [vmem:[%s9248_s0 + $0x30] sm:$0xff] }
  0x29   :  { %287 = vmatpush1.bf16.msra.mxu0 %v7141_v23  ;;  %328 = vmatpush1.bf16.msra.mxu1 %v7160_v32  ;;  %6345 = vrcp.f32 %v89_v42  ;;  %v6342_v44 = vpop.eup %6341 }
  0x2a   :  { %288 = vmatprep.subr.bf16.mxu0 %v7144_v26  ;;  %329 = vmatprep.subr.bf16.mxu1 %v7163_v33  ;;  %6347 = vrcp.f32 %v95_v43  ;;  %v6344_v45 = vpop.eup %6343  ;;  %v102_v47 = vadd.f32 1.0, %v6342_v44 }
  0x2c   :  { %6349 = vrcp.f32 %v102_v47 }
  0x2d   :  { %289 = vmatpush1.bf16.msra.mxu0 %v7150_v28  ;;  %330 = vmatpush1.bf16.msra.mxu1 %v7173_v37 }
  0x2e   :  { %290 = vmatprep.subr.bf16.mxu0 %v7155_v30  ;;  %331 = vmatprep.subr.bf16.mxu1 %v7176_v38 }
  0x31   :  { %291 = vmatpush1.bf16.msra.mxu0 %v7167_v34  ;;  %332 = vmatpush1.bf16.msra.mxu1 %v7181_v40 }
  0x32   :  { %395 = vmatprep.subr.bf16.mxu0 %v7079_v1  ;;  %436 = vmatprep.subr.bf16.mxu1 %v7092_v6 }
  0x33   :  { %v6346_v46 = vpop.eup %6345 }
  0x34   :  { %v6348_v48 = vpop.eup %6347  ;;  %v106_v49 = vmul.f32 %v6346_v46, %v6344_v45 }
  0x35   :  { %v105_v50 = vmul.f32 0.0, %v6348_v48 }
  0x36   :  { %v6350_v52 = vpop.eup %6349 }
  0x37   :  { %v7189_v51 = vadd.f32 %v106_v49, %v105_v50 }
  0x39   :  { %6351 = vtanh.f32 %v7189_v51 }
  0x43   :  { %v6352_v53 = vpop.eup %6351 }
  0x44   :  { %v109_v54 = vmul.f32 %v6352_v53, %v6350_v52 }
  0x46   :  { %v110_v55 = vpack.c.bf16 %v109_v54, %v109_v54 }
  0x48   :  { %111 = vst [vmem:[#allocation2] sm:$0xf] %v110_v55  ;;  %309 = vmatmul.mubr.bf16.vlgmr.msra.gmra.mrb[0].mxu0 %v110_v55  ;;  %350 = vmatmul.mubr.bf16.vlgmr.msra.gmra.mrb[0].mxu1 %v110_v55 }
  0x49   :  { %396 = vmatpush1.bf16.msra.mxu0 %v7081_v2  ;;  %437 = vmatpush1.bf16.msra.mxu1 %v7094_v7 }
  0x4a   :  { %397 = vmatprep.subr.bf16.mxu0 %v7084_v3  ;;  %438 = vmatprep.subr.bf16.mxu1 %v7104_v10 }
  0x4b   :  { %427 = vmatprep.mubr.bf16.mxu0 %v9259_v0  ;;  %468 = vmatprep.mubr.bf16.mxu1 %v9259_v0 }
  0x4d   :  { %398 = vmatpush1.bf16.msra.mxu0 %v7087_v4  ;;  %439 = vmatpush1.bf16.msra.mxu1 %v7106_v11 }
  0x4e   :  { %399 = vmatprep.subr.bf16.mxu0 %v7090_v5  ;;  %440 = vmatprep.subr.bf16.mxu1 %v7114_v14 }
  0x51   :  { %400 = vmatpush1.bf16.msra.mxu0 %v7097_v8  ;;  %441 = vmatpush1.bf16.msra.mxu1 %v7118_v15 }
  0x52   :  { %401 = vmatprep.subr.bf16.mxu0 %v7101_v9  ;;  %442 = vmatprep.subr.bf16.mxu1 %v7121_v16 }
  0x55   :  { %402 = vmatpush1.bf16.msra.mxu0 %v7110_v12  ;;  %443 = vmatpush1.bf16.msra.mxu1 %v7130_v19 }
  0x56   :  { %403 = vmatprep.subr.bf16.mxu0 %v7112_v13  ;;  %444 = vmatprep.subr.bf16.mxu1 %v7133_v20 }
  0x59   :  { %404 = vmatpush1.bf16.msra.mxu0 %v7124_v17  ;;  %445 = vmatpush1.bf16.msra.mxu1 %v7148_v27 }
  0x5a   :  { %405 = vmatprep.subr.bf16.mxu0 %v7127_v18  ;;  %446 = vmatprep.subr.bf16.mxu1 %v7153_v29 }
  0x5d   :  { %406 = vmatpush1.bf16.msra.mxu0 %v7141_v23  ;;  %447 = vmatpush1.bf16.msra.mxu1 %v7160_v32 }
  0x5e   :  { %407 = vmatprep.subr.bf16.mxu0 %v7144_v26  ;;  %448 = vmatprep.subr.bf16.mxu1 %v7163_v33 }
  0x61   :  { %408 = vmatpush1.bf16.msra.mxu0 %v7150_v28  ;;  %449 = vmatpush1.bf16.msra.mxu1 %v7173_v37 }
  0x62   :  { %409 = vmatprep.subr.bf16.mxu0 %v7155_v30  ;;  %450 = vmatprep.subr.bf16.mxu1 %v7176_v38 }
  0x65   :  { %410 = vmatpush1.bf16.msra.mxu0 %v7167_v34  ;;  %451 = vmatpush1.bf16.msra.mxu1 %v7181_v40 }
  0x66   :  { %511 = vmatprep.subr.bf16.mxu0 %v7079_v1  ;;  %552 = vmatprep.subr.bf16.mxu1 %v7092_v6 }
 0x11b   :  { %v310_v58 = vpop.f32.mrb[0].mxu0  ;;  %v351_v59 = vpop.f32.mrb[0].mxu1 }
 0x11c   :  { %v358_v60 = vadd.f32 %v310_v58, %v112_v56  ;;  %v312_v61 = vpop.f32.mrb[1].mxu0  ;;  %v353_v62 = vpop.f32.mrb[1].mxu1  ;;  %v360_v43 = vadd.f32 %v351_v59, %v114_v41 }
 0x11d   :  { %v359_v63 = vadd.f32 %v312_v61, %v113_v57  ;;  %v314_v21 = vpop.f32.mrb[2].mxu0  ;;  %v355_v22 = vpop.f32.mrb[2].mxu1  ;;  %v361_v39 = vadd.f32 %v353_v62, %v115_v36  ;;  %v392_v62 = vld [vmem:[%s9248_s0 + $0x48] sm:$0xff] }
 0x11e   :  { %v5566_v24 = vmul.f32 -1.442695, %v358_v60  ;;  %v315_v25 = vpop.f32.mrb[3].mxu0  ;;  %v356_v31 = vpop.f32.mrb[3].mxu1 }
 0x11f   :  { %v5567_v35 = vmul.f32 -1.442695, %v359_v63  ;;  %v5568_v42 = vmul.f32 -1.442695, %v361_v39 }
 0x120   :  { %6353 = vpow2.f32 %v5566_v24 }
 0x121   :  { %6355 = vpow2.f32 %v5567_v35 }
 0x122   :  { %6357 = vpow2.f32 %v5568_v42 }
 0x123   :  { %6359 = vtanh.f32 %v360_v43  ;;  %v394_v43 = vld [vmem:[%s9248_s0 + $0x58] sm:$0xff] }
 0x12a   :  { %v6354_v44 = vpop.eup %6353 }
 0x12b   :  { %v6356_v45 = vpop.eup %6355  ;;  %v365_v46 = vadd.f32 1.0, %v6354_v44 }
 0x12c   :  { %v371_v47 = vadd.f32 1.0, %v6356_v45  ;;  %v6358_v48 = vpop.eup %6357  ;;  %v393_v45 = vld [vmem:[%s9248_s0 + $0x50] sm:$0xff] }
 0x12d   :  { %6361 = vrcp.f32 %v365_v46  ;;  %v6360_v49 = vpop.eup %6359  ;;  %v378_v52 = vadd.f32 1.0, %v6358_v48 }
 0x12e   :  { %6363 = vrcp.f32 %v371_v47 }
 0x12f   :  { %6365 = vrcp.f32 %v378_v52 }
 0x137   :  { %v6362_v50 = vpop.eup %6361 }
 0x138   :  { %v6364_v53 = vpop.eup %6363  ;;  %v382_v54 = vmul.f32 %v6362_v50, %v6360_v49 }
 0x139   :  { %v381_v55 = vmul.f32 %v6364_v53, %v7189_v51  ;;  %v6366_v57 = vpop.eup %6365  ;;  %v391_v51 = vld [vmem:[%s9248_s0 + $0x40] sm:$0xff] }
 0x13b   :  { %v7239_v56 = vadd.f32 %v382_v54, %v381_v55 }
 0x13d   :  { %6367 = vtanh.f32 %v7239_v56 }
 0x147   :  { %v6368_v58 = vpop.eup %6367 }
 0x148   :  { %v385_v59 = vmul.f32 %v6368_v58, %v6366_v57 }
 0x14a   :  { %v386_v60 = vpack.c.bf16 %v385_v59, %v385_v59 }
 0x14c   :  { %v388_v61 = vrot.slane %v386_v60, 4  ;;  %428 = vmatmul.mubr.bf16.vlgmr.msra.gmra.mrb[4].mxu0 %v386_v60  ;;  %469 = vmatmul.mubr.bf16.vlgmr.msra.gmra.mrb[4].mxu1 %v386_v60 }
 0x14d   :  { %512 = vmatpush1.bf16.msra.mxu0 %v7081_v2  ;;  %553 = vmatpush1.bf16.msra.mxu1 %v7094_v7 }
 0x14e   :  { %390 = vst [vmem:[#allocation2] sm:$0xf0] %v388_v61  ;;  %513 = vmatprep.subr.bf16.mxu0 %v7084_v3  ;;  %554 = vmatprep.subr.bf16.mxu1 %v7104_v10 }
 0x14f   :  { %543 = vmatprep.mubr.bf16.mxu0 %v9259_v0  ;;  %584 = vmatprep.mubr.bf16.mxu1 %v9259_v0 }
 0x151   :  { %514 = vmatpush1.bf16.msra.mxu0 %v7087_v4  ;;  %555 = vmatpush1.bf16.msra.mxu1 %v7106_v11 }
 0x152   :  { %515 = vmatprep.subr.bf16.mxu0 %v7090_v5  ;;  %556 = vmatprep.subr.bf16.mxu1 %v7114_v14 }
 0x155   :  { %516 = vmatpush1.bf16.msra.mxu0 %v7097_v8  ;;  %557 = vmatpush1.bf16.msra.mxu1 %v7118_v15 }
 0x156   :  { %517 = vmatprep.subr.bf16.mxu0 %v7101_v9  ;;  %558 = vmatprep.subr.bf16.mxu1 %v7121_v16 }
 0x159   :  { %518 = vmatpush1.bf16.msra.mxu0 %v7110_v12  ;;  %559 = vmatpush1.bf16.msra.mxu1 %v7130_v19 }
 0x15a   :  { %519 = vmatprep.subr.bf16.mxu0 %v7112_v13  ;;  %560 = vmatprep.subr.bf16.mxu1 %v7133_v20 }
 0x15d   :  { %520 = vmatpush1.bf16.msra.mxu0 %v7124_v17  ;;  %561 = vmatpush1.bf16.msra.mxu1 %v7148_v27 }
 0x15e   :  { %521 = vmatprep.subr.bf16.mxu0 %v7127_v18  ;;  %562 = vmatprep.subr.bf16.mxu1 %v7153_v29 }
 0x161   :  { %522 = vmatpush1.bf16.msra.mxu0 %v7141_v23  ;;  %563 = vmatpush1.bf16.msra.mxu1 %v7160_v32 }
 0x162   :  { %523 = vmatprep.subr.bf16.mxu0 %v7144_v26  ;;  %564 = vmatprep.subr.bf16.mxu1 %v7163_v33 }
 0x165   :  { %524 = vmatpush1.bf16.msra.mxu0 %v7150_v28  ;;  %565 = vmatpush1.bf16.msra.mxu1 %v7173_v37 }
 0x166   :  { %525 = vmatprep.subr.bf16.mxu0 %v7155_v30  ;;  %566 = vmatprep.subr.bf16.mxu1 %v7176_v38 }
 0x169   :  { %526 = vmatpush1.bf16.msra.mxu0 %v7167_v34  ;;  %567 = vmatpush1.bf16.msra.mxu1 %v7181_v40 }
 0x16a   :  { %630 = vmatprep.subr.bf16.mxu0 %v7079_v1  ;;  %671 = vmatprep.subr.bf16.mxu1 %v7092_v6 }
 0x21f   :  { %v429_v63 = vpop.f32.mrb[4].mxu0  ;;  %v470_v21 = vpop.f32.mrb[4].mxu1 }
 0x220   :  { %v477_v22 = vadd.f32 %v429_v63, %v391_v51  ;;  %v431_v24 = vpop.f32.mrb[5].mxu0  ;;  %v472_v25 = vpop.f32.mrb[5].mxu1  ;;  %v479_v47 = vadd.f32 %v470_v21, %v393_v45  ;;  %v7344_v45 = vld [vmem:[#allocation4] ss:$16 sps:$4 sm:$0xff]  }
 0x221   :  { %v478_v31 = vadd.f32 %v431_v24, %v392_v62  ;;  %v433_v35 = vpop.f32.mrb[6].mxu0  ;;  %v474_v36 = vpop.f32.mrb[6].mxu1  ;;  %v480_v44 = vadd.f32 %v472_v25, %v394_v43 }
 0x222   :  { %v5569_v39 = vmul.f32 -1.442695, %v477_v22  ;;  %v434_v1 = vpop.f32.mrb[7].mxu0  ;;  %v475_v41 = vpop.f32.mrb[7].mxu1 }
 0x223   :  { %v5570_v42 = vmul.f32 -1.442695, %v478_v31  ;;  %v5571_v46 = vmul.f32 -1.442695, %v480_v44 }
 0x224   :  { %6369 = vpow2.f32 %v5569_v39 }
 0x225   :  { %6371 = vpow2.f32 %v5570_v42 }
 0x226   :  { %6373 = vpow2.f32 %v5571_v46  ;;  %v7347_v46 = vld [vmem:[#allocation4 + $0x8] ss:$16 sps:$4 sm:$0xff]  }
 0x227   :  { %6375 = vtanh.f32 %v479_v47  ;;  %v7350_v47 = vld [vmem:[#allocation4 + $0x24] ss:$16 sps:$4 sm:$0xff]  }
 0x22e   :  { %v6370_v48 = vpop.eup %6369 }
 0x22f   :  { %v6372_v49 = vpop.eup %6371  ;;  %v484_v50 = vadd.f32 1.0, %v6370_v48  ;;  %v7353_v48 = vld [vmem:[#allocation4 + $0x2c] ss:$16 sps:$4 sm:$0xff]  }
 0x230   :  { %v490_v52 = vadd.f32 1.0, %v6372_v49  ;;  %v6374_v53 = vpop.eup %6373  ;;  %v7358_v49 = vld [vmem:[#allocation4 + $0x20] ss:$16 sps:$4 sm:$0xff]  }
 0x231   :  { %6377 = vrcp.f32 %v484_v50  ;;  %v6376_v54 = vpop.eup %6375  ;;  %v497_v59 = vadd.f32 1.0, %v6374_v53  ;;  %v7361_v50 = vld [vmem:[#allocation4 + $0x28] ss:$16 sps:$4 sm:$0xff]   ;;  %v7367_v53 = vld [vmem:[#allocation4 + $0x4c] ss:$16 sps:$4 sm:$0xff]  }
 0x232   :  { %6379 = vrcp.f32 %v490_v52  ;;  %v7364_v52 = vld [vmem:[#allocation4 + $0x44] ss:$16 sps:$4 sm:$0xff]  }
 0x233   :  { %6381 = vrcp.f32 %v497_v59  ;;  %v7382_v59 = vld [vmem:[#allocation4 + $0x60] ss:$16 sps:$4 sm:$0xff]  }
 0x23b   :  { %v6378_v55 = vpop.eup %6377 }
 0x23c   :  { %v6380_v57 = vpop.eup %6379  ;;  %v501_v58 = vmul.f32 %v6378_v55, %v6376_v54  ;;  %v7370_v54 = vld [vmem:[#allocation4 + $0x40] ss:$16 sps:$4 sm:$0xff]   ;;  %v7373_v55 = vld [vmem:[#allocation4 + $0x48] ss:$16 sps:$4 sm:$0xff]  }
 0x23d   :  { %v500_v60 = vmul.f32 %v6380_v57, %v7239_v56  ;;  %v6382_v51 = vpop.eup %6381  ;;  %v7376_v57 = vld [vmem:[#allocation4 + $0x64] ss:$16 sps:$4 sm:$0xff]  }
 0x23f   :  { %v7289_v61 = vadd.f32 %v501_v58, %v500_v60  ;;  %v7379_v58 = vld [vmem:[#allocation4 + $0x6c] ss:$16 sps:$4 sm:$0xff]   ;;  %v7385_v60 = vld [vmem:[#allocation4 + $0x68] ss:$16 sps:$4 sm:$0xff]  }
 0x241   :  { %6383 = vtanh.f32 %v7289_v61 }
 0x24b   :  { %v6384_v62 = vpop.eup %6383 }
 0x24c   :  { %v504_v63 = vmul.f32 %v6384_v62, %v6382_v51  ;;  %v7391_v51 = vld [vmem:[#allocation4 + $0x8c] ss:$16 sps:$4 sm:$0xff]   ;;  %v7394_v62 = vld [vmem:[#allocation4 + $0x80] ss:$16 sps:$4 sm:$0xff]  }
 0x24e   :  { %v505_v21 = vpack.c.bf16 %v504_v63, %v504_v63  ;;  %v7397_v63 = vld [vmem:[#allocation4 + $0x88] ss:$16 sps:$4 sm:$0xff]  }
 0x250   :  { %506 = vst [vmem:[#allocation2 + $0x8] sm:$0xf] %v505_v21  ;;  %544 = vmatmul.mubr.bf16.vlgmr.msra.gmra.mrb[8].mxu0 %v505_v21  ;;  %585 = vmatmul.mubr.bf16.vlgmr.msra.gmra.mrb[8].mxu1 %v505_v21  ;;  %v7400_v21 = vld [vmem:[#allocation4 + $0xa4] ss:$16 sps:$4 sm:$0xff]  }
 0x251   :  { %631 = vmatpush1.bf16.msra.mxu0 %v7081_v2  ;;  %672 = vmatpush1.bf16.msra.mxu1 %v7094_v7  ;;  %v7324_v2 = vld [vmem:[#allocation4 + $0x4] ss:$16 sps:$4 sm:$0xff]  }
 0x252   :  { %632 = vmatprep.subr.bf16.mxu0 %v7084_v3  ;;  %673 = vmatprep.subr.bf16.mxu1 %v7104_v10  ;;  %v507_v3 = vld [vmem:[%s9248_s0 + $0x60] sm:$0xff] }
 0x253   :  { %662 = vmatprep.mubr.bf16.mxu0 %v9259_v0  ;;  %703 = vmatprep.mubr.bf16.mxu1 %v9259_v0 }
 0x255   :  { %633 = vmatpush1.bf16.msra.mxu0 %v7087_v4  ;;  %674 = vmatpush1.bf16.msra.mxu1 %v7106_v11  ;;  %v508_v4 = vld [vmem:[%s9248_s0 + $0x68] sm:$0xff] }
 0x256   :  { %634 = vmatprep.subr.bf16.mxu0 %v7090_v5  ;;  %675 = vmatprep.subr.bf16.mxu1 %v7114_v14 }
 0x259   :  { %635 = vmatpush1.bf16.msra.mxu0 %v7097_v8  ;;  %676 = vmatpush1.bf16.msra.mxu1 %v7118_v15 }
 0x25a   :  { %636 = vmatprep.subr.bf16.mxu0 %v7101_v9  ;;  %677 = vmatprep.subr.bf16.mxu1 %v7121_v16 }
 0x25d   :  { %637 = vmatpush1.bf16.msra.mxu0 %v7110_v12  ;;  %678 = vmatpush1.bf16.msra.mxu1 %v7130_v19  ;;  %v509_v19 = vld [vmem:[%s9248_s0 + $0x70] sm:$0xff] }
 0x25e   :  { %638 = vmatprep.subr.bf16.mxu0 %v7112_v13  ;;  %679 = vmatprep.subr.bf16.mxu1 %v7133_v20 }
 0x261   :  { %639 = vmatpush1.bf16.msra.mxu0 %v7124_v17  ;;  %680 = vmatpush1.bf16.msra.mxu1 %v7148_v27  ;;  %v510_v17 = vld [vmem:[%s9248_s0 + $0x78] sm:$0xff] }
 0x262   :  { %640 = vmatprep.subr.bf16.mxu0 %v7127_v18  ;;  %681 = vmatprep.subr.bf16.mxu1 %v7153_v29 }
 0x265   :  { %641 = vmatpush1.bf16.msra.mxu0 %v7141_v23  ;;  %682 = vmatpush1.bf16.msra.mxu1 %v7160_v32 }
 0x266   :  { %642 = vmatprep.subr.bf16.mxu0 %v7144_v26  ;;  %683 = vmatprep.subr.bf16.mxu1 %v7163_v33 }
 0x269   :  { %643 = vmatpush1.bf16.msra.mxu0 %v7150_v28  ;;  %684 = vmatpush1.bf16.msra.mxu1 %v7173_v37 }
 0x26a   :  { %644 = vmatprep.subr.bf16.mxu0 %v7155_v30  ;;  %685 = vmatprep.subr.bf16.mxu1 %v7176_v38 }
 0x26d   :  { %645 = vmatpush1.bf16.msra.mxu0 %v7167_v34  ;;  %686 = vmatpush1.bf16.msra.mxu1 %v7181_v40 }
 0x26e   :  { %746 = vmatprep.subr.bf16.mxu0 %v7324_v2  ;;  %787 = vmatprep.subr.bf16.mxu1 %v7092_v6 }
 0x323   :  { %v545_v5 = vpop.f32.mrb[8].mxu0  ;;  %v586_v7 = vpop.f32.mrb[8].mxu1 }
 0x324   :  { %v593_v8 = vadd.f32 %v545_v5, %v507_v3  ;;  %v547_v9 = vpop.f32.mrb[9].mxu0  ;;  %v588_v10 = vpop.f32.mrb[9].mxu1  ;;  %v595_v23 = vadd.f32 %v586_v7, %v509_v19  ;;  %v7404_v3 = vld [vmem:[#allocation4 + $0xa0] ss:$16 sps:$4 sm:$0xff]   ;;  %v7416_v7 = vld [vmem:[#allocation4 + $0xe4] ss:$16 sps:$4 sm:$0xff]  }
 0x325   :  { %v594_v11 = vadd.f32 %v547_v9, %v508_v4  ;;  %v549_v12 = vpop.f32.mrb[10].mxu0  ;;  %v590_v13 = vpop.f32.mrb[10].mxu1  ;;  %v596_v18 = vadd.f32 %v588_v10, %v510_v17  ;;  %v7408_v4 = vld [vmem:[#allocation4 + $0xc4] ss:$16 sps:$4 sm:$0xff]   ;;  %v7412_v5 = vld [vmem:[#allocation4 + $0xc0] ss:$16 sps:$4 sm:$0xff]  }
 0x326   :  { %v5572_v14 = vmul.f32 -1.442695, %v593_v8  ;;  %v550_v15 = vpop.f32.mrb[11].mxu0  ;;  %v591_v16 = vpop.f32.mrb[11].mxu1  ;;  %v628_v17 = vld [vmem:[%s9248_s0 + $0x90] sm:$0xff] }
 0x327   :  { %v5573_v6 = vmul.f32 -1.442695, %v594_v11  ;;  %v5574_v20 = vmul.f32 -1.442695, %v596_v18  ;;  %v629_v16 = vld [vmem:[%s9248_s0 + $0x98] sm:$0xff] }
 0x328   :  { %6385 = vpow2.f32 %v5572_v14 }
 0x329   :  { %6387 = vpow2.f32 %v5573_v6 }
 0x32a   :  { %6389 = vpow2.f32 %v5574_v20 }
 0x32b   :  { %6391 = vtanh.f32 %v595_v23 }
 0x332   :  { %v6386_v26 = vpop.eup %6385 }
 0x333   :  { %v6388_v27 = vpop.eup %6387  ;;  %v600_v28 = vadd.f32 1.0, %v6386_v26 }
 0x334   :  { %v606_v30 = vadd.f32 1.0, %v6388_v27  ;;  %v6390_v56 = vpop.eup %6389 }
 0x335   :  { %6393 = vrcp.f32 %v600_v28  ;;  %v6392_v22 = vpop.eup %6391  ;;  %v613_v35 = vadd.f32 1.0, %v6390_v56 }
 0x336   :  { %6395 = vrcp.f32 %v606_v30 }
 0x337   :  { %6397 = vrcp.f32 %v613_v35 }
 0x33f   :  { %v6394_v24 = vpop.eup %6393 }
 0x340   :  { %v6396_v25 = vpop.eup %6395  ;;  %v617_v31 = vmul.f32 %v6394_v24, %v6392_v22 }
 0x341   :  { %v616_v36 = vmul.f32 %v6396_v25, %v7289_v61  ;;  %v6398_v1 = vpop.eup %6397  ;;  %v7388_v61 = vld [vmem:[#allocation4 + $0x84] ss:$16 sps:$4 sm:$0xff]  }
 0x343   :  { %v7341_v39 = vadd.f32 %v617_v31, %v616_v36 }
 0x345   :  { %6399 = vtanh.f32 %v7341_v39 }
 0x34f   :  { %v6400_v41 = vpop.eup %6399 }
 0x350   :  { %v620_v42 = vmul.f32 %v6400_v41, %v6398_v1 }
 0x352   :  { %v621_v43 = vpack.c.bf16 %v620_v42, %v620_v42 }
 0x354   :  { %v623_v44 = vrot.slane %v621_v43, 4  ;;  %663 = vmatmul.mubr.bf16.vlgmr.msra.gmra.mrb[12].mxu0 %v621_v43  ;;  %704 = vmatmul.mubr.bf16.vlgmr.msra.gmra.mrb[12].mxu1 %v621_v43  ;;  %v7467_v43 = vld [vmem:[#allocation4 + $0xa8] ss:$16 sps:$4 sm:$0xff]  }
 0x355   :  { %747 = vmatpush1.bf16.msra.mxu0 %v7344_v45  ;;  %788 = vmatpush1.bf16.msra.mxu1 %v7347_v46 }
 0x356   :  { %625 = vst [vmem:[#allocation2 + $0x8] sm:$0xf0] %v623_v44  ;;  %748 = vmatprep.subr.bf16.mxu0 %v7350_v47  ;;  %789 = vmatprep.subr.bf16.mxu1 %v7353_v48  ;;  %v7471_v44 = vld [vmem:[#allocation4 + $0xcc] ss:$16 sps:$4 sm:$0xff]  }
 0x357   :  { %778 = vmatprep.mubr.bf16.mxu0 %v9259_v0  ;;  %819 = vmatprep.mubr.bf16.mxu1 %v9259_v0 }
 0x359   :  { %749 = vmatpush1.bf16.msra.mxu0 %v7358_v49  ;;  %790 = vmatpush1.bf16.msra.mxu1 %v7361_v50 }
 0x35a   :  { %750 = vmatprep.subr.bf16.mxu0 %v7364_v52  ;;  %791 = vmatprep.subr.bf16.mxu1 %v7367_v53 }
 0x35d   :  { %751 = vmatpush1.bf16.msra.mxu0 %v7370_v54  ;;  %792 = vmatpush1.bf16.msra.mxu1 %v7373_v55 }
 0x35e   :  { %752 = vmatprep.subr.bf16.mxu0 %v7376_v57  ;;  %793 = vmatprep.subr.bf16.mxu1 %v7379_v58 }
 0x361   :  { %753 = vmatpush1.bf16.msra.mxu0 %v7382_v59  ;;  %794 = vmatpush1.bf16.msra.mxu1 %v7385_v60 }
 0x362   :  { %754 = vmatprep.subr.bf16.mxu0 %v7388_v61  ;;  %795 = vmatprep.subr.bf16.mxu1 %v7391_v51 }
 0x365   :  { %755 = vmatpush1.bf16.msra.mxu0 %v7394_v62  ;;  %796 = vmatpush1.bf16.msra.mxu1 %v7397_v63 }
 0x366   :  { %756 = vmatprep.subr.bf16.mxu0 %v7400_v21  ;;  %797 = vmatprep.subr.bf16.mxu1 %v7153_v29  ;;  %v7423_v29 = vld [vmem:[#allocation4 + $0xc] ss:$16 sps:$4 sm:$0xff]  }
 0x369   :  { %757 = vmatpush1.bf16.msra.mxu0 %v7404_v3  ;;  %798 = vmatpush1.bf16.msra.mxu1 %v7160_v32  ;;  %v626_v32 = vld [vmem:[%s9248_s0 + $0x80] sm:$0xff] }
 0x36a   :  { %758 = vmatprep.subr.bf16.mxu0 %v7408_v4  ;;  %799 = vmatprep.subr.bf16.mxu1 %v7163_v33  ;;  %v627_v33 = vld [vmem:[%s9248_s0 + $0x88] sm:$0xff] }
 0x36d   :  { %759 = vmatpush1.bf16.msra.mxu0 %v7412_v5  ;;  %800 = vmatpush1.bf16.msra.mxu1 %v7173_v37 }
 0x36e   :  { %760 = vmatprep.subr.bf16.mxu0 %v7416_v7  ;;  %801 = vmatprep.subr.bf16.mxu1 %v7176_v38 }
 0x371   :  { %761 = vmatpush1.bf16.msra.mxu0 %v7167_v34  ;;  %802 = vmatpush1.bf16.msra.mxu1 %v7181_v40 }
 0x372   :  { %865 = vmatprep.subr.bf16.mxu0 %v7324_v2  ;;  %906 = vmatprep.subr.bf16.mxu1 %v7423_v29 }
 0x427   :  { %v664_v37 = vpop.f32.mrb[12].mxu0  ;;  %v705_v38 = vpop.f32.mrb[12].mxu1 }
 0x428   :  { %v712_v8 = vadd.f32 %v664_v37, %v626_v32  ;;  %v666_v34 = vpop.f32.mrb[13].mxu0  ;;  %v707_v9 = vpop.f32.mrb[13].mxu1  ;;  %v714_v19 = vadd.f32 %v705_v38, %v628_v17  ;;  %v7475_v32 = vld [vmem:[#allocation4 + $0xc8] ss:$16 sps:$4 sm:$0xff]   ;;  %v7482_v37 = vld [vmem:[#allocation4 + $0xe0] ss:$16 sps:$4 sm:$0xff]  }
 0x429   :  { %v713_v40 = vadd.f32 %v666_v34, %v627_v33  ;;  %v668_v10 = vpop.f32.mrb[14].mxu0  ;;  %v709_v11 = vpop.f32.mrb[14].mxu1  ;;  %v715_v6 = vadd.f32 %v707_v9, %v629_v16  ;;  %v7479_v33 = vld [vmem:[#allocation4 + $0xec] ss:$16 sps:$4 sm:$0xff]   ;;  %v7485_v38 = vld [vmem:[#allocation4 + $0xe8] ss:$16 sps:$4 sm:$0xff]  }
 0x42a   :  { %v5575_v12 = vmul.f32 -1.442695, %v712_v8  ;;  %v669_v13 = vpop.f32.mrb[15].mxu0  ;;  %v710_v14 = vpop.f32.mrb[15].mxu1  ;;  %v742_v8 = vld [vmem:[%s9248_s0 + $0xa0] sm:$0xff]  ;;  %v743_v34 = vld [vmem:[%s9248_s0 + $0xa8] sm:$0xff] }
 0x42b   :  { %v5576_v15 = vmul.f32 -1.442695, %v713_v40  ;;  %v5577_v18 = vmul.f32 -1.442695, %v715_v6  ;;  %v745_v17 = vld [vmem:[%s9248_s0 + $0xb8] sm:$0xff] }
 0x42c   :  { %6401 = vpow2.f32 %v5575_v12 }
 0x42d   :  { %6403 = vpow2.f32 %v5576_v15 }
 0x42e   :  { %6405 = vpow2.f32 %v5577_v18 }
 0x42f   :  { %6407 = vtanh.f32 %v714_v19  ;;  %v744_v19 = vld [vmem:[%s9248_s0 + $0xb0] sm:$0xff] }
 0x436   :  { %v6402_v20 = vpop.eup %6401 }
 0x437   :  { %v6404_v23 = vpop.eup %6403  ;;  %v719_v26 = vadd.f32 1.0, %v6402_v20 }
 0x438   :  { %v725_v27 = vadd.f32 1.0, %v6404_v23  ;;  %v6406_v28 = vpop.eup %6405 }
 0x439   :  { %6409 = vrcp.f32 %v719_v26  ;;  %v6408_v30 = vpop.eup %6407  ;;  %v732_v25 = vadd.f32 1.0, %v6406_v28 }
 0x43a   :  { %6411 = vrcp.f32 %v725_v27 }
 0x43b   :  { %6413 = vrcp.f32 %v732_v25 }
 0x443   :  { %v6410_v56 = vpop.eup %6409 }
 0x444   :  { %v6412_v22 = vpop.eup %6411  ;;  %v736_v24 = vmul.f32 %v6410_v56, %v6408_v30 }
 0x445   :  { %v735_v31 = vmul.f32 %v6412_v22, %v7341_v39  ;;  %v6414_v36 = vpop.eup %6413  ;;  %v7463_v39 = vld [vmem:[#allocation4 + $0xac] ss:$16 sps:$4 sm:$0xff]  }
 0x447   :  { %v7439_v35 = vadd.f32 %v736_v24, %v735_v31 }
 0x449   :  { %6415 = vtanh.f32 %v7439_v35 }
 0x453   :  { %v6416_v1 = vpop.eup %6415 }
 0x454   :  { %v739_v41 = vmul.f32 %v6416_v1, %v6414_v36 }
 0x456   :  { %v740_v42 = vpack.c.bf16 %v739_v41, %v739_v41 }
 0x458   :  { %741 = vst [vmem:[#allocation2 + $0x10] sm:$0xf] %v740_v42  ;;  %779 = vmatmul.mubr.bf16.vlgmr.msra.gmra.mrb[16].mxu0 %v740_v42  ;;  %820 = vmatmul.mubr.bf16.vlgmr.msra.gmra.mrb[16].mxu1 %v740_v42 }
 0x459   :  { %866 = vmatpush1.bf16.msra.mxu0 %v7344_v45  ;;  %907 = vmatpush1.bf16.msra.mxu1 %v7347_v46 }
 0x45a   :  { %867 = vmatprep.subr.bf16.mxu0 %v7350_v47  ;;  %908 = vmatprep.subr.bf16.mxu1 %v7353_v48 }
 0x45b   :  { %897 = vmatprep.mubr.bf16.mxu0 %v9259_v0  ;;  %938 = vmatprep.mubr.bf16.mxu1 %v9259_v0 }
 0x45d   :  { %868 = vmatpush1.bf16.msra.mxu0 %v7358_v49  ;;  %909 = vmatpush1.bf16.msra.mxu1 %v7361_v50 }
 0x45e   :  { %869 = vmatprep.subr.bf16.mxu0 %v7364_v52  ;;  %910 = vmatprep.subr.bf16.mxu1 %v7367_v53 }
 0x461   :  { %870 = vmatpush1.bf16.msra.mxu0 %v7370_v54  ;;  %911 = vmatpush1.bf16.msra.mxu1 %v7373_v55 }
 0x462   :  { %871 = vmatprep.subr.bf16.mxu0 %v7376_v57  ;;  %912 = vmatprep.subr.bf16.mxu1 %v7379_v58 }
 0x465   :  { %872 = vmatpush1.bf16.msra.mxu0 %v7382_v59  ;;  %913 = vmatpush1.bf16.msra.mxu1 %v7385_v60 }
 0x466   :  { %873 = vmatprep.subr.bf16.mxu0 %v7388_v61  ;;  %914 = vmatprep.subr.bf16.mxu1 %v7391_v51 }
 0x469   :  { %874 = vmatpush1.bf16.msra.mxu0 %v7394_v62  ;;  %915 = vmatpush1.bf16.msra.mxu1 %v7397_v63 }
 0x46a   :  { %875 = vmatprep.subr.bf16.mxu0 %v7400_v21  ;;  %916 = vmatprep.subr.bf16.mxu1 %v7463_v39 }
 0x46d   :  { %876 = vmatpush1.bf16.msra.mxu0 %v7404_v3  ;;  %917 = vmatpush1.bf16.msra.mxu1 %v7467_v43 }
 0x46e   :  { %877 = vmatprep.subr.bf16.mxu0 %v7408_v4  ;;  %918 = vmatprep.subr.bf16.mxu1 %v7471_v44 }
 0x471   :  { %878 = vmatpush1.bf16.msra.mxu0 %v7412_v5  ;;  %919 = vmatpush1.bf16.msra.mxu1 %v7475_v32 }
 0x472   :  { %879 = vmatprep.subr.bf16.mxu0 %v7416_v7  ;;  %920 = vmatprep.subr.bf16.mxu1 %v7479_v33 }
 0x475   :  { %880 = vmatpush1.bf16.msra.mxu0 %v7482_v37  ;;  %921 = vmatpush1.bf16.msra.mxu1 %v7485_v38 }
 0x476   :  { %981 = vmatprep.subr.bf16.mxu0 %v7324_v2  ;;  %1022 = vmatprep.subr.bf16.mxu1 %v7423_v29 }
 0x52b   :  { %v780_v9 = vpop.f32.mrb[16].mxu0  ;;  %v821_v40 = vpop.f32.mrb[16].mxu1 }
 0x52c   :  { %v828_v10 = vadd.f32 %v780_v9, %v742_v8  ;;  %v782_v11 = vpop.f32.mrb[17].mxu0  ;;  %v823_v12 = vpop.f32.mrb[17].mxu1  ;;  %v830_v23 = vadd.f32 %v821_v40, %v744_v19  ;;  %v6063_v19 = vld [vmem:[%s9250_s2 + $0x44] ss:$16 sps:$4 sm:$0xff]  }
 0x52d   :  { %v829_v13 = vadd.f32 %v782_v11, %v743_v34  ;;  %v784_v14 = vpop.f32.mrb[18].mxu0  ;;  %v825_v15 = vpop.f32.mrb[18].mxu1  ;;  %v831_v18 = vadd.f32 %v823_v12, %v745_v17  ;;  %v6055_v17 = vld [vmem:[%s9250_s2 + $0x20] ss:$16 sps:$4 sm:$0xff]  }
 0x52e   :  { %v5578_v16 = vmul.f32 -1.442695, %v828_v10  ;;  %v785_v2 = vpop.f32.mrb[19].mxu0  ;;  %v826_v6 = vpop.f32.mrb[19].mxu1  ;;  %v6049_v15 = vld [vmem:[%s9250_s2] ss:$16 sps:$4 sm:$0xff]  }
 0x52f   :  { %v5579_v29 = vmul.f32 -1.442695, %v829_v13  ;;  %v5580_v20 = vmul.f32 -1.442695, %v831_v18  ;;  %v6057_v6 = vld [vmem:[%s9250_s2 + $0x24] ss:$16 sps:$4 sm:$0xff]  }
 0x530   :  { %6417 = vpow2.f32 %v5578_v16  ;;  %v6052_v16 = vld [vmem:[%s9250_s2 + $0x8] ss:$16 sps:$4 sm:$0xff]  }
 0x531   :  { %6419 = vpow2.f32 %v5579_v29  ;;  %v6060_v29 = vld [vmem:[%s9250_s2 + $0x2c] ss:$16 sps:$4 sm:$0xff]   ;;  %v6058_v18 = vld [vmem:[%s9250_s2 + $0x28] ss:$16 sps:$4 sm:$0xff]  }
 0x532   :  { %6421 = vpow2.f32 %v5580_v20  ;;  %v6066_v20 = vld [vmem:[%s9250_s2 + $0x4c] ss:$16 sps:$4 sm:$0xff]  }
 0x533   :  { %6423 = vtanh.f32 %v830_v23  ;;  %v6061_v23 = vld [vmem:[%s9250_s2 + $0x40] ss:$16 sps:$4 sm:$0xff]  }
 0x53a   :  { %v6418_v26 = vpop.eup %6417 }
 0x53b   :  { %v6420_v27 = vpop.eup %6419  ;;  %v835_v28 = vadd.f32 1.0, %v6418_v26  ;;  %v6064_v26 = vld [vmem:[%s9250_s2 + $0x48] ss:$16 sps:$4 sm:$0xff]  }
 0x53c   :  { %v841_v30 = vadd.f32 1.0, %v6420_v27  ;;  %v6422_v56 = vpop.eup %6421  ;;  %v6069_v27 = vld [vmem:[%s9250_s2 + $0x64] ss:$16 sps:$4 sm:$0xff]  }
 0x53d   :  { %6425 = vrcp.f32 %v835_v28  ;;  %v6424_v22 = vpop.eup %6423  ;;  %v848_v36 = vadd.f32 1.0, %v6422_v56  ;;  %v6072_v28 = vld [vmem:[%s9250_s2 + $0x6c] ss:$16 sps:$4 sm:$0xff]   ;;  %v6070_v56 = vld [vmem:[%s9250_s2 + $0x68] ss:$16 sps:$4 sm:$0xff]  }
 0x53e   :  { %6427 = vrcp.f32 %v841_v30  ;;  %v6067_v30 = vld [vmem:[%s9250_s2 + $0x60] ss:$16 sps:$4 sm:$0xff]  }
 0x53f   :  { %6429 = vrcp.f32 %v848_v36  ;;  %v6081_v36 = vld [vmem:[%s9250_s2 + $0xa4] ss:$16 sps:$4 sm:$0xff]  }
 0x547   :  { %v6426_v24 = vpop.eup %6425 }
 0x548   :  { %v6428_v25 = vpop.eup %6427  ;;  %v852_v31 = vmul.f32 %v6426_v24, %v6424_v22  ;;  %v6075_v22 = vld [vmem:[%s9250_s2 + $0x84] ss:$16 sps:$4 sm:$0xff]   ;;  %v6078_v24 = vld [vmem:[%s9250_s2 + $0x8c] ss:$16 sps:$4 sm:$0xff]  }
 0x549   :  { %v851_v1 = vmul.f32 %v6428_v25, %v7439_v35  ;;  %v6430_v42 = vpop.eup %6429  ;;  %v6073_v25 = vld [vmem:[%s9250_s2 + $0x80] ss:$16 sps:$4 sm:$0xff]  }
 0x54b   :  { %v7503_v41 = vadd.f32 %v852_v31, %v851_v1  ;;  %v6076_v31 = vld [vmem:[%s9250_s2 + $0x88] ss:$16 sps:$4 sm:$0xff]   ;;  %v6084_v1 = vld [vmem:[%s9250_s2 + $0xac] ss:$16 sps:$4 sm:$0xff]  }
 0x54d   :  { %6431 = vtanh.f32 %v7503_v41 }
 0x557   :  { %v6432_v8 = vpop.eup %6431 }
 0x558   :  { %v855_v34 = vmul.f32 %v6432_v8, %v6430_v42  ;;  %v6082_v42 = vld [vmem:[%s9250_s2 + $0xa8] ss:$16 sps:$4 sm:$0xff]   ;;  %v6087_v8 = vld [vmem:[%s9250_s2 + $0xc4] ss:$16 sps:$4 sm:$0xff]  }
 0x55a   :  { %v856_v9 = vpack.c.bf16 %v855_v34, %v855_v34  ;;  %v6090_v34 = vld [vmem:[%s9250_s2 + $0xcc] ss:$16 sps:$4 sm:$0xff]  }
 0x55c   :  { %v858_v40 = vrot.slane %v856_v9, 4  ;;  %898 = vmatmul.mubr.bf16.vlgmr.msra.gmra.mrb[20].mxu0 %v856_v9  ;;  %939 = vmatmul.mubr.bf16.vlgmr.msra.gmra.mrb[20].mxu1 %v856_v9  ;;  %v6085_v9 = vld [vmem:[%s9250_s2 + $0xc0] ss:$16 sps:$4 sm:$0xff]  }
 0x55d   :  { %982 = vmatpush1.bf16.msra.mxu0 %v7344_v45  ;;  %1023 = vmatpush1.bf16.msra.mxu1 %v7347_v46  ;;  %v6051_v45 = vld [vmem:[%s9250_s2 + $0x4] ss:$16 sps:$4 sm:$0xff]   ;;  %v6054_v46 = vld [vmem:[%s9250_s2 + $0xc] ss:$16 sps:$4 sm:$0xff]  }
 0x55e   :  { %860 = vst [vmem:[#allocation2 + $0x10] sm:$0xf0] %v858_v40  ;;  %983 = vmatprep.subr.bf16.mxu0 %v7350_v47  ;;  %1024 = vmatprep.subr.bf16.mxu1 %v7353_v48  ;;  %v861_v47 = vld [vmem:[%s9248_s0 + $0xc0] sm:$0xff]  ;;  %v862_v48 = vld [vmem:[%s9248_s0 + $0xc8] sm:$0xff] }
 0x55f   :  { %1013 = vmatprep.mubr.bf16.mxu0 %v9259_v0  ;;  %1054 = vmatprep.mubr.bf16.mxu1 %v9259_v0  ;;  %v6088_v40 = vld [vmem:[%s9250_s2 + $0xc8] ss:$16 sps:$4 sm:$0xff]  }
 0x561   :  { %984 = vmatpush1.bf16.msra.mxu0 %v7358_v49  ;;  %1025 = vmatpush1.bf16.msra.mxu1 %v7361_v50 }
 0x562   :  { %985 = vmatprep.subr.bf16.mxu0 %v7364_v52  ;;  %1026 = vmatprep.subr.bf16.mxu1 %v7367_v53 }
 0x565   :  { %986 = vmatpush1.bf16.msra.mxu0 %v7370_v54  ;;  %1027 = vmatpush1.bf16.msra.mxu1 %v7373_v55 }
 0x566   :  { %987 = vmatprep.subr.bf16.mxu0 %v7376_v57  ;;  %1028 = vmatprep.subr.bf16.mxu1 %v7379_v58 }
 0x569   :  { %988 = vmatpush1.bf16.msra.mxu0 %v7382_v59  ;;  %1029 = vmatpush1.bf16.msra.mxu1 %v7385_v60 }
 0x56a   :  { %989 = vmatprep.subr.bf16.mxu0 %v7388_v61  ;;  %1030 = vmatprep.subr.bf16.mxu1 %v7391_v51 }
 0x56d   :  { %990 = vmatpush1.bf16.msra.mxu0 %v7394_v62  ;;  %1031 = vmatpush1.bf16.msra.mxu1 %v7397_v63  ;;  %v864_v62 = vld [vmem:[%s9248_s0 + $0xd8] sm:$0xff] }
 0x56e   :  { %991 = vmatprep.subr.bf16.mxu0 %v7400_v21  ;;  %1032 = vmatprep.subr.bf16.mxu1 %v7463_v39  ;;  %v863_v21 = vld [vmem:[%s9248_s0 + $0xd0] sm:$0xff] }
 0x571   :  { %992 = vmatpush1.bf16.msra.mxu0 %v7404_v3  ;;  %1033 = vmatpush1.bf16.msra.mxu1 %v7467_v43 }
 0x572   :  { %993 = vmatprep.subr.bf16.mxu0 %v7408_v4  ;;  %1034 = vmatprep.subr.bf16.mxu1 %v7471_v44 }
 0x575   :  { %994 = vmatpush1.bf16.msra.mxu0 %v7412_v5  ;;  %1035 = vmatpush1.bf16.msra.mxu1 %v7475_v32 }
 0x576   :  { %995 = vmatprep.subr.bf16.mxu0 %v7416_v7  ;;  %1036 = vmatprep.subr.bf16.mxu1 %v7479_v33 }
 0x579   :  { %996 = vmatpush1.bf16.msra.mxu0 %v7482_v37  ;;  %1037 = vmatpush1.bf16.msra.mxu1 %v7485_v38 }
 0x57a   :  { %1314 = vmatprep.subr.bf16.mxu0 %v6051_v45  ;;  %1387 = vmatprep.subr.bf16.mxu1 %v6054_v46  ;;  %v6093_v45 = vld [vmem:[%s9250_s2 + $0xe4] ss:$16 sps:$4 sm:$0xff]   ;;  %v6096_v46 = vld [vmem:[%s9250_s2 + $0xec] ss:$16 sps:$4 sm:$0xff]  }
 0x62f   :  { %v899_v49 = vpop.f32.mrb[20].mxu0  ;;  %v940_v50 = vpop.f32.mrb[20].mxu1 }
 0x630   :  { %v947_v52 = vadd.f32 %v899_v49, %v861_v47  ;;  %v901_v53 = vpop.f32.mrb[21].mxu0  ;;  %v942_v54 = vpop.f32.mrb[21].mxu1  ;;  %v949_v4 = vadd.f32 %v940_v50, %v863_v21  ;;  %v6091_v47 = vld [vmem:[%s9250_s2 + $0xe0] ss:$16 sps:$4 sm:$0xff]   ;;  %v1097_v50 = vld [vmem:[#allocation2 + $0x8] sm:$0xff] }
 0x631   :  { %v948_v55 = vadd.f32 %v901_v53, %v862_v48  ;;  %v903_v57 = vpop.f32.mrb[22].mxu0  ;;  %v944_v58 = vpop.f32.mrb[22].mxu1  ;;  %v950_v63 = vadd.f32 %v942_v54, %v864_v62  ;;  %v6094_v48 = vld [vmem:[%s9250_s2 + $0xe8] ss:$16 sps:$4 sm:$0xff]   ;;  %v1096_v49 = vld [vmem:[#allocation2] sm:$0xff] }
 0x632   :  { %v5581_v59 = vmul.f32 -1.442695, %v947_v52  ;;  %v904_v60 = vpop.f32.mrb[23].mxu0  ;;  %v945_v61 = vpop.f32.mrb[23].mxu1  ;;  %v1098_v52 = vld [vmem:[#allocation2 + $0x10] sm:$0xff] }
 0x633   :  { %v5582_v51 = vmul.f32 -1.442695, %v948_v55  ;;  %v5583_v3 = vmul.f32 -1.442695, %v950_v63  ;;  %v7658_v53 = vld [vmem:[#allocation4 + $0x104] ss:$16 sps:$4 sm:$0xff]  }
 0x634   :  { %6433 = vpow2.f32 %v5581_v59  ;;  %v7660_v54 = vld [vmem:[#allocation4 + $0x10c] ss:$16 sps:$4 sm:$0xff]   ;;  %v7662_v55 = vld [vmem:[#allocation4 + $0x100] ss:$16 sps:$4 sm:$0xff]   ;;  %v7664_v57 = vld [vmem:[#allocation4 + $0x108] ss:$16 sps:$4 sm:$0xff]  }
 0x635   :  { %6435 = vpow2.f32 %v5582_v51  ;;  %v7670_v58 = vld [vmem:[#allocation4 + $0x124] ss:$16 sps:$4 sm:$0xff]   ;;  %v7672_v59 = vld [vmem:[#allocation4 + $0x12c] ss:$16 sps:$4 sm:$0xff]   ;;  %v7674_v60 = vld [vmem:[#allocation4 + $0x120] ss:$16 sps:$4 sm:$0xff]  }
 0x636   :  { %6437 = vpow2.f32 %v5583_v3  ;;  %v7676_v61 = vld [vmem:[#allocation4 + $0x128] ss:$16 sps:$4 sm:$0xff]   ;;  %v7682_v51 = vld [vmem:[#allocation4 + $0x144] ss:$16 sps:$4 sm:$0xff]   ;;  %v7684_v62 = vld [vmem:[#allocation4 + $0x14c] ss:$16 sps:$4 sm:$0xff]  }
 0x637   :  { %6439 = vtanh.f32 %v949_v4  ;;  %v7686_v63 = vld [vmem:[#allocation4 + $0x140] ss:$16 sps:$4 sm:$0xff]   ;;  %v7688_v21 = vld [vmem:[#allocation4 + $0x148] ss:$16 sps:$4 sm:$0xff]   ;;  %v7694_v3 = vld [vmem:[#allocation4 + $0x164] ss:$16 sps:$4 sm:$0xff]  }
 0x638   :  { %v7696_v4 = vld [vmem:[#allocation4 + $0x16c] ss:$16 sps:$4 sm:$0xff]  }
 0x63e   :  { %v6434_v5 = vpop.eup %6433 }
 0x63f   :  { %v6436_v7 = vpop.eup %6435  ;;  %v954_v35 = vadd.f32 1.0, %v6434_v5  ;;  %v7698_v5 = vld [vmem:[#allocation4 + $0x160] ss:$16 sps:$4 sm:$0xff]  }
 0x640   :  { %v960_v39 = vadd.f32 1.0, %v6436_v7  ;;  %v6438_v43 = vpop.eup %6437  ;;  %v7700_v7 = vld [vmem:[#allocation4 + $0x168] ss:$16 sps:$4 sm:$0xff]  }
 0x641   :  { %6441 = vrcp.f32 %v954_v35  ;;  %v6440_v44 = vpop.eup %6439  ;;  %v967_v38 = vadd.f32 1.0, %v6438_v43  ;;  %v7706_v35 = vld [vmem:[#allocation4 + $0x184] ss:$16 sps:$4 sm:$0xff]   ;;  %v7710_v43 = vld [vmem:[#allocation4 + $0x180] ss:$16 sps:$4 sm:$0xff]  }
 0x642   :  { %6443 = vrcp.f32 %v960_v39  ;;  %v7708_v39 = vld [vmem:[#allocation4 + $0x18c] ss:$16 sps:$4 sm:$0xff]  }
 0x643   :  { %6445 = vrcp.f32 %v967_v38  ;;  %v7724_v38 = vld [vmem:[#allocation4 + $0x1a8] ss:$16 sps:$4 sm:$0xff]  }
 0x64b   :  { %v6442_v32 = vpop.eup %6441 }
 0x64c   :  { %v6444_v33 = vpop.eup %6443  ;;  %v971_v37 = vmul.f32 %v6442_v32, %v6440_v44  ;;  %v7712_v44 = vld [vmem:[#allocation4 + $0x188] ss:$16 sps:$4 sm:$0xff]   ;;  %v7716_v32 = vld [vmem:[#allocation4 + $0x1a4] ss:$16 sps:$4 sm:$0xff]  }
 0x64d   :  { %v970_v10 = vmul.f32 %v6444_v33, %v7503_v41  ;;  %v6446_v12 = vpop.eup %6445  ;;  %v6079_v41 = vld [vmem:[%s9250_s2 + $0xa0] ss:$16 sps:$4 sm:$0xff]   ;;  %v7718_v33 = vld [vmem:[#allocation4 + $0x1ac] ss:$16 sps:$4 sm:$0xff]  }
 0x64f   :  { %v7557_v11 = vadd.f32 %v971_v37, %v970_v10  ;;  %v7722_v37 = vld [vmem:[#allocation4 + $0x1a0] ss:$16 sps:$4 sm:$0xff]   ;;  %v7728_v10 = vld [vmem:[#allocation4 + $0x1c4] ss:$16 sps:$4 sm:$0xff]  }
 0x651   :  { %6447 = vtanh.f32 %v7557_v11 }
 0x65b   :  { %v6448_v13 = vpop.eup %6447 }
 0x65c   :  { %v974_v14 = vmul.f32 %v6448_v13, %v6446_v12  ;;  %v7730_v12 = vld [vmem:[#allocation4 + $0x1cc] ss:$16 sps:$4 sm:$0xff]   ;;  %v7734_v13 = vld [vmem:[#allocation4 + $0x1c0] ss:$16 sps:$4 sm:$0xff]  }
 0x65e   :  { %v975_v2 = vpack.c.bf16 %v974_v14, %v974_v14  ;;  %v7736_v14 = vld [vmem:[#allocation4 + $0x1c8] ss:$16 sps:$4 sm:$0xff]  }
 0x660   :  { %976 = vst [vmem:[#allocation2 + $0x18] sm:$0xf] %v975_v2  ;;  %1014 = vmatmul.mubr.bf16.vlgmr.msra.gmra.mrb[24].mxu0 %v975_v2  ;;  %1055 = vmatmul.mubr.bf16.vlgmr.msra.gmra.mrb[24].mxu1 %v975_v2  ;;  %v7746_v2 = vld [vmem:[#allocation4 + $0x1e0] ss:$16 sps:$4 sm:$0xff]  }
 0x661   :  { %1315 = vmatpush1.bf16.msra.mxu0 %v6049_v15  ;;  %1388 = vmatpush1.bf16.msra.mxu1 %v6052_v16  ;;  %v7740_v15 = vld [vmem:[#allocation4 + $0x1e4] ss:$16 sps:$4 sm:$0xff]   ;;  %v7742_v16 = vld [vmem:[#allocation4 + $0x1ec] ss:$16 sps:$4 sm:$0xff]  }
 0x662   :  { %1316 = vmatprep.subr.bf16.mxu0 %v6057_v6  ;;  %1389 = vmatprep.subr.bf16.mxu1 %v6060_v29  ;;  %v7748_v6 = vld [vmem:[#allocation4 + $0x1e8] ss:$16 sps:$4 sm:$0xff]   ;;  %v977_v29 = vld [vmem:[%s9248_s0 + $0xe0] sm:$0xff] }
 0x663   :  { %1346 = vmatprep.mubr.bf16.mxu0 %v9259_v0  ;;  %1419 = vmatprep.mubr.bf16.mxu1 %v9259_v0 }
 0x665   :  { %1317 = vmatpush1.bf16.msra.mxu0 %v6055_v17  ;;  %1390 = vmatpush1.bf16.msra.mxu1 %v6058_v18  ;;  %v978_v17 = vld [vmem:[%s9248_s0 + $0xe8] sm:$0xff] }
 0x666   :  { %1318 = vmatprep.subr.bf16.mxu0 %v6063_v19  ;;  %1391 = vmatprep.subr.bf16.mxu1 %v6066_v20 }
 0x669   :  { %1319 = vmatpush1.bf16.msra.mxu0 %v6061_v23  ;;  %1392 = vmatpush1.bf16.msra.mxu1 %v6064_v26 }
 0x66a   :  { %1320 = vmatprep.subr.bf16.mxu0 %v6069_v27  ;;  %1393 = vmatprep.subr.bf16.mxu1 %v6072_v28 }
 0x66d   :  { %1321 = vmatpush1.bf16.msra.mxu0 %v6067_v30  ;;  %1394 = vmatpush1.bf16.msra.mxu1 %v6070_v56 }
 0x66e   :  { %1322 = vmatprep.subr.bf16.mxu0 %v6075_v22  ;;  %1395 = vmatprep.subr.bf16.mxu1 %v6078_v24 }
 0x671   :  { %1323 = vmatpush1.bf16.msra.mxu0 %v6073_v25  ;;  %1396 = vmatpush1.bf16.msra.mxu1 %v6076_v31  ;;  %v980_v31 = vld [vmem:[%s9248_s0 + $0xf8] sm:$0xff] }
 0x672   :  { %1324 = vmatprep.subr.bf16.mxu0 %v6081_v36  ;;  %1397 = vmatprep.subr.bf16.mxu1 %v6084_v1  ;;  %v979_v1 = vld [vmem:[%s9248_s0 + $0xf0] sm:$0xff] }
 0x675   :  { %1325 = vmatpush1.bf16.msra.mxu0 %v6079_v41  ;;  %1398 = vmatpush1.bf16.msra.mxu1 %v6082_v42 }
 0x676   :  { %1326 = vmatprep.subr.bf16.mxu0 %v6087_v8  ;;  %1399 = vmatprep.subr.bf16.mxu1 %v6090_v34 }
 0x679   :  { %1327 = vmatpush1.bf16.msra.mxu0 %v6085_v9  ;;  %1400 = vmatpush1.bf16.msra.mxu1 %v6088_v40 }
 0x67a   :  { %1328 = vmatprep.subr.bf16.mxu0 %v6093_v45  ;;  %1401 = vmatprep.subr.bf16.mxu1 %v6096_v46  ;;  %v1134_v45 = vlaneseq }
 0x67c   :  { %v1135_v46 = vshrl.u32 %v1134_v45, 7 }
 0x67d   :  { %1329 = vmatpush1.bf16.msra.mxu0 %v6091_v47  ;;  %1402 = vmatpush1.bf16.msra.mxu1 %v6094_v48 }
 0x67e   :  { %1719 = vmatprep.subr.bf16.mxu0 %v7658_v53  ;;  %1760 = vmatprep.subr.bf16.mxu1 %v7660_v54  ;;  %v7768_v47 = vsub.s32 0, %v1135_v46 }
 0x680   :  { %1347 = vmatmul.mubr.bf16.vlgmr.msra.gmra.mrb[28].mxu0 %v1096_v49  ;;  %1420 = vmatmul.mubr.bf16.vlgmr.msra.gmra.mrb[28].mxu1 %v1096_v49  ;;  %9269 = vst [vmem:[#allocation7_spill] sm:$0xff] %v7768_v47  ;;  %v1132_v49 = vld [vmem:[%s9251_s3] sm:$0xf] }
 0x681   :  { %1356 = vmatprep.mubr.bf16.mxu0 %v9259_v0  ;;  %1429 = vmatprep.mubr.bf16.mxu1 %v9259_v0 }
 0x682   :  { %1720 = vmatpush1.bf16.msra.mxu0 %v7662_v55  ;;  %1761 = vmatpush1.bf16.msra.mxu1 %v7664_v57 }
 0x683   :  { %1721 = vmatprep.subr.bf16.mxu0 %v7670_v58  ;;  %1762 = vmatprep.subr.bf16.mxu1 %v7672_v59 }
 0x686   :  { %1722 = vmatpush1.bf16.msra.mxu0 %v7674_v60  ;;  %1763 = vmatpush1.bf16.msra.mxu1 %v7676_v61 }
 0x687   :  { %1723 = vmatprep.subr.bf16.mxu0 %v7682_v51  ;;  %1764 = vmatprep.subr.bf16.mxu1 %v7684_v62 }
 0x688   :  { %1357 = vmatmul.mubr.bf16.gmra.mrb[32].mxu0 %v1097_v50  ;;  %1430 = vmatmul.mubr.bf16.gmra.mrb[32].mxu1 %v1097_v50  ;;  %v7773_v50 = vsub.s32 1, %v1135_v46 }
 0x689   :  { %1366 = vmatprep.mubr.bf16.mxu0 %v9259_v0  ;;  %1439 = vmatprep.mubr.bf16.mxu1 %v9259_v0 }
 0x68a   :  { %1724 = vmatpush1.bf16.msra.mxu0 %v7686_v63  ;;  %1765 = vmatpush1.bf16.msra.mxu1 %v7688_v21  ;;  %9270 = vst [vmem:[#allocation8_spill] sm:$0xff] %v7773_v50 }
 0x68b   :  { %1725 = vmatprep.subr.bf16.mxu0 %v7694_v3  ;;  %1766 = vmatprep.subr.bf16.mxu1 %v7696_v4 }
 0x68e   :  { %1726 = vmatpush1.bf16.msra.mxu0 %v7698_v5  ;;  %1767 = vmatpush1.bf16.msra.mxu1 %v7700_v7 }
 0x68f   :  { %1727 = vmatprep.subr.bf16.mxu0 %v7706_v35  ;;  %1768 = vmatprep.subr.bf16.mxu1 %v7708_v39 }
 0x690   :  { %1367 = vmatmul.mubr.bf16.gmra.mrb[36].mxu0 %v1098_v52  ;;  %1440 = vmatmul.mubr.bf16.gmra.mrb[36].mxu1 %v1098_v52 }
 0x691   :  { %1376 = vmatprep.mubr.bf16.mxu0 %v9259_v0  ;;  %1449 = vmatprep.mubr.bf16.mxu1 %v9259_v0 }
 0x692   :  { %1728 = vmatpush1.bf16.msra.mxu0 %v7710_v43  ;;  %1769 = vmatpush1.bf16.msra.mxu1 %v7712_v44 }
 0x693   :  { %1729 = vmatprep.subr.bf16.mxu0 %v7716_v32  ;;  %1770 = vmatprep.subr.bf16.mxu1 %v7718_v33 }
 0x696   :  { %1730 = vmatpush1.bf16.msra.mxu0 %v7722_v37  ;;  %1771 = vmatpush1.bf16.msra.mxu1 %v7724_v38 }
 0x697   :  { %1731 = vmatprep.subr.bf16.mxu0 %v7728_v10  ;;  %1772 = vmatprep.subr.bf16.mxu1 %v7730_v12 }
 0x69a   :  { %1732 = vmatpush1.bf16.msra.mxu0 %v7734_v13  ;;  %1773 = vmatpush1.bf16.msra.mxu1 %v7736_v14 }
 0x69b   :  { %1733 = vmatprep.subr.bf16.mxu0 %v7740_v15  ;;  %1774 = vmatprep.subr.bf16.mxu1 %v7742_v16 }
 0x69e   :  { %1734 = vmatpush1.bf16.msra.mxu0 %v7746_v2  ;;  %1775 = vmatpush1.bf16.msra.mxu1 %v7748_v6 }
 0x69f   :  { %1838 = vmatprep.subr.bf16.mxu0 %v7658_v53  ;;  %1879 = vmatprep.subr.bf16.mxu1 %v7660_v54 }
 0x733   :  { %v1015_v18 = vpop.f32.mrb[24].mxu0  ;;  %v1056_v19 = vpop.f32.mrb[24].mxu1 }
 0x734   :  { %v1063_v20 = vadd.f32 %v1015_v18, %v977_v29  ;;  %v1017_v23 = vpop.f32.mrb[25].mxu0  ;;  %v1058_v26 = vpop.f32.mrb[25].mxu1  ;;  %v1065_v42 = vadd.f32 %v1056_v19, %v979_v1 }
 0x735   :  { %v1064_v27 = vadd.f32 %v1017_v23, %v978_v17  ;;  %v1019_v28 = vpop.f32.mrb[26].mxu0  ;;  %v1060_v30 = vpop.f32.mrb[26].mxu1  ;;  %v1066_v36 = vadd.f32 %v1058_v26, %v980_v31  ;;  %v7780_v26 = vrot.slane %v1132_v49, %v7773_v50 }
 0x736   :  { %v5584_v56 = vmul.f32 -1.442695, %v1063_v20  ;;  %v1020_v22 = vpop.f32.mrb[27].mxu0  ;;  %v1061_v24 = vpop.f32.mrb[27].mxu1  ;;  %v7776_v20 = vrot.slane %v1132_v49, %v7768_v47 }
 0x737   :  { %v5585_v25 = vmul.f32 -1.442695, %v1064_v27  ;;  %v5586_v41 = vmul.f32 -1.442695, %v1066_v36 }
 0x738   :  { %6449 = vpow2.f32 %v5584_v56  ;;  %v7782_v56 = vsub.s32 3, %v1135_v46 }
 0x739   :  { %6451 = vpow2.f32 %v5585_v25 }
 0x73a   :  { %6453 = vpow2.f32 %v5586_v41  ;;  %9271 = vst [vmem:[#allocation9_spill] sm:$0xff] %v7782_v56 }
 0x73b   :  { %6455 = vtanh.f32 %v1065_v42 }
 0x742   :  { %v6450_v8 = vpop.eup %6449 }
 0x743   :  { %v6452_v34 = vpop.eup %6451  ;;  %v1070_v9 = vadd.f32 1.0, %v6450_v8 }
 0x744   :  { %v1076_v40 = vadd.f32 1.0, %v6452_v34  ;;  %v6454_v48 = vpop.eup %6453  ;;  %v7795_v34 = vrot.slane %v1132_v49, %v7782_v56 }
 0x745   :  { %6457 = vrcp.f32 %v1070_v9  ;;  %v6456_v52 = vpop.eup %6455  ;;  %v1083_v19 = vadd.f32 1.0, %v6454_v48  ;;  %v7797_v9 = vsub.s32 2, %v1135_v46 }
 0x746   :  { %6459 = vrcp.f32 %v1076_v40 }
 0x747   :  { %6461 = vrcp.f32 %v1083_v19  ;;  %9272 = vst [vmem:[#allocation10_spill] sm:$0xff] %v7797_v9 }
 0x74f   :  { %v6458_v29 = vpop.eup %6457 }
 0x750   :  { %v6460_v17 = vpop.eup %6459  ;;  %v1087_v18 = vmul.f32 %v6458_v29, %v6456_v52  ;;  %v7805_v52 = vrot.slane %v1132_v49, %v7797_v9 }
 0x751   :  { %v1086_v23 = vmul.f32 %v6460_v17, %v7557_v11  ;;  %v6462_v46 = vpop.eup %6461 }
 0x753   :  { %v1088_v27 = vadd.f32 %v1087_v18, %v1086_v23  ;;  %v1348_v28 = vpop.f32.mrb[28].mxu0  ;;  %v1421_v30 = vpop.f32.mrb[28].mxu1 }
 0x754   :  { %v1349_v22 = vadd.f32 %v1348_v28, %v7776_v20  ;;  %v1350_v24 = vpop.f32.mrb[29].mxu0  ;;  %v1423_v25 = vpop.f32.mrb[29].mxu1 }
 0x755   :  { %6463 = vtanh.f32 %v1088_v27  ;;  %v1351_v31 = vadd.f32 %v1350_v24, %v7780_v26  ;;  %v7786_v36 = vpop.f32.mrb[30].mxu0  ;;  %v7788_v1 = vpop.f32.mrb[30].mxu1  ;;  %v1424_v40 = vadd.f32 %v1423_v25, %v7795_v34  ;;  %v1422_v25 = vadd.f32 %v1421_v30, %v7805_v52 }
 0x756   :  { %v5619_v11 = vmul.f32 -1.442695, %v1349_v22  ;;  %v7790_v41 = vpop.f32.mrb[31].mxu0  ;;  %v7792_v42 = vpop.f32.mrb[31].mxu1 }
 0x757   :  { %v5620_v8 = vmul.f32 -1.442695, %v1351_v31  ;;  %v5621_v22 = vmul.f32 -1.442695, %v1424_v40 }
 0x758   :  { %6465 = vpow2.f32 %v5619_v11 }
 0x759   :  { %6467 = vpow2.f32 %v5620_v8 }
 0x75a   :  { %6469 = vpow2.f32 %v5621_v22 }
 0x75b   :  { %v7800_v45 = vpop.f32.mrb[32].mxu0  ;;  %v7802_v48 = vpop.f32.mrb[32].mxu1  ;;  %6471 = vtanh.f32 %v1422_v25 }
 0x75c   :  { %v7807_v29 = vpop.f32.mrb[33].mxu0  ;;  %v7809_v17 = vpop.f32.mrb[33].mxu1 }
 0x75d   :  { %v7811_v18 = vpop.f32.mrb[34].mxu0  ;;  %v7813_v19 = vpop.f32.mrb[34].mxu1 }
 0x75e   :  { %9273 = vst [vmem:[#allocation11_spill] sm:$0xff] %v7811_v18  ;;  %9274 = vst [vmem:[#allocation12_spill] sm:$0xff] %v7813_v19  ;;  %v7815_v23 = vpop.f32.mrb[35].mxu0  ;;  %v7817_v27 = vpop.f32.mrb[35].mxu1 }
 0x75f   :  { %9275 = vst [vmem:[#allocation13_spill] sm:$0xff] %v7815_v23  ;;  %9276 = vst [vmem:[#allocation14_spill] sm:$0xff] %v7817_v27  ;;  %v6464_v28 = vpop.eup %6463 }
 0x760   :  { %v1090_v24 = vmul.f32 %v6464_v28, %v6462_v46 }
 0x762   :  { %v6466_v49 = vpop.eup %6465  ;;  %v1091_v31 = vpack.c.bf16 %v1090_v24, %v1090_v24 }
 0x763   :  { %v6468_v11 = vpop.eup %6467  ;;  %v1532_v8 = vadd.f32 1.0, %v6466_v49  ;;  %v7820_v0 = vpop.f32.mrb[36].mxu0 }
 0x764   :  { %9277 = vst [vmem:[#allocation15_spill] sm:$0xff] %v7820_v0  ;;  %v7822_v9 = vpop.f32.mrb[36].mxu1  ;;  %v1093_v56 = vrot.slane %v1091_v31, 4  ;;  %v1538_v50 = vadd.f32 1.0, %v6468_v11  ;;  %v7824_v47 = vpop.f32.mrb[37].mxu0  ;;  %v9285_v31 = vmov 0  }
 0x765   :  { %9278 = vst [vmem:[#allocation16_spill] sm:$0xff] %v7822_v9  ;;  %9279 = vst [vmem:[#allocation17_spill] sm:$0xff] %v7824_v47  ;;  %v7826_v27 = vpop.f32.mrb[37].mxu1  ;;  %6473 = vrcp.f32 %v1532_v8  ;;  %v7828_v40 = vpop.f32.mrb[38].mxu0 }
 0x766   :  { %9280 = vst [vmem:[#allocation18_spill] sm:$0xff] %v7826_v27  ;;  %9281 = vst [vmem:[#allocation19_spill] sm:$0xff] %v7828_v40  ;;  %v7830_v30 = vpop.f32.mrb[38].mxu1  ;;  %6475 = vrcp.f32 %v1538_v50  ;;  %v7832_v46 = vpop.f32.mrb[39].mxu0 }
 0x767   :  { %9282 = vst [vmem:[#allocation20_spill] sm:$0xff] %v7830_v30  ;;  %1095 = vst [vmem:[#allocation2 + $0x18] sm:$0xf0] %v1093_v56  ;;  %v7834_v28 = vpop.f32.mrb[39].mxu1  ;;  %v6470_v22 = vpop.eup %6469 }
 0x768   :  { %9283 = vst [vmem:[#allocation21_spill] sm:$0xff] %v7832_v46  ;;  %9284 = vst [vmem:[#allocation22_spill] sm:$0xff] %v7834_v28  ;;  %v6472_v49 = vpop.eup %6471  ;;  %v1545_v40 = vadd.f32 1.0, %v6470_v22 }
 0x76a   :  { %6477 = vrcp.f32 %v1545_v40 }
 0x76e   :  { %v1099_v24 = vld [vmem:[#allocation2 + $0x18] sm:$0xff] }
 0x76f   :  { %1377 = vmatmul.mubr.bf16.gmra.mrb[40].mxu0 %v1099_v24  ;;  %1450 = vmatmul.mubr.bf16.gmra.mrb[40].mxu1 %v1099_v24  ;;  %v6474_v25 = vpop.eup %6473 }
 0x770   :  { %1751 = vmatprep.mubr.bf16.mxu0 %v9285_v31  ;;  %1792 = vmatprep.mubr.bf16.mxu1 %v9285_v31  ;;  %v6476_v11 = vpop.eup %6475  ;;  %v1549_v8 = vmul.f32 %v6474_v25, %v6472_v49  ;;  %v1353_v25 = vadd.f32 %v7786_v36, %v7776_v20 }
 0x771   :  { %v1548_v30 = vmul.f32 0.0, %v6476_v11  ;;  %v1426_v11 = vadd.f32 %v7788_v1, %v7805_v52 }
 0x773   :  { %v7838_v56 = vadd.f32 %v1549_v8, %v1548_v30  ;;  %v1355_v8 = vadd.f32 %v7790_v41, %v7780_v26 }
 0x774   :  { %v6478_v50 = vpop.eup %6477 }
 0x775   :  { %6479 = vtanh.f32 %v7838_v56 }
 0x77f   :  { %v6480_v28 = vpop.eup %6479 }
 0x780   :  { %v1552_v46 = vmul.f32 %v6480_v28, %v6478_v50  ;;  %v1428_v50 = vadd.f32 %v7792_v42, %v7795_v34 }
 0x782   :  { %v1553_v27 = vpack.c.bf16 %v1552_v46, %v1552_v46 }
 0x784   :  { %1554 = vst [vmem:[#allocation2] sm:$0xf] %v1553_v27  ;;  %1752 = vmatmul.mubr.bf16.vlgmr.msra.gmra.mrb[44].mxu0 %v1553_v27  ;;  %1793 = vmatmul.mubr.bf16.vlgmr.msra.gmra.mrb[44].mxu1 %v1553_v27 }
 0x785   :  { %1839 = vmatpush1.bf16.msra.mxu0 %v7662_v55  ;;  %1880 = vmatpush1.bf16.msra.mxu1 %v7664_v57 }
 0x786   :  { %1840 = vmatprep.subr.bf16.mxu0 %v7670_v58  ;;  %1881 = vmatprep.subr.bf16.mxu1 %v7672_v59 }
 0x787   :  { %1870 = vmatprep.mubr.bf16.mxu0 %v9285_v31  ;;  %1911 = vmatprep.mubr.bf16.mxu1 %v9285_v31 }
 0x789   :  { %1841 = vmatpush1.bf16.msra.mxu0 %v7674_v60  ;;  %1882 = vmatpush1.bf16.msra.mxu1 %v7676_v61 }
 0x78a   :  { %1842 = vmatprep.subr.bf16.mxu0 %v7682_v51  ;;  %1883 = vmatprep.subr.bf16.mxu1 %v7684_v62 }
 0x78d   :  { %1843 = vmatpush1.bf16.msra.mxu0 %v7686_v63  ;;  %1884 = vmatpush1.bf16.msra.mxu1 %v7688_v21 }
 0x78e   :  { %1844 = vmatprep.subr.bf16.mxu0 %v7694_v3  ;;  %1885 = vmatprep.subr.bf16.mxu1 %v7696_v4 }
 0x791   :  { %1845 = vmatpush1.bf16.msra.mxu0 %v7698_v5  ;;  %1886 = vmatpush1.bf16.msra.mxu1 %v7700_v7 }
 0x792   :  { %1846 = vmatprep.subr.bf16.mxu0 %v7706_v35  ;;  %1887 = vmatprep.subr.bf16.mxu1 %v7708_v39 }
 0x795   :  { %1847 = vmatpush1.bf16.msra.mxu0 %v7710_v43  ;;  %1888 = vmatpush1.bf16.msra.mxu1 %v7712_v44 }
 0x796   :  { %1848 = vmatprep.subr.bf16.mxu0 %v7716_v32  ;;  %1889 = vmatprep.subr.bf16.mxu1 %v7718_v33 }
 0x799   :  { %1849 = vmatpush1.bf16.msra.mxu0 %v7722_v37  ;;  %1890 = vmatpush1.bf16.msra.mxu1 %v7724_v38 }
 0x79a   :  { %1850 = vmatprep.subr.bf16.mxu0 %v7728_v10  ;;  %1891 = vmatprep.subr.bf16.mxu1 %v7730_v12 }
 0x79d   :  { %1851 = vmatpush1.bf16.msra.mxu0 %v7734_v13  ;;  %1892 = vmatpush1.bf16.msra.mxu1 %v7736_v14 }
 0x79e   :  { %1852 = vmatprep.subr.bf16.mxu0 %v7740_v15  ;;  %1893 = vmatprep.subr.bf16.mxu1 %v7742_v16 }
 0x7a1   :  { %1853 = vmatpush1.bf16.msra.mxu0 %v7746_v2  ;;  %1894 = vmatpush1.bf16.msra.mxu1 %v7748_v6 }
 0x7a2   :  { %1954 = vmatprep.subr.bf16.mxu0 %v7658_v53  ;;  %1995 = vmatprep.subr.bf16.mxu1 %v7660_v54 }
 0x842   :  { %v7875_v27 = vpop.f32.mrb[40].mxu0  ;;  %v7877_v40 = vpop.f32.mrb[40].mxu1 }
 0x843   :  { %9286 = vst [vmem:[#allocation23_spill] sm:$0xff] %v7875_v27  ;;  %9287 = vst [vmem:[#allocation24_spill] sm:$0xff] %v7877_v40  ;;  %v7879_v30 = vpop.f32.mrb[41].mxu0  ;;  %v7881_v46 = vpop.f32.mrb[41].mxu1 }
 0x844   :  { %9288 = vst [vmem:[#allocation25_spill] sm:$0xff] %v7879_v30  ;;  %9289 = vst [vmem:[#allocation26_spill] sm:$0xff] %v7881_v46  ;;  %v7883_v28 = vpop.f32.mrb[42].mxu0  ;;  %v7885_v22 = vpop.f32.mrb[42].mxu1 }
 0x845   :  { %9290 = vst [vmem:[#allocation27_spill] sm:$0xff] %v7883_v28  ;;  %9291 = vst [vmem:[#allocation28_spill] sm:$0xff] %v7885_v22  ;;  %v7887_v24 = vpop.f32.mrb[43].mxu0  ;;  %v7889_v49 = vpop.f32.mrb[43].mxu1 }
 0x846   :  { %9292 = vst [vmem:[#allocation29_spill] sm:$0xff] %v7887_v24  ;;  %9293 = vst [vmem:[#allocation30_spill] sm:$0xff] %v7889_v49 }
 0x857   :  { %v1753_v46 = vpop.f32.mrb[44].mxu0  ;;  %v1794_v28 = vpop.f32.mrb[44].mxu1 }
 0x858   :  { %v1801_v30 = vadd.f32 %v1753_v46, %v1353_v25  ;;  %v1803_v22 = vadd.f32 %v1794_v28, %v1426_v11  ;;  %v1755_v40 = vpop.f32.mrb[45].mxu0  ;;  %v1796_v24 = vpop.f32.mrb[45].mxu1  ;;  %v1432_v25 = vadd.f32 %v7802_v48, %v7805_v52  ;;  %v1361_v11 = vadd.f32 %v7807_v29, %v7780_v26 }
 0x859   :  { %v1802_v27 = vadd.f32 %v1755_v40, %v1355_v8  ;;  %v1804_v49 = vadd.f32 %v1796_v24, %v1428_v50  ;;  %v1757_v47 = vpop.f32.mrb[46].mxu0  ;;  %v1798_v9 = vpop.f32.mrb[46].mxu1  ;;  %v1434_v8 = vadd.f32 %v7809_v17, %v7795_v34 }
 0x85a   :  { %v5654_v36 = vmul.f32 -1.442695, %v1801_v30  ;;  %v1758_v0 = vpop.f32.mrb[47].mxu0  ;;  %v1799_v23 = vpop.f32.mrb[47].mxu1 }
 0x85b   :  { %v5655_v1 = vmul.f32 -1.442695, %v1802_v27  ;;  %v5656_v41 = vmul.f32 -1.442695, %v1804_v49 }
 0x85c   :  { %6481 = vpow2.f32 %v5654_v36 }
 0x85d   :  { %6483 = vpow2.f32 %v5655_v1 }
 0x85e   :  { %6485 = vpow2.f32 %v5656_v41 }
 0x85f   :  { %6487 = vtanh.f32 %v1803_v22 }
 0x866   :  { %v6482_v19 = vpop.eup %6481 }
 0x867   :  { %v6484_v18 = vpop.eup %6483  ;;  %v1808_v42 = vadd.f32 1.0, %v6482_v19 }
 0x868   :  { %v1814_v46 = vadd.f32 1.0, %v6484_v18  ;;  %v6486_v28 = vpop.eup %6485 }
 0x869   :  { %6489 = vrcp.f32 %v1808_v42  ;;  %v6488_v40 = vpop.eup %6487  ;;  %v1821_v30 = vadd.f32 1.0, %v6486_v28 }
 0x86a   :  { %6491 = vrcp.f32 %v1814_v46 }
 0x86b   :  { %6493 = vrcp.f32 %v1821_v30 }
 0x873   :  { %v6490_v24 = vpop.eup %6489 }
 0x874   :  { %v6492_v47 = vpop.eup %6491  ;;  %v1825_v9 = vmul.f32 %v6490_v24, %v6488_v40 }
 0x875   :  { %v1824_v0 = vmul.f32 %v6492_v47, %v7838_v56  ;;  %v6494_v27 = vpop.eup %6493  ;;  %v1359_v56 = vadd.f32 %v7800_v45, %v7776_v20 }
 0x877   :  { %v7900_v23 = vadd.f32 %v1825_v9, %v1824_v0 }
 0x879   :  { %6495 = vtanh.f32 %v7900_v23 }
 0x883   :  { %v6496_v19 = vpop.eup %6495 }
 0x884   :  { %v1828_v49 = vmul.f32 %v6496_v19, %v6494_v27 }
 0x886   :  { %v1829_v22 = vpack.c.bf16 %v1828_v49, %v1828_v49 }
 0x888   :  { %v1831_v18 = vrot.slane %v1829_v22, 4  ;;  %1871 = vmatmul.mubr.bf16.vlgmr.msra.gmra.mrb[48].mxu0 %v1829_v22  ;;  %1912 = vmatmul.mubr.bf16.vlgmr.msra.gmra.mrb[48].mxu1 %v1829_v22 }
 0x889   :  { %1955 = vmatpush1.bf16.msra.mxu0 %v7662_v55  ;;  %1996 = vmatpush1.bf16.msra.mxu1 %v7664_v57 }
 0x88a   :  { %1833 = vst [vmem:[#allocation2] sm:$0xf0] %v1831_v18  ;;  %1956 = vmatprep.subr.bf16.mxu0 %v7670_v58  ;;  %1997 = vmatprep.subr.bf16.mxu1 %v7672_v59 }
 0x88b   :  { %1986 = vmatprep.mubr.bf16.mxu0 %v9285_v31  ;;  %2027 = vmatprep.mubr.bf16.mxu1 %v9285_v31 }
 0x88d   :  { %1957 = vmatpush1.bf16.msra.mxu0 %v7674_v60  ;;  %1998 = vmatpush1.bf16.msra.mxu1 %v7676_v61 }
 0x88e   :  { %1958 = vmatprep.subr.bf16.mxu0 %v7682_v51  ;;  %1999 = vmatprep.subr.bf16.mxu1 %v7684_v62 }
 0x891   :  { %1959 = vmatpush1.bf16.msra.mxu0 %v7686_v63  ;;  %2000 = vmatpush1.bf16.msra.mxu1 %v7688_v21 }
 0x892   :  { %1960 = vmatprep.subr.bf16.mxu0 %v7694_v3  ;;  %2001 = vmatprep.subr.bf16.mxu1 %v7696_v4 }
 0x895   :  { %1961 = vmatpush1.bf16.msra.mxu0 %v7698_v5  ;;  %2002 = vmatpush1.bf16.msra.mxu1 %v7700_v7 }
 0x896   :  { %1962 = vmatprep.subr.bf16.mxu0 %v7706_v35  ;;  %2003 = vmatprep.subr.bf16.mxu1 %v7708_v39 }
 0x899   :  { %1963 = vmatpush1.bf16.msra.mxu0 %v7710_v43  ;;  %2004 = vmatpush1.bf16.msra.mxu1 %v7712_v44 }
 0x89a   :  { %1964 = vmatprep.subr.bf16.mxu0 %v7716_v32  ;;  %2005 = vmatprep.subr.bf16.mxu1 %v7718_v33 }
 0x89d   :  { %1965 = vmatpush1.bf16.msra.mxu0 %v7722_v37  ;;  %2006 = vmatpush1.bf16.msra.mxu1 %v7724_v38 }
 0x89e   :  { %1966 = vmatprep.subr.bf16.mxu0 %v7728_v10  ;;  %2007 = vmatprep.subr.bf16.mxu1 %v7730_v12 }
 0x8a1   :  { %1967 = vmatpush1.bf16.msra.mxu0 %v7734_v13  ;;  %2008 = vmatpush1.bf16.msra.mxu1 %v7736_v14 }
 0x8a2   :  { %1968 = vmatprep.subr.bf16.mxu0 %v7740_v15  ;;  %2009 = vmatprep.subr.bf16.mxu1 %v7742_v16 }
 0x8a5   :  { %1969 = vmatpush1.bf16.msra.mxu0 %v7746_v2  ;;  %2010 = vmatpush1.bf16.msra.mxu1 %v7748_v6 }
 0x8a6   :  { %2073 = vmatprep.subr.bf16.mxu0 %v7658_v53  ;;  %2114 = vmatprep.subr.bf16.mxu1 %v7660_v54 }
 0x95b   :  { %v1872_v50 = vpop.f32.mrb[48].mxu0  ;;  %v1913_v36 = vpop.f32.mrb[48].mxu1 }
 0x95c   :  { %v1920_v1 = vadd.f32 %v1872_v50, %v1359_v56  ;;  %v1922_v41 = vadd.f32 %v1913_v36, %v1432_v25  ;;  %v1874_v42 = vpop.f32.mrb[49].mxu0  ;;  %v1915_v46 = vpop.f32.mrb[49].mxu1 }
 0x95d   :  { %v1921_v28 = vadd.f32 %v1874_v42, %v1361_v11  ;;  %v1923_v40 = vadd.f32 %v1915_v46, %v1434_v8  ;;  %v1876_v24 = vpop.f32.mrb[50].mxu0  ;;  %v1917_v47 = vpop.f32.mrb[50].mxu1 }
 0x95e   :  { %v5657_v45 = vmul.f32 -1.442695, %v1920_v1  ;;  %v1877_v9 = vpop.f32.mrb[51].mxu0  ;;  %v1918_v30 = vpop.f32.mrb[51].mxu1  ;;  %v9296_v24 = vld [vmem:[#allocation13_spill] sm:$0xff] }
 0x95f   :  { %v5658_v48 = vmul.f32 -1.442695, %v1921_v28  ;;  %v5659_v29 = vmul.f32 -1.442695, %v1923_v40  ;;  %v9295_v28 = vld [vmem:[#allocation12_spill] sm:$0xff]  ;;  %v1365_v47 = vadd.f32 %v9296_v24, %v7780_v26 }
 0x960   :  { %6497 = vpow2.f32 %v5657_v45  ;;  %v1436_v40 = vadd.f32 %v9295_v28, %v7805_v52  ;;  %v9297_v45 = vld [vmem:[#allocation14_spill] sm:$0xff] }
 0x961   :  { %6499 = vpow2.f32 %v5658_v48  ;;  %v1438_v9 = vadd.f32 %v9297_v45, %v7795_v34 }
 0x962   :  { %6501 = vpow2.f32 %v5659_v29 }
 0x963   :  { %6503 = vtanh.f32 %v1922_v41 }
 0x96a   :  { %v6498_v0 = vpop.eup %6497 }
 0x96b   :  { %v6500_v27 = vpop.eup %6499  ;;  %v1927_v17 = vadd.f32 1.0, %v6498_v0 }
 0x96c   :  { %v1933_v19 = vadd.f32 1.0, %v6500_v27  ;;  %v6502_v49 = vpop.eup %6501 }
 0x96d   :  { %6505 = vrcp.f32 %v1927_v17  ;;  %v6504_v22 = vpop.eup %6503  ;;  %v1940_v11 = vadd.f32 1.0, %v6502_v49 }
 0x96e   :  { %6507 = vrcp.f32 %v1933_v19 }
 0x96f   :  { %6509 = vrcp.f32 %v1940_v11 }
 0x977   :  { %v6506_v18 = vpop.eup %6505 }
 0x978   :  { %v6508_v56 = vpop.eup %6507  ;;  %v1944_v25 = vmul.f32 %v6506_v18, %v6504_v22 }
 0x979   :  { %v1943_v8 = vmul.f32 %v6508_v56, %v7900_v23  ;;  %v6510_v36 = vpop.eup %6509  ;;  %v9294_v23 = vld [vmem:[#allocation11_spill] sm:$0xff] }
 0x97a   :  { %v1363_v46 = vadd.f32 %v9294_v23, %v7776_v20 }
 0x97b   :  { %v7946_v50 = vadd.f32 %v1944_v25, %v1943_v8 }
 0x97d   :  { %6511 = vtanh.f32 %v7946_v50 }
 0x987   :  { %v6512_v1 = vpop.eup %6511 }
 0x988   :  { %v1947_v42 = vmul.f32 %v6512_v1, %v6510_v36 }
 0x98a   :  { %v1948_v41 = vpack.c.bf16 %v1947_v42, %v1947_v42 }
 0x98c   :  { %1949 = vst [vmem:[#allocation2 + $0x8] sm:$0xf] %v1948_v41  ;;  %1987 = vmatmul.mubr.bf16.vlgmr.msra.gmra.mrb[52].mxu0 %v1948_v41  ;;  %2028 = vmatmul.mubr.bf16.vlgmr.msra.gmra.mrb[52].mxu1 %v1948_v41 }
 0x98d   :  { %2074 = vmatpush1.bf16.msra.mxu0 %v7662_v55  ;;  %2115 = vmatpush1.bf16.msra.mxu1 %v7664_v57 }
 0x98e   :  { %2075 = vmatprep.subr.bf16.mxu0 %v7670_v58  ;;  %2116 = vmatprep.subr.bf16.mxu1 %v7672_v59 }
 0x98f   :  { %2105 = vmatprep.mubr.bf16.mxu0 %v9285_v31  ;;  %2146 = vmatprep.mubr.bf16.mxu1 %v9285_v31 }
 0x991   :  { %2076 = vmatpush1.bf16.msra.mxu0 %v7674_v60  ;;  %2117 = vmatpush1.bf16.msra.mxu1 %v7676_v61 }
 0x992   :  { %2077 = vmatprep.subr.bf16.mxu0 %v7682_v51  ;;  %2118 = vmatprep.subr.bf16.mxu1 %v7684_v62 }
 0x995   :  { %2078 = vmatpush1.bf16.msra.mxu0 %v7686_v63  ;;  %2119 = vmatpush1.bf16.msra.mxu1 %v7688_v21 }
 0x996   :  { %2079 = vmatprep.subr.bf16.mxu0 %v7694_v3  ;;  %2120 = vmatprep.subr.bf16.mxu1 %v7696_v4 }
 0x999   :  { %2080 = vmatpush1.bf16.msra.mxu0 %v7698_v5  ;;  %2121 = vmatpush1.bf16.msra.mxu1 %v7700_v7 }
 0x99a   :  { %2081 = vmatprep.subr.bf16.mxu0 %v7706_v35  ;;  %2122 = vmatprep.subr.bf16.mxu1 %v7708_v39 }
 0x99d   :  { %2082 = vmatpush1.bf16.msra.mxu0 %v7710_v43  ;;  %2123 = vmatpush1.bf16.msra.mxu1 %v7712_v44 }
 0x99e   :  { %2083 = vmatprep.subr.bf16.mxu0 %v7716_v32  ;;  %2124 = vmatprep.subr.bf16.mxu1 %v7718_v33 }
 0x9a1   :  { %2084 = vmatpush1.bf16.msra.mxu0 %v7722_v37  ;;  %2125 = vmatpush1.bf16.msra.mxu1 %v7724_v38 }
 0x9a2   :  { %2085 = vmatprep.subr.bf16.mxu0 %v7728_v10  ;;  %2126 = vmatprep.subr.bf16.mxu1 %v7730_v12 }
 0x9a5   :  { %2086 = vmatpush1.bf16.msra.mxu0 %v7734_v13  ;;  %2127 = vmatpush1.bf16.msra.mxu1 %v7736_v14 }
 0x9a6   :  { %2087 = vmatprep.subr.bf16.mxu0 %v7740_v15  ;;  %2128 = vmatprep.subr.bf16.mxu1 %v7742_v16 }
 0x9a9   :  { %2088 = vmatpush1.bf16.msra.mxu0 %v7746_v2  ;;  %2129 = vmatpush1.bf16.msra.mxu1 %v7748_v6 }
 0x9aa   :  { %2189 = vmatprep.subr.bf16.mxu0 %v7658_v53  ;;  %2230 = vmatprep.subr.bf16.mxu1 %v7660_v54 }
 0xa5f   :  { %v1988_v30 = vpop.f32.mrb[52].mxu0  ;;  %v2029_v48 = vpop.f32.mrb[52].mxu1 }
 0xa60   :  { %v2036_v29 = vadd.f32 %v1988_v30, %v1363_v46  ;;  %v2038_v0 = vadd.f32 %v2029_v48, %v1436_v40  ;;  %v1990_v27 = vpop.f32.mrb[53].mxu0  ;;  %v2031_v17 = vpop.f32.mrb[53].mxu1 }
 0xa61   :  { %v2037_v19 = vadd.f32 %v1990_v27, %v1365_v47  ;;  %v2039_v49 = vadd.f32 %v2031_v17, %v1438_v9  ;;  %v1992_v22 = vpop.f32.mrb[54].mxu0  ;;  %v2033_v18 = vpop.f32.mrb[54].mxu1 }
 0xa62   :  { %v5660_v56 = vmul.f32 -1.442695, %v2036_v29  ;;  %v1993_v25 = vpop.f32.mrb[55].mxu0  ;;  %v2034_v11 = vpop.f32.mrb[55].mxu1  ;;  %v9301_v18 = vld [vmem:[#allocation18_spill] sm:$0xff] }
 0xa63   :  { %v5661_v8 = vmul.f32 -1.442695, %v2037_v19  ;;  %v5662_v36 = vmul.f32 -1.442695, %v2039_v49  ;;  %v9300_v49 = vld [vmem:[#allocation17_spill] sm:$0xff] }
 0xa64   :  { %6513 = vpow2.f32 %v5660_v56  ;;  %v1371_v22 = vadd.f32 %v9300_v49, %v7780_v26  ;;  %v1444_v56 = vadd.f32 %v9301_v18, %v7795_v34 }
 0xa65   :  { %6515 = vpow2.f32 %v5661_v8 }
 0xa66   :  { %6517 = vpow2.f32 %v5662_v36 }
 0xa67   :  { %6519 = vtanh.f32 %v2038_v0 }
 0xa6e   :  { %v6514_v1 = vpop.eup %6513 }
 0xa6f   :  { %v6516_v42 = vpop.eup %6515  ;;  %v2043_v41 = vadd.f32 1.0, %v6514_v1 }
 0xa70   :  { %v2049_v23 = vadd.f32 1.0, %v6516_v42  ;;  %v6518_v46 = vpop.eup %6517 }
 0xa71   :  { %6521 = vrcp.f32 %v2043_v41  ;;  %v6520_v28 = vpop.eup %6519  ;;  %v2056_v45 = vadd.f32 1.0, %v6518_v46 }
 0xa72   :  { %6523 = vrcp.f32 %v2049_v23 }
 0xa73   :  { %6525 = vrcp.f32 %v2056_v45 }
 0xa7b   :  { %v6522_v40 = vpop.eup %6521 }
 0xa7c   :  { %v6524_v24 = vpop.eup %6523  ;;  %v2060_v47 = vmul.f32 %v6522_v40, %v6520_v28 }
 0xa7d   :  { %v2059_v9 = vmul.f32 %v6524_v24, %v7946_v50  ;;  %v6526_v48 = vpop.eup %6525  ;;  %v9299_v50 = vld [vmem:[#allocation16_spill] sm:$0xff] }
 0xa7e   :  { %v1442_v19 = vadd.f32 %v9299_v50, %v7805_v52 }
 0xa7f   :  { %v7992_v30 = vadd.f32 %v2060_v47, %v2059_v9 }
 0xa81   :  { %6527 = vtanh.f32 %v7992_v30 }
 0xa8b   :  { %v6528_v29 = vpop.eup %6527 }
 0xa8c   :  { %v2063_v27 = vmul.f32 %v6528_v29, %v6526_v48 }
 0xa8e   :  { %v2064_v0 = vpack.c.bf16 %v2063_v27, %v2063_v27 }
 0xa90   :  { %v2066_v17 = vrot.slane %v2064_v0, 4  ;;  %2106 = vmatmul.mubr.bf16.vlgmr.msra.gmra.mrb[56].mxu0 %v2064_v0  ;;  %2147 = vmatmul.mubr.bf16.vlgmr.msra.gmra.mrb[56].mxu1 %v2064_v0 }
 0xa91   :  { %2190 = vmatpush1.bf16.msra.mxu0 %v7662_v55  ;;  %2231 = vmatpush1.bf16.msra.mxu1 %v7664_v57  ;;  %v9298_v55 = vld [vmem:[#allocation15_spill] sm:$0xff] }
 0xa92   :  { %2068 = vst [vmem:[#allocation2 + $0x8] sm:$0xf0] %v2066_v17  ;;  %2191 = vmatprep.subr.bf16.mxu0 %v7670_v58  ;;  %2232 = vmatprep.subr.bf16.mxu1 %v7672_v59  ;;  %v1369_v57 = vadd.f32 %v9298_v55, %v7776_v20 }
 0xa93   :  { %2221 = vmatprep.mubr.bf16.mxu0 %v9285_v31  ;;  %2262 = vmatprep.mubr.bf16.mxu1 %v9285_v31 }
 0xa95   :  { %2192 = vmatpush1.bf16.msra.mxu0 %v7674_v60  ;;  %2233 = vmatpush1.bf16.msra.mxu1 %v7676_v61 }
 0xa96   :  { %2193 = vmatprep.subr.bf16.mxu0 %v7682_v51  ;;  %2234 = vmatprep.subr.bf16.mxu1 %v7684_v62 }
 0xa99   :  { %2194 = vmatpush1.bf16.msra.mxu0 %v7686_v63  ;;  %2235 = vmatpush1.bf16.msra.mxu1 %v7688_v21 }
 0xa9a   :  { %2195 = vmatprep.subr.bf16.mxu0 %v7694_v3  ;;  %2236 = vmatprep.subr.bf16.mxu1 %v7696_v4 }
 0xa9d   :  { %2196 = vmatpush1.bf16.msra.mxu0 %v7698_v5  ;;  %2237 = vmatpush1.bf16.msra.mxu1 %v7700_v7 }
 0xa9e   :  { %2197 = vmatprep.subr.bf16.mxu0 %v7706_v35  ;;  %2238 = vmatprep.subr.bf16.mxu1 %v7708_v39 }
 0xaa1   :  { %2198 = vmatpush1.bf16.msra.mxu0 %v7710_v43  ;;  %2239 = vmatpush1.bf16.msra.mxu1 %v7712_v44 }
 0xaa2   :  { %2199 = vmatprep.subr.bf16.mxu0 %v7716_v32  ;;  %2240 = vmatprep.subr.bf16.mxu1 %v7718_v33 }
 0xaa5   :  { %2200 = vmatpush1.bf16.msra.mxu0 %v7722_v37  ;;  %2241 = vmatpush1.bf16.msra.mxu1 %v7724_v38 }
 0xaa6   :  { %2201 = vmatprep.subr.bf16.mxu0 %v7728_v10  ;;  %2242 = vmatprep.subr.bf16.mxu1 %v7730_v12 }
 0xaa9   :  { %2202 = vmatpush1.bf16.msra.mxu0 %v7734_v13  ;;  %2243 = vmatpush1.bf16.msra.mxu1 %v7736_v14 }
 0xaaa   :  { %2203 = vmatprep.subr.bf16.mxu0 %v7740_v15  ;;  %2244 = vmatprep.subr.bf16.mxu1 %v7742_v16 }
 0xaad   :  { %2204 = vmatpush1.bf16.msra.mxu0 %v7746_v2  ;;  %2245 = vmatpush1.bf16.msra.mxu1 %v7748_v6 }
 0xaae   :  { %2308 = vmatprep.subr.bf16.mxu0 %v7658_v53  ;;  %2349 = vmatprep.subr.bf16.mxu1 %v7660_v54 }
 0xb63   :  { %v2107_v25 = vpop.f32.mrb[56].mxu0  ;;  %v2148_v11 = vpop.f32.mrb[56].mxu1 }
 0xb64   :  { %v2155_v8 = vadd.f32 %v2107_v25, %v1369_v57  ;;  %v2157_v36 = vadd.f32 %v2148_v11, %v1442_v19  ;;  %v2109_v1 = vpop.f32.mrb[57].mxu0  ;;  %v2150_v53 = vpop.f32.mrb[57].mxu1  ;;  %v8041_v11 = vld [vmem:[#allocation4 + $0x100] ss:$16 sps:$4 sm:$0xff]  }
 0xb65   :  { %v2156_v42 = vadd.f32 %v2109_v1, %v1371_v22  ;;  %v2158_v54 = vadd.f32 %v2150_v53, %v1444_v56  ;;  %v2111_v41 = vpop.f32.mrb[58].mxu0  ;;  %v2152_v23 = vpop.f32.mrb[58].mxu1 }
 0xb66   :  { %v5663_v46 = vmul.f32 -1.442695, %v2155_v8  ;;  %v2112_v28 = vpop.f32.mrb[59].mxu0  ;;  %v2153_v40 = vpop.f32.mrb[59].mxu1  ;;  %v8044_v8 = vld [vmem:[#allocation4 + $0x108] ss:$16 sps:$4 sm:$0xff]  }
 0xb67   :  { %v5664_v24 = vmul.f32 -1.442695, %v2156_v42  ;;  %v5665_v47 = vmul.f32 -1.442695, %v2158_v54 }
 0xb68   :  { %6529 = vpow2.f32 %v5663_v46 }
 0xb69   :  { %6531 = vpow2.f32 %v5664_v24 }
 0xb6a   :  { %6533 = vpow2.f32 %v5665_v47 }
 0xb6b   :  { %6535 = vtanh.f32 %v2157_v36 }
 0xb72   :  { %v6530_v45 = vpop.eup %6529 }
 0xb73   :  { %v6532_v9 = vpop.eup %6531  ;;  %v2162_v48 = vadd.f32 1.0, %v6530_v45 }
 0xb74   :  { %v2168_v29 = vadd.f32 1.0, %v6532_v9  ;;  %v6534_v27 = vpop.eup %6533  ;;  %v6887_v9 = vld [vmem:[#allocation4 + $0x124] ss:$16 sps:$4 sm:$0xff]  }
 0xb75   :  { %6537 = vrcp.f32 %v2162_v48  ;;  %v6536_v0 = vpop.eup %6535  ;;  %v2175_v50 = vadd.f32 1.0, %v6534_v27  ;;  %v6888_v48 = vld [vmem:[#allocation4 + $0x12c] ss:$16 sps:$4 sm:$0xff]   ;;  %v6890_v27 = vld [vmem:[#allocation4 + $0x128] ss:$16 sps:$4 sm:$0xff]  }
 0xb76   :  { %6539 = vrcp.f32 %v2168_v29  ;;  %v6889_v29 = vld [vmem:[#allocation4 + $0x120] ss:$16 sps:$4 sm:$0xff]  }
 0xb77   :  { %6541 = vrcp.f32 %v2175_v50  ;;  %v6895_v50 = vld [vmem:[#allocation4 + $0x164] ss:$16 sps:$4 sm:$0xff]  }
 0xb7f   :  { %v6538_v17 = vpop.eup %6537 }
 0xb80   :  { %v6540_v55 = vpop.eup %6539  ;;  %v2179_v57 = vmul.f32 %v6538_v17, %v6536_v0  ;;  %v6891_v0 = vld [vmem:[#allocation4 + $0x144] ss:$16 sps:$4 sm:$0xff]   ;;  %v6892_v17 = vld [vmem:[#allocation4 + $0x14c] ss:$16 sps:$4 sm:$0xff]  }
 0xb81   :  { %v2178_v19 = vmul.f32 %v6540_v55, %v7992_v30  ;;  %v6542_v22 = vpop.eup %6541  ;;  %v6893_v55 = vld [vmem:[#allocation4 + $0x140] ss:$16 sps:$4 sm:$0xff]  }
 0xb83   :  { %v8038_v49 = vadd.f32 %v2179_v57, %v2178_v19  ;;  %v6894_v57 = vld [vmem:[#allocation4 + $0x148] ss:$16 sps:$4 sm:$0xff]   ;;  %v6896_v19 = vld [vmem:[#allocation4 + $0x16c] ss:$16 sps:$4 sm:$0xff]  }
 0xb85   :  { %6543 = vtanh.f32 %v8038_v49 }
 0xb8f   :  { %v6544_v18 = vpop.eup %6543 }
 0xb90   :  { %v2182_v56 = vmul.f32 %v6544_v18, %v6542_v22  ;;  %v6898_v22 = vld [vmem:[#allocation4 + $0x168] ss:$16 sps:$4 sm:$0xff]   ;;  %v6899_v18 = vld [vmem:[#allocation4 + $0x184] ss:$16 sps:$4 sm:$0xff]  }
 0xb92   :  { %v2183_v25 = vpack.c.bf16 %v2182_v56, %v2182_v56  ;;  %v6900_v56 = vld [vmem:[#allocation4 + $0x18c] ss:$16 sps:$4 sm:$0xff]  }
 0xb94   :  { %2184 = vst [vmem:[#allocation2 + $0x10] sm:$0xf] %v2183_v25  ;;  %2222 = vmatmul.mubr.bf16.vlgmr.msra.gmra.mrb[60].mxu0 %v2183_v25  ;;  %2263 = vmatmul.mubr.bf16.vlgmr.msra.gmra.mrb[60].mxu1 %v2183_v25  ;;  %v6901_v25 = vld [vmem:[#allocation4 + $0x180] ss:$16 sps:$4 sm:$0xff]  }
 0xb95   :  { %2309 = vmatpush1.bf16.msra.mxu0 %v8041_v11  ;;  %2350 = vmatpush1.bf16.msra.mxu1 %v8044_v8 }
 0xb96   :  { %2310 = vmatprep.subr.bf16.mxu0 %v7670_v58  ;;  %2351 = vmatprep.subr.bf16.mxu1 %v7672_v59  ;;  %v6885_v58 = vld [vmem:[#allocation4 + $0x104] ss:$16 sps:$4 sm:$0xff]   ;;  %v6886_v59 = vld [vmem:[#allocation4 + $0x10c] ss:$16 sps:$4 sm:$0xff]  }
 0xb97   :  { %2340 = vmatprep.mubr.bf16.mxu0 %v9285_v31  ;;  %2381 = vmatprep.mubr.bf16.mxu1 %v9285_v31 }
 0xb99   :  { %2311 = vmatpush1.bf16.msra.mxu0 %v7674_v60  ;;  %2352 = vmatpush1.bf16.msra.mxu1 %v7676_v61  ;;  %v9302_v60 = vld [vmem:[#allocation19_spill] sm:$0xff] }
 0xb9a   :  { %2312 = vmatprep.subr.bf16.mxu0 %v7682_v51  ;;  %2353 = vmatprep.subr.bf16.mxu1 %v7684_v62  ;;  %v1373_v61 = vadd.f32 %v9302_v60, %v7776_v20  ;;  %v9303_v51 = vld [vmem:[#allocation20_spill] sm:$0xff] }
 0xb9b   :  { %v1446_v62 = vadd.f32 %v9303_v51, %v7805_v52  ;;  %v6906_v60 = vld [vmem:[#allocation4 + $0x1a8] ss:$16 sps:$4 sm:$0xff]   ;;  %v6908_v51 = vld [vmem:[#allocation4 + $0x1cc] ss:$16 sps:$4 sm:$0xff]  }
 0xb9d   :  { %2313 = vmatpush1.bf16.msra.mxu0 %v7686_v63  ;;  %2354 = vmatpush1.bf16.msra.mxu1 %v7688_v21  ;;  %v9304_v63 = vld [vmem:[#allocation21_spill] sm:$0xff] }
 0xb9e   :  { %2314 = vmatprep.subr.bf16.mxu0 %v7694_v3  ;;  %2355 = vmatprep.subr.bf16.mxu1 %v7696_v4  ;;  %v1375_v21 = vadd.f32 %v9304_v63, %v7780_v26  ;;  %v9305_v3 = vld [vmem:[#allocation22_spill] sm:$0xff] }
 0xb9f   :  { %v1448_v4 = vadd.f32 %v9305_v3, %v7795_v34  ;;  %v6910_v63 = vld [vmem:[#allocation4 + $0x1c8] ss:$16 sps:$4 sm:$0xff]   ;;  %v6912_v3 = vld [vmem:[#allocation4 + $0x1ec] ss:$16 sps:$4 sm:$0xff]  }
 0xba1   :  { %2315 = vmatpush1.bf16.msra.mxu0 %v7698_v5  ;;  %2356 = vmatpush1.bf16.msra.mxu1 %v7700_v7 }
 0xba2   :  { %2316 = vmatprep.subr.bf16.mxu0 %v7706_v35  ;;  %2357 = vmatprep.subr.bf16.mxu1 %v7708_v39 }
 0xba5   :  { %2317 = vmatpush1.bf16.msra.mxu0 %v7710_v43  ;;  %2358 = vmatpush1.bf16.msra.mxu1 %v7712_v44 }
 0xba6   :  { %2318 = vmatprep.subr.bf16.mxu0 %v7716_v32  ;;  %2359 = vmatprep.subr.bf16.mxu1 %v7718_v33 }
 0xba9   :  { %2319 = vmatpush1.bf16.msra.mxu0 %v7722_v37  ;;  %2360 = vmatpush1.bf16.msra.mxu1 %v7724_v38 }
 0xbaa   :  { %2320 = vmatprep.subr.bf16.mxu0 %v7728_v10  ;;  %2361 = vmatprep.subr.bf16.mxu1 %v7730_v12 }
 0xbad   :  { %2321 = vmatpush1.bf16.msra.mxu0 %v7734_v13  ;;  %2362 = vmatpush1.bf16.msra.mxu1 %v7736_v14 }
 0xbae   :  { %2322 = vmatprep.subr.bf16.mxu0 %v7740_v15  ;;  %2363 = vmatprep.subr.bf16.mxu1 %v7742_v16 }
 0xbb1   :  { %2323 = vmatpush1.bf16.msra.mxu0 %v7746_v2  ;;  %2364 = vmatpush1.bf16.msra.mxu1 %v7748_v6 }
 0xbb2   :  { %2424 = vmatprep.subr.bf16.mxu0 %v6885_v58  ;;  %2465 = vmatprep.subr.bf16.mxu1 %v6886_v59  ;;  %v6904_v58 = vld [vmem:[#allocation4 + $0x1ac] ss:$16 sps:$4 sm:$0xff]   ;;  %v6905_v59 = vld [vmem:[#allocation4 + $0x1a0] ss:$16 sps:$4 sm:$0xff]  }
 0xc67   :  { %v2223_v5 = vpop.f32.mrb[60].mxu0  ;;  %v2264_v7 = vpop.f32.mrb[60].mxu1 }
 0xc68   :  { %v2271_v35 = vadd.f32 %v2223_v5, %v1373_v61  ;;  %v2273_v39 = vadd.f32 %v2264_v7, %v1446_v62  ;;  %v2225_v43 = vpop.f32.mrb[61].mxu0  ;;  %v2266_v44 = vpop.f32.mrb[61].mxu1  ;;  %v6907_v61 = vld [vmem:[#allocation4 + $0x1c4] ss:$16 sps:$4 sm:$0xff]   ;;  %v6909_v62 = vld [vmem:[#allocation4 + $0x1c0] ss:$16 sps:$4 sm:$0xff]  }
 0xc69   :  { %v2272_v32 = vadd.f32 %v2225_v43, %v1375_v21  ;;  %v2274_v33 = vadd.f32 %v2266_v44, %v1448_v4  ;;  %v2227_v37 = vpop.f32.mrb[62].mxu0  ;;  %v2268_v38 = vpop.f32.mrb[62].mxu1  ;;  %v6911_v21 = vld [vmem:[#allocation4 + $0x1e4] ss:$16 sps:$4 sm:$0xff]   ;;  %v6913_v4 = vld [vmem:[#allocation4 + $0x1e0] ss:$16 sps:$4 sm:$0xff]  }
 0xc6a   :  { %v5666_v10 = vmul.f32 -1.442695, %v2271_v35  ;;  %v2228_v12 = vpop.f32.mrb[63].mxu0  ;;  %v2269_v13 = vpop.f32.mrb[63].mxu1  ;;  %v6914_v5 = vld [vmem:[#allocation4 + $0x1e8] ss:$16 sps:$4 sm:$0xff]  }
 0xc6b   :  { %v5667_v14 = vmul.f32 -1.442695, %v2272_v32  ;;  %v5668_v15 = vmul.f32 -1.442695, %v2274_v33  ;;  %v6147_v7 = vld [vmem:[%s9250_s2 + $0x104] ss:$16 sps:$4 sm:$0xff]  }
 0xc6c   :  { %6545 = vpow2.f32 %v5666_v10  ;;  %v6150_v35 = vld [vmem:[%s9250_s2 + $0x10c] ss:$16 sps:$4 sm:$0xff]   ;;  %v9308_v33 = vld [vmem:[#allocation25_spill] sm:$0xff] }
 0xc6d   :  { %6547 = vpow2.f32 %v5667_v14  ;;  %v9307_v44 = vld [vmem:[#allocation24_spill] sm:$0xff]  ;;  %v1381_v37 = vadd.f32 %v9308_v33, %v7780_v26  ;;  %v9309_v38 = vld [vmem:[#allocation26_spill] sm:$0xff]  ;;  %v6181_v33 = vld [vmem:[%s9250_s2 + $0x1c0] ss:$16 sps:$4 sm:$0xff]  }
 0xc6e   :  { %6549 = vpow2.f32 %v5668_v15  ;;  %v1452_v32 = vadd.f32 %v9307_v44, %v7805_v52  ;;  %v1454_v10 = vadd.f32 %v9309_v38, %v7795_v34  ;;  %v6183_v44 = vld [vmem:[%s9250_s2 + $0x1c4] ss:$16 sps:$4 sm:$0xff]  }
 0xc6f   :  { %6551 = vtanh.f32 %v2273_v39  ;;  %v9306_v39 = vld [vmem:[#allocation23_spill] sm:$0xff] }
 0xc70   :  { %v1379_v43 = vadd.f32 %v9306_v39, %v7776_v20  ;;  %v6175_v39 = vld [vmem:[%s9250_s2 + $0x1a0] ss:$16 sps:$4 sm:$0xff]   ;;  %v6189_v38 = vld [vmem:[%s9250_s2 + $0x1e4] ss:$16 sps:$4 sm:$0xff]  }
 0xc76   :  { %v6546_v16 = vpop.eup %6545 }
 0xc77   :  { %v6548_v2 = vpop.eup %6547  ;;  %v2278_v6 = vadd.f32 1.0, %v6546_v16 }
 0xc78   :  { %v2284_v30 = vadd.f32 1.0, %v6548_v2  ;;  %v6550_v36 = vpop.eup %6549 }
 0xc79   :  { %6553 = vrcp.f32 %v2278_v6  ;;  %v6552_v1 = vpop.eup %6551  ;;  %v2291_v41 = vadd.f32 1.0, %v6550_v36 }
 0xc7a   :  { %6555 = vrcp.f32 %v2284_v30 }
 0xc7b   :  { %6557 = vrcp.f32 %v2291_v41 }
 0xc83   :  { %v6554_v53 = vpop.eup %6553 }
 0xc84   :  { %v6556_v42 = vpop.eup %6555  ;;  %v2295_v54 = vmul.f32 %v6554_v53, %v6552_v1 }
 0xc85   :  { %v2294_v23 = vmul.f32 %v6556_v42, %v8038_v49  ;;  %v6558_v28 = vpop.eup %6557  ;;  %v6897_v49 = vld [vmem:[#allocation4 + $0x160] ss:$16 sps:$4 sm:$0xff]  }
 0xc87   :  { %v8086_v46 = vadd.f32 %v2295_v54, %v2294_v23 }
 0xc89   :  { %6559 = vtanh.f32 %v8086_v46 }
 0xc93   :  { %v6560_v40 = vpop.eup %6559 }
 0xc94   :  { %v2298_v24 = vmul.f32 %v6560_v40, %v6558_v28 }
 0xc96   :  { %v2299_v47 = vpack.c.bf16 %v2298_v24, %v2298_v24 }
 0xc98   :  { %v2301_v45 = vrot.slane %v2299_v47, 4  ;;  %2341 = vmatmul.mubr.bf16.vlgmr.msra.gmra.mrb[64].mxu0 %v2299_v47  ;;  %2382 = vmatmul.mubr.bf16.vlgmr.msra.gmra.mrb[64].mxu1 %v2299_v47 }
 0xc99   :  { %2425 = vmatpush1.bf16.msra.mxu0 %v8041_v11  ;;  %2466 = vmatpush1.bf16.msra.mxu1 %v8044_v8  ;;  %v6902_v11 = vld [vmem:[#allocation4 + $0x188] ss:$16 sps:$4 sm:$0xff]   ;;  %v6903_v8 = vld [vmem:[#allocation4 + $0x1a4] ss:$16 sps:$4 sm:$0xff]  }
 0xc9a   :  { %2303 = vst [vmem:[#allocation2 + $0x10] sm:$0xf0] %v2301_v45  ;;  %2426 = vmatprep.subr.bf16.mxu0 %v6887_v9  ;;  %2467 = vmatprep.subr.bf16.mxu1 %v6888_v48 }
 0xc9b   :  { %2456 = vmatprep.mubr.bf16.mxu0 %v9285_v31  ;;  %2497 = vmatprep.mubr.bf16.mxu1 %v9285_v31 }
 0xc9d   :  { %2427 = vmatpush1.bf16.msra.mxu0 %v6889_v29  ;;  %2468 = vmatpush1.bf16.msra.mxu1 %v6890_v27 }
 0xc9e   :  { %2428 = vmatprep.subr.bf16.mxu0 %v6891_v0  ;;  %2469 = vmatprep.subr.bf16.mxu1 %v6892_v17 }
 0xca1   :  { %2429 = vmatpush1.bf16.msra.mxu0 %v6893_v55  ;;  %2470 = vmatpush1.bf16.msra.mxu1 %v6894_v57 }
 0xca2   :  { %2430 = vmatprep.subr.bf16.mxu0 %v6895_v50  ;;  %2471 = vmatprep.subr.bf16.mxu1 %v6896_v19 }
 0xca5   :  { %2431 = vmatpush1.bf16.msra.mxu0 %v6897_v49  ;;  %2472 = vmatpush1.bf16.msra.mxu1 %v6898_v22  ;;  %v6145_v49 = vld [vmem:[%s9250_s2 + $0x100] ss:$16 sps:$4 sm:$0xff]   ;;  %v6148_v22 = vld [vmem:[%s9250_s2 + $0x108] ss:$16 sps:$4 sm:$0xff]  }
 0xca6   :  { %2432 = vmatprep.subr.bf16.mxu0 %v6899_v18  ;;  %2473 = vmatprep.subr.bf16.mxu1 %v6900_v56  ;;  %v6156_v56 = vld [vmem:[%s9250_s2 + $0x12c] ss:$16 sps:$4 sm:$0xff]  }
 0xca9   :  { %2433 = vmatpush1.bf16.msra.mxu0 %v6901_v25  ;;  %2474 = vmatpush1.bf16.msra.mxu1 %v6902_v11  ;;  %v6151_v25 = vld [vmem:[%s9250_s2 + $0x120] ss:$16 sps:$4 sm:$0xff]   ;;  %v6154_v11 = vld [vmem:[%s9250_s2 + $0x128] ss:$16 sps:$4 sm:$0xff]  }
 0xcaa   :  { %2434 = vmatprep.subr.bf16.mxu0 %v6903_v8  ;;  %2475 = vmatprep.subr.bf16.mxu1 %v6904_v58  ;;  %v6159_v8 = vld [vmem:[%s9250_s2 + $0x144] ss:$16 sps:$4 sm:$0xff]   ;;  %v6162_v58 = vld [vmem:[%s9250_s2 + $0x14c] ss:$16 sps:$4 sm:$0xff]  }
 0xcad   :  { %2435 = vmatpush1.bf16.msra.mxu0 %v6905_v59  ;;  %2476 = vmatpush1.bf16.msra.mxu1 %v6906_v60  ;;  %v6157_v59 = vld [vmem:[%s9250_s2 + $0x140] ss:$16 sps:$4 sm:$0xff]   ;;  %v6160_v60 = vld [vmem:[%s9250_s2 + $0x148] ss:$16 sps:$4 sm:$0xff]  }
 0xcae   :  { %2436 = vmatprep.subr.bf16.mxu0 %v6907_v61  ;;  %2477 = vmatprep.subr.bf16.mxu1 %v6908_v51  ;;  %v6165_v61 = vld [vmem:[%s9250_s2 + $0x164] ss:$16 sps:$4 sm:$0xff]   ;;  %v6168_v51 = vld [vmem:[%s9250_s2 + $0x16c] ss:$16 sps:$4 sm:$0xff]  }
 0xcb1   :  { %2437 = vmatpush1.bf16.msra.mxu0 %v6909_v62  ;;  %2478 = vmatpush1.bf16.msra.mxu1 %v6910_v63  ;;  %v6163_v62 = vld [vmem:[%s9250_s2 + $0x160] ss:$16 sps:$4 sm:$0xff]   ;;  %v6166_v63 = vld [vmem:[%s9250_s2 + $0x168] ss:$16 sps:$4 sm:$0xff]  }
 0xcb2   :  { %2438 = vmatprep.subr.bf16.mxu0 %v6911_v21  ;;  %2479 = vmatprep.subr.bf16.mxu1 %v6912_v3  ;;  %v6171_v21 = vld [vmem:[%s9250_s2 + $0x184] ss:$16 sps:$4 sm:$0xff]   ;;  %v6174_v3 = vld [vmem:[%s9250_s2 + $0x18c] ss:$16 sps:$4 sm:$0xff]  }
 0xcb5   :  { %2439 = vmatpush1.bf16.msra.mxu0 %v6913_v4  ;;  %2480 = vmatpush1.bf16.msra.mxu1 %v6914_v5  ;;  %v6169_v4 = vld [vmem:[%s9250_s2 + $0x180] ss:$16 sps:$4 sm:$0xff]   ;;  %v6172_v5 = vld [vmem:[%s9250_s2 + $0x188] ss:$16 sps:$4 sm:$0xff]  }
 0xcb6   :  { %2759 = vmatprep.subr.bf16.mxu0 %v6147_v7  ;;  %2832 = vmatprep.subr.bf16.mxu1 %v6150_v35  ;;  %v6177_v7 = vld [vmem:[%s9250_s2 + $0x1a4] ss:$16 sps:$4 sm:$0xff]   ;;  %v6180_v35 = vld [vmem:[%s9250_s2 + $0x1ac] ss:$16 sps:$4 sm:$0xff]  }
 0xd6b   :  { %v2342_v12 = vpop.f32.mrb[64].mxu0  ;;  %v2383_v13 = vpop.f32.mrb[64].mxu1 }
 0xd6c   :  { %v2390_v14 = vadd.f32 %v2342_v12, %v1379_v43  ;;  %v2392_v15 = vadd.f32 %v2383_v13, %v1452_v32  ;;  %v2344_v16 = vpop.f32.mrb[65].mxu0  ;;  %v2385_v2 = vpop.f32.mrb[65].mxu1  ;;  %v6178_v43 = vld [vmem:[%s9250_s2 + $0x1a8] ss:$16 sps:$4 sm:$0xff]   ;;  %v6186_v32 = vld [vmem:[%s9250_s2 + $0x1cc] ss:$16 sps:$4 sm:$0xff]  }
 0xd6d   :  { %v2391_v6 = vadd.f32 %v2344_v16, %v1381_v37  ;;  %v2393_v30 = vadd.f32 %v2385_v2, %v1454_v10  ;;  %v2346_v36 = vpop.f32.mrb[66].mxu0  ;;  %v2387_v1 = vpop.f32.mrb[66].mxu1  ;;  %v6184_v37 = vld [vmem:[%s9250_s2 + $0x1c8] ss:$16 sps:$4 sm:$0xff]   ;;  %v6192_v10 = vld [vmem:[%s9250_s2 + $0x1ec] ss:$16 sps:$4 sm:$0xff]  }
 0xd6e   :  { %v5669_v53 = vmul.f32 -1.442695, %v2390_v14  ;;  %v2347_v42 = vpop.f32.mrb[67].mxu0  ;;  %v2388_v54 = vpop.f32.mrb[67].mxu1  ;;  %v6187_v12 = vld [vmem:[%s9250_s2 + $0x1e0] ss:$16 sps:$4 sm:$0xff]  }
 0xd6f   :  { %v5670_v41 = vmul.f32 -1.442695, %v2391_v6  ;;  %v5671_v23 = vmul.f32 -1.442695, %v2393_v30  ;;  %v6190_v13 = vld [vmem:[%s9250_s2 + $0x1e8] ss:$16 sps:$4 sm:$0xff]  }
 0xd70   :  { %6561 = vpow2.f32 %v5669_v53  ;;  %v2539_v14 = vld [vmem:[#allocation2] sm:$0xff]  ;;  %v2541_v16 = vld [vmem:[#allocation2 + $0x10] sm:$0xff]  ;;  %v8211_v6 = vld [vmem:[#allocation4 + $0x20c] ss:$16 sps:$4 sm:$0xff]  }
 0xd71   :  { %6563 = vpow2.f32 %v5670_v41  ;;  %v8209_v2 = vld [vmem:[#allocation4 + $0x204] ss:$16 sps:$4 sm:$0xff]   ;;  %v8213_v30 = vld [vmem:[#allocation4 + $0x200] ss:$16 sps:$4 sm:$0xff]   ;;  %v8215_v36 = vld [vmem:[#allocation4 + $0x208] ss:$16 sps:$4 sm:$0xff]  }
 0xd72   :  { %6565 = vpow2.f32 %v5671_v23  ;;  %v8221_v1 = vld [vmem:[#allocation4 + $0x224] ss:$16 sps:$4 sm:$0xff]   ;;  %v8223_v53 = vld [vmem:[#allocation4 + $0x22c] ss:$16 sps:$4 sm:$0xff]   ;;  %v8225_v42 = vld [vmem:[#allocation4 + $0x220] ss:$16 sps:$4 sm:$0xff]  }
 0xd73   :  { %6567 = vtanh.f32 %v2392_v15  ;;  %v2540_v15 = vld [vmem:[#allocation2 + $0x8] sm:$0xff]  ;;  %v8233_v41 = vld [vmem:[#allocation4 + $0x244] ss:$16 sps:$4 sm:$0xff]  }
 0xd74   :  { %v8227_v54 = vld [vmem:[#allocation4 + $0x228] ss:$16 sps:$4 sm:$0xff]   ;;  %v8235_v23 = vld [vmem:[#allocation4 + $0x24c] ss:$16 sps:$4 sm:$0xff]  }
 0xd7a   :  { %v6562_v28 = vpop.eup %6561 }
 0xd7b   :  { %v6564_v40 = vpop.eup %6563  ;;  %v2397_v24 = vadd.f32 1.0, %v6562_v28  ;;  %v8237_v28 = vld [vmem:[#allocation4 + $0x240] ss:$16 sps:$4 sm:$0xff]  }
 0xd7c   :  { %v2403_v47 = vadd.f32 1.0, %v6564_v40  ;;  %v6566_v45 = vpop.eup %6565  ;;  %v8239_v40 = vld [vmem:[#allocation4 + $0x248] ss:$16 sps:$4 sm:$0xff]  }
 0xd7d   :  { %6569 = vrcp.f32 %v2397_v24  ;;  %v6568_v9 = vpop.eup %6567  ;;  %v2410_v0 = vadd.f32 1.0, %v6566_v45  ;;  %v8245_v24 = vld [vmem:[#allocation4 + $0x264] ss:$16 sps:$4 sm:$0xff]   ;;  %v8249_v45 = vld [vmem:[#allocation4 + $0x260] ss:$16 sps:$4 sm:$0xff]  }
 0xd7e   :  { %6571 = vrcp.f32 %v2403_v47  ;;  %v8247_v47 = vld [vmem:[#allocation4 + $0x26c] ss:$16 sps:$4 sm:$0xff]  }
 0xd7f   :  { %6573 = vrcp.f32 %v2410_v0  ;;  %v8263_v0 = vld [vmem:[#allocation4 + $0x288] ss:$16 sps:$4 sm:$0xff]  }
 0xd87   :  { %v6570_v48 = vpop.eup %6569 }
 0xd88   :  { %v6572_v29 = vpop.eup %6571  ;;  %v2414_v27 = vmul.f32 %v6570_v48, %v6568_v9  ;;  %v8251_v9 = vld [vmem:[#allocation4 + $0x268] ss:$16 sps:$4 sm:$0xff]   ;;  %v8257_v48 = vld [vmem:[#allocation4 + $0x284] ss:$16 sps:$4 sm:$0xff]  }
 0xd89   :  { %v2413_v17 = vmul.f32 %v6572_v29, %v8086_v46  ;;  %v6574_v57 = vpop.eup %6573  ;;  %v6153_v46 = vld [vmem:[%s9250_s2 + $0x124] ss:$16 sps:$4 sm:$0xff]   ;;  %v8259_v29 = vld [vmem:[#allocation4 + $0x28c] ss:$16 sps:$4 sm:$0xff]  }
 0xd8b   :  { %v8108_v55 = vadd.f32 %v2414_v27, %v2413_v17  ;;  %v8261_v27 = vld [vmem:[#allocation4 + $0x280] ss:$16 sps:$4 sm:$0xff]   ;;  %v8267_v17 = vld [vmem:[#allocation4 + $0x2a4] ss:$16 sps:$4 sm:$0xff]  }
 0xd8d   :  { %6575 = vtanh.f32 %v8108_v55 }
 0xd97   :  { %v6576_v50 = vpop.eup %6575 }
 0xd98   :  { %v2417_v19 = vmul.f32 %v6576_v50, %v6574_v57  ;;  %v8269_v57 = vld [vmem:[#allocation4 + $0x2ac] ss:$16 sps:$4 sm:$0xff]   ;;  %v8273_v50 = vld [vmem:[#allocation4 + $0x2a0] ss:$16 sps:$4 sm:$0xff]  }
 0xd9a   :  { %v2418_v18 = vpack.c.bf16 %v2417_v19, %v2417_v19  ;;  %v8275_v19 = vld [vmem:[#allocation4 + $0x2a8] ss:$16 sps:$4 sm:$0xff]  }
 0xd9c   :  { %2419 = vst [vmem:[#allocation2 + $0x18] sm:$0xf] %v2418_v18  ;;  %2457 = vmatmul.mubr.bf16.vlgmr.msra.gmra.mrb[68].mxu0 %v2418_v18  ;;  %2498 = vmatmul.mubr.bf16.vlgmr.msra.gmra.mrb[68].mxu1 %v2418_v18  ;;  %v8285_v18 = vld [vmem:[#allocation4 + $0x2c0] ss:$16 sps:$4 sm:$0xff]  }
 0xd9d   :  { %2760 = vmatpush1.bf16.msra.mxu0 %v6145_v49  ;;  %2833 = vmatpush1.bf16.msra.mxu1 %v6148_v22  ;;  %v8279_v49 = vld [vmem:[#allocation4 + $0x2c4] ss:$16 sps:$4 sm:$0xff]   ;;  %v8281_v22 = vld [vmem:[#allocation4 + $0x2cc] ss:$16 sps:$4 sm:$0xff]  }
 0xd9e   :  { %2761 = vmatprep.subr.bf16.mxu0 %v6153_v46  ;;  %2834 = vmatprep.subr.bf16.mxu1 %v6156_v56  ;;  %v8287_v46 = vld [vmem:[#allocation4 + $0x2c8] ss:$16 sps:$4 sm:$0xff]   ;;  %v8291_v56 = vld [vmem:[#allocation4 + $0x2e4] ss:$16 sps:$4 sm:$0xff]  }
 0xd9f   :  { %2791 = vmatprep.mubr.bf16.mxu0 %v9285_v31  ;;  %2864 = vmatprep.mubr.bf16.mxu1 %v9285_v31 }
 0xda1   :  { %2762 = vmatpush1.bf16.msra.mxu0 %v6151_v25  ;;  %2835 = vmatpush1.bf16.msra.mxu1 %v6154_v11  ;;  %v8293_v25 = vld [vmem:[#allocation4 + $0x2ec] ss:$16 sps:$4 sm:$0xff]   ;;  %v8297_v11 = vld [vmem:[#allocation4 + $0x2e0] ss:$16 sps:$4 sm:$0xff]  }
 0xda2   :  { %2763 = vmatprep.subr.bf16.mxu0 %v6159_v8  ;;  %2836 = vmatprep.subr.bf16.mxu1 %v6162_v58  ;;  %v8299_v8 = vld [vmem:[#allocation4 + $0x2e8] ss:$16 sps:$4 sm:$0xff]   ;;  %v9310_v58 = vld [vmem:[#allocation27_spill] sm:$0xff] }
 0xda5   :  { %2764 = vmatpush1.bf16.msra.mxu0 %v6157_v59  ;;  %2837 = vmatpush1.bf16.msra.mxu1 %v6160_v60  ;;  %v1383_v59 = vadd.f32 %v9310_v58, %v7776_v20  ;;  %v9311_v60 = vld [vmem:[#allocation28_spill] sm:$0xff] }
 0xda6   :  { %2765 = vmatprep.subr.bf16.mxu0 %v6165_v61  ;;  %2838 = vmatprep.subr.bf16.mxu1 %v6168_v51  ;;  %v1456_v61 = vadd.f32 %v9311_v60, %v7805_v52  ;;  %v9312_v51 = vld [vmem:[#allocation29_spill] sm:$0xff] }
 0xda9   :  { %2766 = vmatpush1.bf16.msra.mxu0 %v6163_v62  ;;  %2839 = vmatpush1.bf16.msra.mxu1 %v6166_v63  ;;  %v1385_v62 = vadd.f32 %v9312_v51, %v7780_v26  ;;  %v9313_v63 = vld [vmem:[#allocation30_spill] sm:$0xff]  ;;  %v9314_v51 = vld [vmem:[#allocation7_spill] sm:$0xff] }
 0xdaa   :  { %2767 = vmatprep.subr.bf16.mxu0 %v6171_v21  ;;  %2840 = vmatprep.subr.bf16.mxu1 %v6174_v3  ;;  %v1458_v21 = vadd.f32 %v9313_v63, %v7795_v34 }
 0xdad   :  { %2768 = vmatpush1.bf16.msra.mxu0 %v6169_v4  ;;  %2841 = vmatpush1.bf16.msra.mxu1 %v6172_v5 }
 0xdae   :  { %2769 = vmatprep.subr.bf16.mxu0 %v6177_v7  ;;  %2842 = vmatprep.subr.bf16.mxu1 %v6180_v35 }
 0xdb1   :  { %2770 = vmatpush1.bf16.msra.mxu0 %v6175_v39  ;;  %2843 = vmatpush1.bf16.msra.mxu1 %v6178_v43 }
 0xdb2   :  { %2771 = vmatprep.subr.bf16.mxu0 %v6183_v44  ;;  %2844 = vmatprep.subr.bf16.mxu1 %v6186_v32 }
 0xdb5   :  { %2772 = vmatpush1.bf16.msra.mxu0 %v6181_v33  ;;  %2845 = vmatpush1.bf16.msra.mxu1 %v6184_v37 }
 0xdb6   :  { %2773 = vmatprep.subr.bf16.mxu0 %v6189_v38  ;;  %2846 = vmatprep.subr.bf16.mxu1 %v6192_v10 }
 0xdb9   :  { %2774 = vmatpush1.bf16.msra.mxu0 %v6187_v12  ;;  %2847 = vmatpush1.bf16.msra.mxu1 %v6190_v13 }
 0xdba   :  { %3164 = vmatprep.subr.bf16.mxu0 %v8209_v2  ;;  %3205 = vmatprep.subr.bf16.mxu1 %v8211_v6 }
 0xdbc   :  { %2792 = vmatmul.mubr.bf16.vlgmr.msra.gmra.mrb[72].mxu0 %v2539_v14  ;;  %2865 = vmatmul.mubr.bf16.vlgmr.msra.gmra.mrb[72].mxu1 %v2539_v14 }
 0xdbd   :  { %2801 = vmatprep.mubr.bf16.mxu0 %v9285_v31  ;;  %2874 = vmatprep.mubr.bf16.mxu1 %v9285_v31 }
 0xdbe   :  { %3165 = vmatpush1.bf16.msra.mxu0 %v8213_v30  ;;  %3206 = vmatpush1.bf16.msra.mxu1 %v8215_v36 }
 0xdbf   :  { %3166 = vmatprep.subr.bf16.mxu0 %v8221_v1  ;;  %3207 = vmatprep.subr.bf16.mxu1 %v8223_v53 }
 0xdc2   :  { %3167 = vmatpush1.bf16.msra.mxu0 %v8225_v42  ;;  %3208 = vmatpush1.bf16.msra.mxu1 %v8227_v54 }
 0xdc3   :  { %3168 = vmatprep.subr.bf16.mxu0 %v8233_v41  ;;  %3209 = vmatprep.subr.bf16.mxu1 %v8235_v23 }
 0xdc4   :  { %2802 = vmatmul.mubr.bf16.gmra.mrb[76].mxu0 %v2540_v15  ;;  %2875 = vmatmul.mubr.bf16.gmra.mrb[76].mxu1 %v2540_v15  ;;  %v5707_v15 = vld [vmem:[%s9251_s3 + $0x4] sm:$0xf] }
 0xdc5   :  { %2811 = vmatprep.mubr.bf16.mxu0 %v9285_v31  ;;  %2884 = vmatprep.mubr.bf16.mxu1 %v9285_v31 }
 0xdc6   :  { %3169 = vmatpush1.bf16.msra.mxu0 %v8237_v28  ;;  %3210 = vmatpush1.bf16.msra.mxu1 %v8239_v40 }
 0xdc7   :  { %3170 = vmatprep.subr.bf16.mxu0 %v8245_v24  ;;  %3211 = vmatprep.subr.bf16.mxu1 %v8247_v47 }
 0xdca   :  { %3171 = vmatpush1.bf16.msra.mxu0 %v8249_v45  ;;  %3212 = vmatpush1.bf16.msra.mxu1 %v8251_v9 }
 0xdcb   :  { %3172 = vmatprep.subr.bf16.mxu0 %v8257_v48  ;;  %3213 = vmatprep.subr.bf16.mxu1 %v8259_v29 }
 0xdcc   :  { %2812 = vmatmul.mubr.bf16.gmra.mrb[80].mxu0 %v2541_v16  ;;  %2885 = vmatmul.mubr.bf16.gmra.mrb[80].mxu1 %v2541_v16 }
 0xdcd   :  { %2821 = vmatprep.mubr.bf16.mxu0 %v9285_v31  ;;  %2894 = vmatprep.mubr.bf16.mxu1 %v9285_v31 }
 0xdce   :  { %3173 = vmatpush1.bf16.msra.mxu0 %v8261_v27  ;;  %3214 = vmatpush1.bf16.msra.mxu1 %v8263_v0 }
 0xdcf   :  { %3174 = vmatprep.subr.bf16.mxu0 %v8267_v17  ;;  %3215 = vmatprep.subr.bf16.mxu1 %v8269_v57 }
 0xdd2   :  { %3175 = vmatpush1.bf16.msra.mxu0 %v8273_v50  ;;  %3216 = vmatpush1.bf16.msra.mxu1 %v8275_v19 }
 0xdd3   :  { %3176 = vmatprep.subr.bf16.mxu0 %v8279_v49  ;;  %3217 = vmatprep.subr.bf16.mxu1 %v8281_v22 }
 0xdd6   :  { %3177 = vmatpush1.bf16.msra.mxu0 %v8285_v18  ;;  %3218 = vmatpush1.bf16.msra.mxu1 %v8287_v46 }
 0xdd7   :  { %3178 = vmatprep.subr.bf16.mxu0 %v8291_v56  ;;  %3219 = vmatprep.subr.bf16.mxu1 %v8293_v25 }
 0xdda   :  { %3179 = vmatpush1.bf16.msra.mxu0 %v8297_v11  ;;  %3220 = vmatpush1.bf16.msra.mxu1 %v8299_v8 }
 0xddb   :  { %3283 = vmatprep.subr.bf16.mxu0 %v8209_v2  ;;  %3324 = vmatprep.subr.bf16.mxu1 %v8211_v6 }
 0xe6f   :  { %v2458_v3 = vpop.f32.mrb[68].mxu0  ;;  %v2499_v4 = vpop.f32.mrb[68].mxu1 }
 0xe70   :  { %v2506_v5 = vadd.f32 %v2458_v3, %v1383_v59  ;;  %v2508_v7 = vadd.f32 %v2499_v4, %v1456_v61  ;;  %v2460_v35 = vpop.f32.mrb[69].mxu0  ;;  %v2501_v39 = vpop.f32.mrb[69].mxu1 }
 0xe71   :  { %v2507_v43 = vadd.f32 %v2460_v35, %v1385_v62  ;;  %v2509_v44 = vadd.f32 %v2501_v39, %v1458_v21  ;;  %v2462_v32 = vpop.f32.mrb[70].mxu0  ;;  %v2503_v33 = vpop.f32.mrb[70].mxu1  ;;  %v8319_v62 = vrot.slane %v5707_v15, %v9314_v51  ;;  %v9315_v21 = vld [vmem:[#allocation8_spill] sm:$0xff] }
 0xe72   :  { %v5672_v20 = vmul.f32 -1.442695, %v2506_v5  ;;  %v2463_v37 = vpop.f32.mrb[71].mxu0  ;;  %v2504_v38 = vpop.f32.mrb[71].mxu1  ;;  %v8323_v3 = vrot.slane %v5707_v15, %v9315_v21 }
 0xe73   :  { %v5673_v52 = vmul.f32 -1.442695, %v2507_v43  ;;  %v5674_v26 = vmul.f32 -1.442695, %v2509_v44 }
 0xe74   :  { %6577 = vpow2.f32 %v5672_v20 }
 0xe75   :  { %6579 = vpow2.f32 %v5673_v52  ;;  %v9316_v52 = vld [vmem:[#allocation9_spill] sm:$0xff] }
 0xe76   :  { %6581 = vpow2.f32 %v5674_v26  ;;  %v8336_v26 = vrot.slane %v5707_v15, %v9316_v52 }
 0xe77   :  { %6583 = vtanh.f32 %v2508_v7 }
 0xe7e   :  { %v6578_v10 = vpop.eup %6577 }
 0xe7f   :  { %v6580_v12 = vpop.eup %6579  ;;  %v2513_v34 = vadd.f32 1.0, %v6578_v10 }
 0xe80   :  { %v2519_v13 = vadd.f32 1.0, %v6580_v12  ;;  %v6582_v14 = vpop.eup %6581 }
 0xe81   :  { %6585 = vrcp.f32 %v2513_v34  ;;  %v6584_v16 = vpop.eup %6583  ;;  %v2526_v61 = vadd.f32 1.0, %v6582_v14 }
 0xe82   :  { %6587 = vrcp.f32 %v2519_v13  ;;  %v9317_v13 = vld [vmem:[#allocation10_spill] sm:$0xff] }
 0xe83   :  { %6589 = vrcp.f32 %v2526_v61  ;;  %v8344_v14 = vrot.slane %v5707_v15, %v9317_v13 }
 0xe8b   :  { %v6586_v58 = vpop.eup %6585 }
 0xe8c   :  { %v6588_v59 = vpop.eup %6587  ;;  %v2530_v60 = vmul.f32 %v6586_v58, %v6584_v16 }
 0xe8d   :  { %v2529_v63 = vmul.f32 %v6588_v59, %v8108_v55  ;;  %v6590_v61 = vpop.eup %6589 }
 0xe8f   :  { %v2531_v4 = vadd.f32 %v2530_v60, %v2529_v63  ;;  %v2793_v5 = vpop.f32.mrb[72].mxu0  ;;  %v2866_v7 = vpop.f32.mrb[72].mxu1 }
 0xe90   :  { %v2794_v35 = vadd.f32 %v2793_v5, %v8319_v62  ;;  %v2795_v39 = vpop.f32.mrb[73].mxu0  ;;  %v2868_v43 = vpop.f32.mrb[73].mxu1 }
 0xe91   :  { %6591 = vtanh.f32 %v2531_v4  ;;  %v2796_v44 = vadd.f32 %v2795_v39, %v8323_v3  ;;  %v8327_v32 = vpop.f32.mrb[74].mxu0  ;;  %v8329_v33 = vpop.f32.mrb[74].mxu1  ;;  %v2869_v10 = vadd.f32 %v2868_v43, %v8336_v26  ;;  %v2867_v43 = vadd.f32 %v2866_v7, %v8344_v14 }
 0xe92   :  { %v5740_v20 = vmul.f32 -1.442695, %v2794_v35  ;;  %v8331_v55 = vpop.f32.mrb[75].mxu0  ;;  %v8333_v37 = vpop.f32.mrb[75].mxu1 }
 0xe93   :  { %v5741_v38 = vmul.f32 -1.442695, %v2796_v44  ;;  %v5742_v35 = vmul.f32 -1.442695, %v2869_v10 }
 0xe94   :  { %6593 = vpow2.f32 %v5740_v20 }
 0xe95   :  { %6595 = vpow2.f32 %v5741_v38 }
 0xe96   :  { %6597 = vpow2.f32 %v5742_v35 }
 0xe97   :  { %v8339_v12 = vpop.f32.mrb[76].mxu0  ;;  %v8341_v34 = vpop.f32.mrb[76].mxu1  ;;  %6599 = vtanh.f32 %v2867_v43 }
 0xe98   :  { %v8346_v16 = vpop.f32.mrb[77].mxu0  ;;  %v8348_v58 = vpop.f32.mrb[77].mxu1 }
 0xe99   :  { %v8350_v59 = vpop.f32.mrb[78].mxu0  ;;  %v8352_v60 = vpop.f32.mrb[78].mxu1 }
 0xe9a   :  { %9318 = vst [vmem:[#allocation11_spill] sm:$0xff] %v8350_v59  ;;  %9319 = vst [vmem:[#allocation12_spill] sm:$0xff] %v8352_v60  ;;  %v8354_v63 = vpop.f32.mrb[79].mxu0  ;;  %v8356_v4 = vpop.f32.mrb[79].mxu1 }
 0xe9b   :  { %9320 = vst [vmem:[#allocation13_spill] sm:$0xff] %v8354_v63  ;;  %9321 = vst [vmem:[#allocation14_spill] sm:$0xff] %v8356_v4  ;;  %v6592_v5 = vpop.eup %6591 }
 0xe9c   :  { %v2533_v39 = vmul.f32 %v6592_v5, %v6590_v61 }
 0xe9e   :  { %v6594_v15 = vpop.eup %6593  ;;  %v2534_v44 = vpack.c.bf16 %v2533_v39, %v2533_v39 }
 0xe9f   :  { %v6596_v20 = vpop.eup %6595  ;;  %v2977_v38 = vadd.f32 1.0, %v6594_v15  ;;  %v8359_v13 = vpop.f32.mrb[80].mxu0 }
 0xea0   :  { %9322 = vst [vmem:[#allocation15_spill] sm:$0xff] %v8359_v13  ;;  %v8361_v52 = vpop.f32.mrb[80].mxu1  ;;  %v2536_v21 = vrot.slane %v2534_v44, 4  ;;  %v2983_v51 = vadd.f32 1.0, %v6596_v20  ;;  %v8363_v63 = vpop.f32.mrb[81].mxu0 }
 0xea1   :  { %9323 = vst [vmem:[#allocation16_spill] sm:$0xff] %v8361_v52  ;;  %9324 = vst [vmem:[#allocation17_spill] sm:$0xff] %v8363_v63  ;;  %v8365_v4 = vpop.f32.mrb[81].mxu1  ;;  %6601 = vrcp.f32 %v2977_v38  ;;  %v8367_v10 = vpop.f32.mrb[82].mxu0 }
 0xea2   :  { %9325 = vst [vmem:[#allocation18_spill] sm:$0xff] %v8365_v4  ;;  %9326 = vst [vmem:[#allocation19_spill] sm:$0xff] %v8367_v10  ;;  %v8369_v7 = vpop.f32.mrb[82].mxu1  ;;  %6603 = vrcp.f32 %v2983_v51  ;;  %v8371_v61 = vpop.f32.mrb[83].mxu0 }
 0xea3   :  { %9327 = vst [vmem:[#allocation20_spill] sm:$0xff] %v8369_v7  ;;  %2538 = vst [vmem:[#allocation2 + $0x18] sm:$0xf0] %v2536_v21  ;;  %v8373_v5 = vpop.f32.mrb[83].mxu1  ;;  %v6598_v35 = vpop.eup %6597 }
 0xea4   :  { %9328 = vst [vmem:[#allocation21_spill] sm:$0xff] %v8371_v61  ;;  %9329 = vst [vmem:[#allocation22_spill] sm:$0xff] %v8373_v5  ;;  %v6600_v15 = vpop.eup %6599  ;;  %v2990_v38 = vadd.f32 1.0, %v6598_v35 }
 0xea6   :  { %6605 = vrcp.f32 %v2990_v38  ;;  %v2800_v38 = vadd.f32 %v8331_v55, %v8323_v3 }
 0xeaa   :  { %v2542_v39 = vld [vmem:[#allocation2 + $0x18] sm:$0xff] }
 0xeab   :  { %2822 = vmatmul.mubr.bf16.gmra.mrb[84].mxu0 %v2542_v39  ;;  %2895 = vmatmul.mubr.bf16.gmra.mrb[84].mxu1 %v2542_v39  ;;  %v6602_v43 = vpop.eup %6601 }
 0xeac   :  { %3196 = vmatprep.mubr.bf16.mxu0 %v9285_v31  ;;  %3237 = vmatprep.mubr.bf16.mxu1 %v9285_v31  ;;  %v6604_v44 = vpop.eup %6603  ;;  %v2994_v20 = vmul.f32 %v6602_v43, %v6600_v15 }
 0xead   :  { %v2993_v7 = vmul.f32 0.0, %v6604_v44  ;;  %v2798_v44 = vadd.f32 %v8327_v32, %v8319_v62 }
 0xeaf   :  { %v8377_v21 = vadd.f32 %v2994_v20, %v2993_v7  ;;  %v2871_v20 = vadd.f32 %v8329_v33, %v8344_v14 }
 0xeb0   :  { %v6606_v51 = vpop.eup %6605 }
 0xeb1   :  { %6607 = vtanh.f32 %v8377_v21 }
 0xebb   :  { %v6608_v5 = vpop.eup %6607 }
 0xebc   :  { %v2997_v61 = vmul.f32 %v6608_v5, %v6606_v51  ;;  %v2873_v51 = vadd.f32 %v8333_v37, %v8336_v26 }
 0xebe   :  { %v2998_v10 = vpack.c.bf16 %v2997_v61, %v2997_v61 }
 0xec0   :  { %2999 = vst [vmem:[#allocation2] sm:$0xf] %v2998_v10  ;;  %3197 = vmatmul.mubr.bf16.vlgmr.msra.gmra.mrb[88].mxu0 %v2998_v10  ;;  %3238 = vmatmul.mubr.bf16.vlgmr.msra.gmra.mrb[88].mxu1 %v2998_v10 }
 0xec1   :  { %3284 = vmatpush1.bf16.msra.mxu0 %v8213_v30  ;;  %3325 = vmatpush1.bf16.msra.mxu1 %v8215_v36 }
 0xec2   :  { %3285 = vmatprep.subr.bf16.mxu0 %v8221_v1  ;;  %3326 = vmatprep.subr.bf16.mxu1 %v8223_v53 }
 0xec3   :  { %3315 = vmatprep.mubr.bf16.mxu0 %v9285_v31  ;;  %3356 = vmatprep.mubr.bf16.mxu1 %v9285_v31 }
 0xec5   :  { %3286 = vmatpush1.bf16.msra.mxu0 %v8225_v42  ;;  %3327 = vmatpush1.bf16.msra.mxu1 %v8227_v54 }
 0xec6   :  { %3287 = vmatprep.subr.bf16.mxu0 %v8233_v41  ;;  %3328 = vmatprep.subr.bf16.mxu1 %v8235_v23 }
 0xec9   :  { %3288 = vmatpush1.bf16.msra.mxu0 %v8237_v28  ;;  %3329 = vmatpush1.bf16.msra.mxu1 %v8239_v40 }
 0xeca   :  { %3289 = vmatprep.subr.bf16.mxu0 %v8245_v24  ;;  %3330 = vmatprep.subr.bf16.mxu1 %v8247_v47 }
 0xecd   :  { %3290 = vmatpush1.bf16.msra.mxu0 %v8249_v45  ;;  %3331 = vmatpush1.bf16.msra.mxu1 %v8251_v9 }
 0xece   :  { %3291 = vmatprep.subr.bf16.mxu0 %v8257_v48  ;;  %3332 = vmatprep.subr.bf16.mxu1 %v8259_v29 }
 0xed1   :  { %3292 = vmatpush1.bf16.msra.mxu0 %v8261_v27  ;;  %3333 = vmatpush1.bf16.msra.mxu1 %v8263_v0 }
 0xed2   :  { %3293 = vmatprep.subr.bf16.mxu0 %v8267_v17  ;;  %3334 = vmatprep.subr.bf16.mxu1 %v8269_v57 }
 0xed5   :  { %3294 = vmatpush1.bf16.msra.mxu0 %v8273_v50  ;;  %3335 = vmatpush1.bf16.msra.mxu1 %v8275_v19 }
 0xed6   :  { %3295 = vmatprep.subr.bf16.mxu0 %v8279_v49  ;;  %3336 = vmatprep.subr.bf16.mxu1 %v8281_v22 }
 0xed9   :  { %3296 = vmatpush1.bf16.msra.mxu0 %v8285_v18  ;;  %3337 = vmatpush1.bf16.msra.mxu1 %v8287_v46 }
 0xeda   :  { %3297 = vmatprep.subr.bf16.mxu0 %v8291_v56  ;;  %3338 = vmatprep.subr.bf16.mxu1 %v8293_v25 }
 0xedd   :  { %3298 = vmatpush1.bf16.msra.mxu0 %v8297_v11  ;;  %3339 = vmatpush1.bf16.msra.mxu1 %v8299_v8 }
 0xede   :  { %3399 = vmatprep.subr.bf16.mxu0 %v8209_v2  ;;  %3440 = vmatprep.subr.bf16.mxu1 %v8211_v6 }
 0xf7e   :  { %v8414_v10 = vpop.f32.mrb[84].mxu0  ;;  %v8416_v7 = vpop.f32.mrb[84].mxu1 }
 0xf7f   :  { %9330 = vst [vmem:[#allocation23_spill] sm:$0xff] %v8414_v10  ;;  %9331 = vst [vmem:[#allocation24_spill] sm:$0xff] %v8416_v7  ;;  %v8418_v61 = vpop.f32.mrb[85].mxu0  ;;  %v8420_v5 = vpop.f32.mrb[85].mxu1 }
 0xf80   :  { %9332 = vst [vmem:[#allocation25_spill] sm:$0xff] %v8418_v61  ;;  %9333 = vst [vmem:[#allocation26_spill] sm:$0xff] %v8420_v5  ;;  %v8422_v35 = vpop.f32.mrb[86].mxu0  ;;  %v8424_v39 = vpop.f32.mrb[86].mxu1 }
 0xf81   :  { %9334 = vst [vmem:[#allocation27_spill] sm:$0xff] %v8422_v35  ;;  %9335 = vst [vmem:[#allocation28_spill] sm:$0xff] %v8424_v39  ;;  %v8426_v15 = vpop.f32.mrb[87].mxu0  ;;  %v8428_v43 = vpop.f32.mrb[87].mxu1 }
 0xf82   :  { %9336 = vst [vmem:[#allocation29_spill] sm:$0xff] %v8426_v15  ;;  %9337 = vst [vmem:[#allocation30_spill] sm:$0xff] %v8428_v43 }
 0xf93   :  { %v3198_v5 = vpop.f32.mrb[88].mxu0  ;;  %v3239_v35 = vpop.f32.mrb[88].mxu1 }
 0xf94   :  { %v3246_v61 = vadd.f32 %v3198_v5, %v2798_v44  ;;  %v3248_v39 = vadd.f32 %v3239_v35, %v2871_v20  ;;  %v3200_v7 = vpop.f32.mrb[89].mxu0  ;;  %v3241_v15 = vpop.f32.mrb[89].mxu1  ;;  %v2877_v44 = vadd.f32 %v8341_v34, %v8344_v14  ;;  %v2806_v20 = vadd.f32 %v8346_v16, %v8323_v3 }
 0xf95   :  { %v3247_v10 = vadd.f32 %v3200_v7, %v2800_v38  ;;  %v3249_v43 = vadd.f32 %v3241_v15, %v2873_v51  ;;  %v3202_v4 = vpop.f32.mrb[90].mxu0  ;;  %v3243_v63 = vpop.f32.mrb[90].mxu1  ;;  %v2879_v38 = vadd.f32 %v8348_v58, %v8336_v26 }
 0xf96   :  { %v5775_v32 = vmul.f32 -1.442695, %v3246_v61  ;;  %v3203_v52 = vpop.f32.mrb[91].mxu0  ;;  %v3244_v13 = vpop.f32.mrb[91].mxu1 }
 0xf97   :  { %v5776_v33 = vmul.f32 -1.442695, %v3247_v10  ;;  %v5777_v55 = vmul.f32 -1.442695, %v3249_v43 }
 0xf98   :  { %6609 = vpow2.f32 %v5775_v32 }
 0xf99   :  { %6611 = vpow2.f32 %v5776_v33 }
 0xf9a   :  { %6613 = vpow2.f32 %v5777_v55 }
 0xf9b   :  { %6615 = vtanh.f32 %v3248_v39 }
 0xfa2   :  { %v6610_v60 = vpop.eup %6609 }
 0xfa3   :  { %v6612_v59 = vpop.eup %6611  ;;  %v3253_v37 = vadd.f32 1.0, %v6610_v60 }
 0xfa4   :  { %v3259_v5 = vadd.f32 1.0, %v6612_v59  ;;  %v6614_v35 = vpop.eup %6613 }
 0xfa5   :  { %6617 = vrcp.f32 %v3253_v37  ;;  %v6616_v7 = vpop.eup %6615  ;;  %v3266_v61 = vadd.f32 1.0, %v6614_v35 }
 0xfa6   :  { %6619 = vrcp.f32 %v3259_v5 }
 0xfa7   :  { %6621 = vrcp.f32 %v3266_v61 }
 0xfaf   :  { %v6618_v15 = vpop.eup %6617 }
 0xfb0   :  { %v6620_v4 = vpop.eup %6619  ;;  %v3270_v63 = vmul.f32 %v6618_v15, %v6616_v7 }
 0xfb1   :  { %v3269_v52 = vmul.f32 %v6620_v4, %v8377_v21  ;;  %v6622_v10 = vpop.eup %6621  ;;  %v2804_v21 = vadd.f32 %v8339_v12, %v8319_v62 }
 0xfb3   :  { %v8439_v13 = vadd.f32 %v3270_v63, %v3269_v52 }
 0xfb5   :  { %6623 = vtanh.f32 %v8439_v13 }
 0xfbf   :  { %v6624_v60 = vpop.eup %6623 }
 0xfc0   :  { %v3273_v43 = vmul.f32 %v6624_v60, %v6622_v10 }
 0xfc2   :  { %v3274_v39 = vpack.c.bf16 %v3273_v43, %v3273_v43 }
 0xfc4   :  { %v3276_v59 = vrot.slane %v3274_v39, 4  ;;  %3316 = vmatmul.mubr.bf16.vlgmr.msra.gmra.mrb[92].mxu0 %v3274_v39  ;;  %3357 = vmatmul.mubr.bf16.vlgmr.msra.gmra.mrb[92].mxu1 %v3274_v39 }
 0xfc5   :  { %3400 = vmatpush1.bf16.msra.mxu0 %v8213_v30  ;;  %3441 = vmatpush1.bf16.msra.mxu1 %v8215_v36 }
 0xfc6   :  { %3278 = vst [vmem:[#allocation2] sm:$0xf0] %v3276_v59  ;;  %3401 = vmatprep.subr.bf16.mxu0 %v8221_v1  ;;  %3442 = vmatprep.subr.bf16.mxu1 %v8223_v53 }
 0xfc7   :  { %3431 = vmatprep.mubr.bf16.mxu0 %v9285_v31  ;;  %3472 = vmatprep.mubr.bf16.mxu1 %v9285_v31 }
 0xfc9   :  { %3402 = vmatpush1.bf16.msra.mxu0 %v8225_v42  ;;  %3443 = vmatpush1.bf16.msra.mxu1 %v8227_v54 }
 0xfca   :  { %3403 = vmatprep.subr.bf16.mxu0 %v8233_v41  ;;  %3444 = vmatprep.subr.bf16.mxu1 %v8235_v23 }
 0xfcd   :  { %3404 = vmatpush1.bf16.msra.mxu0 %v8237_v28  ;;  %3445 = vmatpush1.bf16.msra.mxu1 %v8239_v40 }
 0xfce   :  { %3405 = vmatprep.subr.bf16.mxu0 %v8245_v24  ;;  %3446 = vmatprep.subr.bf16.mxu1 %v8247_v47 }
 0xfd1   :  { %3406 = vmatpush1.bf16.msra.mxu0 %v8249_v45  ;;  %3447 = vmatpush1.bf16.msra.mxu1 %v8251_v9 }
 0xfd2   :  { %3407 = vmatprep.subr.bf16.mxu0 %v8257_v48  ;;  %3448 = vmatprep.subr.bf16.mxu1 %v8259_v29 }
 0xfd5   :  { %3408 = vmatpush1.bf16.msra.mxu0 %v8261_v27  ;;  %3449 = vmatpush1.bf16.msra.mxu1 %v8263_v0 }
 0xfd6   :  { %3409 = vmatprep.subr.bf16.mxu0 %v8267_v17  ;;  %3450 = vmatprep.subr.bf16.mxu1 %v8269_v57 }
 0xfd9   :  { %3410 = vmatpush1.bf16.msra.mxu0 %v8273_v50  ;;  %3451 = vmatpush1.bf16.msra.mxu1 %v8275_v19 }
 0xfda   :  { %3411 = vmatprep.subr.bf16.mxu0 %v8279_v49  ;;  %3452 = vmatprep.subr.bf16.mxu1 %v8281_v22 }
 0xfdd   :  { %3412 = vmatpush1.bf16.msra.mxu0 %v8285_v18  ;;  %3453 = vmatpush1.bf16.msra.mxu1 %v8287_v46 }
 0xfde   :  { %3413 = vmatprep.subr.bf16.mxu0 %v8291_v56  ;;  %3454 = vmatprep.subr.bf16.mxu1 %v8293_v25 }
 0xfe1   :  { %3414 = vmatpush1.bf16.msra.mxu0 %v8297_v11  ;;  %3455 = vmatpush1.bf16.msra.mxu1 %v8299_v8 }
 0xfe2   :  { %3518 = vmatprep.subr.bf16.mxu0 %v8209_v2  ;;  %3559 = vmatprep.subr.bf16.mxu1 %v8211_v6 }
0x1097   :  { %v3317_v51 = vpop.f32.mrb[92].mxu0  ;;  %v3358_v32 = vpop.f32.mrb[92].mxu1 }
0x1098   :  { %v3365_v33 = vadd.f32 %v3317_v51, %v2804_v21  ;;  %v3367_v55 = vadd.f32 %v3358_v32, %v2877_v44  ;;  %v3319_v37 = vpop.f32.mrb[93].mxu0  ;;  %v3360_v5 = vpop.f32.mrb[93].mxu1 }
0x1099   :  { %v3366_v35 = vadd.f32 %v3319_v37, %v2806_v20  ;;  %v3368_v7 = vadd.f32 %v3360_v5, %v2879_v38  ;;  %v3321_v15 = vpop.f32.mrb[94].mxu0  ;;  %v3362_v4 = vpop.f32.mrb[94].mxu1 }
0x109a   :  { %v5778_v12 = vmul.f32 -1.442695, %v3365_v33  ;;  %v3322_v63 = vpop.f32.mrb[95].mxu0  ;;  %v3363_v61 = vpop.f32.mrb[95].mxu1  ;;  %v9340_v15 = vld [vmem:[#allocation13_spill] sm:$0xff] }
0x109b   :  { %v5779_v34 = vmul.f32 -1.442695, %v3366_v35  ;;  %v5780_v16 = vmul.f32 -1.442695, %v3368_v7  ;;  %v9339_v35 = vld [vmem:[#allocation12_spill] sm:$0xff]  ;;  %v2810_v4 = vadd.f32 %v9340_v15, %v8323_v3 }
0x109c   :  { %6625 = vpow2.f32 %v5778_v12  ;;  %v2881_v7 = vadd.f32 %v9339_v35, %v8344_v14  ;;  %v9341_v12 = vld [vmem:[#allocation14_spill] sm:$0xff] }
0x109d   :  { %6627 = vpow2.f32 %v5779_v34  ;;  %v2883_v63 = vadd.f32 %v9341_v12, %v8336_v26 }
0x109e   :  { %6629 = vpow2.f32 %v5780_v16 }
0x109f   :  { %6631 = vtanh.f32 %v3367_v55 }
0x10a6   :  { %v6626_v52 = vpop.eup %6625 }
0x10a7   :  { %v6628_v10 = vpop.eup %6627  ;;  %v3372_v58 = vadd.f32 1.0, %v6626_v52 }
0x10a8   :  { %v3378_v60 = vadd.f32 1.0, %v6628_v10  ;;  %v6630_v43 = vpop.eup %6629 }
0x10a9   :  { %6633 = vrcp.f32 %v3372_v58  ;;  %v6632_v39 = vpop.eup %6631  ;;  %v3385_v20 = vadd.f32 1.0, %v6630_v43 }
0x10aa   :  { %6635 = vrcp.f32 %v3378_v60 }
0x10ab   :  { %6637 = vrcp.f32 %v3385_v20 }
0x10b3   :  { %v6634_v59 = vpop.eup %6633 }
0x10b4   :  { %v6636_v21 = vpop.eup %6635  ;;  %v3389_v44 = vmul.f32 %v6634_v59, %v6632_v39 }
0x10b5   :  { %v3388_v38 = vmul.f32 %v6636_v21, %v8439_v13  ;;  %v6638_v32 = vpop.eup %6637  ;;  %v9338_v13 = vld [vmem:[#allocation11_spill] sm:$0xff] }
0x10b6   :  { %v2808_v5 = vadd.f32 %v9338_v13, %v8319_v62 }
0x10b7   :  { %v8485_v51 = vadd.f32 %v3389_v44, %v3388_v38 }
0x10b9   :  { %6639 = vtanh.f32 %v8485_v51 }
0x10c3   :  { %v6640_v33 = vpop.eup %6639 }
0x10c4   :  { %v3392_v37 = vmul.f32 %v6640_v33, %v6638_v32 }
0x10c6   :  { %v3393_v55 = vpack.c.bf16 %v3392_v37, %v3392_v37 }
0x10c8   :  { %3394 = vst [vmem:[#allocation2 + $0x8] sm:$0xf] %v3393_v55  ;;  %3432 = vmatmul.mubr.bf16.vlgmr.msra.gmra.mrb[96].mxu0 %v3393_v55  ;;  %3473 = vmatmul.mubr.bf16.vlgmr.msra.gmra.mrb[96].mxu1 %v3393_v55 }
0x10c9   :  { %3519 = vmatpush1.bf16.msra.mxu0 %v8213_v30  ;;  %3560 = vmatpush1.bf16.msra.mxu1 %v8215_v36 }
0x10ca   :  { %3520 = vmatprep.subr.bf16.mxu0 %v8221_v1  ;;  %3561 = vmatprep.subr.bf16.mxu1 %v8223_v53 }
0x10cb   :  { %3550 = vmatprep.mubr.bf16.mxu0 %v9285_v31  ;;  %3591 = vmatprep.mubr.bf16.mxu1 %v9285_v31 }
0x10cd   :  { %3521 = vmatpush1.bf16.msra.mxu0 %v8225_v42  ;;  %3562 = vmatpush1.bf16.msra.mxu1 %v8227_v54 }
0x10ce   :  { %3522 = vmatprep.subr.bf16.mxu0 %v8233_v41  ;;  %3563 = vmatprep.subr.bf16.mxu1 %v8235_v23 }
0x10d1   :  { %3523 = vmatpush1.bf16.msra.mxu0 %v8237_v28  ;;  %3564 = vmatpush1.bf16.msra.mxu1 %v8239_v40 }
0x10d2   :  { %3524 = vmatprep.subr.bf16.mxu0 %v8245_v24  ;;  %3565 = vmatprep.subr.bf16.mxu1 %v8247_v47 }
0x10d5   :  { %3525 = vmatpush1.bf16.msra.mxu0 %v8249_v45  ;;  %3566 = vmatpush1.bf16.msra.mxu1 %v8251_v9 }
0x10d6   :  { %3526 = vmatprep.subr.bf16.mxu0 %v8257_v48  ;;  %3567 = vmatprep.subr.bf16.mxu1 %v8259_v29 }
0x10d9   :  { %3527 = vmatpush1.bf16.msra.mxu0 %v8261_v27  ;;  %3568 = vmatpush1.bf16.msra.mxu1 %v8263_v0 }
0x10da   :  { %3528 = vmatprep.subr.bf16.mxu0 %v8267_v17  ;;  %3569 = vmatprep.subr.bf16.mxu1 %v8269_v57 }
0x10dd   :  { %3529 = vmatpush1.bf16.msra.mxu0 %v8273_v50  ;;  %3570 = vmatpush1.bf16.msra.mxu1 %v8275_v19 }
0x10de   :  { %3530 = vmatprep.subr.bf16.mxu0 %v8279_v49  ;;  %3571 = vmatprep.subr.bf16.mxu1 %v8281_v22 }
0x10e1   :  { %3531 = vmatpush1.bf16.msra.mxu0 %v8285_v18  ;;  %3572 = vmatpush1.bf16.msra.mxu1 %v8287_v46 }
0x10e2   :  { %3532 = vmatprep.subr.bf16.mxu0 %v8291_v56  ;;  %3573 = vmatprep.subr.bf16.mxu1 %v8293_v25 }
0x10e5   :  { %3533 = vmatpush1.bf16.msra.mxu0 %v8297_v11  ;;  %3574 = vmatpush1.bf16.msra.mxu1 %v8299_v8 }
0x10e6   :  { %3634 = vmatprep.subr.bf16.mxu0 %v8209_v2  ;;  %3675 = vmatprep.subr.bf16.mxu1 %v8211_v6 }
0x119b   :  { %v3433_v61 = vpop.f32.mrb[96].mxu0  ;;  %v3474_v34 = vpop.f32.mrb[96].mxu1 }
0x119c   :  { %v3481_v16 = vadd.f32 %v3433_v61, %v2808_v5  ;;  %v3483_v52 = vadd.f32 %v3474_v34, %v2881_v7  ;;  %v3435_v10 = vpop.f32.mrb[97].mxu0  ;;  %v3476_v58 = vpop.f32.mrb[97].mxu1 }
0x119d   :  { %v3482_v60 = vadd.f32 %v3435_v10, %v2810_v4  ;;  %v3484_v43 = vadd.f32 %v3476_v58, %v2883_v63  ;;  %v3437_v39 = vpop.f32.mrb[98].mxu0  ;;  %v3478_v59 = vpop.f32.mrb[98].mxu1 }
0x119e   :  { %v5781_v21 = vmul.f32 -1.442695, %v3481_v16  ;;  %v3438_v44 = vpop.f32.mrb[99].mxu0  ;;  %v3479_v20 = vpop.f32.mrb[99].mxu1  ;;  %v9344_v59 = vld [vmem:[#allocation17_spill] sm:$0xff] }
0x119f   :  { %v5782_v38 = vmul.f32 -1.442695, %v3482_v60  ;;  %v5783_v32 = vmul.f32 -1.442695, %v3484_v43  ;;  %v9343_v43 = vld [vmem:[#allocation16_spill] sm:$0xff]  ;;  %v9345_v44 = vld [vmem:[#allocation18_spill] sm:$0xff] }
0x11a0   :  { %6641 = vpow2.f32 %v5781_v21  ;;  %v2887_v39 = vadd.f32 %v9343_v43, %v8344_v14  ;;  %v2816_v21 = vadd.f32 %v9344_v59, %v8323_v3  ;;  %v2889_v20 = vadd.f32 %v9345_v44, %v8336_v26 }
0x11a1   :  { %6643 = vpow2.f32 %v5782_v38 }
0x11a2   :  { %6645 = vpow2.f32 %v5783_v32 }
0x11a3   :  { %6647 = vtanh.f32 %v3483_v52 }
0x11aa   :  { %v6642_v33 = vpop.eup %6641 }
0x11ab   :  { %v6644_v37 = vpop.eup %6643  ;;  %v3488_v55 = vadd.f32 1.0, %v6642_v33 }
0x11ac   :  { %v3494_v13 = vadd.f32 1.0, %v6644_v37  ;;  %v6646_v5 = vpop.eup %6645 }
0x11ad   :  { %6649 = vrcp.f32 %v3488_v55  ;;  %v6648_v35 = vpop.eup %6647  ;;  %v3501_v12 = vadd.f32 1.0, %v6646_v5 }
0x11ae   :  { %6651 = vrcp.f32 %v3494_v13 }
0x11af   :  { %6653 = vrcp.f32 %v3501_v12 }
0x11b7   :  { %v6650_v7 = vpop.eup %6649 }
0x11b8   :  { %v6652_v15 = vpop.eup %6651  ;;  %v3505_v4 = vmul.f32 %v6650_v7, %v6648_v35 }
0x11b9   :  { %v3504_v63 = vmul.f32 %v6652_v15, %v8485_v51  ;;  %v6654_v34 = vpop.eup %6653  ;;  %v9342_v51 = vld [vmem:[#allocation15_spill] sm:$0xff] }
0x11ba   :  { %v2814_v60 = vadd.f32 %v9342_v51, %v8319_v62 }
0x11bb   :  { %v8531_v61 = vadd.f32 %v3505_v4, %v3504_v63 }
0x11bd   :  { %6655 = vtanh.f32 %v8531_v61 }
0x11c7   :  { %v6656_v16 = vpop.eup %6655 }
0x11c8   :  { %v3508_v10 = vmul.f32 %v6656_v16, %v6654_v34 }
0x11ca   :  { %v3509_v52 = vpack.c.bf16 %v3508_v10, %v3508_v10 }
0x11cc   :  { %v3511_v58 = vrot.slane %v3509_v52, 4  ;;  %3551 = vmatmul.mubr.bf16.vlgmr.msra.gmra.mrb[100].mxu0 %v3509_v52  ;;  %3592 = vmatmul.mubr.bf16.vlgmr.msra.gmra.mrb[100].mxu1 %v3509_v52 }
0x11cd   :  { %3635 = vmatpush1.bf16.msra.mxu0 %v8213_v30  ;;  %3676 = vmatpush1.bf16.msra.mxu1 %v8215_v36 }
0x11ce   :  { %3513 = vst [vmem:[#allocation2 + $0x8] sm:$0xf0] %v3511_v58  ;;  %3636 = vmatprep.subr.bf16.mxu0 %v8221_v1  ;;  %3677 = vmatprep.subr.bf16.mxu1 %v8223_v53 }
0x11cf   :  { %3666 = vmatprep.mubr.bf16.mxu0 %v9285_v31  ;;  %3707 = vmatprep.mubr.bf16.mxu1 %v9285_v31 }
0x11d1   :  { %3637 = vmatpush1.bf16.msra.mxu0 %v8225_v42  ;;  %3678 = vmatpush1.bf16.msra.mxu1 %v8227_v54 }
0x11d2   :  { %3638 = vmatprep.subr.bf16.mxu0 %v8233_v41  ;;  %3679 = vmatprep.subr.bf16.mxu1 %v8235_v23 }
0x11d5   :  { %3639 = vmatpush1.bf16.msra.mxu0 %v8237_v28  ;;  %3680 = vmatpush1.bf16.msra.mxu1 %v8239_v40 }
0x11d6   :  { %3640 = vmatprep.subr.bf16.mxu0 %v8245_v24  ;;  %3681 = vmatprep.subr.bf16.mxu1 %v8247_v47 }
0x11d9   :  { %3641 = vmatpush1.bf16.msra.mxu0 %v8249_v45  ;;  %3682 = vmatpush1.bf16.msra.mxu1 %v8251_v9 }
0x11da   :  { %3642 = vmatprep.subr.bf16.mxu0 %v8257_v48  ;;  %3683 = vmatprep.subr.bf16.mxu1 %v8259_v29 }
0x11dd   :  { %3643 = vmatpush1.bf16.msra.mxu0 %v8261_v27  ;;  %3684 = vmatpush1.bf16.msra.mxu1 %v8263_v0 }
0x11de   :  { %3644 = vmatprep.subr.bf16.mxu0 %v8267_v17  ;;  %3685 = vmatprep.subr.bf16.mxu1 %v8269_v57 }
0x11e1   :  { %3645 = vmatpush1.bf16.msra.mxu0 %v8273_v50  ;;  %3686 = vmatpush1.bf16.msra.mxu1 %v8275_v19 }
0x11e2   :  { %3646 = vmatprep.subr.bf16.mxu0 %v8279_v49  ;;  %3687 = vmatprep.subr.bf16.mxu1 %v8281_v22 }
0x11e5   :  { %3647 = vmatpush1.bf16.msra.mxu0 %v8285_v18  ;;  %3688 = vmatpush1.bf16.msra.mxu1 %v8287_v46 }
0x11e6   :  { %3648 = vmatprep.subr.bf16.mxu0 %v8291_v56  ;;  %3689 = vmatprep.subr.bf16.mxu1 %v8293_v25 }
0x11e9   :  { %3649 = vmatpush1.bf16.msra.mxu0 %v8297_v11  ;;  %3690 = vmatpush1.bf16.msra.mxu1 %v8299_v8 }
0x11ea   :  { %3753 = vmatprep.subr.bf16.mxu0 %v8209_v2  ;;  %3794 = vmatprep.subr.bf16.mxu1 %v8211_v6 }
0x129f   :  { %v3552_v38 = vpop.f32.mrb[100].mxu0  ;;  %v3593_v32 = vpop.f32.mrb[100].mxu1 }
0x12a0   :  { %v3600_v33 = vadd.f32 %v3552_v38, %v2814_v60  ;;  %v3602_v37 = vadd.f32 %v3593_v32, %v2887_v39  ;;  %v3554_v55 = vpop.f32.mrb[101].mxu0  ;;  %v3595_v2 = vpop.f32.mrb[101].mxu1 }
0x12a1   :  { %v3601_v13 = vadd.f32 %v3554_v55, %v2816_v21  ;;  %v3603_v6 = vadd.f32 %v3595_v2, %v2889_v20  ;;  %v3556_v5 = vpop.f32.mrb[102].mxu0  ;;  %v3597_v35 = vpop.f32.mrb[102].mxu1 }
0x12a2   :  { %v5784_v7 = vmul.f32 -1.442695, %v3600_v33  ;;  %v3557_v15 = vpop.f32.mrb[103].mxu0  ;;  %v3598_v4 = vpop.f32.mrb[103].mxu1 }
0x12a3   :  { %v5785_v12 = vmul.f32 -1.442695, %v3601_v13  ;;  %v5786_v63 = vmul.f32 -1.442695, %v3603_v6 }
0x12a4   :  { %6657 = vpow2.f32 %v5784_v7 }
0x12a5   :  { %6659 = vpow2.f32 %v5785_v12 }
0x12a6   :  { %6661 = vpow2.f32 %v5786_v63  ;;  %v6917_v63 = vld [vmem:[#allocation4 + $0x200] ss:$16 sps:$4 sm:$0xff]  }
0x12a7   :  { %6663 = vtanh.f32 %v3602_v37 }
0x12ae   :  { %v6658_v34 = vpop.eup %6657 }
0x12af   :  { %v6660_v16 = vpop.eup %6659  ;;  %v3607_v10 = vadd.f32 1.0, %v6658_v34  ;;  %v6918_v34 = vld [vmem:[#allocation4 + $0x208] ss:$16 sps:$4 sm:$0xff]  }
0x12b0   :  { %v3613_v52 = vadd.f32 1.0, %v6660_v16  ;;  %v6662_v58 = vpop.eup %6661  ;;  %v6919_v16 = vld [vmem:[#allocation4 + $0x224] ss:$16 sps:$4 sm:$0xff]  }
0x12b1   :  { %6665 = vrcp.f32 %v3607_v10  ;;  %v6664_v51 = vpop.eup %6663  ;;  %v3620_v59 = vadd.f32 1.0, %v6662_v58  ;;  %v6920_v10 = vld [vmem:[#allocation4 + $0x22c] ss:$16 sps:$4 sm:$0xff]   ;;  %v6922_v58 = vld [vmem:[#allocation4 + $0x228] ss:$16 sps:$4 sm:$0xff]  }
0x12b2   :  { %6667 = vrcp.f32 %v3613_v52  ;;  %v6921_v52 = vld [vmem:[#allocation4 + $0x220] ss:$16 sps:$4 sm:$0xff]  }
0x12b3   :  { %6669 = vrcp.f32 %v3620_v59  ;;  %v6927_v59 = vld [vmem:[#allocation4 + $0x264] ss:$16 sps:$4 sm:$0xff]  }
0x12bb   :  { %v6666_v60 = vpop.eup %6665 }
0x12bc   :  { %v6668_v43 = vpop.eup %6667  ;;  %v3624_v39 = vmul.f32 %v6666_v60, %v6664_v51  ;;  %v6923_v51 = vld [vmem:[#allocation4 + $0x244] ss:$16 sps:$4 sm:$0xff]   ;;  %v6924_v60 = vld [vmem:[#allocation4 + $0x24c] ss:$16 sps:$4 sm:$0xff]  }
0x12bd   :  { %v3623_v21 = vmul.f32 %v6668_v43, %v8531_v61  ;;  %v6670_v20 = vpop.eup %6669  ;;  %v6925_v43 = vld [vmem:[#allocation4 + $0x240] ss:$16 sps:$4 sm:$0xff]  }
0x12bf   :  { %v8577_v44 = vadd.f32 %v3624_v39, %v3623_v21  ;;  %v6926_v39 = vld [vmem:[#allocation4 + $0x248] ss:$16 sps:$4 sm:$0xff]   ;;  %v6928_v21 = vld [vmem:[#allocation4 + $0x26c] ss:$16 sps:$4 sm:$0xff]  }
0x12c1   :  { %6671 = vtanh.f32 %v8577_v44 }
0x12cb   :  { %v6672_v38 = vpop.eup %6671 }
0x12cc   :  { %v3627_v32 = vmul.f32 %v6672_v38, %v6670_v20  ;;  %v6930_v20 = vld [vmem:[#allocation4 + $0x268] ss:$16 sps:$4 sm:$0xff]   ;;  %v6931_v38 = vld [vmem:[#allocation4 + $0x284] ss:$16 sps:$4 sm:$0xff]  }
0x12ce   :  { %v3628_v33 = vpack.c.bf16 %v3627_v32, %v3627_v32  ;;  %v6932_v32 = vld [vmem:[#allocation4 + $0x28c] ss:$16 sps:$4 sm:$0xff]  }
0x12d0   :  { %3629 = vst [vmem:[#allocation2 + $0x10] sm:$0xf] %v3628_v33  ;;  %3667 = vmatmul.mubr.bf16.vlgmr.msra.gmra.mrb[104].mxu0 %v3628_v33  ;;  %3708 = vmatmul.mubr.bf16.vlgmr.msra.gmra.mrb[104].mxu1 %v3628_v33  ;;  %v6933_v33 = vld [vmem:[#allocation4 + $0x280] ss:$16 sps:$4 sm:$0xff]  }
0x12d1   :  { %3754 = vmatpush1.bf16.msra.mxu0 %v8213_v30  ;;  %3795 = vmatpush1.bf16.msra.mxu1 %v8215_v36  ;;  %v6915_v30 = vld [vmem:[#allocation4 + $0x204] ss:$16 sps:$4 sm:$0xff]   ;;  %v6916_v36 = vld [vmem:[#allocation4 + $0x20c] ss:$16 sps:$4 sm:$0xff]  }
0x12d2   :  { %3755 = vmatprep.subr.bf16.mxu0 %v8221_v1  ;;  %3796 = vmatprep.subr.bf16.mxu1 %v8223_v53  ;;  %v9346_v1 = vld [vmem:[#allocation19_spill] sm:$0xff] }
0x12d3   :  { %3785 = vmatprep.mubr.bf16.mxu0 %v9285_v31  ;;  %3826 = vmatprep.mubr.bf16.mxu1 %v9285_v31  ;;  %v2818_v53 = vadd.f32 %v9346_v1, %v8319_v62  ;;  %v6936_v1 = vld [vmem:[#allocation4 + $0x2ac] ss:$16 sps:$4 sm:$0xff]  }
0x12d5   :  { %3756 = vmatpush1.bf16.msra.mxu0 %v8225_v42  ;;  %3797 = vmatpush1.bf16.msra.mxu1 %v8227_v54  ;;  %v9347_v42 = vld [vmem:[#allocation20_spill] sm:$0xff] }
0x12d6   :  { %3757 = vmatprep.subr.bf16.mxu0 %v8233_v41  ;;  %3798 = vmatprep.subr.bf16.mxu1 %v8235_v23  ;;  %v2891_v54 = vadd.f32 %v9347_v42, %v8344_v14  ;;  %v9348_v41 = vld [vmem:[#allocation21_spill] sm:$0xff]  ;;  %v6938_v42 = vld [vmem:[#allocation4 + $0x2a8] ss:$16 sps:$4 sm:$0xff]  }
0x12d7   :  { %v2820_v23 = vadd.f32 %v9348_v41, %v8323_v3  ;;  %v6940_v41 = vld [vmem:[#allocation4 + $0x2cc] ss:$16 sps:$4 sm:$0xff]  }
0x12d9   :  { %3758 = vmatpush1.bf16.msra.mxu0 %v8237_v28  ;;  %3799 = vmatpush1.bf16.msra.mxu1 %v8239_v40  ;;  %v9349_v28 = vld [vmem:[#allocation22_spill] sm:$0xff] }
0x12da   :  { %3759 = vmatprep.subr.bf16.mxu0 %v8245_v24  ;;  %3800 = vmatprep.subr.bf16.mxu1 %v8247_v47  ;;  %v2893_v40 = vadd.f32 %v9349_v28, %v8336_v26  ;;  %v6942_v28 = vld [vmem:[#allocation4 + $0x2c8] ss:$16 sps:$4 sm:$0xff]  }
0x12dd   :  { %3760 = vmatpush1.bf16.msra.mxu0 %v8249_v45  ;;  %3801 = vmatpush1.bf16.msra.mxu1 %v8251_v9 }
0x12de   :  { %3761 = vmatprep.subr.bf16.mxu0 %v8257_v48  ;;  %3802 = vmatprep.subr.bf16.mxu1 %v8259_v29 }
0x12e1   :  { %3762 = vmatpush1.bf16.msra.mxu0 %v8261_v27  ;;  %3803 = vmatpush1.bf16.msra.mxu1 %v8263_v0 }
0x12e2   :  { %3763 = vmatprep.subr.bf16.mxu0 %v8267_v17  ;;  %3804 = vmatprep.subr.bf16.mxu1 %v8269_v57 }
0x12e5   :  { %3764 = vmatpush1.bf16.msra.mxu0 %v8273_v50  ;;  %3805 = vmatpush1.bf16.msra.mxu1 %v8275_v19 }
0x12e6   :  { %3765 = vmatprep.subr.bf16.mxu0 %v8279_v49  ;;  %3806 = vmatprep.subr.bf16.mxu1 %v8281_v22 }
0x12e9   :  { %3766 = vmatpush1.bf16.msra.mxu0 %v8285_v18  ;;  %3807 = vmatpush1.bf16.msra.mxu1 %v8287_v46 }
0x12ea   :  { %3767 = vmatprep.subr.bf16.mxu0 %v8291_v56  ;;  %3808 = vmatprep.subr.bf16.mxu1 %v8293_v25 }
0x12ed   :  { %3768 = vmatpush1.bf16.msra.mxu0 %v8297_v11  ;;  %3809 = vmatpush1.bf16.msra.mxu1 %v8299_v8 }
0x12ee   :  { %3869 = vmatprep.subr.bf16.mxu0 %v6915_v30  ;;  %3910 = vmatprep.subr.bf16.mxu1 %v6916_v36  ;;  %v6934_v30 = vld [vmem:[#allocation4 + $0x288] ss:$16 sps:$4 sm:$0xff]   ;;  %v6935_v36 = vld [vmem:[#allocation4 + $0x2a4] ss:$16 sps:$4 sm:$0xff]  }
0x13a3   :  { %v3668_v24 = vpop.f32.mrb[104].mxu0  ;;  %v3709_v47 = vpop.f32.mrb[104].mxu1 }
0x13a4   :  { %v3716_v45 = vadd.f32 %v3668_v24, %v2818_v53  ;;  %v3718_v9 = vadd.f32 %v3709_v47, %v2891_v54  ;;  %v3670_v48 = vpop.f32.mrb[105].mxu0  ;;  %v3711_v29 = vpop.f32.mrb[105].mxu1  ;;  %v6937_v53 = vld [vmem:[#allocation4 + $0x2a0] ss:$16 sps:$4 sm:$0xff]   ;;  %v6939_v54 = vld [vmem:[#allocation4 + $0x2c4] ss:$16 sps:$4 sm:$0xff]  }
0x13a5   :  { %v3717_v27 = vadd.f32 %v3670_v48, %v2820_v23  ;;  %v3719_v0 = vadd.f32 %v3711_v29, %v2893_v40  ;;  %v3672_v17 = vpop.f32.mrb[106].mxu0  ;;  %v3713_v57 = vpop.f32.mrb[106].mxu1  ;;  %v6941_v23 = vld [vmem:[#allocation4 + $0x2c0] ss:$16 sps:$4 sm:$0xff]   ;;  %v6943_v40 = vld [vmem:[#allocation4 + $0x2e4] ss:$16 sps:$4 sm:$0xff]  }
0x13a6   :  { %v5787_v50 = vmul.f32 -1.442695, %v3716_v45  ;;  %v3673_v19 = vpop.f32.mrb[107].mxu0  ;;  %v3714_v49 = vpop.f32.mrb[107].mxu1  ;;  %v6944_v24 = vld [vmem:[#allocation4 + $0x2ec] ss:$16 sps:$4 sm:$0xff]  }
0x13a7   :  { %v5788_v22 = vmul.f32 -1.442695, %v3717_v27  ;;  %v5789_v18 = vmul.f32 -1.442695, %v3719_v0  ;;  %v6945_v47 = vld [vmem:[#allocation4 + $0x2e0] ss:$16 sps:$4 sm:$0xff]  }
0x13a8   :  { %6673 = vpow2.f32 %v5787_v50  ;;  %v6946_v45 = vld [vmem:[#allocation4 + $0x2e8] ss:$16 sps:$4 sm:$0xff]   ;;  %v6246_v48 = vld [vmem:[%s9250_s2 + $0x20c] ss:$16 sps:$4 sm:$0xff]   ;;  %v9350_v29 = vld [vmem:[#allocation23_spill] sm:$0xff] }
0x13a9   :  { %6675 = vpow2.f32 %v5788_v22  ;;  %v2824_v27 = vadd.f32 %v9350_v29, %v8319_v62  ;;  %v9351_v0 = vld [vmem:[#allocation24_spill] sm:$0xff]  ;;  %v9352_v57 = vld [vmem:[#allocation25_spill] sm:$0xff]  ;;  %v9353_v19 = vld [vmem:[#allocation26_spill] sm:$0xff] }
0x13aa   :  { %6677 = vpow2.f32 %v5789_v18  ;;  %v2897_v17 = vadd.f32 %v9351_v0, %v8344_v14  ;;  %v2826_v50 = vadd.f32 %v9352_v57, %v8323_v3  ;;  %v2899_v49 = vadd.f32 %v9353_v19, %v8336_v26  ;;  %v6271_v29 = vld [vmem:[%s9250_s2 + $0x2a0] ss:$16 sps:$4 sm:$0xff]   ;;  %v6279_v0 = vld [vmem:[%s9250_s2 + $0x2c4] ss:$16 sps:$4 sm:$0xff]  }
0x13ab   :  { %6679 = vtanh.f32 %v3718_v9  ;;  %v6243_v9 = vld [vmem:[%s9250_s2 + $0x204] ss:$16 sps:$4 sm:$0xff]   ;;  %v6277_v57 = vld [vmem:[%s9250_s2 + $0x2c0] ss:$16 sps:$4 sm:$0xff]  }
0x13ac   :  { %v6285_v19 = vld [vmem:[%s9250_s2 + $0x2e4] ss:$16 sps:$4 sm:$0xff]  }
0x13b2   :  { %v6674_v46 = vpop.eup %6673 }
0x13b3   :  { %v6676_v56 = vpop.eup %6675  ;;  %v3723_v25 = vadd.f32 1.0, %v6674_v46 }
0x13b4   :  { %v3729_v11 = vadd.f32 1.0, %v6676_v56  ;;  %v6678_v8 = vpop.eup %6677 }
0x13b5   :  { %6681 = vrcp.f32 %v3723_v25  ;;  %v6680_v61 = vpop.eup %6679  ;;  %v3736_v13 = vadd.f32 1.0, %v6678_v8 }
0x13b6   :  { %6683 = vrcp.f32 %v3729_v11 }
0x13b7   :  { %6685 = vrcp.f32 %v3736_v13 }
0x13bf   :  { %v6682_v37 = vpop.eup %6681 }
0x13c0   :  { %v6684_v55 = vpop.eup %6683  ;;  %v3740_v2 = vmul.f32 %v6682_v37, %v6680_v61 }
0x13c1   :  { %v3739_v6 = vmul.f32 %v6684_v55, %v8577_v44  ;;  %v6686_v35 = vpop.eup %6685  ;;  %v6929_v44 = vld [vmem:[#allocation4 + $0x260] ss:$16 sps:$4 sm:$0xff]  }
0x13c3   :  { %v8621_v5 = vadd.f32 %v3740_v2, %v3739_v6 }
0x13c5   :  { %6687 = vtanh.f32 %v8621_v5 }
0x13cf   :  { %v6688_v7 = vpop.eup %6687 }
0x13d0   :  { %v3743_v15 = vmul.f32 %v6688_v7, %v6686_v35 }
0x13d2   :  { %v3744_v4 = vpack.c.bf16 %v3743_v15, %v3743_v15 }
0x13d4   :  { %v3746_v12 = vrot.slane %v3744_v4, 4  ;;  %3786 = vmatmul.mubr.bf16.vlgmr.msra.gmra.mrb[108].mxu0 %v3744_v4  ;;  %3827 = vmatmul.mubr.bf16.vlgmr.msra.gmra.mrb[108].mxu1 %v3744_v4 }
0x13d5   :  { %3870 = vmatpush1.bf16.msra.mxu0 %v6917_v63  ;;  %3911 = vmatpush1.bf16.msra.mxu1 %v6918_v34 }
0x13d6   :  { %3748 = vst [vmem:[#allocation2 + $0x10] sm:$0xf0] %v3746_v12  ;;  %3871 = vmatprep.subr.bf16.mxu0 %v6919_v16  ;;  %3912 = vmatprep.subr.bf16.mxu1 %v6920_v10 }
0x13d7   :  { %3901 = vmatprep.mubr.bf16.mxu0 %v9285_v31  ;;  %3942 = vmatprep.mubr.bf16.mxu1 %v9285_v31 }
0x13d9   :  { %3872 = vmatpush1.bf16.msra.mxu0 %v6921_v52  ;;  %3913 = vmatpush1.bf16.msra.mxu1 %v6922_v58 }
0x13da   :  { %3873 = vmatprep.subr.bf16.mxu0 %v6923_v51  ;;  %3914 = vmatprep.subr.bf16.mxu1 %v6924_v60 }
0x13dd   :  { %3874 = vmatpush1.bf16.msra.mxu0 %v6925_v43  ;;  %3915 = vmatpush1.bf16.msra.mxu1 %v6926_v39 }
0x13de   :  { %3875 = vmatprep.subr.bf16.mxu0 %v6927_v59  ;;  %3916 = vmatprep.subr.bf16.mxu1 %v6928_v21 }
0x13e1   :  { %3876 = vmatpush1.bf16.msra.mxu0 %v6929_v44  ;;  %3917 = vmatpush1.bf16.msra.mxu1 %v6930_v20  ;;  %v6241_v44 = vld [vmem:[%s9250_s2 + $0x200] ss:$16 sps:$4 sm:$0xff]   ;;  %v6244_v20 = vld [vmem:[%s9250_s2 + $0x208] ss:$16 sps:$4 sm:$0xff]  }
0x13e2   :  { %3877 = vmatprep.subr.bf16.mxu0 %v6931_v38  ;;  %3918 = vmatprep.subr.bf16.mxu1 %v6932_v32  ;;  %v6252_v32 = vld [vmem:[%s9250_s2 + $0x22c] ss:$16 sps:$4 sm:$0xff]  }
0x13e5   :  { %3878 = vmatpush1.bf16.msra.mxu0 %v6933_v33  ;;  %3919 = vmatpush1.bf16.msra.mxu1 %v6934_v30  ;;  %v6247_v33 = vld [vmem:[%s9250_s2 + $0x220] ss:$16 sps:$4 sm:$0xff]   ;;  %v6250_v30 = vld [vmem:[%s9250_s2 + $0x228] ss:$16 sps:$4 sm:$0xff]  }
0x13e6   :  { %3879 = vmatprep.subr.bf16.mxu0 %v6935_v36  ;;  %3920 = vmatprep.subr.bf16.mxu1 %v6936_v1  ;;  %v6255_v36 = vld [vmem:[%s9250_s2 + $0x244] ss:$16 sps:$4 sm:$0xff]   ;;  %v6258_v1 = vld [vmem:[%s9250_s2 + $0x24c] ss:$16 sps:$4 sm:$0xff]  }
0x13e9   :  { %3880 = vmatpush1.bf16.msra.mxu0 %v6937_v53  ;;  %3921 = vmatpush1.bf16.msra.mxu1 %v6938_v42  ;;  %v6253_v53 = vld [vmem:[%s9250_s2 + $0x240] ss:$16 sps:$4 sm:$0xff]   ;;  %v6256_v42 = vld [vmem:[%s9250_s2 + $0x248] ss:$16 sps:$4 sm:$0xff]  }
0x13ea   :  { %3881 = vmatprep.subr.bf16.mxu0 %v6939_v54  ;;  %3922 = vmatprep.subr.bf16.mxu1 %v6940_v41  ;;  %v6261_v54 = vld [vmem:[%s9250_s2 + $0x264] ss:$16 sps:$4 sm:$0xff]   ;;  %v6264_v41 = vld [vmem:[%s9250_s2 + $0x26c] ss:$16 sps:$4 sm:$0xff]  }
0x13ed   :  { %3882 = vmatpush1.bf16.msra.mxu0 %v6941_v23  ;;  %3923 = vmatpush1.bf16.msra.mxu1 %v6942_v28  ;;  %v6259_v23 = vld [vmem:[%s9250_s2 + $0x260] ss:$16 sps:$4 sm:$0xff]   ;;  %v6262_v28 = vld [vmem:[%s9250_s2 + $0x268] ss:$16 sps:$4 sm:$0xff]  }
0x13ee   :  { %3883 = vmatprep.subr.bf16.mxu0 %v6943_v40  ;;  %3924 = vmatprep.subr.bf16.mxu1 %v6944_v24  ;;  %v6267_v40 = vld [vmem:[%s9250_s2 + $0x284] ss:$16 sps:$4 sm:$0xff]   ;;  %v6270_v24 = vld [vmem:[%s9250_s2 + $0x28c] ss:$16 sps:$4 sm:$0xff]  }
0x13f1   :  { %3884 = vmatpush1.bf16.msra.mxu0 %v6945_v47  ;;  %3925 = vmatpush1.bf16.msra.mxu1 %v6946_v45  ;;  %v6265_v47 = vld [vmem:[%s9250_s2 + $0x280] ss:$16 sps:$4 sm:$0xff]   ;;  %v6268_v45 = vld [vmem:[%s9250_s2 + $0x288] ss:$16 sps:$4 sm:$0xff]  }
0x13f2   :  { %4204 = vmatprep.subr.bf16.mxu0 %v6243_v9  ;;  %4277 = vmatprep.subr.bf16.mxu1 %v6246_v48  ;;  %v6273_v9 = vld [vmem:[%s9250_s2 + $0x2a4] ss:$16 sps:$4 sm:$0xff]   ;;  %v6276_v48 = vld [vmem:[%s9250_s2 + $0x2ac] ss:$16 sps:$4 sm:$0xff]  }
0x14a7   :  { %v3787_v22 = vpop.f32.mrb[108].mxu0  ;;  %v3828_v18 = vpop.f32.mrb[108].mxu1 }
0x14a8   :  { %v3835_v46 = vadd.f32 %v3787_v22, %v2824_v27  ;;  %v3837_v56 = vadd.f32 %v3828_v18, %v2897_v17  ;;  %v3789_v25 = vpop.f32.mrb[109].mxu0  ;;  %v3830_v11 = vpop.f32.mrb[109].mxu1  ;;  %v6274_v27 = vld [vmem:[%s9250_s2 + $0x2a8] ss:$16 sps:$4 sm:$0xff]   ;;  %v6282_v17 = vld [vmem:[%s9250_s2 + $0x2cc] ss:$16 sps:$4 sm:$0xff]  }
0x14a9   :  { %v3836_v8 = vadd.f32 %v3789_v25, %v2826_v50  ;;  %v3838_v61 = vadd.f32 %v3830_v11, %v2899_v49  ;;  %v3791_v37 = vpop.f32.mrb[110].mxu0  ;;  %v3832_v55 = vpop.f32.mrb[110].mxu1  ;;  %v6280_v50 = vld [vmem:[%s9250_s2 + $0x2c8] ss:$16 sps:$4 sm:$0xff]   ;;  %v6288_v49 = vld [vmem:[%s9250_s2 + $0x2ec] ss:$16 sps:$4 sm:$0xff]  }
0x14aa   :  { %v5790_v2 = vmul.f32 -1.442695, %v3835_v46  ;;  %v3792_v13 = vpop.f32.mrb[111].mxu0  ;;  %v3833_v6 = vpop.f32.mrb[111].mxu1  ;;  %v6283_v22 = vld [vmem:[%s9250_s2 + $0x2e0] ss:$16 sps:$4 sm:$0xff]  }
0x14ab   :  { %v5791_v35 = vmul.f32 -1.442695, %v3836_v8  ;;  %v5792_v7 = vmul.f32 -1.442695, %v3838_v61  ;;  %v6286_v18 = vld [vmem:[%s9250_s2 + $0x2e8] ss:$16 sps:$4 sm:$0xff]  }
0x14ac   :  { %6689 = vpow2.f32 %v5790_v2  ;;  %v3984_v46 = vld [vmem:[#allocation2] sm:$0xff]  ;;  %v3986_v25 = vld [vmem:[#allocation2 + $0x10] sm:$0xff]  ;;  %v8744_v8 = vld [vmem:[#allocation4 + $0x30c] ss:$16 sps:$4 sm:$0xff]  }
0x14ad   :  { %6691 = vpow2.f32 %v5791_v35  ;;  %v8742_v11 = vld [vmem:[#allocation4 + $0x304] ss:$16 sps:$4 sm:$0xff]   ;;  %v8746_v61 = vld [vmem:[#allocation4 + $0x300] ss:$16 sps:$4 sm:$0xff]   ;;  %v8748_v37 = vld [vmem:[#allocation4 + $0x308] ss:$16 sps:$4 sm:$0xff]  }
0x14ae   :  { %6693 = vpow2.f32 %v5792_v7  ;;  %v8754_v55 = vld [vmem:[#allocation4 + $0x324] ss:$16 sps:$4 sm:$0xff]   ;;  %v8756_v2 = vld [vmem:[#allocation4 + $0x32c] ss:$16 sps:$4 sm:$0xff]   ;;  %v8758_v13 = vld [vmem:[#allocation4 + $0x320] ss:$16 sps:$4 sm:$0xff]  }
0x14af   :  { %6695 = vtanh.f32 %v3837_v56  ;;  %v3985_v56 = vld [vmem:[#allocation2 + $0x8] sm:$0xff]  ;;  %v8766_v35 = vld [vmem:[#allocation4 + $0x344] ss:$16 sps:$4 sm:$0xff]  }
0x14b0   :  { %v8760_v6 = vld [vmem:[#allocation4 + $0x328] ss:$16 sps:$4 sm:$0xff]   ;;  %v8768_v7 = vld [vmem:[#allocation4 + $0x34c] ss:$16 sps:$4 sm:$0xff]  }
0x14b6   :  { %v6690_v15 = vpop.eup %6689 }
0x14b7   :  { %v6692_v4 = vpop.eup %6691  ;;  %v3842_v12 = vadd.f32 1.0, %v6690_v15  ;;  %v8770_v15 = vld [vmem:[#allocation4 + $0x340] ss:$16 sps:$4 sm:$0xff]  }
0x14b8   :  { %v3848_v63 = vadd.f32 1.0, %v6692_v4  ;;  %v6694_v34 = vpop.eup %6693  ;;  %v8772_v4 = vld [vmem:[#allocation4 + $0x348] ss:$16 sps:$4 sm:$0xff]  }
0x14b9   :  { %6697 = vrcp.f32 %v3842_v12  ;;  %v6696_v16 = vpop.eup %6695  ;;  %v3855_v51 = vadd.f32 1.0, %v6694_v34  ;;  %v8778_v12 = vld [vmem:[#allocation4 + $0x364] ss:$16 sps:$4 sm:$0xff]   ;;  %v8782_v34 = vld [vmem:[#allocation4 + $0x360] ss:$16 sps:$4 sm:$0xff]  }
0x14ba   :  { %6699 = vrcp.f32 %v3848_v63  ;;  %v8780_v63 = vld [vmem:[#allocation4 + $0x36c] ss:$16 sps:$4 sm:$0xff]  }
0x14bb   :  { %6701 = vrcp.f32 %v3855_v51  ;;  %v8796_v51 = vld [vmem:[#allocation4 + $0x388] ss:$16 sps:$4 sm:$0xff]  }
0x14c3   :  { %v6698_v10 = vpop.eup %6697 }
0x14c4   :  { %v6700_v52 = vpop.eup %6699  ;;  %v3859_v58 = vmul.f32 %v6698_v10, %v6696_v16  ;;  %v8784_v16 = vld [vmem:[#allocation4 + $0x368] ss:$16 sps:$4 sm:$0xff]   ;;  %v8790_v10 = vld [vmem:[#allocation4 + $0x384] ss:$16 sps:$4 sm:$0xff]  }
0x14c5   :  { %v3858_v60 = vmul.f32 %v6700_v52, %v8621_v5  ;;  %v6702_v39 = vpop.eup %6701  ;;  %v6249_v5 = vld [vmem:[%s9250_s2 + $0x224] ss:$16 sps:$4 sm:$0xff]   ;;  %v8792_v52 = vld [vmem:[#allocation4 + $0x38c] ss:$16 sps:$4 sm:$0xff]  }
0x14c7   :  { %v8641_v43 = vadd.f32 %v3859_v58, %v3858_v60  ;;  %v8794_v58 = vld [vmem:[#allocation4 + $0x380] ss:$16 sps:$4 sm:$0xff]   ;;  %v8800_v60 = vld [vmem:[#allocation4 + $0x3a4] ss:$16 sps:$4 sm:$0xff]  }
0x14c9   :  { %6703 = vtanh.f32 %v8641_v43 }
0x14d3   :  { %v6704_v59 = vpop.eup %6703 }
0x14d4   :  { %v3862_v21 = vmul.f32 %v6704_v59, %v6702_v39  ;;  %v8802_v39 = vld [vmem:[#allocation4 + $0x3ac] ss:$16 sps:$4 sm:$0xff]   ;;  %v8806_v59 = vld [vmem:[#allocation4 + $0x3a0] ss:$16 sps:$4 sm:$0xff]  }
0x14d6   :  { %v3863_v38 = vpack.c.bf16 %v3862_v21, %v3862_v21  ;;  %v8808_v21 = vld [vmem:[#allocation4 + $0x3a8] ss:$16 sps:$4 sm:$0xff]  }
0x14d8   :  { %3864 = vst [vmem:[#allocation2 + $0x18] sm:$0xf] %v3863_v38  ;;  %3902 = vmatmul.mubr.bf16.vlgmr.msra.gmra.mrb[112].mxu0 %v3863_v38  ;;  %3943 = vmatmul.mubr.bf16.vlgmr.msra.gmra.mrb[112].mxu1 %v3863_v38  ;;  %v8818_v38 = vld [vmem:[#allocation4 + $0x3c0] ss:$16 sps:$4 sm:$0xff]  }
0x14d9   :  { %4205 = vmatpush1.bf16.msra.mxu0 %v6241_v44  ;;  %4278 = vmatpush1.bf16.msra.mxu1 %v6244_v20  ;;  %v8812_v44 = vld [vmem:[#allocation4 + $0x3c4] ss:$16 sps:$4 sm:$0xff]   ;;  %v8814_v20 = vld [vmem:[#allocation4 + $0x3cc] ss:$16 sps:$4 sm:$0xff]  }
0x14da   :  { %4206 = vmatprep.subr.bf16.mxu0 %v6249_v5  ;;  %4279 = vmatprep.subr.bf16.mxu1 %v6252_v32  ;;  %v8820_v5 = vld [vmem:[#allocation4 + $0x3c8] ss:$16 sps:$4 sm:$0xff]   ;;  %v8824_v32 = vld [vmem:[#allocation4 + $0x3e4] ss:$16 sps:$4 sm:$0xff]  }
0x14db   :  { %4236 = vmatprep.mubr.bf16.mxu0 %v9285_v31  ;;  %4309 = vmatprep.mubr.bf16.mxu1 %v9285_v31 }
0x14dd   :  { %4207 = vmatpush1.bf16.msra.mxu0 %v6247_v33  ;;  %4280 = vmatpush1.bf16.msra.mxu1 %v6250_v30  ;;  %v8826_v33 = vld [vmem:[#allocation4 + $0x3ec] ss:$16 sps:$4 sm:$0xff]   ;;  %v8830_v30 = vld [vmem:[#allocation4 + $0x3e0] ss:$16 sps:$4 sm:$0xff]  }
0x14de   :  { %4208 = vmatprep.subr.bf16.mxu0 %v6255_v36  ;;  %4281 = vmatprep.subr.bf16.mxu1 %v6258_v1  ;;  %v8832_v36 = vld [vmem:[#allocation4 + $0x3e8] ss:$16 sps:$4 sm:$0xff]   ;;  %v9354_v1 = vld [vmem:[#allocation27_spill] sm:$0xff] }
0x14e1   :  { %4209 = vmatpush1.bf16.msra.mxu0 %v6253_v53  ;;  %4282 = vmatpush1.bf16.msra.mxu1 %v6256_v42  ;;  %v2828_v53 = vadd.f32 %v9354_v1, %v8319_v62  ;;  %v9355_v42 = vld [vmem:[#allocation28_spill] sm:$0xff] }
0x14e2   :  { %4210 = vmatprep.subr.bf16.mxu0 %v6261_v54  ;;  %4283 = vmatprep.subr.bf16.mxu1 %v6264_v41  ;;  %v2901_v54 = vadd.f32 %v9355_v42, %v8344_v14  ;;  %v9356_v41 = vld [vmem:[#allocation29_spill] sm:$0xff] }
0x14e5   :  { %4211 = vmatpush1.bf16.msra.mxu0 %v6259_v23  ;;  %4284 = vmatpush1.bf16.msra.mxu1 %v6262_v28  ;;  %v2830_v23 = vadd.f32 %v9356_v41, %v8323_v3  ;;  %v9357_v28 = vld [vmem:[#allocation30_spill] sm:$0xff]  ;;  %v9358_v41 = vld [vmem:[#allocation7_spill] sm:$0xff] }
0x14e6   :  { %4212 = vmatprep.subr.bf16.mxu0 %v6267_v40  ;;  %4285 = vmatprep.subr.bf16.mxu1 %v6270_v24  ;;  %v2903_v40 = vadd.f32 %v9357_v28, %v8336_v26 }
0x14e9   :  { %4213 = vmatpush1.bf16.msra.mxu0 %v6265_v47  ;;  %4286 = vmatpush1.bf16.msra.mxu1 %v6268_v45 }
0x14ea   :  { %4214 = vmatprep.subr.bf16.mxu0 %v6273_v9  ;;  %4287 = vmatprep.subr.bf16.mxu1 %v6276_v48 }
0x14ed   :  { %4215 = vmatpush1.bf16.msra.mxu0 %v6271_v29  ;;  %4288 = vmatpush1.bf16.msra.mxu1 %v6274_v27 }
0x14ee   :  { %4216 = vmatprep.subr.bf16.mxu0 %v6279_v0  ;;  %4289 = vmatprep.subr.bf16.mxu1 %v6282_v17 }
0x14f1   :  { %4217 = vmatpush1.bf16.msra.mxu0 %v6277_v57  ;;  %4290 = vmatpush1.bf16.msra.mxu1 %v6280_v50 }
0x14f2   :  { %4218 = vmatprep.subr.bf16.mxu0 %v6285_v19  ;;  %4291 = vmatprep.subr.bf16.mxu1 %v6288_v49 }
0x14f5   :  { %4219 = vmatpush1.bf16.msra.mxu0 %v6283_v22  ;;  %4292 = vmatpush1.bf16.msra.mxu1 %v6286_v18 }
0x14f6   :  { %4608 = vmatprep.subr.bf16.mxu0 %v8742_v11  ;;  %4649 = vmatprep.subr.bf16.mxu1 %v8744_v8 }
0x14f8   :  { %4237 = vmatmul.mubr.bf16.vlgmr.msra.gmra.mrb[116].mxu0 %v3984_v46  ;;  %4310 = vmatmul.mubr.bf16.vlgmr.msra.gmra.mrb[116].mxu1 %v3984_v46 }
0x14f9   :  { %4246 = vmatprep.mubr.bf16.mxu0 %v9285_v31  ;;  %4319 = vmatprep.mubr.bf16.mxu1 %v9285_v31 }
0x14fa   :  { %4609 = vmatpush1.bf16.msra.mxu0 %v8746_v61  ;;  %4650 = vmatpush1.bf16.msra.mxu1 %v8748_v37 }
0x14fb   :  { %4610 = vmatprep.subr.bf16.mxu0 %v8754_v55  ;;  %4651 = vmatprep.subr.bf16.mxu1 %v8756_v2 }
0x14fe   :  { %4611 = vmatpush1.bf16.msra.mxu0 %v8758_v13  ;;  %4652 = vmatpush1.bf16.msra.mxu1 %v8760_v6 }
0x14ff   :  { %4612 = vmatprep.subr.bf16.mxu0 %v8766_v35  ;;  %4653 = vmatprep.subr.bf16.mxu1 %v8768_v7 }
0x1500   :  { %4247 = vmatmul.mubr.bf16.gmra.mrb[120].mxu0 %v3985_v56  ;;  %4320 = vmatmul.mubr.bf16.gmra.mrb[120].mxu1 %v3985_v56  ;;  %v5828_v56 = vld [vmem:[%s9251_s3 + $0x8] sm:$0xf] }
0x1501   :  { %4256 = vmatprep.mubr.bf16.mxu0 %v9285_v31  ;;  %4329 = vmatprep.mubr.bf16.mxu1 %v9285_v31 }
0x1502   :  { %4613 = vmatpush1.bf16.msra.mxu0 %v8770_v15  ;;  %4654 = vmatpush1.bf16.msra.mxu1 %v8772_v4 }
0x1503   :  { %4614 = vmatprep.subr.bf16.mxu0 %v8778_v12  ;;  %4655 = vmatprep.subr.bf16.mxu1 %v8780_v63 }
0x1506   :  { %4615 = vmatpush1.bf16.msra.mxu0 %v8782_v34  ;;  %4656 = vmatpush1.bf16.msra.mxu1 %v8784_v16 }
0x1507   :  { %4616 = vmatprep.subr.bf16.mxu0 %v8790_v10  ;;  %4657 = vmatprep.subr.bf16.mxu1 %v8792_v52 }
0x1508   :  { %4257 = vmatmul.mubr.bf16.gmra.mrb[124].mxu0 %v3986_v25  ;;  %4330 = vmatmul.mubr.bf16.gmra.mrb[124].mxu1 %v3986_v25 }
0x1509   :  { %4266 = vmatprep.mubr.bf16.mxu0 %v9285_v31  ;;  %4339 = vmatprep.mubr.bf16.mxu1 %v9285_v31 }
0x150a   :  { %4617 = vmatpush1.bf16.msra.mxu0 %v8794_v58  ;;  %4658 = vmatpush1.bf16.msra.mxu1 %v8796_v51 }
0x150b   :  { %4618 = vmatprep.subr.bf16.mxu0 %v8800_v60  ;;  %4659 = vmatprep.subr.bf16.mxu1 %v8802_v39 }
0x150e   :  { %4619 = vmatpush1.bf16.msra.mxu0 %v8806_v59  ;;  %4660 = vmatpush1.bf16.msra.mxu1 %v8808_v21 }
0x150f   :  { %4620 = vmatprep.subr.bf16.mxu0 %v8812_v44  ;;  %4661 = vmatprep.subr.bf16.mxu1 %v8814_v20 }
0x1512   :  { %4621 = vmatpush1.bf16.msra.mxu0 %v8818_v38  ;;  %4662 = vmatpush1.bf16.msra.mxu1 %v8820_v5 }
0x1513   :  { %4622 = vmatprep.subr.bf16.mxu0 %v8824_v32  ;;  %4663 = vmatprep.subr.bf16.mxu1 %v8826_v33 }
0x1516   :  { %4623 = vmatpush1.bf16.msra.mxu0 %v8830_v30  ;;  %4664 = vmatpush1.bf16.msra.mxu1 %v8832_v36 }
0x1517   :  { %4723 = vmatprep.subr.bf16.mxu0 %v8742_v11  ;;  %4764 = vmatprep.subr.bf16.mxu1 %v8744_v8 }
0x15ab   :  { %v3903_v24 = vpop.f32.mrb[112].mxu0  ;;  %v3944_v47 = vpop.f32.mrb[112].mxu1 }
0x15ac   :  { %v3951_v45 = vadd.f32 %v3903_v24, %v2828_v53  ;;  %v3953_v9 = vadd.f32 %v3944_v47, %v2901_v54  ;;  %v3905_v48 = vpop.f32.mrb[113].mxu0  ;;  %v3946_v29 = vpop.f32.mrb[113].mxu1 }
0x15ad   :  { %v3952_v27 = vadd.f32 %v3905_v48, %v2830_v23  ;;  %v3954_v0 = vadd.f32 %v3946_v29, %v2903_v40  ;;  %v3907_v17 = vpop.f32.mrb[114].mxu0  ;;  %v3948_v57 = vpop.f32.mrb[114].mxu1  ;;  %v8852_v23 = vrot.slane %v5828_v56, %v9358_v41  ;;  %v9359_v40 = vld [vmem:[#allocation8_spill] sm:$0xff] }
0x15ae   :  { %v5793_v62 = vmul.f32 -1.442695, %v3951_v45  ;;  %v3908_v50 = vpop.f32.mrb[115].mxu0  ;;  %v3949_v19 = vpop.f32.mrb[115].mxu1  ;;  %v8856_v24 = vrot.slane %v5828_v56, %v9359_v40 }
0x15af   :  { %v5794_v14 = vmul.f32 -1.442695, %v3952_v27  ;;  %v5795_v3 = vmul.f32 -1.442695, %v3954_v0 }
0x15b0   :  { %6705 = vpow2.f32 %v5793_v62 }
0x15b1   :  { %6707 = vpow2.f32 %v5794_v14  ;;  %v9360_v14 = vld [vmem:[#allocation9_spill] sm:$0xff] }
0x15b2   :  { %6709 = vpow2.f32 %v5795_v3  ;;  %v8869_v3 = vrot.slane %v5828_v56, %v9360_v14 }
0x15b3   :  { %6711 = vtanh.f32 %v3953_v9 }
0x15ba   :  { %v6706_v49 = vpop.eup %6705 }
0x15bb   :  { %v6708_v22 = vpop.eup %6707  ;;  %v3958_v26 = vadd.f32 1.0, %v6706_v49 }
0x15bc   :  { %v3964_v18 = vadd.f32 1.0, %v6708_v22  ;;  %v6710_v46 = vpop.eup %6709 }
0x15bd   :  { %6713 = vrcp.f32 %v3958_v26  ;;  %v6712_v25 = vpop.eup %6711  ;;  %v3971_v54 = vadd.f32 1.0, %v6710_v46 }
0x15be   :  { %6715 = vrcp.f32 %v3964_v18  ;;  %v9361_v18 = vld [vmem:[#allocation10_spill] sm:$0xff] }
0x15bf   :  { %6717 = vrcp.f32 %v3971_v54  ;;  %v8877_v46 = vrot.slane %v5828_v56, %v9361_v18 }
0x15c7   :  { %v6714_v1 = vpop.eup %6713 }
0x15c8   :  { %v6716_v53 = vpop.eup %6715  ;;  %v3975_v42 = vmul.f32 %v6714_v1, %v6712_v25 }
0x15c9   :  { %v3974_v28 = vmul.f32 %v6716_v53, %v8641_v43  ;;  %v6718_v54 = vpop.eup %6717 }
0x15cb   :  { %v3976_v47 = vadd.f32 %v3975_v42, %v3974_v28  ;;  %v4238_v45 = vpop.f32.mrb[116].mxu0  ;;  %v4311_v9 = vpop.f32.mrb[116].mxu1 }
0x15cc   :  { %v4239_v48 = vadd.f32 %v4238_v45, %v8852_v23  ;;  %v4240_v29 = vpop.f32.mrb[117].mxu0  ;;  %v4313_v27 = vpop.f32.mrb[117].mxu1 }
0x15cd   :  { %6719 = vtanh.f32 %v3976_v47  ;;  %v4241_v0 = vadd.f32 %v4240_v29, %v8856_v24  ;;  %v8860_v17 = vpop.f32.mrb[118].mxu0  ;;  %v8862_v57 = vpop.f32.mrb[118].mxu1  ;;  %v4314_v49 = vadd.f32 %v4313_v27, %v8869_v3  ;;  %v4312_v29 = vadd.f32 %v4311_v9, %v8877_v46 }
0x15ce   :  { %v5861_v62 = vmul.f32 -1.442695, %v4239_v48  ;;  %v8864_v43 = vpop.f32.mrb[119].mxu0  ;;  %v8866_v50 = vpop.f32.mrb[119].mxu1 }
0x15cf   :  { %v5862_v19 = vmul.f32 -1.442695, %v4241_v0  ;;  %v5863_v45 = vmul.f32 -1.442695, %v4314_v49 }
0x15d0   :  { %6721 = vpow2.f32 %v5861_v62 }
0x15d1   :  { %6723 = vpow2.f32 %v5862_v19 }
0x15d2   :  { %6725 = vpow2.f32 %v5863_v45 }
0x15d3   :  { %v8872_v22 = vpop.f32.mrb[120].mxu0  ;;  %v8874_v26 = vpop.f32.mrb[120].mxu1  ;;  %6727 = vtanh.f32 %v4312_v29 }
0x15d4   :  { %v8879_v25 = vpop.f32.mrb[121].mxu0  ;;  %v8881_v1 = vpop.f32.mrb[121].mxu1 }
0x15d5   :  { %v8883_v53 = vpop.f32.mrb[122].mxu0  ;;  %v8885_v42 = vpop.f32.mrb[122].mxu1 }
0x15d6   :  { %9362 = vst [vmem:[#allocation11_spill] sm:$0xff] %v8883_v53  ;;  %9363 = vst [vmem:[#allocation12_spill] sm:$0xff] %v8885_v42  ;;  %v8887_v28 = vpop.f32.mrb[123].mxu0  ;;  %v8889_v40 = vpop.f32.mrb[123].mxu1 }
0x15d7   :  { %9364 = vst [vmem:[#allocation13_spill] sm:$0xff] %v8887_v28  ;;  %9365 = vst [vmem:[#allocation14_spill] sm:$0xff] %v8889_v40  ;;  %v6720_v47 = vpop.eup %6719 }
0x15d8   :  { %v3978_v48 = vmul.f32 %v6720_v47, %v6718_v54 }
0x15da   :  { %v6722_v56 = vpop.eup %6721  ;;  %v3979_v27 = vpack.c.bf16 %v3978_v48, %v3978_v48 }
0x15db   :  { %v6724_v0 = vpop.eup %6723  ;;  %v4422_v62 = vadd.f32 1.0, %v6722_v56  ;;  %v8892_v19 = vpop.f32.mrb[124].mxu0 }
0x15dc   :  { %9366 = vst [vmem:[#allocation15_spill] sm:$0xff] %v8892_v19  ;;  %v8894_v14 = vpop.f32.mrb[124].mxu1  ;;  %v3981_v18 = vrot.slane %v3979_v27, 4  ;;  %v4428_v41 = vadd.f32 1.0, %v6724_v0  ;;  %v8896_v28 = vpop.f32.mrb[125].mxu0 }
0x15dd   :  { %9367 = vst [vmem:[#allocation16_spill] sm:$0xff] %v8894_v14  ;;  %9368 = vst [vmem:[#allocation17_spill] sm:$0xff] %v8896_v28  ;;  %v8898_v40 = vpop.f32.mrb[125].mxu1  ;;  %6729 = vrcp.f32 %v4422_v62  ;;  %v8900_v49 = vpop.f32.mrb[126].mxu0 }
0x15de   :  { %9369 = vst [vmem:[#allocation18_spill] sm:$0xff] %v8898_v40  ;;  %9370 = vst [vmem:[#allocation19_spill] sm:$0xff] %v8900_v49  ;;  %v8902_v9 = vpop.f32.mrb[126].mxu1  ;;  %6731 = vrcp.f32 %v4428_v41  ;;  %v8904_v54 = vpop.f32.mrb[127].mxu0 }
0x15df   :  { %9371 = vst [vmem:[#allocation20_spill] sm:$0xff] %v8902_v9  ;;  %3983 = vst [vmem:[#allocation2 + $0x18] sm:$0xf0] %v3981_v18  ;;  %v8906_v47 = vpop.f32.mrb[127].mxu1  ;;  %v6726_v45 = vpop.eup %6725 }
0x15e0   :  { %9372 = vst [vmem:[#allocation21_spill] sm:$0xff] %v8904_v54  ;;  %9373 = vst [vmem:[#allocation22_spill] sm:$0xff] %v8906_v47  ;;  %v6728_v56 = vpop.eup %6727  ;;  %v4435_v62 = vadd.f32 1.0, %v6726_v45 }
0x15e2   :  { %6733 = vrcp.f32 %v4435_v62  ;;  %v4245_v62 = vadd.f32 %v8864_v43, %v8856_v24 }
0x15e6   :  { %v3987_v48 = vld [vmem:[#allocation2 + $0x18] sm:$0xff] }
0x15e7   :  { %4267 = vmatmul.mubr.bf16.gmra.mrb[128].mxu0 %v3987_v48  ;;  %4340 = vmatmul.mubr.bf16.gmra.mrb[128].mxu1 %v3987_v48  ;;  %v6730_v29 = vpop.eup %6729 }
0x15e8   :  { %4640 = vmatprep.mubr.bf16.mxu0 %v9285_v31  ;;  %4681 = vmatprep.mubr.bf16.mxu1 %v9285_v31  ;;  %v6732_v27 = vpop.eup %6731  ;;  %v4439_v0 = vmul.f32 %v6730_v29, %v6728_v56 }
0x15e9   :  { %v4438_v9 = vmul.f32 0.0, %v6732_v27  ;;  %v4243_v27 = vadd.f32 %v8860_v17, %v8852_v23 }
0x15eb   :  { %v8910_v18 = vadd.f32 %v4439_v0, %v4438_v9  ;;  %v4316_v0 = vadd.f32 %v8862_v57, %v8877_v46 }
0x15ec   :  { %v6734_v41 = vpop.eup %6733 }
0x15ed   :  { %6735 = vtanh.f32 %v8910_v18 }
0x15f7   :  { %v6736_v47 = vpop.eup %6735 }
0x15f8   :  { %v4442_v54 = vmul.f32 %v6736_v47, %v6734_v41  ;;  %v4318_v41 = vadd.f32 %v8866_v50, %v8869_v3 }
0x15fa   :  { %v4443_v49 = vpack.c.bf16 %v4442_v54, %v4442_v54 }
0x15fc   :  { %4641 = vmatmul.mubr.bf16.vlgmr.msra.gmra.mrb[132].mxu0 %v4443_v49  ;;  %4682 = vmatmul.mubr.bf16.vlgmr.msra.gmra.mrb[132].mxu1 %v4443_v49 }
0x15fd   :  { %4724 = vmatpush1.bf16.msra.mxu0 %v8746_v61  ;;  %4765 = vmatpush1.bf16.msra.mxu1 %v8748_v37 }
0x15fe   :  { %4725 = vmatprep.subr.bf16.mxu0 %v8754_v55  ;;  %4766 = vmatprep.subr.bf16.mxu1 %v8756_v2 }
0x15ff   :  { %4755 = vmatprep.mubr.bf16.mxu0 %v9285_v31  ;;  %4796 = vmatprep.mubr.bf16.mxu1 %v9285_v31 }
0x1601   :  { %4726 = vmatpush1.bf16.msra.mxu0 %v8758_v13  ;;  %4767 = vmatpush1.bf16.msra.mxu1 %v8760_v6 }
0x1602   :  { %4727 = vmatprep.subr.bf16.mxu0 %v8766_v35  ;;  %4768 = vmatprep.subr.bf16.mxu1 %v8768_v7 }
0x1605   :  { %4728 = vmatpush1.bf16.msra.mxu0 %v8770_v15  ;;  %4769 = vmatpush1.bf16.msra.mxu1 %v8772_v4 }
0x1606   :  { %4729 = vmatprep.subr.bf16.mxu0 %v8778_v12  ;;  %4770 = vmatprep.subr.bf16.mxu1 %v8780_v63 }
0x1609   :  { %4730 = vmatpush1.bf16.msra.mxu0 %v8782_v34  ;;  %4771 = vmatpush1.bf16.msra.mxu1 %v8784_v16 }
0x160a   :  { %4731 = vmatprep.subr.bf16.mxu0 %v8790_v10  ;;  %4772 = vmatprep.subr.bf16.mxu1 %v8792_v52 }
0x160d   :  { %4732 = vmatpush1.bf16.msra.mxu0 %v8794_v58  ;;  %4773 = vmatpush1.bf16.msra.mxu1 %v8796_v51 }
0x160e   :  { %4733 = vmatprep.subr.bf16.mxu0 %v8800_v60  ;;  %4774 = vmatprep.subr.bf16.mxu1 %v8802_v39 }
0x1611   :  { %4734 = vmatpush1.bf16.msra.mxu0 %v8806_v59  ;;  %4775 = vmatpush1.bf16.msra.mxu1 %v8808_v21 }
0x1612   :  { %4735 = vmatprep.subr.bf16.mxu0 %v8812_v44  ;;  %4776 = vmatprep.subr.bf16.mxu1 %v8814_v20 }
0x1615   :  { %4736 = vmatpush1.bf16.msra.mxu0 %v8818_v38  ;;  %4777 = vmatpush1.bf16.msra.mxu1 %v8820_v5 }
0x1616   :  { %4737 = vmatprep.subr.bf16.mxu0 %v8824_v32  ;;  %4778 = vmatprep.subr.bf16.mxu1 %v8826_v33 }
0x1619   :  { %4738 = vmatpush1.bf16.msra.mxu0 %v8830_v30  ;;  %4779 = vmatpush1.bf16.msra.mxu1 %v8832_v36 }
0x161a   :  { %4838 = vmatprep.subr.bf16.mxu0 %v8742_v11  ;;  %4879 = vmatprep.subr.bf16.mxu1 %v8744_v8 }
0x16ba   :  { %v8947_v49 = vpop.f32.mrb[128].mxu0  ;;  %v8949_v9 = vpop.f32.mrb[128].mxu1 }
0x16bb   :  { %9374 = vst [vmem:[#allocation23_spill] sm:$0xff] %v8947_v49  ;;  %9375 = vst [vmem:[#allocation24_spill] sm:$0xff] %v8949_v9  ;;  %v8951_v54 = vpop.f32.mrb[129].mxu0  ;;  %v8953_v47 = vpop.f32.mrb[129].mxu1 }
0x16bc   :  { %9376 = vst [vmem:[#allocation25_spill] sm:$0xff] %v8951_v54  ;;  %9377 = vst [vmem:[#allocation26_spill] sm:$0xff] %v8953_v47  ;;  %v8955_v45 = vpop.f32.mrb[130].mxu0  ;;  %v8957_v48 = vpop.f32.mrb[130].mxu1 }
0x16bd   :  { %9378 = vst [vmem:[#allocation27_spill] sm:$0xff] %v8955_v45  ;;  %9379 = vst [vmem:[#allocation28_spill] sm:$0xff] %v8957_v48  ;;  %v8959_v56 = vpop.f32.mrb[131].mxu0  ;;  %v8961_v29 = vpop.f32.mrb[131].mxu1 }
0x16be   :  { %9380 = vst [vmem:[#allocation29_spill] sm:$0xff] %v8959_v56  ;;  %9381 = vst [vmem:[#allocation30_spill] sm:$0xff] %v8961_v29 }
0x16cf   :  { %v4642_v47 = vpop.f32.mrb[132].mxu0  ;;  %v4683_v45 = vpop.f32.mrb[132].mxu1 }
0x16d0   :  { %v4690_v54 = vadd.f32 %v4642_v47, %v4243_v27  ;;  %v4692_v48 = vadd.f32 %v4683_v45, %v4316_v0  ;;  %v4644_v9 = vpop.f32.mrb[133].mxu0  ;;  %v4685_v56 = vpop.f32.mrb[133].mxu1  ;;  %v4251_v27 = vadd.f32 %v8879_v25, %v8856_v24  ;;  %v4324_v0 = vadd.f32 %v8881_v1, %v8869_v3 }
0x16d1   :  { %v4691_v49 = vadd.f32 %v4644_v9, %v4245_v62  ;;  %v4693_v29 = vadd.f32 %v4685_v56, %v4318_v41  ;;  %v4646_v40 = vpop.f32.mrb[134].mxu0  ;;  %v4687_v28 = vpop.f32.mrb[134].mxu1 }
0x16d2   :  { %v5896_v17 = vmul.f32 -1.442695, %v4690_v54  ;;  %v4647_v14 = vpop.f32.mrb[135].mxu0  ;;  %v4688_v19 = vpop.f32.mrb[135].mxu1 }
0x16d3   :  { %v5897_v57 = vmul.f32 -1.442695, %v4691_v49  ;;  %v5898_v43 = vmul.f32 -1.442695, %v4693_v29 }
0x16d4   :  { %6737 = vpow2.f32 %v5896_v17 }
0x16d5   :  { %6739 = vpow2.f32 %v5897_v57 }
0x16d6   :  { %6741 = vpow2.f32 %v5898_v43 }
0x16d7   :  { %6743 = vtanh.f32 %v4692_v48 }
0x16de   :  { %v6738_v42 = vpop.eup %6737 }
0x16df   :  { %v6740_v53 = vpop.eup %6739  ;;  %v4697_v50 = vadd.f32 1.0, %v6738_v42 }
0x16e0   :  { %v4703_v47 = vadd.f32 1.0, %v6740_v53  ;;  %v6742_v45 = vpop.eup %6741  ;;  %v4249_v53 = vadd.f32 %v8872_v22, %v8852_v23 }
0x16e1   :  { %6745 = vrcp.f32 %v4697_v50  ;;  %v6744_v9 = vpop.eup %6743  ;;  %v4710_v54 = vadd.f32 1.0, %v6742_v45 }
0x16e2   :  { %6747 = vrcp.f32 %v4703_v47 }
0x16e3   :  { %6749 = vrcp.f32 %v4710_v54 }
0x16eb   :  { %v6746_v56 = vpop.eup %6745 }
0x16ec   :  { %v6748_v40 = vpop.eup %6747  ;;  %v4714_v28 = vmul.f32 %v6746_v56, %v6744_v9 }
0x16ed   :  { %v4713_v19 = vmul.f32 %v6748_v40, %v8910_v18  ;;  %v6750_v49 = vpop.eup %6749  ;;  %v4322_v18 = vadd.f32 %v8874_v26, %v8877_v46 }
0x16ef   :  { %v8972_v14 = vadd.f32 %v4714_v28, %v4713_v19 }
0x16f1   :  { %6751 = vtanh.f32 %v8972_v14 }
0x16fb   :  { %v6752_v42 = vpop.eup %6751 }
0x16fc   :  { %v4717_v29 = vmul.f32 %v6752_v42, %v6750_v49 }
0x16fe   :  { %v4718_v48 = vpack.c.bf16 %v4717_v29, %v4717_v29 }
0x1700   :  { %4756 = vmatmul.mubr.bf16.vlgmr.msra.gmra.mrb[136].mxu0 %v4718_v48  ;;  %4797 = vmatmul.mubr.bf16.vlgmr.msra.gmra.mrb[136].mxu1 %v4718_v48 }
0x1701   :  { %4839 = vmatpush1.bf16.msra.mxu0 %v8746_v61  ;;  %4880 = vmatpush1.bf16.msra.mxu1 %v8748_v37 }
0x1702   :  { %4840 = vmatprep.subr.bf16.mxu0 %v8754_v55  ;;  %4881 = vmatprep.subr.bf16.mxu1 %v8756_v2 }
0x1703   :  { %4870 = vmatprep.mubr.bf16.mxu0 %v9285_v31  ;;  %4911 = vmatprep.mubr.bf16.mxu1 %v9285_v31 }
0x1705   :  { %4841 = vmatpush1.bf16.msra.mxu0 %v8758_v13  ;;  %4882 = vmatpush1.bf16.msra.mxu1 %v8760_v6 }
0x1706   :  { %4842 = vmatprep.subr.bf16.mxu0 %v8766_v35  ;;  %4883 = vmatprep.subr.bf16.mxu1 %v8768_v7 }
0x1709   :  { %4843 = vmatpush1.bf16.msra.mxu0 %v8770_v15  ;;  %4884 = vmatpush1.bf16.msra.mxu1 %v8772_v4 }
0x170a   :  { %4844 = vmatprep.subr.bf16.mxu0 %v8778_v12  ;;  %4885 = vmatprep.subr.bf16.mxu1 %v8780_v63 }
0x170d   :  { %4845 = vmatpush1.bf16.msra.mxu0 %v8782_v34  ;;  %4886 = vmatpush1.bf16.msra.mxu1 %v8784_v16 }
0x170e   :  { %4846 = vmatprep.subr.bf16.mxu0 %v8790_v10  ;;  %4887 = vmatprep.subr.bf16.mxu1 %v8792_v52 }
0x1711   :  { %4847 = vmatpush1.bf16.msra.mxu0 %v8794_v58  ;;  %4888 = vmatpush1.bf16.msra.mxu1 %v8796_v51 }
0x1712   :  { %4848 = vmatprep.subr.bf16.mxu0 %v8800_v60  ;;  %4889 = vmatprep.subr.bf16.mxu1 %v8802_v39 }
0x1715   :  { %4849 = vmatpush1.bf16.msra.mxu0 %v8806_v59  ;;  %4890 = vmatpush1.bf16.msra.mxu1 %v8808_v21 }
0x1716   :  { %4850 = vmatprep.subr.bf16.mxu0 %v8812_v44  ;;  %4891 = vmatprep.subr.bf16.mxu1 %v8814_v20 }
0x1719   :  { %4851 = vmatpush1.bf16.msra.mxu0 %v8818_v38  ;;  %4892 = vmatpush1.bf16.msra.mxu1 %v8820_v5 }
0x171a   :  { %4852 = vmatprep.subr.bf16.mxu0 %v8824_v32  ;;  %4893 = vmatprep.subr.bf16.mxu1 %v8826_v33 }
0x171d   :  { %4853 = vmatpush1.bf16.msra.mxu0 %v8830_v30  ;;  %4894 = vmatpush1.bf16.msra.mxu1 %v8832_v36 }
0x171e   :  { %4953 = vmatprep.subr.bf16.mxu0 %v8742_v11  ;;  %4994 = vmatprep.subr.bf16.mxu1 %v8744_v8 }
0x17d3   :  { %v4757_v62 = vpop.f32.mrb[136].mxu0  ;;  %v4798_v41 = vpop.f32.mrb[136].mxu1 }
0x17d4   :  { %v4805_v17 = vadd.f32 %v4757_v62, %v4249_v53  ;;  %v4807_v57 = vadd.f32 %v4798_v41, %v4322_v18  ;;  %v4759_v43 = vpop.f32.mrb[137].mxu0  ;;  %v4800_v50 = vpop.f32.mrb[137].mxu1 }
0x17d5   :  { %v4806_v47 = vadd.f32 %v4759_v43, %v4251_v27  ;;  %v4808_v45 = vadd.f32 %v4800_v50, %v4324_v0  ;;  %v4761_v9 = vpop.f32.mrb[138].mxu0  ;;  %v4802_v56 = vpop.f32.mrb[138].mxu1 }
0x17d6   :  { %v5899_v22 = vmul.f32 -1.442695, %v4805_v17  ;;  %v4762_v40 = vpop.f32.mrb[139].mxu0  ;;  %v4803_v28 = vpop.f32.mrb[139].mxu1  ;;  %v9384_v9 = vld [vmem:[#allocation13_spill] sm:$0xff] }
0x17d7   :  { %v5900_v26 = vmul.f32 -1.442695, %v4806_v47  ;;  %v5901_v25 = vmul.f32 -1.442695, %v4808_v45  ;;  %v9383_v47 = vld [vmem:[#allocation12_spill] sm:$0xff]  ;;  %v4255_v56 = vadd.f32 %v9384_v9, %v8856_v24 }
0x17d8   :  { %6753 = vpow2.f32 %v5899_v22  ;;  %v4326_v45 = vadd.f32 %v9383_v47, %v8877_v46  ;;  %v9385_v22 = vld [vmem:[#allocation14_spill] sm:$0xff] }
0x17d9   :  { %6755 = vpow2.f32 %v5900_v26  ;;  %v4328_v40 = vadd.f32 %v9385_v22, %v8869_v3 }
0x17da   :  { %6757 = vpow2.f32 %v5901_v25 }
0x17db   :  { %6759 = vtanh.f32 %v4807_v57 }
0x17e2   :  { %v6754_v54 = vpop.eup %6753 }
0x17e3   :  { %v6756_v19 = vpop.eup %6755  ;;  %v4812_v1 = vadd.f32 1.0, %v6754_v54 }
0x17e4   :  { %v4818_v49 = vadd.f32 1.0, %v6756_v19  ;;  %v6758_v42 = vpop.eup %6757 }
0x17e5   :  { %6761 = vrcp.f32 %v4812_v1  ;;  %v6760_v29 = vpop.eup %6759  ;;  %v4825_v27 = vadd.f32 1.0, %v6758_v42 }
0x17e6   :  { %6763 = vrcp.f32 %v4818_v49 }
0x17e7   :  { %6765 = vrcp.f32 %v4825_v27 }
0x17ef   :  { %v6762_v48 = vpop.eup %6761 }
0x17f0   :  { %v6764_v53 = vpop.eup %6763  ;;  %v4829_v18 = vmul.f32 %v6762_v48, %v6760_v29 }
0x17f1   :  { %v4828_v0 = vmul.f32 %v6764_v53, %v8972_v14  ;;  %v6766_v41 = vpop.eup %6765  ;;  %v9382_v14 = vld [vmem:[#allocation11_spill] sm:$0xff] }
0x17f2   :  { %v4253_v50 = vadd.f32 %v9382_v14, %v8852_v23 }
0x17f3   :  { %v9018_v62 = vadd.f32 %v4829_v18, %v4828_v0 }
0x17f5   :  { %6767 = vtanh.f32 %v9018_v62 }
0x17ff   :  { %v6768_v17 = vpop.eup %6767 }
0x1800   :  { %v4832_v43 = vmul.f32 %v6768_v17, %v6766_v41 }
0x1802   :  { %v4833_v57 = vpack.c.bf16 %v4832_v43, %v4832_v43 }
0x1804   :  { %4871 = vmatmul.mubr.bf16.vlgmr.msra.gmra.mrb[140].mxu0 %v4833_v57  ;;  %4912 = vmatmul.mubr.bf16.vlgmr.msra.gmra.mrb[140].mxu1 %v4833_v57 }
0x1805   :  { %4954 = vmatpush1.bf16.msra.mxu0 %v8746_v61  ;;  %4995 = vmatpush1.bf16.msra.mxu1 %v8748_v37 }
0x1806   :  { %4955 = vmatprep.subr.bf16.mxu0 %v8754_v55  ;;  %4996 = vmatprep.subr.bf16.mxu1 %v8756_v2 }
0x1807   :  { %4985 = vmatprep.mubr.bf16.mxu0 %v9285_v31  ;;  %5026 = vmatprep.mubr.bf16.mxu1 %v9285_v31 }
0x1809   :  { %4956 = vmatpush1.bf16.msra.mxu0 %v8758_v13  ;;  %4997 = vmatpush1.bf16.msra.mxu1 %v8760_v6 }
0x180a   :  { %4957 = vmatprep.subr.bf16.mxu0 %v8766_v35  ;;  %4998 = vmatprep.subr.bf16.mxu1 %v8768_v7 }
0x180d   :  { %4958 = vmatpush1.bf16.msra.mxu0 %v8770_v15  ;;  %4999 = vmatpush1.bf16.msra.mxu1 %v8772_v4 }
0x180e   :  { %4959 = vmatprep.subr.bf16.mxu0 %v8778_v12  ;;  %5000 = vmatprep.subr.bf16.mxu1 %v8780_v63 }
0x1811   :  { %4960 = vmatpush1.bf16.msra.mxu0 %v8782_v34  ;;  %5001 = vmatpush1.bf16.msra.mxu1 %v8784_v16 }
0x1812   :  { %4961 = vmatprep.subr.bf16.mxu0 %v8790_v10  ;;  %5002 = vmatprep.subr.bf16.mxu1 %v8792_v52 }
0x1815   :  { %4962 = vmatpush1.bf16.msra.mxu0 %v8794_v58  ;;  %5003 = vmatpush1.bf16.msra.mxu1 %v8796_v51 }
0x1816   :  { %4963 = vmatprep.subr.bf16.mxu0 %v8800_v60  ;;  %5004 = vmatprep.subr.bf16.mxu1 %v8802_v39 }
0x1819   :  { %4964 = vmatpush1.bf16.msra.mxu0 %v8806_v59  ;;  %5005 = vmatpush1.bf16.msra.mxu1 %v8808_v21 }
0x181a   :  { %4965 = vmatprep.subr.bf16.mxu0 %v8812_v44  ;;  %5006 = vmatprep.subr.bf16.mxu1 %v8814_v20 }
0x181d   :  { %4966 = vmatpush1.bf16.msra.mxu0 %v8818_v38  ;;  %5007 = vmatpush1.bf16.msra.mxu1 %v8820_v5 }
0x181e   :  { %4967 = vmatprep.subr.bf16.mxu0 %v8824_v32  ;;  %5008 = vmatprep.subr.bf16.mxu1 %v8826_v33 }
0x1821   :  { %4968 = vmatpush1.bf16.msra.mxu0 %v8830_v30  ;;  %5009 = vmatpush1.bf16.msra.mxu1 %v8832_v36 }
0x1822   :  { %5068 = vmatprep.subr.bf16.mxu0 %v8742_v11  ;;  %5109 = vmatprep.subr.bf16.mxu1 %v8744_v8 }
0x18d7   :  { %v4872_v28 = vpop.f32.mrb[140].mxu0  ;;  %v4913_v26 = vpop.f32.mrb[140].mxu1 }
0x18d8   :  { %v4920_v25 = vadd.f32 %v4872_v28, %v4253_v50  ;;  %v4922_v54 = vadd.f32 %v4913_v26, %v4326_v45  ;;  %v4874_v19 = vpop.f32.mrb[141].mxu0  ;;  %v4915_v1 = vpop.f32.mrb[141].mxu1 }
0x18d9   :  { %v4921_v49 = vadd.f32 %v4874_v19, %v4255_v56  ;;  %v4923_v42 = vadd.f32 %v4915_v1, %v4328_v40  ;;  %v4876_v29 = vpop.f32.mrb[142].mxu0  ;;  %v4917_v48 = vpop.f32.mrb[142].mxu1 }
0x18da   :  { %v5902_v53 = vmul.f32 -1.442695, %v4920_v25  ;;  %v4877_v18 = vpop.f32.mrb[143].mxu0  ;;  %v4918_v27 = vpop.f32.mrb[143].mxu1  ;;  %v9388_v29 = vld [vmem:[#allocation17_spill] sm:$0xff] }
0x18db   :  { %v5903_v0 = vmul.f32 -1.442695, %v4921_v49  ;;  %v5904_v41 = vmul.f32 -1.442695, %v4923_v42  ;;  %v9387_v49 = vld [vmem:[#allocation16_spill] sm:$0xff]  ;;  %v4261_v48 = vadd.f32 %v9388_v29, %v8856_v24 }
0x18dc   :  { %6769 = vpow2.f32 %v5902_v53  ;;  %v4332_v42 = vadd.f32 %v9387_v49, %v8877_v46  ;;  %v9389_v53 = vld [vmem:[#allocation18_spill] sm:$0xff] }
0x18dd   :  { %6771 = vpow2.f32 %v5903_v0  ;;  %v4334_v18 = vadd.f32 %v9389_v53, %v8869_v3 }
0x18de   :  { %6773 = vpow2.f32 %v5904_v41 }
0x18df   :  { %6775 = vtanh.f32 %v4922_v54 }
0x18e6   :  { %v6770_v17 = vpop.eup %6769 }
0x18e7   :  { %v6772_v43 = vpop.eup %6771  ;;  %v4927_v57 = vadd.f32 1.0, %v6770_v17 }
0x18e8   :  { %v4933_v14 = vadd.f32 1.0, %v6772_v43  ;;  %v6774_v50 = vpop.eup %6773 }
0x18e9   :  { %6777 = vrcp.f32 %v4927_v57  ;;  %v6776_v47 = vpop.eup %6775  ;;  %v4940_v22 = vadd.f32 1.0, %v6774_v50 }
0x18ea   :  { %6779 = vrcp.f32 %v4933_v14 }
0x18eb   :  { %6781 = vrcp.f32 %v4940_v22 }
0x18f3   :  { %v6778_v45 = vpop.eup %6777 }
0x18f4   :  { %v6780_v9 = vpop.eup %6779  ;;  %v4944_v56 = vmul.f32 %v6778_v45, %v6776_v47 }
0x18f5   :  { %v4943_v40 = vmul.f32 %v6780_v9, %v9018_v62  ;;  %v6782_v26 = vpop.eup %6781  ;;  %v9386_v62 = vld [vmem:[#allocation15_spill] sm:$0xff] }
0x18f6   :  { %v4259_v1 = vadd.f32 %v9386_v62, %v8852_v23 }
0x18f7   :  { %v9064_v28 = vadd.f32 %v4944_v56, %v4943_v40 }
0x18f9   :  { %6783 = vtanh.f32 %v9064_v28 }
0x1903   :  { %v6784_v25 = vpop.eup %6783 }
0x1904   :  { %v4947_v19 = vmul.f32 %v6784_v25, %v6782_v26 }
0x1906   :  { %v4948_v54 = vpack.c.bf16 %v4947_v19, %v4947_v19 }
0x1908   :  { %4986 = vmatmul.mubr.bf16.vlgmr.msra.gmra.mrb[144].mxu0 %v4948_v54  ;;  %5027 = vmatmul.mubr.bf16.vlgmr.msra.gmra.mrb[144].mxu1 %v4948_v54 }
0x1909   :  { %5069 = vmatpush1.bf16.msra.mxu0 %v8746_v61  ;;  %5110 = vmatpush1.bf16.msra.mxu1 %v8748_v37 }
0x190a   :  { %5070 = vmatprep.subr.bf16.mxu0 %v8754_v55  ;;  %5111 = vmatprep.subr.bf16.mxu1 %v8756_v2 }
0x190b   :  { %5100 = vmatprep.mubr.bf16.mxu0 %v9285_v31  ;;  %5141 = vmatprep.mubr.bf16.mxu1 %v9285_v31 }
0x190d   :  { %5071 = vmatpush1.bf16.msra.mxu0 %v8758_v13  ;;  %5112 = vmatpush1.bf16.msra.mxu1 %v8760_v6 }
0x190e   :  { %5072 = vmatprep.subr.bf16.mxu0 %v8766_v35  ;;  %5113 = vmatprep.subr.bf16.mxu1 %v8768_v7 }
0x1911   :  { %5073 = vmatpush1.bf16.msra.mxu0 %v8770_v15  ;;  %5114 = vmatpush1.bf16.msra.mxu1 %v8772_v4 }
0x1912   :  { %5074 = vmatprep.subr.bf16.mxu0 %v8778_v12  ;;  %5115 = vmatprep.subr.bf16.mxu1 %v8780_v63 }
0x1915   :  { %5075 = vmatpush1.bf16.msra.mxu0 %v8782_v34  ;;  %5116 = vmatpush1.bf16.msra.mxu1 %v8784_v16 }
0x1916   :  { %5076 = vmatprep.subr.bf16.mxu0 %v8790_v10  ;;  %5117 = vmatprep.subr.bf16.mxu1 %v8792_v52 }
0x1919   :  { %5077 = vmatpush1.bf16.msra.mxu0 %v8794_v58  ;;  %5118 = vmatpush1.bf16.msra.mxu1 %v8796_v51 }
0x191a   :  { %5078 = vmatprep.subr.bf16.mxu0 %v8800_v60  ;;  %5119 = vmatprep.subr.bf16.mxu1 %v8802_v39 }
0x191d   :  { %5079 = vmatpush1.bf16.msra.mxu0 %v8806_v59  ;;  %5120 = vmatpush1.bf16.msra.mxu1 %v8808_v21 }
0x191e   :  { %5080 = vmatprep.subr.bf16.mxu0 %v8812_v44  ;;  %5121 = vmatprep.subr.bf16.mxu1 %v8814_v20 }
0x1921   :  { %5081 = vmatpush1.bf16.msra.mxu0 %v8818_v38  ;;  %5122 = vmatpush1.bf16.msra.mxu1 %v8820_v5 }
0x1922   :  { %5082 = vmatprep.subr.bf16.mxu0 %v8824_v32  ;;  %5123 = vmatprep.subr.bf16.mxu1 %v8826_v33 }
0x1925   :  { %5083 = vmatpush1.bf16.msra.mxu0 %v8830_v30  ;;  %5124 = vmatpush1.bf16.msra.mxu1 %v8832_v36 }
0x1926   :  { %5183 = vmatprep.subr.bf16.mxu0 %v8742_v11  ;;  %5224 = vmatprep.subr.bf16.mxu1 %v8744_v8 }
0x19db   :  { %v4987_v27 = vpop.f32.mrb[144].mxu0  ;;  %v5028_v0 = vpop.f32.mrb[144].mxu1 }
0x19dc   :  { %v5035_v41 = vadd.f32 %v4987_v27, %v4259_v1  ;;  %v5037_v17 = vadd.f32 %v5028_v0, %v4332_v42  ;;  %v4989_v43 = vpop.f32.mrb[145].mxu0  ;;  %v5030_v11 = vpop.f32.mrb[145].mxu1 }
0x19dd   :  { %v5036_v57 = vadd.f32 %v4989_v43, %v4261_v48  ;;  %v5038_v8 = vadd.f32 %v5030_v11, %v4334_v18  ;;  %v4991_v14 = vpop.f32.mrb[146].mxu0  ;;  %v5032_v50 = vpop.f32.mrb[146].mxu1 }
0x19de   :  { %v5905_v47 = vmul.f32 -1.442695, %v5035_v41  ;;  %v4992_v45 = vpop.f32.mrb[147].mxu0  ;;  %v5033_v9 = vpop.f32.mrb[147].mxu1 }
0x19df   :  { %v5906_v56 = vmul.f32 -1.442695, %v5036_v57  ;;  %v5907_v22 = vmul.f32 -1.442695, %v5038_v8 }
0x19e0   :  { %6785 = vpow2.f32 %v5905_v47 }
0x19e1   :  { %6787 = vpow2.f32 %v5906_v56  ;;  %v6949_v56 = vld [vmem:[#allocation4 + $0x300] ss:$16 sps:$4 sm:$0xff]  }
0x19e2   :  { %6789 = vpow2.f32 %v5907_v22  ;;  %v6950_v22 = vld [vmem:[#allocation4 + $0x308] ss:$16 sps:$4 sm:$0xff]  }
0x19e3   :  { %6791 = vtanh.f32 %v5037_v17 }
0x19ea   :  { %v6786_v40 = vpop.eup %6785 }
0x19eb   :  { %v6788_v26 = vpop.eup %6787  ;;  %v5042_v25 = vadd.f32 1.0, %v6786_v40  ;;  %v6951_v40 = vld [vmem:[#allocation4 + $0x324] ss:$16 sps:$4 sm:$0xff]  }
0x19ec   :  { %v5048_v19 = vadd.f32 1.0, %v6788_v26  ;;  %v6790_v54 = vpop.eup %6789  ;;  %v6952_v26 = vld [vmem:[#allocation4 + $0x32c] ss:$16 sps:$4 sm:$0xff]  }
0x19ed   :  { %6793 = vrcp.f32 %v5042_v25  ;;  %v6792_v62 = vpop.eup %6791  ;;  %v5055_v29 = vadd.f32 1.0, %v6790_v54  ;;  %v6953_v25 = vld [vmem:[#allocation4 + $0x320] ss:$16 sps:$4 sm:$0xff]   ;;  %v6955_v54 = vld [vmem:[#allocation4 + $0x344] ss:$16 sps:$4 sm:$0xff]  }
0x19ee   :  { %6795 = vrcp.f32 %v5048_v19  ;;  %v6954_v19 = vld [vmem:[#allocation4 + $0x328] ss:$16 sps:$4 sm:$0xff]  }
0x19ef   :  { %6797 = vrcp.f32 %v5055_v29  ;;  %v6960_v29 = vld [vmem:[#allocation4 + $0x36c] ss:$16 sps:$4 sm:$0xff]  }
0x19f7   :  { %v6794_v1 = vpop.eup %6793 }
0x19f8   :  { %v6796_v49 = vpop.eup %6795  ;;  %v5059_v42 = vmul.f32 %v6794_v1, %v6792_v62  ;;  %v6956_v62 = vld [vmem:[#allocation4 + $0x34c] ss:$16 sps:$4 sm:$0xff]   ;;  %v6957_v1 = vld [vmem:[#allocation4 + $0x340] ss:$16 sps:$4 sm:$0xff]  }
0x19f9   :  { %v5058_v48 = vmul.f32 %v6796_v49, %v9064_v28  ;;  %v6798_v18 = vpop.eup %6797  ;;  %v6958_v49 = vld [vmem:[#allocation4 + $0x348] ss:$16 sps:$4 sm:$0xff]  }
0x19fb   :  { %v9110_v53 = vadd.f32 %v5059_v42, %v5058_v48  ;;  %v6959_v42 = vld [vmem:[#allocation4 + $0x364] ss:$16 sps:$4 sm:$0xff]   ;;  %v6961_v48 = vld [vmem:[#allocation4 + $0x360] ss:$16 sps:$4 sm:$0xff]  }
0x19fd   :  { %6799 = vtanh.f32 %v9110_v53 }
0x1a07   :  { %v6800_v27 = vpop.eup %6799 }
0x1a08   :  { %v5062_v0 = vmul.f32 %v6800_v27, %v6798_v18  ;;  %v6964_v18 = vld [vmem:[#allocation4 + $0x38c] ss:$16 sps:$4 sm:$0xff]   ;;  %v6965_v27 = vld [vmem:[#allocation4 + $0x380] ss:$16 sps:$4 sm:$0xff]  }
0x1a0a   :  { %v5063_v41 = vpack.c.bf16 %v5062_v0, %v5062_v0  ;;  %v6966_v0 = vld [vmem:[#allocation4 + $0x388] ss:$16 sps:$4 sm:$0xff]  }
0x1a0c   :  { %5101 = vmatmul.mubr.bf16.vlgmr.msra.gmra.mrb[148].mxu0 %v5063_v41  ;;  %5142 = vmatmul.mubr.bf16.vlgmr.msra.gmra.mrb[148].mxu1 %v5063_v41  ;;  %v6967_v41 = vld [vmem:[#allocation4 + $0x3a4] ss:$16 sps:$4 sm:$0xff]  }
0x1a0d   :  { %5184 = vmatpush1.bf16.msra.mxu0 %v8746_v61  ;;  %5225 = vmatpush1.bf16.msra.mxu1 %v8748_v37  ;;  %v6947_v61 = vld [vmem:[#allocation4 + $0x304] ss:$16 sps:$4 sm:$0xff]   ;;  %v6948_v37 = vld [vmem:[#allocation4 + $0x30c] ss:$16 sps:$4 sm:$0xff]  }
0x1a0e   :  { %5185 = vmatprep.subr.bf16.mxu0 %v8754_v55  ;;  %5226 = vmatprep.subr.bf16.mxu1 %v8756_v2  ;;  %v9390_v55 = vld [vmem:[#allocation19_spill] sm:$0xff] }
0x1a0f   :  { %5215 = vmatprep.mubr.bf16.mxu0 %v9285_v31  ;;  %5256 = vmatprep.mubr.bf16.mxu1 %v9285_v31  ;;  %v4263_v2 = vadd.f32 %v9390_v55, %v8852_v23  ;;  %v6970_v55 = vld [vmem:[#allocation4 + $0x3a8] ss:$16 sps:$4 sm:$0xff]  }
0x1a11   :  { %5186 = vmatpush1.bf16.msra.mxu0 %v8758_v13  ;;  %5227 = vmatpush1.bf16.msra.mxu1 %v8760_v6  ;;  %v9391_v13 = vld [vmem:[#allocation20_spill] sm:$0xff] }
0x1a12   :  { %5187 = vmatprep.subr.bf16.mxu0 %v8766_v35  ;;  %5228 = vmatprep.subr.bf16.mxu1 %v8768_v7  ;;  %v4336_v6 = vadd.f32 %v9391_v13, %v8877_v46  ;;  %v9392_v35 = vld [vmem:[#allocation21_spill] sm:$0xff]  ;;  %v6972_v13 = vld [vmem:[#allocation4 + $0x3cc] ss:$16 sps:$4 sm:$0xff]  }
0x1a13   :  { %v4265_v7 = vadd.f32 %v9392_v35, %v8856_v24  ;;  %v6974_v35 = vld [vmem:[#allocation4 + $0x3c8] ss:$16 sps:$4 sm:$0xff]  }
0x1a15   :  { %5188 = vmatpush1.bf16.msra.mxu0 %v8770_v15  ;;  %5229 = vmatpush1.bf16.msra.mxu1 %v8772_v4  ;;  %v9393_v15 = vld [vmem:[#allocation22_spill] sm:$0xff] }
0x1a16   :  { %5189 = vmatprep.subr.bf16.mxu0 %v8778_v12  ;;  %5230 = vmatprep.subr.bf16.mxu1 %v8780_v63  ;;  %v4338_v4 = vadd.f32 %v9393_v15, %v8869_v3  ;;  %v6976_v15 = vld [vmem:[#allocation4 + $0x3ec] ss:$16 sps:$4 sm:$0xff]  }
0x1a19   :  { %5190 = vmatpush1.bf16.msra.mxu0 %v8782_v34  ;;  %5231 = vmatpush1.bf16.msra.mxu1 %v8784_v16 }
0x1a1a   :  { %5191 = vmatprep.subr.bf16.mxu0 %v8790_v10  ;;  %5232 = vmatprep.subr.bf16.mxu1 %v8792_v52 }
0x1a1d   :  { %5192 = vmatpush1.bf16.msra.mxu0 %v8794_v58  ;;  %5233 = vmatpush1.bf16.msra.mxu1 %v8796_v51 }
0x1a1e   :  { %5193 = vmatprep.subr.bf16.mxu0 %v8800_v60  ;;  %5234 = vmatprep.subr.bf16.mxu1 %v8802_v39 }
0x1a21   :  { %5194 = vmatpush1.bf16.msra.mxu0 %v8806_v59  ;;  %5235 = vmatpush1.bf16.msra.mxu1 %v8808_v21 }
0x1a22   :  { %5195 = vmatprep.subr.bf16.mxu0 %v8812_v44  ;;  %5236 = vmatprep.subr.bf16.mxu1 %v8814_v20 }
0x1a25   :  { %5196 = vmatpush1.bf16.msra.mxu0 %v8818_v38  ;;  %5237 = vmatpush1.bf16.msra.mxu1 %v8820_v5 }
0x1a26   :  { %5197 = vmatprep.subr.bf16.mxu0 %v8824_v32  ;;  %5238 = vmatprep.subr.bf16.mxu1 %v8826_v33 }
0x1a29   :  { %5198 = vmatpush1.bf16.msra.mxu0 %v8830_v30  ;;  %5239 = vmatpush1.bf16.msra.mxu1 %v8832_v36 }
0x1a2a   :  { %5298 = vmatprep.subr.bf16.mxu0 %v6947_v61  ;;  %5339 = vmatprep.subr.bf16.mxu1 %v6948_v37  ;;  %v6968_v61 = vld [vmem:[#allocation4 + $0x3ac] ss:$16 sps:$4 sm:$0xff]   ;;  %v6969_v37 = vld [vmem:[#allocation4 + $0x3a0] ss:$16 sps:$4 sm:$0xff]  }
0x1adf   :  { %v5102_v12 = vpop.f32.mrb[148].mxu0  ;;  %v5143_v63 = vpop.f32.mrb[148].mxu1 }
0x1ae0   :  { %v5150_v34 = vadd.f32 %v5102_v12, %v4263_v2  ;;  %v5152_v16 = vadd.f32 %v5143_v63, %v4336_v6  ;;  %v5104_v10 = vpop.f32.mrb[149].mxu0  ;;  %v5145_v52 = vpop.f32.mrb[149].mxu1  ;;  %v6971_v2 = vld [vmem:[#allocation4 + $0x3c4] ss:$16 sps:$4 sm:$0xff]   ;;  %v6973_v6 = vld [vmem:[#allocation4 + $0x3c0] ss:$16 sps:$4 sm:$0xff]  }
0x1ae1   :  { %v5151_v58 = vadd.f32 %v5104_v10, %v4265_v7  ;;  %v5153_v51 = vadd.f32 %v5145_v52, %v4338_v4  ;;  %v5106_v60 = vpop.f32.mrb[150].mxu0  ;;  %v5147_v39 = vpop.f32.mrb[150].mxu1  ;;  %v6975_v7 = vld [vmem:[#allocation4 + $0x3e4] ss:$16 sps:$4 sm:$0xff]   ;;  %v6977_v4 = vld [vmem:[#allocation4 + $0x3e0] ss:$16 sps:$4 sm:$0xff]  }
0x1ae2   :  { %v5908_v59 = vmul.f32 -1.442695, %v5150_v34  ;;  %v5107_v21 = vpop.f32.mrb[151].mxu0  ;;  %v5148_v44 = vpop.f32.mrb[151].mxu1  ;;  %v6978_v12 = vld [vmem:[#allocation4 + $0x3e8] ss:$16 sps:$4 sm:$0xff]  }
0x1ae3   :  { %v5909_v20 = vmul.f32 -1.442695, %v5151_v58  ;;  %v5910_v38 = vmul.f32 -1.442695, %v5153_v51  ;;  %v9394_v63 = vld [vmem:[#allocation23_spill] sm:$0xff]  ;;  %v9396_v52 = vld [vmem:[#allocation25_spill] sm:$0xff] }
0x1ae4   :  { %6801 = vpow2.f32 %v5908_v59  ;;  %v4269_v34 = vadd.f32 %v9394_v63, %v8852_v23  ;;  %v4271_v58 = vadd.f32 %v9396_v52, %v8856_v24  ;;  %v9397_v51 = vld [vmem:[#allocation26_spill] sm:$0xff]  ;;  %v5444_v63 = vld [vmem:[%s9256_s8 + $0x68] sm:$0xff] }
0x1ae5   :  { %6803 = vpow2.f32 %v5909_v20  ;;  %v4344_v60 = vadd.f32 %v9397_v51, %v8869_v3 }
0x1ae6   :  { %6805 = vpow2.f32 %v5910_v38 }
0x1ae7   :  { %6807 = vtanh.f32 %v5152_v16  ;;  %v9395_v16 = vld [vmem:[#allocation24_spill] sm:$0xff] }
0x1ae8   :  { %v4342_v10 = vadd.f32 %v9395_v16, %v8877_v46  ;;  %v5445_v16 = vld [vmem:[%s9256_s8 + $0x70] sm:$0xff] }
0x1aee   :  { %v6802_v5 = vpop.eup %6801 }
0x1aef   :  { %v6804_v32 = vpop.eup %6803  ;;  %v5157_v33 = vadd.f32 1.0, %v6802_v5 }
0x1af0   :  { %v5163_v30 = vadd.f32 1.0, %v6804_v32  ;;  %v6806_v36 = vpop.eup %6805 }
0x1af1   :  { %6809 = vrcp.f32 %v5157_v33  ;;  %v6808_v28 = vpop.eup %6807  ;;  %v5170_v57 = vadd.f32 1.0, %v6806_v36 }
0x1af2   :  { %6811 = vrcp.f32 %v5163_v30 }
0x1af3   :  { %6813 = vrcp.f32 %v5170_v57 }
0x1afb   :  { %v6810_v17 = vpop.eup %6809 }
0x1afc   :  { %v6812_v43 = vpop.eup %6811  ;;  %v5174_v11 = vmul.f32 %v6810_v17, %v6808_v28 }
0x1afd   :  { %v5173_v8 = vmul.f32 %v6812_v43, %v9110_v53  ;;  %v6814_v50 = vpop.eup %6813  ;;  %v6962_v53 = vld [vmem:[#allocation4 + $0x368] ss:$16 sps:$4 sm:$0xff]  }
0x1aff   :  { %v9154_v14 = vadd.f32 %v5174_v11, %v5173_v8 }
0x1b01   :  { %6815 = vtanh.f32 %v9154_v14 }
0x1b0b   :  { %v6816_v47 = vpop.eup %6815 }
0x1b0c   :  { %v5177_v45 = vmul.f32 %v6816_v47, %v6814_v50 }
0x1b0e   :  { %v5178_v9 = vpack.c.bf16 %v5177_v45, %v5177_v45 }
0x1b10   :  { %5216 = vmatmul.mubr.bf16.vlgmr.msra.gmra.mrb[152].mxu0 %v5178_v9  ;;  %5257 = vmatmul.mubr.bf16.vlgmr.msra.gmra.mrb[152].mxu1 %v5178_v9 }
0x1b11   :  { %5299 = vmatpush1.bf16.msra.mxu0 %v6949_v56  ;;  %5340 = vmatpush1.bf16.msra.mxu1 %v6950_v22 }
0x1b12   :  { %5300 = vmatprep.subr.bf16.mxu0 %v6951_v40  ;;  %5341 = vmatprep.subr.bf16.mxu1 %v6952_v26 }
0x1b13   :  { %5330 = vmatprep.mubr.bf16.mxu0 %v9285_v31  ;;  %5371 = vmatprep.mubr.bf16.mxu1 %v9285_v31  ;;  %v6963_v31 = vld [vmem:[#allocation4 + $0x384] ss:$16 sps:$4 sm:$0xff]  }
0x1b15   :  { %5301 = vmatpush1.bf16.msra.mxu0 %v6953_v25  ;;  %5342 = vmatpush1.bf16.msra.mxu1 %v6954_v19 }
0x1b16   :  { %5302 = vmatprep.subr.bf16.mxu0 %v6955_v54  ;;  %5343 = vmatprep.subr.bf16.mxu1 %v6956_v62 }
0x1b19   :  { %5303 = vmatpush1.bf16.msra.mxu0 %v6957_v1  ;;  %5344 = vmatpush1.bf16.msra.mxu1 %v6958_v49 }
0x1b1a   :  { %5304 = vmatprep.subr.bf16.mxu0 %v6959_v42  ;;  %5345 = vmatprep.subr.bf16.mxu1 %v6960_v29  ;;  %v5431_v42 = vld [vmem:[%s9256_s8] sm:$0xff]  ;;  %v5432_v29 = vld [vmem:[%s9256_s8 + $0x8] sm:$0xff] }
0x1b1d   :  { %5305 = vmatpush1.bf16.msra.mxu0 %v6961_v48  ;;  %5346 = vmatpush1.bf16.msra.mxu1 %v6962_v53  ;;  %v7007_v48 = vmov 0.0|0.0   ;;  %v5433_v53 = vld [vmem:[%s9256_s8 + $0x10] sm:$0xff] }
0x1b1e   :  { %5306 = vmatprep.subr.bf16.mxu0 %v6963_v31  ;;  %5347 = vmatprep.subr.bf16.mxu1 %v6964_v18  ;;  %v5434_v31 = vld [vmem:[%s9256_s8 + $0x18] sm:$0xff] }
0x1b1f   :  { %v5974_v18 = vpack.c.bf16 %v5434_v31, %v5433_v53  ;;  %v5413_v31 = vld [vmem:[%s9253_s5] sm:$0x1] }
0x1b21   :  { %5307 = vmatpush1.bf16.msra.mxu0 %v6965_v27  ;;  %5348 = vmatpush1.bf16.msra.mxu1 %v6966_v0  ;;  %v5435_v27 = vld [vmem:[%s9256_s8 + $0x20] sm:$0xff]  ;;  %v5436_v0 = vld [vmem:[%s9256_s8 + $0x28] sm:$0xff] }
0x1b22   :  { %5308 = vmatprep.subr.bf16.mxu0 %v6967_v41  ;;  %5349 = vmatprep.subr.bf16.mxu1 %v6968_v61  ;;  %v5977_v41 = vpack.c.bf16 %v5436_v0, %v5435_v27  ;;  %v5437_v61 = vld [vmem:[%s9256_s8 + $0x30] sm:$0xff] }
0x1b25   :  { %5309 = vmatpush1.bf16.msra.mxu0 %v6969_v37  ;;  %5350 = vmatpush1.bf16.msra.mxu1 %v6970_v55  ;;  %v5438_v37 = vld [vmem:[%s9256_s8 + $0x38] sm:$0xff] }
0x1b26   :  { %5310 = vmatprep.subr.bf16.mxu0 %v6971_v2  ;;  %5351 = vmatprep.subr.bf16.mxu1 %v6972_v13  ;;  %v5980_v55 = vpack.c.bf16 %v5438_v37, %v5437_v61  ;;  %v5439_v2 = vld [vmem:[%s9256_s8 + $0x40] sm:$0xff]  ;;  %v5440_v13 = vld [vmem:[%s9256_s8 + $0x48] sm:$0xff] }
0x1b29   :  { %5311 = vmatpush1.bf16.msra.mxu0 %v6973_v6  ;;  %5352 = vmatpush1.bf16.msra.mxu1 %v6974_v35  ;;  %v5441_v6 = vld [vmem:[%s9256_s8 + $0x50] sm:$0xff]  ;;  %v5983_v35 = vpack.c.bf16 %v5440_v13, %v5439_v2  ;;  %v5917_v13 = vld [vmem:[%s9257_s9] ss:$0 sm:$0xff] }
0x1b2a   :  { %5312 = vmatprep.subr.bf16.mxu0 %v6975_v7  ;;  %5353 = vmatprep.subr.bf16.mxu1 %v6976_v15  ;;  %v5442_v7 = vld [vmem:[%s9256_s8 + $0x58] sm:$0xff]  ;;  %v7009_v15 = vmov 0.0  }
0x1b2d   :  { %5313 = vmatpush1.bf16.msra.mxu0 %v6977_v4  ;;  %5354 = vmatpush1.bf16.msra.mxu1 %v6978_v12  ;;  %v5986_v4 = vpack.c.bf16 %v5442_v7, %v5441_v6  ;;  %v5443_v12 = vld [vmem:[%s9256_s8 + $0x60] sm:$0xff] }
0x1b2e   :  { %5970 = vmatprep.subr.bf16.mxu0 %v7007_v48 }
0x1be3   :  { %v5217_v39 = vpop.f32.mrb[152].mxu0  ;;  %v5258_v59 = vpop.f32.mrb[152].mxu1 }
0x1be4   :  { %v5265_v21 = vadd.f32 %v5217_v39, %v4269_v34  ;;  %v5267_v44 = vadd.f32 %v5258_v59, %v4342_v10  ;;  %v5219_v20 = vpop.f32.mrb[153].mxu0  ;;  %v5260_v38 = vpop.f32.mrb[153].mxu1  ;;  %v5989_v34 = vpack.c.bf16 %v5444_v63, %v5443_v12  ;;  %v5446_v10 = vld [vmem:[%s9256_s8 + $0x78] sm:$0xff]  ;;  %v9400_v59 = vld [vmem:[#allocation29_spill] sm:$0xff] }
0x1be5   :  { %v5266_v5 = vadd.f32 %v5219_v20, %v4271_v58  ;;  %v5268_v32 = vadd.f32 %v5260_v38, %v4344_v60  ;;  %v5221_v33 = vpop.f32.mrb[154].mxu0  ;;  %v5262_v30 = vpop.f32.mrb[154].mxu1  ;;  %v5992_v52 = vpack.c.bf16 %v5446_v10, %v5445_v16  ;;  %v9398_v58 = vld [vmem:[#allocation27_spill] sm:$0xff]  ;;  %v9399_v60 = vld [vmem:[#allocation28_spill] sm:$0xff] }
0x1be6   :  { %v5911_v36 = vmul.f32 -1.442695, %v5265_v21  ;;  %v5222_v28 = vpop.f32.mrb[155].mxu0  ;;  %v5263_v17 = vpop.f32.mrb[155].mxu1  ;;  %v4273_v51 = vadd.f32 %v9398_v58, %v8852_v23  ;;  %v4346_v39 = vadd.f32 %v9399_v60, %v8877_v46  ;;  %v4275_v21 = vadd.f32 %v9400_v59, %v8856_v24 }
0x1be7   :  { %v5912_v43 = vmul.f32 -1.442695, %v5266_v5  ;;  %v5913_v11 = vmul.f32 -1.442695, %v5268_v32 }
0x1be8   :  { %6817 = vpow2.f32 %v5911_v36 }
0x1be9   :  { %6819 = vpow2.f32 %v5912_v43 }
0x1bea   :  { %6821 = vpow2.f32 %v5913_v11 }
0x1beb   :  { %6823 = vtanh.f32 %v5267_v44  ;;  %v9401_v44 = vld [vmem:[#allocation30_spill] sm:$0xff] }
0x1bec   :  { %v4348_v20 = vadd.f32 %v9401_v44, %v8869_v3  ;;  %v5409_v3 = vld [vmem:[%s9255_s7] sm:$0x1] }
0x1bf2   :  { %v6818_v57 = vpop.eup %6817 }
0x1bf3   :  { %v6820_v8 = vpop.eup %6819  ;;  %v5272_v50 = vadd.f32 1.0, %v6818_v57 }
0x1bf4   :  { %v5278_v47 = vadd.f32 1.0, %v6820_v8  ;;  %v6822_v45 = vpop.eup %6821 }
0x1bf5   :  { %6825 = vrcp.f32 %v5272_v50  ;;  %v6824_v9 = vpop.eup %6823  ;;  %v5285_v26 = vadd.f32 1.0, %v6822_v45 }
0x1bf6   :  { %6827 = vrcp.f32 %v5278_v47 }
0x1bf7   :  { %6829 = vrcp.f32 %v5285_v26 }
0x1bff   :  { %v6826_v56 = vpop.eup %6825 }
0x1c00   :  { %v6828_v22 = vpop.eup %6827  ;;  %v5289_v40 = vmul.f32 %v6826_v56, %v6824_v9  ;;  %v5410_v9 = vadd.f32 1e-05, %v5409_v3 }
0x1c01   :  { %v5288_v25 = vmul.f32 %v6828_v22, %v9154_v14  ;;  %v6830_v54 = vpop.eup %6829  ;;  %v5971_v14 = vpack.c.bf16 %v5432_v29, %v5431_v42  ;;  %v5408_v42 = vld [vmem:[%s9252_s4] sm:$0x1] }
0x1c03   :  { %v9168_v19 = vadd.f32 %v5289_v40, %v5288_v25 }
0x1c05   :  { %6831 = vtanh.f32 %v9168_v19 }
0x1c0f   :  { %v6832_v62 = vpop.eup %6831 }
0x1c10   :  { %v5292_v1 = vmul.f32 %v6832_v62, %v6830_v54 }
0x1c12   :  { %v5293_v49 = vpack.c.bf16 %v5292_v1, %v5292_v1 }
0x1c14   :  { %5331 = vmatmul.mubr.bf16.vlgmr.msra.gmra.mrb[156].mxu0 %v5293_v49  ;;  %5372 = vmatmul.mubr.bf16.vlgmr.msra.gmra.mrb[156].mxu1 %v5293_v49 }
0x1c15   :  { %5972 = vmatpush3.bf16.msra.mxu0 %v5971_v14  ;;  %5967 = vmatprep.mubr.msk.f32.mxu0 %vm7008_vm0, %v7009_v15 }
0x1c16   :  { %5973 = vmatprep.subr.bf16.mxu0 %v7007_v48 }
0x1c19   :  { %5975 = vmatpush3.bf16.msra.mxu0 %v5974_v18 }
0x1c1a   :  { %5976 = vmatprep.subr.bf16.mxu0 %v7007_v48 }
0x1c1d   :  { %5978 = vmatpush3.bf16.msra.mxu0 %v5977_v41 }
0x1c1e   :  { %5979 = vmatprep.subr.bf16.mxu0 %v7007_v48 }
0x1c21   :  { %5981 = vmatpush3.bf16.msra.mxu0 %v5980_v55 }
0x1c22   :  { %5982 = vmatprep.subr.bf16.mxu0 %v7007_v48 }
0x1c25   :  { %5984 = vmatpush3.bf16.msra.mxu0 %v5983_v35 }
0x1c26   :  { %5985 = vmatprep.subr.bf16.mxu0 %v7007_v48 }
0x1c29   :  { %5987 = vmatpush3.bf16.msra.mxu0 %v5986_v4 }
0x1c2a   :  { %5988 = vmatprep.subr.bf16.mxu0 %v7007_v48 }
0x1c2d   :  { %5990 = vmatpush3.bf16.msra.mxu0 %v5989_v34 }
0x1c2e   :  { %5991 = vmatprep.subr.bf16.mxu0 %v7007_v48  ;;  %v5414_v48 = vld [vmem:[%s9254_s6] sm:$0x1] }
0x1c31   :  { %5993 = vmatpush3.bf16.msra.mxu0 %v5992_v52 }
0x1ce7   :  { %v5332_v38 = vpop.f32.mrb[156].mxu0  ;;  %v5373_v5 = vpop.f32.mrb[156].mxu1 }
0x1ce8   :  { %v5380_v32 = vadd.f32 %v5332_v38, %v4273_v51  ;;  %v5382_v33 = vadd.f32 %v5373_v5, %v4346_v39  ;;  %v5334_v30 = vpop.f32.mrb[157].mxu0  ;;  %v5375_v36 = vpop.f32.mrb[157].mxu1 }
0x1ce9   :  { %v5381_v28 = vadd.f32 %v5334_v30, %v4275_v21  ;;  %v5383_v17 = vadd.f32 %v5375_v36, %v4348_v20  ;;  %v5336_v43 = vpop.f32.mrb[158].mxu0  ;;  %v5377_v11 = vpop.f32.mrb[158].mxu1 }
0x1cea   :  { %v5914_v23 = vmul.f32 -1.442695, %v5380_v32  ;;  %v5337_v57 = vpop.f32.mrb[159].mxu0  ;;  %v5378_v8 = vpop.f32.mrb[159].mxu1 }
0x1ceb   :  { %v5915_v46 = vmul.f32 -1.442695, %v5381_v28  ;;  %v5916_v24 = vmul.f32 -1.442695, %v5383_v17 }
0x1cec   :  { %6833 = vpow2.f32 %v5914_v23 }
0x1ced   :  { %6835 = vpow2.f32 %v5915_v46 }
0x1cee   :  { %6837 = vpow2.f32 %v5916_v24 }
0x1cef   :  { %6839 = vtanh.f32 %v5382_v33 }
0x1cf6   :  { %v6834_v50 = vpop.eup %6833 }
0x1cf7   :  { %v6836_v47 = vpop.eup %6835  ;;  %v5387_v45 = vadd.f32 1.0, %v6834_v50 }
0x1cf8   :  { %v5393_v56 = vadd.f32 1.0, %v6836_v47  ;;  %v6838_v22 = vpop.eup %6837 }
0x1cf9   :  { %6841 = vrcp.f32 %v5387_v45  ;;  %v6840_v40 = vpop.eup %6839  ;;  %v5400_v62 = vadd.f32 1.0, %v6838_v22 }
0x1cfa   :  { %6843 = vrcp.f32 %v5393_v56 }
0x1cfb   :  { %6845 = vrsqrt.f32 %v5410_v9 }
0x1cfc   :  { %6847 = vrcp.f32 %v5400_v62 }
0x1d03   :  { %v6842_v26 = vpop.eup %6841 }
0x1d04   :  { %v6844_v25 = vpop.eup %6843  ;;  %v5404_v54 = vmul.f32 %v6842_v26, %v6840_v40 }
0x1d05   :  { %v6846_v1 = vpop.eup %6845  ;;  %v5403_v49 = vmul.f32 %v6844_v25, %v9168_v19  ;;  %v9402_v19 = vld [vmem:[#allocation7_spill] sm:$0xff] }
0x1d06   :  { %v5412_v14 = vmul.f32 %v6846_v1, %v5408_v42  ;;  %v6848_v27 = vpop.eup %6847 }
0x1d07   :  { %v5405_v29 = vadd.f32 %v5404_v54, %v5403_v49 }
0x1d08   :  { %v5415_v53 = vmul.f32 %v5414_v48, %v5412_v14  ;;  %v5421_v0 = vrot.slane %v5412_v14, %v9402_v19 }
0x1d09   :  { %6849 = vtanh.f32 %v5405_v29 }
0x1d0a   :  { %v5416_v18 = vsub.f32 %v5413_v31, %v5415_v53 }
0x1d0c   :  { %v5428_v37 = vrot.slane %v5416_v18, %v9402_v19 }
0x1d13   :  { %v6850_v41 = vpop.eup %6849 }
0x1d14   :  { %v5407_v61 = vmul.f32 %v6850_v41, %v6848_v27 }
0x1d16   :  { %v5423_v55 = vmul.f32 %v5421_v0, %v5407_v61 }
0x1d18   :  { %v5430_v2 = vadd.f32 %v5428_v37, %v5423_v55 }
0x1d1a   :  { %5968 = vmatmul.mubr.f32.vlgmr.msra.gmra.mrb[160].mxu0 %v5430_v2 }
0x1ded   :  { %v5520_v6 = vpop.f32.mrb[160].mxu0 }
0x1dee   :  { %v5521_v35 = vadd.f32 %v5917_v13, %v5520_v6  ;;  %v5969_v7 = vpop.f32.mrb[161].mxu0 }
0x1df0   :  { %5525 = vst.msk [vmem:[%s9258_s10] sm:$0xff] %vm5524_vm1, %v5521_v35 }
0x1df1   :  { %5530 = vsyncpa [#allocation5], 1 }

</bundles_post_ra>
